<compile_context>
chip_gen: v7x
topology: tpu7x:2x2x1
jax: 0.10.0
libtpu: 0.0.40
codegen_flags: <defaults>
</compile_context>

<pallas_src>
import functools
import numpy as np
import jax
import jax.numpy as jnp
from jax.experimental import pallas as pl
from jax.experimental.pallas import tpu as pltpu


# ----------------------------------------------------------------------------
# Lanczos2 kernel weights (DIP get_kernel, phase=0.5, support=2)
# ----------------------------------------------------------------------------
def lanczos2_weights(factor):
    support = 2
    kernel_width = 4 * factor + 1
    size = kernel_width - 1  # phase == 0.5
    center = (kernel_width + 1) / 2.0
    kern = np.zeros((size, size), np.float64)
    for i in range(1, size + 1):
        for j in range(1, size + 1):
            di = abs(i + 0.5 - center) / factor
            dj = abs(j + 0.5 - center) / factor
            val = 1.0
            if di != 0:
                val *= support * np.sin(np.pi * di) * np.sin(np.pi * di / support)
                val /= np.pi * np.pi * di * di
            if dj != 0:
                val *= support * np.sin(np.pi * dj) * np.sin(np.pi * dj / support)
                val /= np.pi * np.pi * dj * dj
            kern[i - 1, j - 1] = val
    kern /= kern.sum()
    return kern


# ----------------------------------------------------------------------------
# QCBM circuit unitary construction (deterministic setup, numpy glue)
# ----------------------------------------------------------------------------
def _ry(a):
    c, s = np.cos(a / 2.0), np.sin(a / 2.0)
    return np.array([[c, -s], [s, c]], np.float64)


def _cnot(n, control, target):
    D = 2 ** n
    U = np.zeros((D, D), np.float64)
    for i in range(D):
        bits = [(i >> (n - 1 - k)) & 1 for k in range(n)]
        if bits[control] == 1:
            bits[target] ^= 1
        j = 0
        for b in bits:
            j = (j << 1) | b
        U[j, i] = 1.0
    return U


def build_block_diag_unitaries(theta, n_qubits, n_layers):
    """Block-diagonal matrix of the per-head TRANSPOSED circuit unitaries."""
    n_heads = theta.shape[0]
    D = 2 ** n_qubits
    ents = [_cnot(n_qubits, q, (q + 1) % n_qubits) for q in range(n_qubits)]
    bd = np.zeros((n_heads * D, n_heads * D), np.float64)
    for h in range(n_heads):
        U = np.eye(D)
        for l in range(n_layers):
            layer = np.array([[1.0]])
            for q in range(n_qubits):
                layer = np.kron(layer, _ry(theta[h, l, q]))
            for E in ents:
                layer = E @ layer
            U = layer @ U
        bd[h * D:(h + 1) * D, h * D:(h + 1) * D] = U.T  # row-vector @ U^T inside kernel
    return jnp.asarray(bd, jnp.float32)


def build_upsample2x_matrix(src, dst):
    """(dst*dst, src*src) 0/1 matrix: out[I*dst+J] = in[(I//2)*src + (J//2)]."""
    up = np.zeros((dst * dst, src * src), np.float32)
    for I in range(dst):
        for J in range(dst):
            up[I * dst + J, (I // 2) * src + (J // 2)] = 1.0
    return jnp.asarray(up)


# ----------------------------------------------------------------------------
# Fused forward kernel (one batch element per grid step)
# ----------------------------------------------------------------------------
def _qdgp_fused_kernel(
    # inputs
    x_ref, emb_ref, t_ref, ubd_ref, sblk_ref, up_ref,
    wlq_ref, wle_ref, blin_ref,
    w1_ref, b1_ref, w2_ref, b2_ref, wo_ref, bo_ref,
    # outputs
    qout_ref, rec_ref,
    # scratch
    pad1_ref, padL_ref, pad4_ref,
    *, n_heads, n_qubits, ch, shared_dim, use_in, factor, lanczos_pad, lanczos_k,
):
    Q = n_qubits
    D = 2 ** Q
    NHD = n_heads * D

    # ----------------- QCBM ensemble prior (block-diag statevector sim) -----
    x = x_ref[...].reshape(1, n_heads * Q)        # data-encoding angles
    ca = jnp.cos(x * 0.5)                         # hoisted: all half-angle cos
    sa = jnp.sin(x * 0.5)                         # hoisted: all half-angle sin

    lane = jax.lax.broadcasted_iota(jnp.int32, (1, NHD), 1)
    d_idx = jnp.bitwise_and(lane, D - 1)          # basis index within its head
    h_idx = jnp.right_shift(lane, Q)              # head index of this lane
    bit0 = [jnp.bitwise_and(jnp.right_shift(d_idx, Q - 1 - q), 1) == 0
            for q in range(Q)]                    # hoisted, head-invariant masks

    # product-state data encoding, laid out as a single (1, NHD) vector
    amp = jnp.zeros((1, NHD), jnp.float32)
    for h in range(n_heads):
        ah = jnp.ones((1, NHD), jnp.float32)
        for q in range(Q):
            k = h * Q + q
            ah = ah * jnp.where(bit0[q], ca[:, k:k + 1], sa[:, k:k + 1])
        amp = amp + jnp.where(h_idx == h, ah, 0.0)

    # one 128x128 MXU matmul with the block-diagonal transposed unitaries
    state = jnp.dot(amp, ubd_ref[...], preferred_element_type=jnp.float32)
    probs = state * state + 1e-12
    # tempering: p^(1/T) / Z_head   (p <= 1, so no overflow; max-shift cancels)
    pt = jnp.exp(jnp.log(probs) / t_ref[...])
    zsum = jnp.dot(pt, sblk_ref[...], preferred_element_type=jnp.float32)  # per-head sums
    qout = pt / zsum                                                        # (1, NHD)
    qout_ref[...] = qout.reshape(1, 1, NHD)

    # ----------------- Generator: linear ------------------------------------
    emb = emb_ref[...].reshape(1, shared_dim)
    h0 = (jnp.dot(qout, wlq_ref[...], preferred_element_type=jnp.float32)
          + jnp.dot(emb, wle_ref[...], preferred_element_type=jnp.float32)
          + blin_ref[...])                        # (1, 16*ch) == 4x4 spatial x ch

    # reshape -> 4x4, nearest x2 upsample -> 8x8, zero pad -> 10x10 scratch
    pad1_ref[...] = jnp.zeros_like(pad1_ref)
    for p in range(16):
        i, j = p // 4, p % 4
        v = h0[:, p * ch:(p + 1) * ch]            # (1, ch)
        pad1_ref[1 + 2 * i:3 + 2 * i, 1 + 2 * j:3 + 2 * j, :] = (
            jnp.broadcast_to(v, (2, 2, ch)))

    def conv3x3(xp, w9, bias, ho, wo_, cout):
        cin = xp.shape[-1]
        acc = jnp.zeros((ho * wo_, cout), jnp.float32)
        for t in range(9):
            dy, dx = t // 3, t % 3
            patch = xp[dy:dy + ho, dx:dx + wo_, :].reshape(ho * wo_, cin)
            acc = acc + jnp.dot(patch, w9[t], preferred_element_type=jnp.float32)
        return acc + bias

    def inorm(a):  # instance norm over spatial rows, per channel (affine=False)
        m = jnp.mean(a, axis=0, keepdims=True)
        v = jnp.mean((a - m) * (a - m), axis=0, keepdims=True)
        return (a - m) * jax.lax.rsqrt(v + 1e-5)

    # conv1 (8x8) + [IN] + relu
    h1 = conv3x3(pad1_ref[...], w1_ref[...], b1_ref[...], 8, 8, ch)     # (64, ch)
    if use_in:
        h1 = inorm(h1)
    h1 = jnp.maximum(h1, 0.0)

    # nearest x2 upsample 8x8 -> 16x16 via ONE MXU matmul against the constant
    # 0/1 duplication matrix (replaces 64 masked (2,2,ch) scratch stores),
    # then a single slab store into the zero-padded 18x18 scratch.
    h1u = jnp.dot(up_ref[...], h1, preferred_element_type=jnp.float32)  # (256, ch)
    padL_ref[...] = jnp.zeros_like(padL_ref)
    padL_ref[1:17, 1:17, :] = h1u.reshape(16, 16, ch)

    # conv2 (16x16) + [IN] + relu
    h2 = conv3x3(padL_ref[...], w2_ref[...], b2_ref[...], 16, 16, ch)   # (256, ch)
    if use_in:
        h2 = inorm(h2)
    h2 = jnp.maximum(h2, 0.0)

    # out conv (16x16 -> 3 channels) + tanh -- reuse padL (border already zero)
    padL_ref[1:17, 1:17, :] = h2.reshape(16, 16, ch)
    rec = jnp.tanh(
        conv3x3(padL_ref[...], wo_ref[...], bo_ref[...], 16, 16, 3))    # (256, 3)

    # ----------------- Lanczos2 downsampler on (rec+1)/2, replication pad ---
    HH = 16
    P = lanczos_pad
    x01 = (rec.reshape(HH, HH, 3) + 1.0) * 0.5
    pad4_ref[P:P + HH, P:P + HH, :] = x01
    top = x01[0:1, :, :]
    bot = x01[HH - 1:HH, :, :]
    for k in range(P):
        pad4_ref[k:k + 1, P:P + HH, :] = top
        pad4_ref[P + HH + k:P + HH + k + 1, P:P + HH, :] = bot
    full = pad4_ref[...]
    left = full[:, P:P + 1, :]
    right = full[:, P + HH - 1:P + HH, :]
    for k in range(P):
        pad4_ref[:, k:k + 1, :] = left
        pad4_ref[:, P + HH + k:P + HH + k + 1, :] = right

    ksz = len(lanczos_k)
    Ho, Wo = rec_ref.shape[1], rec_ref.shape[2]
    xp4 = pad4_ref[...]
    acc = jnp.zeros((Ho, Wo, 3), jnp.float32)
    for dy in range(ksz):
        for dx in range(ksz):
            wgt = lanczos_k[dy][dx]
            if factor == 1:
                patch = xp4[dy:dy + Ho, dx:dx + Wo, :]
            else:
                # TODO(synk): strided in-kernel slice; only traced for the
                # resolution=256 (factor=2) path which is not exercised here.
                patch = xp4[dy:dy + factor * Ho:factor, dx:dx + factor * Wo:factor, :]
            acc = acc + patch * wgt
    rec_ref[...] = acc.reshape(1, Ho, Wo, 3)


# ----------------------------------------------------------------------------
# Parameter init + full forward
# ----------------------------------------------------------------------------
def init_params(config, key):
    H, Q, L = config["n_heads"], config["n_qubits"], config["n_qlayers"]
    D = 2 ** Q
    z_dim = H * D
    shared = config["shared_dim"]
    ch = config["g_ch"]
    ks = jax.random.split(key, 8)
    theta = np.asarray(
        jax.random.uniform(ks[0], (H, L, Q), minval=0.0, maxval=2.0 * np.pi))
    w_lin = 0.05 * jax.random.normal(ks[2], (z_dim + shared, ch * 16), jnp.float32)
    params = {
        "u_bd": build_block_diag_unitaries(theta, Q, L),   # (z_dim, z_dim) block-diag U^T
        "w_embed": 0.1 * jax.random.normal(ks[1], (config["n_classes"], shared), jnp.float32),
        "w_lin_q": w_lin[:z_dim],                          # latent part of the linear
        "w_lin_e": w_lin[z_dim:],                          # shared-embedding part
        "b_lin": jnp.zeros((ch * 16,), jnp.float32),
        "w_c1": 0.05 * jax.random.normal(ks[3], (3, 3, ch, ch), jnp.float32),
        "b_c1": jnp.zeros((ch,), jnp.float32),
        "w_c2": 0.05 * jax.random.normal(ks[4], (3, 3, ch, ch), jnp.float32),
        "b_c2": jnp.zeros((ch,), jnp.float32),
        "w_out": 0.05 * jax.random.normal(ks[5], (3, 3, ch, 3), jnp.float32),
        "b_out": jnp.zeros((3,), jnp.float32),
    }
    return params


def qdgp_hybrid_forward(params, x, y, temperature, config):
    NH, Q = config["n_heads"], config["n_qubits"]
    D = 2 ** Q
    NHD = NH * D
    ch = config["g_ch"]
    shared = config["shared_dim"]
    use_in = bool(config["use_in"][0])
    factor = 2 if config["resolution"] == 256 else 1
    B = x.shape[0]

    # static lanczos kernel / shapes
    kern2d = lanczos2_weights(factor)
    ksz = kern2d.shape[0]
    P = (ksz - 1) // 2 if ksz % 2 == 1 else (ksz - factor) // 2
    HH = 16
    Ho = (HH + 2 * P - ksz) // factor + 1
    kvals = tuple(tuple(float(v) for v in row) for row in kern2d)

    # tiny glue (embedding lookup + shape plumbing)
    x_in = x.reshape(B, 1, NH * Q).astype(jnp.float32)
    emb = jnp.take(params["w_embed"], y, axis=0).reshape(B, 1, shared)
    temp = jnp.full((1, 1), temperature, jnp.float32)
    sblk = jnp.asarray(np.kron(np.eye(NH), np.ones((D, D))), jnp.float32)
    up_mat = build_upsample2x_matrix(8, 16)              # (256, 64) constant
    w1 = params["w_c1"].reshape(9, ch, ch)
    w2 = params["w_c2"].reshape(9, ch, ch)
    wo = params["w_out"].reshape(9, ch, 3)

    kern = functools.partial(
        _qdgp_fused_kernel, n_heads=NH, n_qubits=Q, ch=ch, shared_dim=shared,
        use_in=use_in, factor=factor, lanczos_pad=P, lanczos_k=kvals)

    full2 = lambda b: (0, 0)
    full3 = lambda b: (0, 0, 0)

    qout3, rec = pl.pallas_call(
        kern,
        grid=(B,),
        out_shape=(
            jax.ShapeDtypeStruct((B, 1, NHD), jnp.float32),
            jax.ShapeDtypeStruct((B, Ho, Ho, 3), jnp.float32),
        ),
        in_specs=[
            pl.BlockSpec((1, 1, NH * Q), lambda b: (b, 0, 0)),   # encoding angles
            pl.BlockSpec((1, 1, shared), lambda b: (b, 0, 0)),   # class embedding
            pl.BlockSpec((1, 1), full2),                         # temperature
            pl.BlockSpec((NHD, NHD), full2),                     # block-diag unitary^T
            pl.BlockSpec((NHD, NHD), full2),                     # per-head block-sum matrix
            pl.BlockSpec((256, 64), full2),                      # nearest-x2 dup matrix
            pl.BlockSpec((NHD, ch * 16), full2),                 # linear weight (latent)
            pl.BlockSpec((shared, ch * 16), full2),              # linear weight (embedding)
            pl.BlockSpec((1, ch * 16), full2),                   # linear bias
            pl.BlockSpec((9, ch, ch), full3),                    # conv1 weight
            pl.BlockSpec((1, ch), full2),                        # conv1 bias
            pl.BlockSpec((9, ch, ch), full3),                    # conv2 weight
            pl.BlockSpec((1, ch), full2),                        # conv2 bias
            pl.BlockSpec((9, ch, 3), full3),                     # out conv weight
            pl.BlockSpec((1, 3), full2),                         # out conv bias
        ],
        out_specs=(
            pl.BlockSpec((1, 1, NHD), lambda b: (b, 0, 0)),      # qout (lane-dense)
            pl.BlockSpec((1, Ho, Ho, 3), lambda b: (b, 0, 0, 0)),
        ),
        scratch_shapes=[
            pltpu.VMEM((10, 10, ch), jnp.float32),               # conv1 padded input
            pltpu.VMEM((18, 18, ch), jnp.float32),               # conv2 / out-conv padded input
            pltpu.VMEM((HH + 2 * P, HH + 2 * P, 3), jnp.float32),  # lanczos padded input
        ],
        compiler_params=pltpu.CompilerParams(
            dimension_semantics=("parallel",)),
    )(x_in, emb, temp, params["u_bd"], sblk, up_mat,
      params["w_lin_q"], params["w_lin_e"], params["b_lin"].reshape(1, ch * 16),
      w1, params["b_c1"].reshape(1, ch),
      w2, params["b_c2"].reshape(1, ch),
      wo, params["b_out"].reshape(1, 3))

    qout = qout3.reshape(B, NHD)
    rec_nchw = jnp.transpose(rec, (0, 3, 1, 2))   # back to PyTorch NCHW
    return rec_nchw, qout


# ----------------------------------------------------------------------------
if __name__ == "__main__":
    config = {
        "use_in": [False],
        "resolution": 128,          # -> downsample factor 1
        "n_heads": 8,
        "n_qubits": 4,              # 8 heads * 2^4 = 128-d latent (qdgp_128)
        "n_qlayers": 2,
        "measurement_setting": "s",
        "n_classes": 10,
        "shared_dim": 16,
        "g_ch": 32,
    }

    key = jax.random.PRNGKey(0)
    kp, kx = jax.random.split(key)
    params = init_params(config, kp)

    B = 2
    x = jax.random.uniform(
        kx, (B, config["n_heads"], config["n_qubits"]),
        minval=0.0, maxval=2.0 * np.pi, dtype=jnp.float32,
    )
    y = jnp.array([1, 3], dtype=jnp.int32)
    temperature = 1.5

    rec_image, qout = qdgp_hybrid_forward(params, x, y, temperature, config)
    jax.block_until_ready((rec_image, qout))

    assert qout.shape == (B, 128)
    assert rec_image.shape[0] == B and rec_image.shape[1] == 3
    print("KERNEL_OK")
</pallas_src>

<mosaic_0001>
module attributes {stable_mosaic.version = 11 : i64} {
  func.func @_qdgp_fused_kernel(%arg0: i32, %arg1: memref<1x1x32xf32, #tpu.memory_space<vmem>>, %arg2: memref<1x1x16xf32, #tpu.memory_space<vmem>>, %arg3: memref<1x1xf32, #tpu.memory_space<vmem>>, %arg4: memref<128x128xf32, #tpu.memory_space<vmem>>, %arg5: memref<128x128xf32, #tpu.memory_space<vmem>>, %arg6: memref<256x64xf32, #tpu.memory_space<vmem>>, %arg7: memref<128x512xf32, #tpu.memory_space<vmem>>, %arg8: memref<16x512xf32, #tpu.memory_space<vmem>>, %arg9: memref<1x512xf32, #tpu.memory_space<vmem>>, %arg10: memref<9x32x32xf32, #tpu.memory_space<vmem>>, %arg11: memref<1x32xf32, #tpu.memory_space<vmem>>, %arg12: memref<9x32x32xf32, #tpu.memory_space<vmem>>, %arg13: memref<1x32xf32, #tpu.memory_space<vmem>>, %arg14: memref<9x32x3xf32, #tpu.memory_space<vmem>>, %arg15: memref<1x3xf32, #tpu.memory_space<vmem>>, %arg16: memref<1x1x128xf32, #tpu.memory_space<vmem>>, %arg17: memref<1x15x15x3xf32, #tpu.memory_space<vmem>>, %arg18: memref<10x10x32xf32, #tpu.memory_space<vmem>>, %arg19: memref<18x18x32xf32, #tpu.memory_space<vmem>>, %arg20: memref<18x18x3xf32, #tpu.memory_space<vmem>>) attributes {dimension_semantics = [#tpu.dimension_semantics<parallel>], iteration_bounds = array<i64: 2>, scalar_prefetch = 0 : i64, scratch_operands = 3 : i64, tpu.core_type = #tpu.core_type<tc>, window_params = [{transform_indices = @transform_0, window_bounds = array<i64: 1, 1, 32>}, {transform_indices = @transform_1, window_bounds = array<i64: 1, 1, 16>}, {pipeline_mode = #tpu.pipeline_mode<synchronous>, transform_indices = @transform_2, window_bounds = array<i64: 1, 1>}, {pipeline_mode = #tpu.pipeline_mode<synchronous>, transform_indices = @transform_3, window_bounds = array<i64: 128, 128>}, {pipeline_mode = #tpu.pipeline_mode<synchronous>, transform_indices = @transform_4, window_bounds = array<i64: 128, 128>}, {pipeline_mode = #tpu.pipeline_mode<synchronous>, transform_indices = @transform_5, window_bounds = array<i64: 256, 64>}, {pipeline_mode = #tpu.pipeline_mode<synchronous>, transform_indices = @transform_6, window_bounds = array<i64: 128, 512>}, {pipeline_mode = #tpu.pipeline_mode<synchronous>, transform_indices = @transform_7, window_bounds = array<i64: 16, 512>}, {pipeline_mode = #tpu.pipeline_mode<synchronous>, transform_indices = @transform_8, window_bounds = array<i64: 1, 512>}, {pipeline_mode = #tpu.pipeline_mode<synchronous>, transform_indices = @transform_9, window_bounds = array<i64: 9, 32, 32>}, {pipeline_mode = #tpu.pipeline_mode<synchronous>, transform_indices = @transform_10, window_bounds = array<i64: 1, 32>}, {pipeline_mode = #tpu.pipeline_mode<synchronous>, transform_indices = @transform_11, window_bounds = array<i64: 9, 32, 32>}, {pipeline_mode = #tpu.pipeline_mode<synchronous>, transform_indices = @transform_12, window_bounds = array<i64: 1, 32>}, {pipeline_mode = #tpu.pipeline_mode<synchronous>, transform_indices = @transform_13, window_bounds = array<i64: 9, 32, 3>}, {pipeline_mode = #tpu.pipeline_mode<synchronous>, transform_indices = @transform_14, window_bounds = array<i64: 1, 3>}, {transform_indices = @transform_15, window_bounds = array<i64: 1, 1, 128>}, {transform_indices = @transform_16, window_bounds = array<i64: 1, 15, 15, 3>}]} {
    %c0 = arith.constant 0 : index
    %c0_0 = arith.constant 0 : index
    %c0_1 = arith.constant 0 : index
    %0 = vector.load %arg1[%c0, %c0_0, %c0_1] : memref<1x1x32xf32, #tpu.memory_space<vmem>>, vector<1x1x32xf32>
    %1 = vector.shape_cast %0 : vector<1x1x32xf32> to vector<1x32xf32>
    %cst = arith.constant 5.000000e-01 : f32
    %2 = vector.broadcast %cst : f32 to vector<1x32xf32>
    %3 = arith.mulf %1, %2 : vector<1x32xf32>
    %4 = math.cos %3 : vector<1x32xf32>
    %cst_2 = arith.constant 5.000000e-01 : f32
    %5 = vector.broadcast %cst_2 : f32 to vector<1x32xf32>
    %6 = arith.mulf %1, %5 : vector<1x32xf32>
    %7 = math.sin %6 : vector<1x32xf32>
    %8 = tpu.iota {dimensions = array<i32: 1>} : vector<1x128xi32>
    %c15_i32 = arith.constant 15 : i32
    %9 = vector.broadcast %c15_i32 : i32 to vector<1x128xi32>
    %10 = arith.andi %8, %9 : vector<1x128xi32>
    %c4_i32 = arith.constant 4 : i32
    %11 = vector.broadcast %c4_i32 : i32 to vector<1x128xi32>
    %12 = arith.shrsi %8, %11 : vector<1x128xi32>
    %c3_i32 = arith.constant 3 : i32
    %13 = vector.broadcast %c3_i32 : i32 to vector<1x128xi32>
    %14 = arith.shrsi %10, %13 : vector<1x128xi32>
    %c1_i32 = arith.constant 1 : i32
    %15 = vector.broadcast %c1_i32 : i32 to vector<1x128xi32>
    %16 = arith.andi %14, %15 : vector<1x128xi32>
    %c0_i32 = arith.constant 0 : i32
    %17 = vector.broadcast %c0_i32 : i32 to vector<1x128xi32>
    %18 = arith.cmpi eq, %16, %17 : vector<1x128xi32>
    %c2_i32 = arith.constant 2 : i32
    %19 = vector.broadcast %c2_i32 : i32 to vector<1x128xi32>
    %20 = arith.shrsi %10, %19 : vector<1x128xi32>
    %c1_i32_3 = arith.constant 1 : i32
    %21 = vector.broadcast %c1_i32_3 : i32 to vector<1x128xi32>
    %22 = arith.andi %20, %21 : vector<1x128xi32>
    %c0_i32_4 = arith.constant 0 : i32
    %23 = vector.broadcast %c0_i32_4 : i32 to vector<1x128xi32>
    %24 = arith.cmpi eq, %22, %23 : vector<1x128xi32>
    %c1_i32_5 = arith.constant 1 : i32
    %25 = vector.broadcast %c1_i32_5 : i32 to vector<1x128xi32>
    %26 = arith.shrsi %10, %25 : vector<1x128xi32>
    %c1_i32_6 = arith.constant 1 : i32
    %27 = vector.broadcast %c1_i32_6 : i32 to vector<1x128xi32>
    %28 = arith.andi %26, %27 : vector<1x128xi32>
    %c0_i32_7 = arith.constant 0 : i32
    %29 = vector.broadcast %c0_i32_7 : i32 to vector<1x128xi32>
    %30 = arith.cmpi eq, %28, %29 : vector<1x128xi32>
    %c0_i32_8 = arith.constant 0 : i32
    %31 = vector.broadcast %c0_i32_8 : i32 to vector<1x128xi32>
    %32 = arith.shrsi %10, %31 : vector<1x128xi32>
    %c1_i32_9 = arith.constant 1 : i32
    %33 = vector.broadcast %c1_i32_9 : i32 to vector<1x128xi32>
    %34 = arith.andi %32, %33 : vector<1x128xi32>
    %c0_i32_10 = arith.constant 0 : i32
    %35 = vector.broadcast %c0_i32_10 : i32 to vector<1x128xi32>
    %36 = arith.cmpi eq, %34, %35 : vector<1x128xi32>
    %cst_11 = arith.constant 0.000000e+00 : f32
    %37 = vector.broadcast %cst_11 : f32 to vector<1x128xf32>
    %cst_12 = arith.constant 1.000000e+00 : f32
    %38 = vector.broadcast %cst_12 : f32 to vector<1x128xf32>
    %39 = vector.extract_strided_slice %4 {offsets = [0, 0], sizes = [1, 1], strides = [1, 1]} : vector<1x32xf32> to vector<1x1xf32>
    %40 = vector.extract_strided_slice %7 {offsets = [0, 0], sizes = [1, 1], strides = [1, 1]} : vector<1x32xf32> to vector<1x1xf32>
    %41 = vector.shape_cast %39 : vector<1x1xf32> to vector<1x1xf32>
    %42 = vector.broadcast %41 : vector<1x1xf32> to vector<1x128xf32>
    %43 = vector.shape_cast %40 : vector<1x1xf32> to vector<1x1xf32>
    %44 = vector.broadcast %43 : vector<1x1xf32> to vector<1x128xf32>
    %45 = arith.select %18, %42, %44 : vector<1x128xi1>, vector<1x128xf32>
    %46 = arith.mulf %38, %45 : vector<1x128xf32>
    %47 = vector.extract_strided_slice %4 {offsets = [0, 1], sizes = [1, 1], strides = [1, 1]} : vector<1x32xf32> to vector<1x1xf32>
    %48 = vector.extract_strided_slice %7 {offsets = [0, 1], sizes = [1, 1], strides = [1, 1]} : vector<1x32xf32> to vector<1x1xf32>
    %49 = vector.shape_cast %47 : vector<1x1xf32> to vector<1x1xf32>
    %50 = vector.broadcast %49 : vector<1x1xf32> to vector<1x128xf32>
    %51 = vector.shape_cast %48 : vector<1x1xf32> to vector<1x1xf32>
    %52 = vector.broadcast %51 : vector<1x1xf32> to vector<1x128xf32>
    %53 = arith.select %24, %50, %52 : vector<1x128xi1>, vector<1x128xf32>
    %54 = arith.mulf %46, %53 : vector<1x128xf32>
    %55 = vector.extract_strided_slice %4 {offsets = [0, 2], sizes = [1, 1], strides = [1, 1]} : vector<1x32xf32> to vector<1x1xf32>
    %56 = vector.extract_strided_slice %7 {offsets = [0, 2], sizes = [1, 1], strides = [1, 1]} : vector<1x32xf32> to vector<1x1xf32>
    %57 = vector.shape_cast %55 : vector<1x1xf32> to vector<1x1xf32>
    %58 = vector.broadcast %57 : vector<1x1xf32> to vector<1x128xf32>
    %59 = vector.shape_cast %56 : vector<1x1xf32> to vector<1x1xf32>
    %60 = vector.broadcast %59 : vector<1x1xf32> to vector<1x128xf32>
    %61 = arith.select %30, %58, %60 : vector<1x128xi1>, vector<1x128xf32>
    %62 = arith.mulf %54, %61 : vector<1x128xf32>
    %63 = vector.extract_strided_slice %4 {offsets = [0, 3], sizes = [1, 1], strides = [1, 1]} : vector<1x32xf32> to vector<1x1xf32>
    %64 = vector.extract_strided_slice %7 {offsets = [0, 3], sizes = [1, 1], strides = [1, 1]} : vector<1x32xf32> to vector<1x1xf32>
    %65 = vector.shape_cast %63 : vector<1x1xf32> to vector<1x1xf32>
    %66 = vector.broadcast %65 : vector<1x1xf32> to vector<1x128xf32>
    %67 = vector.shape_cast %64 : vector<1x1xf32> to vector<1x1xf32>
    %68 = vector.broadcast %67 : vector<1x1xf32> to vector<1x128xf32>
    %69 = arith.select %36, %66, %68 : vector<1x128xi1>, vector<1x128xf32>
    %70 = arith.mulf %62, %69 : vector<1x128xf32>
    %c0_i32_13 = arith.constant 0 : i32
    %71 = vector.broadcast %c0_i32_13 : i32 to vector<1x128xi32>
    %72 = arith.cmpi eq, %12, %71 : vector<1x128xi32>
    %cst_14 = arith.constant 0.000000e+00 : f32
    %73 = vector.broadcast %cst_14 : f32 to vector<1x128xf32>
    %74 = arith.select %72, %70, %73 : vector<1x128xi1>, vector<1x128xf32>
    %75 = arith.addf %37, %74 : vector<1x128xf32>
    %cst_15 = arith.constant 1.000000e+00 : f32
    %76 = vector.broadcast %cst_15 : f32 to vector<1x128xf32>
    %77 = vector.extract_strided_slice %4 {offsets = [0, 4], sizes = [1, 1], strides = [1, 1]} : vector<1x32xf32> to vector<1x1xf32>
    %78 = vector.extract_strided_slice %7 {offsets = [0, 4], sizes = [1, 1], strides = [1, 1]} : vector<1x32xf32> to vector<1x1xf32>
    %79 = vector.shape_cast %77 : vector<1x1xf32> to vector<1x1xf32>
    %80 = vector.broadcast %79 : vector<1x1xf32> to vector<1x128xf32>
    %81 = vector.shape_cast %78 : vector<1x1xf32> to vector<1x1xf32>
    %82 = vector.broadcast %81 : vector<1x1xf32> to vector<1x128xf32>
    %83 = arith.select %18, %80, %82 : vector<1x128xi1>, vector<1x128xf32>
    %84 = arith.mulf %76, %83 : vector<1x128xf32>
    %85 = vector.extract_strided_slice %4 {offsets = [0, 5], sizes = [1, 1], strides = [1, 1]} : vector<1x32xf32> to vector<1x1xf32>
    %86 = vector.extract_strided_slice %7 {offsets = [0, 5], sizes = [1, 1], strides = [1, 1]} : vector<1x32xf32> to vector<1x1xf32>
    %87 = vector.shape_cast %85 : vector<1x1xf32> to vector<1x1xf32>
    %88 = vector.broadcast %87 : vector<1x1xf32> to vector<1x128xf32>
    %89 = vector.shape_cast %86 : vector<1x1xf32> to vector<1x1xf32>
    %90 = vector.broadcast %89 : vector<1x1xf32> to vector<1x128xf32>
    %91 = arith.select %24, %88, %90 : vector<1x128xi1>, vector<1x128xf32>
    %92 = arith.mulf %84, %91 : vector<1x128xf32>
    %93 = vector.extract_strided_slice %4 {offsets = [0, 6], sizes = [1, 1], strides = [1, 1]} : vector<1x32xf32> to vector<1x1xf32>
    %94 = vector.extract_strided_slice %7 {offsets = [0, 6], sizes = [1, 1], strides = [1, 1]} : vector<1x32xf32> to vector<1x1xf32>
    %95 = vector.shape_cast %93 : vector<1x1xf32> to vector<1x1xf32>
    %96 = vector.broadcast %95 : vector<1x1xf32> to vector<1x128xf32>
    %97 = vector.shape_cast %94 : vector<1x1xf32> to vector<1x1xf32>
    %98 = vector.broadcast %97 : vector<1x1xf32> to vector<1x128xf32>
    %99 = arith.select %30, %96, %98 : vector<1x128xi1>, vector<1x128xf32>
    %100 = arith.mulf %92, %99 : vector<1x128xf32>
    %101 = vector.extract_strided_slice %4 {offsets = [0, 7], sizes = [1, 1], strides = [1, 1]} : vector<1x32xf32> to vector<1x1xf32>
    %102 = vector.extract_strided_slice %7 {offsets = [0, 7], sizes = [1, 1], strides = [1, 1]} : vector<1x32xf32> to vector<1x1xf32>
    %103 = vector.shape_cast %101 : vector<1x1xf32> to vector<1x1xf32>
    %104 = vector.broadcast %103 : vector<1x1xf32> to vector<1x128xf32>
    %105 = vector.shape_cast %102 : vector<1x1xf32> to vector<1x1xf32>
    %106 = vector.broadcast %105 : vector<1x1xf32> to vector<1x128xf32>
    %107 = arith.select %36, %104, %106 : vector<1x128xi1>, vector<1x128xf32>
    %108 = arith.mulf %100, %107 : vector<1x128xf32>
    %c1_i32_16 = arith.constant 1 : i32
    %109 = vector.broadcast %c1_i32_16 : i32 to vector<1x128xi32>
    %110 = arith.cmpi eq, %12, %109 : vector<1x128xi32>
    %cst_17 = arith.constant 0.000000e+00 : f32
    %111 = vector.broadcast %cst_17 : f32 to vector<1x128xf32>
    %112 = arith.select %110, %108, %111 : vector<1x128xi1>, vector<1x128xf32>
    %113 = arith.addf %75, %112 : vector<1x128xf32>
    %cst_18 = arith.constant 1.000000e+00 : f32
    %114 = vector.broadcast %cst_18 : f32 to vector<1x128xf32>
    %115 = vector.extract_strided_slice %4 {offsets = [0, 8], sizes = [1, 1], strides = [1, 1]} : vector<1x32xf32> to vector<1x1xf32>
    %116 = vector.extract_strided_slice %7 {offsets = [0, 8], sizes = [1, 1], strides = [1, 1]} : vector<1x32xf32> to vector<1x1xf32>
    %117 = vector.shape_cast %115 : vector<1x1xf32> to vector<1x1xf32>
    %118 = vector.broadcast %117 : vector<1x1xf32> to vector<1x128xf32>
    %119 = vector.shape_cast %116 : vector<1x1xf32> to vector<1x1xf32>
    %120 = vector.broadcast %119 : vector<1x1xf32> to vector<1x128xf32>
    %121 = arith.select %18, %118, %120 : vector<1x128xi1>, vector<1x128xf32>
    %122 = arith.mulf %114, %121 : vector<1x128xf32>
    %123 = vector.extract_strided_slice %4 {offsets = [0, 9], sizes = [1, 1], strides = [1, 1]} : vector<1x32xf32> to vector<1x1xf32>
    %124 = vector.extract_strided_slice %7 {offsets = [0, 9], sizes = [1, 1], strides = [1, 1]} : vector<1x32xf32> to vector<1x1xf32>
    %125 = vector.shape_cast %123 : vector<1x1xf32> to vector<1x1xf32>
    %126 = vector.broadcast %125 : vector<1x1xf32> to vector<1x128xf32>
    %127 = vector.shape_cast %124 : vector<1x1xf32> to vector<1x1xf32>
    %128 = vector.broadcast %127 : vector<1x1xf32> to vector<1x128xf32>
    %129 = arith.select %24, %126, %128 : vector<1x128xi1>, vector<1x128xf32>
    %130 = arith.mulf %122, %129 : vector<1x128xf32>
    %131 = vector.extract_strided_slice %4 {offsets = [0, 10], sizes = [1, 1], strides = [1, 1]} : vector<1x32xf32> to vector<1x1xf32>
    %132 = vector.extract_strided_slice %7 {offsets = [0, 10], sizes = [1, 1], strides = [1, 1]} : vector<1x32xf32> to vector<1x1xf32>
    %133 = vector.shape_cast %131 : vector<1x1xf32> to vector<1x1xf32>
    %134 = vector.broadcast %133 : vector<1x1xf32> to vector<1x128xf32>
    %135 = vector.shape_cast %132 : vector<1x1xf32> to vector<1x1xf32>
    %136 = vector.broadcast %135 : vector<1x1xf32> to vector<1x128xf32>
    %137 = arith.select %30, %134, %136 : vector<1x128xi1>, vector<1x128xf32>
    %138 = arith.mulf %130, %137 : vector<1x128xf32>
    %139 = vector.extract_strided_slice %4 {offsets = [0, 11], sizes = [1, 1], strides = [1, 1]} : vector<1x32xf32> to vector<1x1xf32>
    %140 = vector.extract_strided_slice %7 {offsets = [0, 11], sizes = [1, 1], strides = [1, 1]} : vector<1x32xf32> to vector<1x1xf32>
    %141 = vector.shape_cast %139 : vector<1x1xf32> to vector<1x1xf32>
    %142 = vector.broadcast %141 : vector<1x1xf32> to vector<1x128xf32>
    %143 = vector.shape_cast %140 : vector<1x1xf32> to vector<1x1xf32>
    %144 = vector.broadcast %143 : vector<1x1xf32> to vector<1x128xf32>
    %145 = arith.select %36, %142, %144 : vector<1x128xi1>, vector<1x128xf32>
    %146 = arith.mulf %138, %145 : vector<1x128xf32>
    %c2_i32_19 = arith.constant 2 : i32
    %147 = vector.broadcast %c2_i32_19 : i32 to vector<1x128xi32>
    %148 = arith.cmpi eq, %12, %147 : vector<1x128xi32>
    %cst_20 = arith.constant 0.000000e+00 : f32
    %149 = vector.broadcast %cst_20 : f32 to vector<1x128xf32>
    %150 = arith.select %148, %146, %149 : vector<1x128xi1>, vector<1x128xf32>
    %151 = arith.addf %113, %150 : vector<1x128xf32>
    %cst_21 = arith.constant 1.000000e+00 : f32
    %152 = vector.broadcast %cst_21 : f32 to vector<1x128xf32>
    %153 = vector.extract_strided_slice %4 {offsets = [0, 12], sizes = [1, 1], strides = [1, 1]} : vector<1x32xf32> to vector<1x1xf32>
    %154 = vector.extract_strided_slice %7 {offsets = [0, 12], sizes = [1, 1], strides = [1, 1]} : vector<1x32xf32> to vector<1x1xf32>
    %155 = vector.shape_cast %153 : vector<1x1xf32> to vector<1x1xf32>
    %156 = vector.broadcast %155 : vector<1x1xf32> to vector<1x128xf32>
    %157 = vector.shape_cast %154 : vector<1x1xf32> to vector<1x1xf32>
    %158 = vector.broadcast %157 : vector<1x1xf32> to vector<1x128xf32>
    %159 = arith.select %18, %156, %158 : vector<1x128xi1>, vector<1x128xf32>
    %160 = arith.mulf %152, %159 : vector<1x128xf32>
    %161 = vector.extract_strided_slice %4 {offsets = [0, 13], sizes = [1, 1], strides = [1, 1]} : vector<1x32xf32> to vector<1x1xf32>
    %162 = vector.extract_strided_slice %7 {offsets = [0, 13], sizes = [1, 1], strides = [1, 1]} : vector<1x32xf32> to vector<1x1xf32>
    %163 = vector.shape_cast %161 : vector<1x1xf32> to vector<1x1xf32>
    %164 = vector.broadcast %163 : vector<1x1xf32> to vector<1x128xf32>
    %165 = vector.shape_cast %162 : vector<1x1xf32> to vector<1x1xf32>
    %166 = vector.broadcast %165 : vector<1x1xf32> to vector<1x128xf32>
    %167 = arith.select %24, %164, %166 : vector<1x128xi1>, vector<1x128xf32>
    %168 = arith.mulf %160, %167 : vector<1x128xf32>
    %169 = vector.extract_strided_slice %4 {offsets = [0, 14], sizes = [1, 1], strides = [1, 1]} : vector<1x32xf32> to vector<1x1xf32>
    %170 = vector.extract_strided_slice %7 {offsets = [0, 14], sizes = [1, 1], strides = [1, 1]} : vector<1x32xf32> to vector<1x1xf32>
    %171 = vector.shape_cast %169 : vector<1x1xf32> to vector<1x1xf32>
    %172 = vector.broadcast %171 : vector<1x1xf32> to vector<1x128xf32>
    %173 = vector.shape_cast %170 : vector<1x1xf32> to vector<1x1xf32>
    %174 = vector.broadcast %173 : vector<1x1xf32> to vector<1x128xf32>
    %175 = arith.select %30, %172, %174 : vector<1x128xi1>, vector<1x128xf32>
    %176 = arith.mulf %168, %175 : vector<1x128xf32>
    %177 = vector.extract_strided_slice %4 {offsets = [0, 15], sizes = [1, 1], strides = [1, 1]} : vector<1x32xf32> to vector<1x1xf32>
    %178 = vector.extract_strided_slice %7 {offsets = [0, 15], sizes = [1, 1], strides = [1, 1]} : vector<1x32xf32> to vector<1x1xf32>
    %179 = vector.shape_cast %177 : vector<1x1xf32> to vector<1x1xf32>
    %180 = vector.broadcast %179 : vector<1x1xf32> to vector<1x128xf32>
    %181 = vector.shape_cast %178 : vector<1x1xf32> to vector<1x1xf32>
    %182 = vector.broadcast %181 : vector<1x1xf32> to vector<1x128xf32>
    %183 = arith.select %36, %180, %182 : vector<1x128xi1>, vector<1x128xf32>
    %184 = arith.mulf %176, %183 : vector<1x128xf32>
    %c3_i32_22 = arith.constant 3 : i32
    %185 = vector.broadcast %c3_i32_22 : i32 to vector<1x128xi32>
    %186 = arith.cmpi eq, %12, %185 : vector<1x128xi32>
    %cst_23 = arith.constant 0.000000e+00 : f32
    %187 = vector.broadcast %cst_23 : f32 to vector<1x128xf32>
    %188 = arith.select %186, %184, %187 : vector<1x128xi1>, vector<1x128xf32>
    %189 = arith.addf %151, %188 : vector<1x128xf32>
    %cst_24 = arith.constant 1.000000e+00 : f32
    %190 = vector.broadcast %cst_24 : f32 to vector<1x128xf32>
    %191 = vector.extract_strided_slice %4 {offsets = [0, 16], sizes = [1, 1], strides = [1, 1]} : vector<1x32xf32> to vector<1x1xf32>
    %192 = vector.extract_strided_slice %7 {offsets = [0, 16], sizes = [1, 1], strides = [1, 1]} : vector<1x32xf32> to vector<1x1xf32>
    %193 = vector.shape_cast %191 : vector<1x1xf32> to vector<1x1xf32>
    %194 = vector.broadcast %193 : vector<1x1xf32> to vector<1x128xf32>
    %195 = vector.shape_cast %192 : vector<1x1xf32> to vector<1x1xf32>
    %196 = vector.broadcast %195 : vector<1x1xf32> to vector<1x128xf32>
    %197 = arith.select %18, %194, %196 : vector<1x128xi1>, vector<1x128xf32>
    %198 = arith.mulf %190, %197 : vector<1x128xf32>
    %199 = vector.extract_strided_slice %4 {offsets = [0, 17], sizes = [1, 1], strides = [1, 1]} : vector<1x32xf32> to vector<1x1xf32>
    %200 = vector.extract_strided_slice %7 {offsets = [0, 17], sizes = [1, 1], strides = [1, 1]} : vector<1x32xf32> to vector<1x1xf32>
    %201 = vector.shape_cast %199 : vector<1x1xf32> to vector<1x1xf32>
    %202 = vector.broadcast %201 : vector<1x1xf32> to vector<1x128xf32>
    %203 = vector.shape_cast %200 : vector<1x1xf32> to vector<1x1xf32>
    %204 = vector.broadcast %203 : vector<1x1xf32> to vector<1x128xf32>
    %205 = arith.select %24, %202, %204 : vector<1x128xi1>, vector<1x128xf32>
    %206 = arith.mulf %198, %205 : vector<1x128xf32>
    %207 = vector.extract_strided_slice %4 {offsets = [0, 18], sizes = [1, 1], strides = [1, 1]} : vector<1x32xf32> to vector<1x1xf32>
    %208 = vector.extract_strided_slice %7 {offsets = [0, 18], sizes = [1, 1], strides = [1, 1]} : vector<1x32xf32> to vector<1x1xf32>
    %209 = vector.shape_cast %207 : vector<1x1xf32> to vector<1x1xf32>
    %210 = vector.broadcast %209 : vector<1x1xf32> to vector<1x128xf32>
    %211 = vector.shape_cast %208 : vector<1x1xf32> to vector<1x1xf32>
    %212 = vector.broadcast %211 : vector<1x1xf32> to vector<1x128xf32>
    %213 = arith.select %30, %210, %212 : vector<1x128xi1>, vector<1x128xf32>
    %214 = arith.mulf %206, %213 : vector<1x128xf32>
    %215 = vector.extract_strided_slice %4 {offsets = [0, 19], sizes = [1, 1], strides = [1, 1]} : vector<1x32xf32> to vector<1x1xf32>
    %216 = vector.extract_strided_slice %7 {offsets = [0, 19], sizes = [1, 1], strides = [1, 1]} : vector<1x32xf32> to vector<1x1xf32>
    %217 = vector.shape_cast %215 : vector<1x1xf32> to vector<1x1xf32>
    %218 = vector.broadcast %217 : vector<1x1xf32> to vector<1x128xf32>
    %219 = vector.shape_cast %216 : vector<1x1xf32> to vector<1x1xf32>
    %220 = vector.broadcast %219 : vector<1x1xf32> to vector<1x128xf32>
    %221 = arith.select %36, %218, %220 : vector<1x128xi1>, vector<1x128xf32>
    %222 = arith.mulf %214, %221 : vector<1x128xf32>
    %c4_i32_25 = arith.constant 4 : i32
    %223 = vector.broadcast %c4_i32_25 : i32 to vector<1x128xi32>
    %224 = arith.cmpi eq, %12, %223 : vector<1x128xi32>
    %cst_26 = arith.constant 0.000000e+00 : f32
    %225 = vector.broadcast %cst_26 : f32 to vector<1x128xf32>
    %226 = arith.select %224, %222, %225 : vector<1x128xi1>, vector<1x128xf32>
    %227 = arith.addf %189, %226 : vector<1x128xf32>
    %cst_27 = arith.constant 1.000000e+00 : f32
    %228 = vector.broadcast %cst_27 : f32 to vector<1x128xf32>
    %229 = vector.extract_strided_slice %4 {offsets = [0, 20], sizes = [1, 1], strides = [1, 1]} : vector<1x32xf32> to vector<1x1xf32>
    %230 = vector.extract_strided_slice %7 {offsets = [0, 20], sizes = [1, 1], strides = [1, 1]} : vector<1x32xf32> to vector<1x1xf32>
    %231 = vector.shape_cast %229 : vector<1x1xf32> to vector<1x1xf32>
    %232 = vector.broadcast %231 : vector<1x1xf32> to vector<1x128xf32>
    %233 = vector.shape_cast %230 : vector<1x1xf32> to vector<1x1xf32>
    %234 = vector.broadcast %233 : vector<1x1xf32> to vector<1x128xf32>
    %235 = arith.select %18, %232, %234 : vector<1x128xi1>, vector<1x128xf32>
    %236 = arith.mulf %228, %235 : vector<1x128xf32>
    %237 = vector.extract_strided_slice %4 {offsets = [0, 21], sizes = [1, 1], strides = [1, 1]} : vector<1x32xf32> to vector<1x1xf32>
    %238 = vector.extract_strided_slice %7 {offsets = [0, 21], sizes = [1, 1], strides = [1, 1]} : vector<1x32xf32> to vector<1x1xf32>
    %239 = vector.shape_cast %237 : vector<1x1xf32> to vector<1x1xf32>
    %240 = vector.broadcast %239 : vector<1x1xf32> to vector<1x128xf32>
    %241 = vector.shape_cast %238 : vector<1x1xf32> to vector<1x1xf32>
    %242 = vector.broadcast %241 : vector<1x1xf32> to vector<1x128xf32>
    %243 = arith.select %24, %240, %242 : vector<1x128xi1>, vector<1x128xf32>
    %244 = arith.mulf %236, %243 : vector<1x128xf32>
    %245 = vector.extract_strided_slice %4 {offsets = [0, 22], sizes = [1, 1], strides = [1, 1]} : vector<1x32xf32> to vector<1x1xf32>
    %246 = vector.extract_strided_slice %7 {offsets = [0, 22], sizes = [1, 1], strides = [1, 1]} : vector<1x32xf32> to vector<1x1xf32>
    %247 = vector.shape_cast %245 : vector<1x1xf32> to vector<1x1xf32>
    %248 = vector.broadcast %247 : vector<1x1xf32> to vector<1x128xf32>
    %249 = vector.shape_cast %246 : vector<1x1xf32> to vector<1x1xf32>
    %250 = vector.broadcast %249 : vector<1x1xf32> to vector<1x128xf32>
    %251 = arith.select %30, %248, %250 : vector<1x128xi1>, vector<1x128xf32>
    %252 = arith.mulf %244, %251 : vector<1x128xf32>
    %253 = vector.extract_strided_slice %4 {offsets = [0, 23], sizes = [1, 1], strides = [1, 1]} : vector<1x32xf32> to vector<1x1xf32>
    %254 = vector.extract_strided_slice %7 {offsets = [0, 23], sizes = [1, 1], strides = [1, 1]} : vector<1x32xf32> to vector<1x1xf32>
    %255 = vector.shape_cast %253 : vector<1x1xf32> to vector<1x1xf32>
    %256 = vector.broadcast %255 : vector<1x1xf32> to vector<1x128xf32>
    %257 = vector.shape_cast %254 : vector<1x1xf32> to vector<1x1xf32>
    %258 = vector.broadcast %257 : vector<1x1xf32> to vector<1x128xf32>
    %259 = arith.select %36, %256, %258 : vector<1x128xi1>, vector<1x128xf32>
    %260 = arith.mulf %252, %259 : vector<1x128xf32>
    %c5_i32 = arith.constant 5 : i32
    %261 = vector.broadcast %c5_i32 : i32 to vector<1x128xi32>
    %262 = arith.cmpi eq, %12, %261 : vector<1x128xi32>
    %cst_28 = arith.constant 0.000000e+00 : f32
    %263 = vector.broadcast %cst_28 : f32 to vector<1x128xf32>
    %264 = arith.select %262, %260, %263 : vector<1x128xi1>, vector<1x128xf32>
    %265 = arith.addf %227, %264 : vector<1x128xf32>
    %cst_29 = arith.constant 1.000000e+00 : f32
    %266 = vector.broadcast %cst_29 : f32 to vector<1x128xf32>
    %267 = vector.extract_strided_slice %4 {offsets = [0, 24], sizes = [1, 1], strides = [1, 1]} : vector<1x32xf32> to vector<1x1xf32>
    %268 = vector.extract_strided_slice %7 {offsets = [0, 24], sizes = [1, 1], strides = [1, 1]} : vector<1x32xf32> to vector<1x1xf32>
    %269 = vector.shape_cast %267 : vector<1x1xf32> to vector<1x1xf32>
    %270 = vector.broadcast %269 : vector<1x1xf32> to vector<1x128xf32>
    %271 = vector.shape_cast %268 : vector<1x1xf32> to vector<1x1xf32>
    %272 = vector.broadcast %271 : vector<1x1xf32> to vector<1x128xf32>
    %273 = arith.select %18, %270, %272 : vector<1x128xi1>, vector<1x128xf32>
    %274 = arith.mulf %266, %273 : vector<1x128xf32>
    %275 = vector.extract_strided_slice %4 {offsets = [0, 25], sizes = [1, 1], strides = [1, 1]} : vector<1x32xf32> to vector<1x1xf32>
    %276 = vector.extract_strided_slice %7 {offsets = [0, 25], sizes = [1, 1], strides = [1, 1]} : vector<1x32xf32> to vector<1x1xf32>
    %277 = vector.shape_cast %275 : vector<1x1xf32> to vector<1x1xf32>
    %278 = vector.broadcast %277 : vector<1x1xf32> to vector<1x128xf32>
    %279 = vector.shape_cast %276 : vector<1x1xf32> to vector<1x1xf32>
    %280 = vector.broadcast %279 : vector<1x1xf32> to vector<1x128xf32>
    %281 = arith.select %24, %278, %280 : vector<1x128xi1>, vector<1x128xf32>
    %282 = arith.mulf %274, %281 : vector<1x128xf32>
    %283 = vector.extract_strided_slice %4 {offsets = [0, 26], sizes = [1, 1], strides = [1, 1]} : vector<1x32xf32> to vector<1x1xf32>
    %284 = vector.extract_strided_slice %7 {offsets = [0, 26], sizes = [1, 1], strides = [1, 1]} : vector<1x32xf32> to vector<1x1xf32>
    %285 = vector.shape_cast %283 : vector<1x1xf32> to vector<1x1xf32>
    %286 = vector.broadcast %285 : vector<1x1xf32> to vector<1x128xf32>
    %287 = vector.shape_cast %284 : vector<1x1xf32> to vector<1x1xf32>
    %288 = vector.broadcast %287 : vector<1x1xf32> to vector<1x128xf32>
    %289 = arith.select %30, %286, %288 : vector<1x128xi1>, vector<1x128xf32>
    %290 = arith.mulf %282, %289 : vector<1x128xf32>
    %291 = vector.extract_strided_slice %4 {offsets = [0, 27], sizes = [1, 1], strides = [1, 1]} : vector<1x32xf32> to vector<1x1xf32>
    %292 = vector.extract_strided_slice %7 {offsets = [0, 27], sizes = [1, 1], strides = [1, 1]} : vector<1x32xf32> to vector<1x1xf32>
    %293 = vector.shape_cast %291 : vector<1x1xf32> to vector<1x1xf32>
    %294 = vector.broadcast %293 : vector<1x1xf32> to vector<1x128xf32>
    %295 = vector.shape_cast %292 : vector<1x1xf32> to vector<1x1xf32>
    %296 = vector.broadcast %295 : vector<1x1xf32> to vector<1x128xf32>
    %297 = arith.select %36, %294, %296 : vector<1x128xi1>, vector<1x128xf32>
    %298 = arith.mulf %290, %297 : vector<1x128xf32>
    %c6_i32 = arith.constant 6 : i32
    %299 = vector.broadcast %c6_i32 : i32 to vector<1x128xi32>
    %300 = arith.cmpi eq, %12, %299 : vector<1x128xi32>
    %cst_30 = arith.constant 0.000000e+00 : f32
    %301 = vector.broadcast %cst_30 : f32 to vector<1x128xf32>
    %302 = arith.select %300, %298, %301 : vector<1x128xi1>, vector<1x128xf32>
    %303 = arith.addf %265, %302 : vector<1x128xf32>
    %cst_31 = arith.constant 1.000000e+00 : f32
    %304 = vector.broadcast %cst_31 : f32 to vector<1x128xf32>
    %305 = vector.extract_strided_slice %4 {offsets = [0, 28], sizes = [1, 1], strides = [1, 1]} : vector<1x32xf32> to vector<1x1xf32>
    %306 = vector.extract_strided_slice %7 {offsets = [0, 28], sizes = [1, 1], strides = [1, 1]} : vector<1x32xf32> to vector<1x1xf32>
    %307 = vector.shape_cast %305 : vector<1x1xf32> to vector<1x1xf32>
    %308 = vector.broadcast %307 : vector<1x1xf32> to vector<1x128xf32>
    %309 = vector.shape_cast %306 : vector<1x1xf32> to vector<1x1xf32>
    %310 = vector.broadcast %309 : vector<1x1xf32> to vector<1x128xf32>
    %311 = arith.select %18, %308, %310 : vector<1x128xi1>, vector<1x128xf32>
    %312 = arith.mulf %304, %311 : vector<1x128xf32>
    %313 = vector.extract_strided_slice %4 {offsets = [0, 29], sizes = [1, 1], strides = [1, 1]} : vector<1x32xf32> to vector<1x1xf32>
    %314 = vector.extract_strided_slice %7 {offsets = [0, 29], sizes = [1, 1], strides = [1, 1]} : vector<1x32xf32> to vector<1x1xf32>
    %315 = vector.shape_cast %313 : vector<1x1xf32> to vector<1x1xf32>
    %316 = vector.broadcast %315 : vector<1x1xf32> to vector<1x128xf32>
    %317 = vector.shape_cast %314 : vector<1x1xf32> to vector<1x1xf32>
    %318 = vector.broadcast %317 : vector<1x1xf32> to vector<1x128xf32>
    %319 = arith.select %24, %316, %318 : vector<1x128xi1>, vector<1x128xf32>
    %320 = arith.mulf %312, %319 : vector<1x128xf32>
    %321 = vector.extract_strided_slice %4 {offsets = [0, 30], sizes = [1, 1], strides = [1, 1]} : vector<1x32xf32> to vector<1x1xf32>
    %322 = vector.extract_strided_slice %7 {offsets = [0, 30], sizes = [1, 1], strides = [1, 1]} : vector<1x32xf32> to vector<1x1xf32>
    %323 = vector.shape_cast %321 : vector<1x1xf32> to vector<1x1xf32>
    %324 = vector.broadcast %323 : vector<1x1xf32> to vector<1x128xf32>
    %325 = vector.shape_cast %322 : vector<1x1xf32> to vector<1x1xf32>
    %326 = vector.broadcast %325 : vector<1x1xf32> to vector<1x128xf32>
    %327 = arith.select %30, %324, %326 : vector<1x128xi1>, vector<1x128xf32>
    %328 = arith.mulf %320, %327 : vector<1x128xf32>
    %329 = vector.extract_strided_slice %4 {offsets = [0, 31], sizes = [1, 1], strides = [1, 1]} : vector<1x32xf32> to vector<1x1xf32>
    %330 = vector.extract_strided_slice %7 {offsets = [0, 31], sizes = [1, 1], strides = [1, 1]} : vector<1x32xf32> to vector<1x1xf32>
    %331 = vector.shape_cast %329 : vector<1x1xf32> to vector<1x1xf32>
    %332 = vector.broadcast %331 : vector<1x1xf32> to vector<1x128xf32>
    %333 = vector.shape_cast %330 : vector<1x1xf32> to vector<1x1xf32>
    %334 = vector.broadcast %333 : vector<1x1xf32> to vector<1x128xf32>
    %335 = arith.select %36, %332, %334 : vector<1x128xi1>, vector<1x128xf32>
    %336 = arith.mulf %328, %335 : vector<1x128xf32>
    %c7_i32 = arith.constant 7 : i32
    %337 = vector.broadcast %c7_i32 : i32 to vector<1x128xi32>
    %338 = arith.cmpi eq, %12, %337 : vector<1x128xi32>
    %cst_32 = arith.constant 0.000000e+00 : f32
    %339 = vector.broadcast %cst_32 : f32 to vector<1x128xf32>
    %340 = arith.select %338, %336, %339 : vector<1x128xi1>, vector<1x128xf32>
    %341 = arith.addf %303, %340 : vector<1x128xf32>
    %c0_33 = arith.constant 0 : index
    %c0_34 = arith.constant 0 : index
    %342 = vector.load %arg4[%c0_33, %c0_34] : memref<128x128xf32, #tpu.memory_space<vmem>>, vector<128x128xf32>
    %cst_35 = arith.constant dense<0.000000e+00> : vector<1x128xf32>
    %343 = tpu.matmul %341, %342, %cst_35 {dimension_numbers = #tpu.dot_dimension_numbers<[1], [0], [0], [1], [0, 0, 1, 1], [], []>} : vector<1x128xf32>, vector<128x128xf32>, vector<1x128xf32> -> vector<1x128xf32>
    %344 = arith.mulf %343, %343 : vector<1x128xf32>
    %cst_36 = arith.constant 9.99999996E-13 : f32
    %345 = vector.broadcast %cst_36 : f32 to vector<1x128xf32>
    %346 = arith.addf %344, %345 : vector<1x128xf32>
    %347 = math.log %346 : vector<1x128xf32>
    %c0_37 = arith.constant 0 : index
    %c0_38 = arith.constant 0 : index
    %348 = vector.load %arg3[%c0_37, %c0_38] : memref<1x1xf32, #tpu.memory_space<vmem>>, vector<1x1xf32>
    %349 = vector.broadcast %348 : vector<1x1xf32> to vector<1x128xf32>
    %350 = arith.divf %347, %349 : vector<1x128xf32>
    %351 = math.exp %350 : vector<1x128xf32>
    %c0_39 = arith.constant 0 : index
    %c0_40 = arith.constant 0 : index
    %352 = vector.load %arg5[%c0_39, %c0_40] : memref<128x128xf32, #tpu.memory_space<vmem>>, vector<128x128xf32>
    %cst_41 = arith.constant dense<0.000000e+00> : vector<1x128xf32>
    %353 = tpu.matmul %351, %352, %cst_41 {dimension_numbers = #tpu.dot_dimension_numbers<[1], [0], [0], [1], [0, 0, 1, 1], [], []>} : vector<1x128xf32>, vector<128x128xf32>, vector<1x128xf32> -> vector<1x128xf32>
    %354 = arith.divf %351, %353 : vector<1x128xf32>
    %355 = vector.shape_cast %354 : vector<1x128xf32> to vector<1x1x128xf32>
    %c0_42 = arith.constant 0 : index
    %c0_43 = arith.constant 0 : index
    %c0_44 = arith.constant 0 : index
    %356 = vector.load %arg16[%c0_42, %c0_43, %c0_44] : memref<1x1x128xf32, #tpu.memory_space<vmem>>, vector<1x1x128xf32>
    tpu.vector_store %arg16[%c0_42, %c0_43, %c0_44], %355 {strides = array<i32>} : memref<1x1x128xf32, #tpu.memory_space<vmem>>, vector<1x1x128xf32>,
    %c0_45 = arith.constant 0 : index
    %c0_46 = arith.constant 0 : index
    %c0_47 = arith.constant 0 : index
    %357 = vector.load %arg2[%c0_45, %c0_46, %c0_47] : memref<1x1x16xf32, #tpu.memory_space<vmem>>, vector<1x1x16xf32>
    %358 = vector.shape_cast %357 : vector<1x1x16xf32> to vector<1x16xf32>
    %c0_48 = arith.constant 0 : index
    %c0_49 = arith.constant 0 : index
    %359 = vector.load %arg7[%c0_48, %c0_49] : memref<128x512xf32, #tpu.memory_space<vmem>>, vector<128x512xf32>
    %cst_50 = arith.constant dense<0.000000e+00> : vector<1x512xf32>
    %360 = tpu.matmul %354, %359, %cst_50 {dimension_numbers = #tpu.dot_dimension_numbers<[1], [0], [0], [1], [0, 0, 1, 1], [], []>} : vector<1x128xf32>, vector<128x512xf32>, vector<1x512xf32> -> vector<1x512xf32>
    %c0_51 = arith.constant 0 : index
    %c0_52 = arith.constant 0 : index
    %361 = vector.load %arg8[%c0_51, %c0_52] : memref<16x512xf32, #tpu.memory_space<vmem>>, vector<16x512xf32>
    %cst_53 = arith.constant dense<0.000000e+00> : vector<1x512xf32>
    %362 = tpu.matmul %358, %361, %cst_53 {dimension_numbers = #tpu.dot_dimension_numbers<[1], [0], [0], [1], [0, 0, 1, 1], [], []>} : vector<1x16xf32>, vector<16x512xf32>, vector<1x512xf32> -> vector<1x512xf32>
    %363 = arith.addf %360, %362 : vector<1x512xf32>
    %c0_54 = arith.constant 0 : index
    %c0_55 = arith.constant 0 : index
    %364 = vector.load %arg9[%c0_54, %c0_55] : memref<1x512xf32, #tpu.memory_space<vmem>>, vector<1x512xf32>
    %365 = arith.addf %363, %364 : vector<1x512xf32>
    %cst_56 = arith.constant 0.000000e+00 : f32
    %366 = vector.broadcast %cst_56 : f32 to vector<10x10x32xf32>
    %c0_57 = arith.constant 0 : index
    %c0_58 = arith.constant 0 : index
    %c0_59 = arith.constant 0 : index
    %367 = vector.load %arg18[%c0_57, %c0_58, %c0_59] : memref<10x10x32xf32, #tpu.memory_space<vmem>>, vector<10x10x32xf32>
    tpu.vector_store %arg18[%c0_57, %c0_58, %c0_59], %366 {strides = array<i32>} : memref<10x10x32xf32, #tpu.memory_space<vmem>>, vector<10x10x32xf32>,
    %368 = vector.extract_strided_slice %365 {offsets = [0, 0], sizes = [1, 32], strides = [1, 1]} : vector<1x512xf32> to vector<1x32xf32>
    %369 = vector.shape_cast %368 : vector<1x32xf32> to vector<1x1x32xf32>
    %370 = vector.broadcast %369 : vector<1x1x32xf32> to vector<2x2x32xf32>
    %c1 = arith.constant 1 : index
    %c1_60 = arith.constant 1 : index
    %c0_61 = arith.constant 0 : index
    %371 = vector.load %arg18[%c1, %c1_60, %c0_61] : memref<10x10x32xf32, #tpu.memory_space<vmem>>, vector<2x2x32xf32>
    tpu.vector_store %arg18[%c1, %c1_60, %c0_61], %370 {strides = array<i32>} : memref<10x10x32xf32, #tpu.memory_space<vmem>>, vector<2x2x32xf32>,
    %372 = vector.extract_strided_slice %365 {offsets = [0, 32], sizes = [1, 32], strides = [1, 1]} : vector<1x512xf32> to vector<1x32xf32>
    %373 = vector.shape_cast %372 : vector<1x32xf32> to vector<1x1x32xf32>
    %374 = vector.broadcast %373 : vector<1x1x32xf32> to vector<2x2x32xf32>
    %c1_62 = arith.constant 1 : index
    %c3 = arith.constant 3 : index
    %c0_63 = arith.constant 0 : index
    %375 = vector.load %arg18[%c1_62, %c3, %c0_63] : memref<10x10x32xf32, #tpu.memory_space<vmem>>, vector<2x2x32xf32>
    tpu.vector_store %arg18[%c1_62, %c3, %c0_63], %374 {strides = array<i32>} : memref<10x10x32xf32, #tpu.memory_space<vmem>>, vector<2x2x32xf32>,
    %376 = vector.extract_strided_slice %365 {offsets = [0, 64], sizes = [1, 32], strides = [1, 1]} : vector<1x512xf32> to vector<1x32xf32>
    %377 = vector.shape_cast %376 : vector<1x32xf32> to vector<1x1x32xf32>
    %378 = vector.broadcast %377 : vector<1x1x32xf32> to vector<2x2x32xf32>
    %c1_64 = arith.constant 1 : index
    %c5 = arith.constant 5 : index
    %c0_65 = arith.constant 0 : index
    %379 = vector.load %arg18[%c1_64, %c5, %c0_65] : memref<10x10x32xf32, #tpu.memory_space<vmem>>, vector<2x2x32xf32>
    tpu.vector_store %arg18[%c1_64, %c5, %c0_65], %378 {strides = array<i32>} : memref<10x10x32xf32, #tpu.memory_space<vmem>>, vector<2x2x32xf32>,
    %380 = vector.extract_strided_slice %365 {offsets = [0, 96], sizes = [1, 32], strides = [1, 1]} : vector<1x512xf32> to vector<1x32xf32>
    %381 = vector.shape_cast %380 : vector<1x32xf32> to vector<1x1x32xf32>
    %382 = vector.broadcast %381 : vector<1x1x32xf32> to vector<2x2x32xf32>
    %c1_66 = arith.constant 1 : index
    %c7 = arith.constant 7 : index
    %c0_67 = arith.constant 0 : index
    %383 = vector.load %arg18[%c1_66, %c7, %c0_67] : memref<10x10x32xf32, #tpu.memory_space<vmem>>, vector<2x2x32xf32>
    tpu.vector_store %arg18[%c1_66, %c7, %c0_67], %382 {strides = array<i32>} : memref<10x10x32xf32, #tpu.memory_space<vmem>>, vector<2x2x32xf32>,
    %384 = vector.extract_strided_slice %365 {offsets = [0, 128], sizes = [1, 32], strides = [1, 1]} : vector<1x512xf32> to vector<1x32xf32>
    %385 = vector.shape_cast %384 : vector<1x32xf32> to vector<1x1x32xf32>
    %386 = vector.broadcast %385 : vector<1x1x32xf32> to vector<2x2x32xf32>
    %c3_68 = arith.constant 3 : index
    %c1_69 = arith.constant 1 : index
    %c0_70 = arith.constant 0 : index
    %387 = vector.load %arg18[%c3_68, %c1_69, %c0_70] : memref<10x10x32xf32, #tpu.memory_space<vmem>>, vector<2x2x32xf32>
    tpu.vector_store %arg18[%c3_68, %c1_69, %c0_70], %386 {strides = array<i32>} : memref<10x10x32xf32, #tpu.memory_space<vmem>>, vector<2x2x32xf32>,
    %388 = vector.extract_strided_slice %365 {offsets = [0, 160], sizes = [1, 32], strides = [1, 1]} : vector<1x512xf32> to vector<1x32xf32>
    %389 = vector.shape_cast %388 : vector<1x32xf32> to vector<1x1x32xf32>
    %390 = vector.broadcast %389 : vector<1x1x32xf32> to vector<2x2x32xf32>
    %c3_71 = arith.constant 3 : index
    %c3_72 = arith.constant 3 : index
    %c0_73 = arith.constant 0 : index
    %391 = vector.load %arg18[%c3_71, %c3_72, %c0_73] : memref<10x10x32xf32, #tpu.memory_space<vmem>>, vector<2x2x32xf32>
    tpu.vector_store %arg18[%c3_71, %c3_72, %c0_73], %390 {strides = array<i32>} : memref<10x10x32xf32, #tpu.memory_space<vmem>>, vector<2x2x32xf32>,
    %392 = vector.extract_strided_slice %365 {offsets = [0, 192], sizes = [1, 32], strides = [1, 1]} : vector<1x512xf32> to vector<1x32xf32>
    %393 = vector.shape_cast %392 : vector<1x32xf32> to vector<1x1x32xf32>
    %394 = vector.broadcast %393 : vector<1x1x32xf32> to vector<2x2x32xf32>
    %c3_74 = arith.constant 3 : index
    %c5_75 = arith.constant 5 : index
    %c0_76 = arith.constant 0 : index
    %395 = vector.load %arg18[%c3_74, %c5_75, %c0_76] : memref<10x10x32xf32, #tpu.memory_space<vmem>>, vector<2x2x32xf32>
    tpu.vector_store %arg18[%c3_74, %c5_75, %c0_76], %394 {strides = array<i32>} : memref<10x10x32xf32, #tpu.memory_space<vmem>>, vector<2x2x32xf32>,
    %396 = vector.extract_strided_slice %365 {offsets = [0, 224], sizes = [1, 32], strides = [1, 1]} : vector<1x512xf32> to vector<1x32xf32>
    %397 = vector.shape_cast %396 : vector<1x32xf32> to vector<1x1x32xf32>
    %398 = vector.broadcast %397 : vector<1x1x32xf32> to vector<2x2x32xf32>
    %c3_77 = arith.constant 3 : index
    %c7_78 = arith.constant 7 : index
    %c0_79 = arith.constant 0 : index
    %399 = vector.load %arg18[%c3_77, %c7_78, %c0_79] : memref<10x10x32xf32, #tpu.memory_space<vmem>>, vector<2x2x32xf32>
    tpu.vector_store %arg18[%c3_77, %c7_78, %c0_79], %398 {strides = array<i32>} : memref<10x10x32xf32, #tpu.memory_space<vmem>>, vector<2x2x32xf32>,
    %400 = vector.extract_strided_slice %365 {offsets = [0, 256], sizes = [1, 32], strides = [1, 1]} : vector<1x512xf32> to vector<1x32xf32>
    %401 = vector.shape_cast %400 : vector<1x32xf32> to vector<1x1x32xf32>
    %402 = vector.broadcast %401 : vector<1x1x32xf32> to vector<2x2x32xf32>
    %c5_80 = arith.constant 5 : index
    %c1_81 = arith.constant 1 : index
    %c0_82 = arith.constant 0 : index
    %403 = vector.load %arg18[%c5_80, %c1_81, %c0_82] : memref<10x10x32xf32, #tpu.memory_space<vmem>>, vector<2x2x32xf32>
    tpu.vector_store %arg18[%c5_80, %c1_81, %c0_82], %402 {strides = array<i32>} : memref<10x10x32xf32, #tpu.memory_space<vmem>>, vector<2x2x32xf32>,
    %404 = vector.extract_strided_slice %365 {offsets = [0, 288], sizes = [1, 32], strides = [1, 1]} : vector<1x512xf32> to vector<1x32xf32>
    %405 = vector.shape_cast %404 : vector<1x32xf32> to vector<1x1x32xf32>
    %406 = vector.broadcast %405 : vector<1x1x32xf32> to vector<2x2x32xf32>
    %c5_83 = arith.constant 5 : index
    %c3_84 = arith.constant 3 : index
    %c0_85 = arith.constant 0 : index
    %407 = vector.load %arg18[%c5_83, %c3_84, %c0_85] : memref<10x10x32xf32, #tpu.memory_space<vmem>>, vector<2x2x32xf32>
    tpu.vector_store %arg18[%c5_83, %c3_84, %c0_85], %406 {strides = array<i32>} : memref<10x10x32xf32, #tpu.memory_space<vmem>>, vector<2x2x32xf32>,
    %408 = vector.extract_strided_slice %365 {offsets = [0, 320], sizes = [1, 32], strides = [1, 1]} : vector<1x512xf32> to vector<1x32xf32>
    %409 = vector.shape_cast %408 : vector<1x32xf32> to vector<1x1x32xf32>
    %410 = vector.broadcast %409 : vector<1x1x32xf32> to vector<2x2x32xf32>
    %c5_86 = arith.constant 5 : index
    %c5_87 = arith.constant 5 : index
    %c0_88 = arith.constant 0 : index
    %411 = vector.load %arg18[%c5_86, %c5_87, %c0_88] : memref<10x10x32xf32, #tpu.memory_space<vmem>>, vector<2x2x32xf32>
    tpu.vector_store %arg18[%c5_86, %c5_87, %c0_88], %410 {strides = array<i32>} : memref<10x10x32xf32, #tpu.memory_space<vmem>>, vector<2x2x32xf32>,
    %412 = vector.extract_strided_slice %365 {offsets = [0, 352], sizes = [1, 32], strides = [1, 1]} : vector<1x512xf32> to vector<1x32xf32>
    %413 = vector.shape_cast %412 : vector<1x32xf32> to vector<1x1x32xf32>
    %414 = vector.broadcast %413 : vector<1x1x32xf32> to vector<2x2x32xf32>
    %c5_89 = arith.constant 5 : index
    %c7_90 = arith.constant 7 : index
    %c0_91 = arith.constant 0 : index
    %415 = vector.load %arg18[%c5_89, %c7_90, %c0_91] : memref<10x10x32xf32, #tpu.memory_space<vmem>>, vector<2x2x32xf32>
    tpu.vector_store %arg18[%c5_89, %c7_90, %c0_91], %414 {strides = array<i32>} : memref<10x10x32xf32, #tpu.memory_space<vmem>>, vector<2x2x32xf32>,
    %416 = vector.extract_strided_slice %365 {offsets = [0, 384], sizes = [1, 32], strides = [1, 1]} : vector<1x512xf32> to vector<1x32xf32>
    %417 = vector.shape_cast %416 : vector<1x32xf32> to vector<1x1x32xf32>
    %418 = vector.broadcast %417 : vector<1x1x32xf32> to vector<2x2x32xf32>
    %c7_92 = arith.constant 7 : index
    %c1_93 = arith.constant 1 : index
    %c0_94 = arith.constant 0 : index
    %419 = vector.load %arg18[%c7_92, %c1_93, %c0_94] : memref<10x10x32xf32, #tpu.memory_space<vmem>>, vector<2x2x32xf32>
    tpu.vector_store %arg18[%c7_92, %c1_93, %c0_94], %418 {strides = array<i32>} : memref<10x10x32xf32, #tpu.memory_space<vmem>>, vector<2x2x32xf32>,
    %420 = vector.extract_strided_slice %365 {offsets = [0, 416], sizes = [1, 32], strides = [1, 1]} : vector<1x512xf32> to vector<1x32xf32>
    %421 = vector.shape_cast %420 : vector<1x32xf32> to vector<1x1x32xf32>
    %422 = vector.broadcast %421 : vector<1x1x32xf32> to vector<2x2x32xf32>
    %c7_95 = arith.constant 7 : index
    %c3_96 = arith.constant 3 : index
    %c0_97 = arith.constant 0 : index
    %423 = vector.load %arg18[%c7_95, %c3_96, %c0_97] : memref<10x10x32xf32, #tpu.memory_space<vmem>>, vector<2x2x32xf32>
    tpu.vector_store %arg18[%c7_95, %c3_96, %c0_97], %422 {strides = array<i32>} : memref<10x10x32xf32, #tpu.memory_space<vmem>>, vector<2x2x32xf32>,
    %424 = vector.extract_strided_slice %365 {offsets = [0, 448], sizes = [1, 32], strides = [1, 1]} : vector<1x512xf32> to vector<1x32xf32>
    %425 = vector.shape_cast %424 : vector<1x32xf32> to vector<1x1x32xf32>
    %426 = vector.broadcast %425 : vector<1x1x32xf32> to vector<2x2x32xf32>
    %c7_98 = arith.constant 7 : index
    %c5_99 = arith.constant 5 : index
    %c0_100 = arith.constant 0 : index
    %427 = vector.load %arg18[%c7_98, %c5_99, %c0_100] : memref<10x10x32xf32, #tpu.memory_space<vmem>>, vector<2x2x32xf32>
    tpu.vector_store %arg18[%c7_98, %c5_99, %c0_100], %426 {strides = array<i32>} : memref<10x10x32xf32, #tpu.memory_space<vmem>>, vector<2x2x32xf32>,
    %428 = vector.extract_strided_slice %365 {offsets = [0, 480], sizes = [1, 32], strides = [1, 1]} : vector<1x512xf32> to vector<1x32xf32>
    %429 = vector.shape_cast %428 : vector<1x32xf32> to vector<1x1x32xf32>
    %430 = vector.broadcast %429 : vector<1x1x32xf32> to vector<2x2x32xf32>
    %c7_101 = arith.constant 7 : index
    %c7_102 = arith.constant 7 : index
    %c0_103 = arith.constant 0 : index
    %431 = vector.load %arg18[%c7_101, %c7_102, %c0_103] : memref<10x10x32xf32, #tpu.memory_space<vmem>>, vector<2x2x32xf32>
    tpu.vector_store %arg18[%c7_101, %c7_102, %c0_103], %430 {strides = array<i32>} : memref<10x10x32xf32, #tpu.memory_space<vmem>>, vector<2x2x32xf32>,
    %c0_104 = arith.constant 0 : index
    %c0_105 = arith.constant 0 : index
    %c0_106 = arith.constant 0 : index
    %432 = vector.load %arg18[%c0_104, %c0_105, %c0_106] : memref<10x10x32xf32, #tpu.memory_space<vmem>>, vector<10x10x32xf32>
    %c0_107 = arith.constant 0 : index
    %c0_108 = arith.constant 0 : index
    %c0_109 = arith.constant 0 : index
    %433 = vector.load %arg10[%c0_107, %c0_108, %c0_109] : memref<9x32x32xf32, #tpu.memory_space<vmem>>, vector<9x32x32xf32>
    %c0_110 = arith.constant 0 : index
    %c0_111 = arith.constant 0 : index
    %434 = vector.load %arg11[%c0_110, %c0_111] : memref<1x32xf32, #tpu.memory_space<vmem>>, vector<1x32xf32>
    %cst_112 = arith.constant 0.000000e+00 : f32
    %435 = vector.broadcast %cst_112 : f32 to vector<64x32xf32>
    %436 = vector.extract_strided_slice %432 {offsets = [0, 0, 0], sizes = [8, 8, 32], strides = [1, 1, 1]} : vector<10x10x32xf32> to vector<8x8x32xf32>
    %437 = vector.shape_cast %436 : vector<8x8x32xf32> to vector<64x32xf32>
    %438 = vector.extract_strided_slice %433 {offsets = [0, 0, 0], sizes = [1, 32, 32], strides = [1, 1, 1]} : vector<9x32x32xf32> to vector<1x32x32xf32>
    %439 = vector.shape_cast %438 : vector<1x32x32xf32> to vector<32x32xf32>
    %cst_113 = arith.constant dense<0.000000e+00> : vector<64x32xf32>
    %440 = tpu.matmul %437, %439, %cst_113 {dimension_numbers = #tpu.dot_dimension_numbers<[1], [0], [0], [1], [0, 0, 1, 1], [], []>} : vector<64x32xf32>, vector<32x32xf32>, vector<64x32xf32> -> vector<64x32xf32>
    %441 = arith.addf %435, %440 : vector<64x32xf32>
    %442 = vector.extract_strided_slice %432 {offsets = [0, 1, 0], sizes = [8, 8, 32], strides = [1, 1, 1]} : vector<10x10x32xf32> to vector<8x8x32xf32>
    %443 = vector.shape_cast %442 : vector<8x8x32xf32> to vector<64x32xf32>
    %444 = vector.extract_strided_slice %433 {offsets = [1, 0, 0], sizes = [1, 32, 32], strides = [1, 1, 1]} : vector<9x32x32xf32> to vector<1x32x32xf32>
    %445 = vector.shape_cast %444 : vector<1x32x32xf32> to vector<32x32xf32>
    %cst_114 = arith.constant dense<0.000000e+00> : vector<64x32xf32>
    %446 = tpu.matmul %443, %445, %cst_114 {dimension_numbers = #tpu.dot_dimension_numbers<[1], [0], [0], [1], [0, 0, 1, 1], [], []>} : vector<64x32xf32>, vector<32x32xf32>, vector<64x32xf32> -> vector<64x32xf32>
    %447 = arith.addf %441, %446 : vector<64x32xf32>
    %448 = vector.extract_strided_slice %432 {offsets = [0, 2, 0], sizes = [8, 8, 32], strides = [1, 1, 1]} : vector<10x10x32xf32> to vector<8x8x32xf32>
    %449 = vector.shape_cast %448 : vector<8x8x32xf32> to vector<64x32xf32>
    %450 = vector.extract_strided_slice %433 {offsets = [2, 0, 0], sizes = [1, 32, 32], strides = [1, 1, 1]} : vector<9x32x32xf32> to vector<1x32x32xf32>
    %451 = vector.shape_cast %450 : vector<1x32x32xf32> to vector<32x32xf32>
    %cst_115 = arith.constant dense<0.000000e+00> : vector<64x32xf32>
    %452 = tpu.matmul %449, %451, %cst_115 {dimension_numbers = #tpu.dot_dimension_numbers<[1], [0], [0], [1], [0, 0, 1, 1], [], []>} : vector<64x32xf32>, vector<32x32xf32>, vector<64x32xf32> -> vector<64x32xf32>
    %453 = arith.addf %447, %452 : vector<64x32xf32>
    %454 = vector.extract_strided_slice %432 {offsets = [1, 0, 0], sizes = [8, 8, 32], strides = [1, 1, 1]} : vector<10x10x32xf32> to vector<8x8x32xf32>
    %455 = vector.shape_cast %454 : vector<8x8x32xf32> to vector<64x32xf32>
    %456 = vector.extract_strided_slice %433 {offsets = [3, 0, 0], sizes = [1, 32, 32], strides = [1, 1, 1]} : vector<9x32x32xf32> to vector<1x32x32xf32>
    %457 = vector.shape_cast %456 : vector<1x32x32xf32> to vector<32x32xf32>
    %cst_116 = arith.constant dense<0.000000e+00> : vector<64x32xf32>
    %458 = tpu.matmul %455, %457, %cst_116 {dimension_numbers = #tpu.dot_dimension_numbers<[1], [0], [0], [1], [0, 0, 1, 1], [], []>} : vector<64x32xf32>, vector<32x32xf32>, vector<64x32xf32> -> vector<64x32xf32>
    %459 = arith.addf %453, %458 : vector<64x32xf32>
    %460 = vector.extract_strided_slice %432 {offsets = [1, 1, 0], sizes = [8, 8, 32], strides = [1, 1, 1]} : vector<10x10x32xf32> to vector<8x8x32xf32>
    %461 = vector.shape_cast %460 : vector<8x8x32xf32> to vector<64x32xf32>
    %462 = vector.extract_strided_slice %433 {offsets = [4, 0, 0], sizes = [1, 32, 32], strides = [1, 1, 1]} : vector<9x32x32xf32> to vector<1x32x32xf32>
    %463 = vector.shape_cast %462 : vector<1x32x32xf32> to vector<32x32xf32>
    %cst_117 = arith.constant dense<0.000000e+00> : vector<64x32xf32>
    %464 = tpu.matmul %461, %463, %cst_117 {dimension_numbers = #tpu.dot_dimension_numbers<[1], [0], [0], [1], [0, 0, 1, 1], [], []>} : vector<64x32xf32>, vector<32x32xf32>, vector<64x32xf32> -> vector<64x32xf32>
    %465 = arith.addf %459, %464 : vector<64x32xf32>
    %466 = vector.extract_strided_slice %432 {offsets = [1, 2, 0], sizes = [8, 8, 32], strides = [1, 1, 1]} : vector<10x10x32xf32> to vector<8x8x32xf32>
    %467 = vector.shape_cast %466 : vector<8x8x32xf32> to vector<64x32xf32>
    %468 = vector.extract_strided_slice %433 {offsets = [5, 0, 0], sizes = [1, 32, 32], strides = [1, 1, 1]} : vector<9x32x32xf32> to vector<1x32x32xf32>
    %469 = vector.shape_cast %468 : vector<1x32x32xf32> to vector<32x32xf32>
    %cst_118 = arith.constant dense<0.000000e+00> : vector<64x32xf32>
    %470 = tpu.matmul %467, %469, %cst_118 {dimension_numbers = #tpu.dot_dimension_numbers<[1], [0], [0], [1], [0, 0, 1, 1], [], []>} : vector<64x32xf32>, vector<32x32xf32>, vector<64x32xf32> -> vector<64x32xf32>
    %471 = arith.addf %465, %470 : vector<64x32xf32>
    %472 = vector.extract_strided_slice %432 {offsets = [2, 0, 0], sizes = [8, 8, 32], strides = [1, 1, 1]} : vector<10x10x32xf32> to vector<8x8x32xf32>
    %473 = vector.shape_cast %472 : vector<8x8x32xf32> to vector<64x32xf32>
    %474 = vector.extract_strided_slice %433 {offsets = [6, 0, 0], sizes = [1, 32, 32], strides = [1, 1, 1]} : vector<9x32x32xf32> to vector<1x32x32xf32>
    %475 = vector.shape_cast %474 : vector<1x32x32xf32> to vector<32x32xf32>
    %cst_119 = arith.constant dense<0.000000e+00> : vector<64x32xf32>
    %476 = tpu.matmul %473, %475, %cst_119 {dimension_numbers = #tpu.dot_dimension_numbers<[1], [0], [0], [1], [0, 0, 1, 1], [], []>} : vector<64x32xf32>, vector<32x32xf32>, vector<64x32xf32> -> vector<64x32xf32>
    %477 = arith.addf %471, %476 : vector<64x32xf32>
    %478 = vector.extract_strided_slice %432 {offsets = [2, 1, 0], sizes = [8, 8, 32], strides = [1, 1, 1]} : vector<10x10x32xf32> to vector<8x8x32xf32>
    %479 = vector.shape_cast %478 : vector<8x8x32xf32> to vector<64x32xf32>
    %480 = vector.extract_strided_slice %433 {offsets = [7, 0, 0], sizes = [1, 32, 32], strides = [1, 1, 1]} : vector<9x32x32xf32> to vector<1x32x32xf32>
    %481 = vector.shape_cast %480 : vector<1x32x32xf32> to vector<32x32xf32>
    %cst_120 = arith.constant dense<0.000000e+00> : vector<64x32xf32>
    %482 = tpu.matmul %479, %481, %cst_120 {dimension_numbers = #tpu.dot_dimension_numbers<[1], [0], [0], [1], [0, 0, 1, 1], [], []>} : vector<64x32xf32>, vector<32x32xf32>, vector<64x32xf32> -> vector<64x32xf32>
    %483 = arith.addf %477, %482 : vector<64x32xf32>
    %484 = vector.extract_strided_slice %432 {offsets = [2, 2, 0], sizes = [8, 8, 32], strides = [1, 1, 1]} : vector<10x10x32xf32> to vector<8x8x32xf32>
    %485 = vector.shape_cast %484 : vector<8x8x32xf32> to vector<64x32xf32>
    %486 = vector.extract_strided_slice %433 {offsets = [8, 0, 0], sizes = [1, 32, 32], strides = [1, 1, 1]} : vector<9x32x32xf32> to vector<1x32x32xf32>
    %487 = vector.shape_cast %486 : vector<1x32x32xf32> to vector<32x32xf32>
    %cst_121 = arith.constant dense<0.000000e+00> : vector<64x32xf32>
    %488 = tpu.matmul %485, %487, %cst_121 {dimension_numbers = #tpu.dot_dimension_numbers<[1], [0], [0], [1], [0, 0, 1, 1], [], []>} : vector<64x32xf32>, vector<32x32xf32>, vector<64x32xf32> -> vector<64x32xf32>
    %489 = arith.addf %483, %488 : vector<64x32xf32>
    %490 = vector.broadcast %434 : vector<1x32xf32> to vector<64x32xf32>
    %491 = arith.addf %489, %490 : vector<64x32xf32>
    %cst_122 = arith.constant 0.000000e+00 : f32
    %492 = vector.broadcast %cst_122 : f32 to vector<64x32xf32>
    %493 = arith.maximumf %491, %492 : vector<64x32xf32>
    %c0_123 = arith.constant 0 : index
    %c0_124 = arith.constant 0 : index
    %494 = vector.load %arg6[%c0_123, %c0_124] : memref<256x64xf32, #tpu.memory_space<vmem>>, vector<256x64xf32>
    %cst_125 = arith.constant dense<0.000000e+00> : vector<256x32xf32>
    %495 = tpu.matmul %494, %493, %cst_125 {dimension_numbers = #tpu.dot_dimension_numbers<[1], [0], [0], [1], [0, 0, 1, 1], [], []>} : vector<256x64xf32>, vector<64x32xf32>, vector<256x32xf32> -> vector<256x32xf32>
    %cst_126 = arith.constant 0.000000e+00 : f32
    %496 = vector.broadcast %cst_126 : f32 to vector<18x18x32xf32>
    %c0_127 = arith.constant 0 : index
    %c0_128 = arith.constant 0 : index
    %c0_129 = arith.constant 0 : index
    %497 = vector.load %arg19[%c0_127, %c0_128, %c0_129] : memref<18x18x32xf32, #tpu.memory_space<vmem>>, vector<18x18x32xf32>
    tpu.vector_store %arg19[%c0_127, %c0_128, %c0_129], %496 {strides = array<i32>} : memref<18x18x32xf32, #tpu.memory_space<vmem>>, vector<18x18x32xf32>,
    %498 = vector.shape_cast %495 : vector<256x32xf32> to vector<16x16x32xf32>
    %c1_130 = arith.constant 1 : index
    %c1_131 = arith.constant 1 : index
    %c0_132 = arith.constant 0 : index
    %499 = vector.load %arg19[%c1_130, %c1_131, %c0_132] : memref<18x18x32xf32, #tpu.memory_space<vmem>>, vector<16x16x32xf32>
    tpu.vector_store %arg19[%c1_130, %c1_131, %c0_132], %498 {strides = array<i32>} : memref<18x18x32xf32, #tpu.memory_space<vmem>>, vector<16x16x32xf32>,
    %c0_133 = arith.constant 0 : index
    %c0_134 = arith.constant 0 : index
    %c0_135 = arith.constant 0 : index
    %500 = vector.load %arg19[%c0_133, %c0_134, %c0_135] : memref<18x18x32xf32, #tpu.memory_space<vmem>>, vector<18x18x32xf32>
    %c0_136 = arith.constant 0 : index
    %c0_137 = arith.constant 0 : index
    %c0_138 = arith.constant 0 : index
    %501 = vector.load %arg12[%c0_136, %c0_137, %c0_138] : memref<9x32x32xf32, #tpu.memory_space<vmem>>, vector<9x32x32xf32>
    %c0_139 = arith.constant 0 : index
    %c0_140 = arith.constant 0 : index
    %502 = vector.load %arg13[%c0_139, %c0_140] : memref<1x32xf32, #tpu.memory_space<vmem>>, vector<1x32xf32>
    %cst_141 = arith.constant 0.000000e+00 : f32
    %503 = vector.broadcast %cst_141 : f32 to vector<256x32xf32>
    %504 = vector.extract_strided_slice %500 {offsets = [0, 0, 0], sizes = [16, 16, 32], strides = [1, 1, 1]} : vector<18x18x32xf32> to vector<16x16x32xf32>
    %505 = vector.shape_cast %504 : vector<16x16x32xf32> to vector<256x32xf32>
    %506 = vector.extract_strided_slice %501 {offsets = [0, 0, 0], sizes = [1, 32, 32], strides = [1, 1, 1]} : vector<9x32x32xf32> to vector<1x32x32xf32>
    %507 = vector.shape_cast %506 : vector<1x32x32xf32> to vector<32x32xf32>
    %cst_142 = arith.constant dense<0.000000e+00> : vector<256x32xf32>
    %508 = tpu.matmul %505, %507, %cst_142 {dimension_numbers = #tpu.dot_dimension_numbers<[1], [0], [0], [1], [0, 0, 1, 1], [], []>} : vector<256x32xf32>, vector<32x32xf32>, vector<256x32xf32> -> vector<256x32xf32>
    %509 = arith.addf %503, %508 : vector<256x32xf32>
    %510 = vector.extract_strided_slice %500 {offsets = [0, 1, 0], sizes = [16, 16, 32], strides = [1, 1, 1]} : vector<18x18x32xf32> to vector<16x16x32xf32>
    %511 = vector.shape_cast %510 : vector<16x16x32xf32> to vector<256x32xf32>
    %512 = vector.extract_strided_slice %501 {offsets = [1, 0, 0], sizes = [1, 32, 32], strides = [1, 1, 1]} : vector<9x32x32xf32> to vector<1x32x32xf32>
    %513 = vector.shape_cast %512 : vector<1x32x32xf32> to vector<32x32xf32>
    %cst_143 = arith.constant dense<0.000000e+00> : vector<256x32xf32>
    %514 = tpu.matmul %511, %513, %cst_143 {dimension_numbers = #tpu.dot_dimension_numbers<[1], [0], [0], [1], [0, 0, 1, 1], [], []>} : vector<256x32xf32>, vector<32x32xf32>, vector<256x32xf32> -> vector<256x32xf32>
    %515 = arith.addf %509, %514 : vector<256x32xf32>
    %516 = vector.extract_strided_slice %500 {offsets = [0, 2, 0], sizes = [16, 16, 32], strides = [1, 1, 1]} : vector<18x18x32xf32> to vector<16x16x32xf32>
    %517 = vector.shape_cast %516 : vector<16x16x32xf32> to vector<256x32xf32>
    %518 = vector.extract_strided_slice %501 {offsets = [2, 0, 0], sizes = [1, 32, 32], strides = [1, 1, 1]} : vector<9x32x32xf32> to vector<1x32x32xf32>
    %519 = vector.shape_cast %518 : vector<1x32x32xf32> to vector<32x32xf32>
    %cst_144 = arith.constant dense<0.000000e+00> : vector<256x32xf32>
    %520 = tpu.matmul %517, %519, %cst_144 {dimension_numbers = #tpu.dot_dimension_numbers<[1], [0], [0], [1], [0, 0, 1, 1], [], []>} : vector<256x32xf32>, vector<32x32xf32>, vector<256x32xf32> -> vector<256x32xf32>
    %521 = arith.addf %515, %520 : vector<256x32xf32>
    %522 = vector.extract_strided_slice %500 {offsets = [1, 0, 0], sizes = [16, 16, 32], strides = [1, 1, 1]} : vector<18x18x32xf32> to vector<16x16x32xf32>
    %523 = vector.shape_cast %522 : vector<16x16x32xf32> to vector<256x32xf32>
    %524 = vector.extract_strided_slice %501 {offsets = [3, 0, 0], sizes = [1, 32, 32], strides = [1, 1, 1]} : vector<9x32x32xf32> to vector<1x32x32xf32>
    %525 = vector.shape_cast %524 : vector<1x32x32xf32> to vector<32x32xf32>
    %cst_145 = arith.constant dense<0.000000e+00> : vector<256x32xf32>
    %526 = tpu.matmul %523, %525, %cst_145 {dimension_numbers = #tpu.dot_dimension_numbers<[1], [0], [0], [1], [0, 0, 1, 1], [], []>} : vector<256x32xf32>, vector<32x32xf32>, vector<256x32xf32> -> vector<256x32xf32>
    %527 = arith.addf %521, %526 : vector<256x32xf32>
    %528 = vector.extract_strided_slice %500 {offsets = [1, 1, 0], sizes = [16, 16, 32], strides = [1, 1, 1]} : vector<18x18x32xf32> to vector<16x16x32xf32>
    %529 = vector.shape_cast %528 : vector<16x16x32xf32> to vector<256x32xf32>
    %530 = vector.extract_strided_slice %501 {offsets = [4, 0, 0], sizes = [1, 32, 32], strides = [1, 1, 1]} : vector<9x32x32xf32> to vector<1x32x32xf32>
    %531 = vector.shape_cast %530 : vector<1x32x32xf32> to vector<32x32xf32>
    %cst_146 = arith.constant dense<0.000000e+00> : vector<256x32xf32>
    %532 = tpu.matmul %529, %531, %cst_146 {dimension_numbers = #tpu.dot_dimension_numbers<[1], [0], [0], [1], [0, 0, 1, 1], [], []>} : vector<256x32xf32>, vector<32x32xf32>, vector<256x32xf32> -> vector<256x32xf32>
    %533 = arith.addf %527, %532 : vector<256x32xf32>
    %534 = vector.extract_strided_slice %500 {offsets = [1, 2, 0], sizes = [16, 16, 32], strides = [1, 1, 1]} : vector<18x18x32xf32> to vector<16x16x32xf32>
    %535 = vector.shape_cast %534 : vector<16x16x32xf32> to vector<256x32xf32>
    %536 = vector.extract_strided_slice %501 {offsets = [5, 0, 0], sizes = [1, 32, 32], strides = [1, 1, 1]} : vector<9x32x32xf32> to vector<1x32x32xf32>
    %537 = vector.shape_cast %536 : vector<1x32x32xf32> to vector<32x32xf32>
    %cst_147 = arith.constant dense<0.000000e+00> : vector<256x32xf32>
    %538 = tpu.matmul %535, %537, %cst_147 {dimension_numbers = #tpu.dot_dimension_numbers<[1], [0], [0], [1], [0, 0, 1, 1], [], []>} : vector<256x32xf32>, vector<32x32xf32>, vector<256x32xf32> -> vector<256x32xf32>
    %539 = arith.addf %533, %538 : vector<256x32xf32>
    %540 = vector.extract_strided_slice %500 {offsets = [2, 0, 0], sizes = [16, 16, 32], strides = [1, 1, 1]} : vector<18x18x32xf32> to vector<16x16x32xf32>
    %541 = vector.shape_cast %540 : vector<16x16x32xf32> to vector<256x32xf32>
    %542 = vector.extract_strided_slice %501 {offsets = [6, 0, 0], sizes = [1, 32, 32], strides = [1, 1, 1]} : vector<9x32x32xf32> to vector<1x32x32xf32>
    %543 = vector.shape_cast %542 : vector<1x32x32xf32> to vector<32x32xf32>
    %cst_148 = arith.constant dense<0.000000e+00> : vector<256x32xf32>
    %544 = tpu.matmul %541, %543, %cst_148 {dimension_numbers = #tpu.dot_dimension_numbers<[1], [0], [0], [1], [0, 0, 1, 1], [], []>} : vector<256x32xf32>, vector<32x32xf32>, vector<256x32xf32> -> vector<256x32xf32>
    %545 = arith.addf %539, %544 : vector<256x32xf32>
    %546 = vector.extract_strided_slice %500 {offsets = [2, 1, 0], sizes = [16, 16, 32], strides = [1, 1, 1]} : vector<18x18x32xf32> to vector<16x16x32xf32>
    %547 = vector.shape_cast %546 : vector<16x16x32xf32> to vector<256x32xf32>
    %548 = vector.extract_strided_slice %501 {offsets = [7, 0, 0], sizes = [1, 32, 32], strides = [1, 1, 1]} : vector<9x32x32xf32> to vector<1x32x32xf32>
    %549 = vector.shape_cast %548 : vector<1x32x32xf32> to vector<32x32xf32>
    %cst_149 = arith.constant dense<0.000000e+00> : vector<256x32xf32>
    %550 = tpu.matmul %547, %549, %cst_149 {dimension_numbers = #tpu.dot_dimension_numbers<[1], [0], [0], [1], [0, 0, 1, 1], [], []>} : vector<256x32xf32>, vector<32x32xf32>, vector<256x32xf32> -> vector<256x32xf32>
    %551 = arith.addf %545, %550 : vector<256x32xf32>
    %552 = vector.extract_strided_slice %500 {offsets = [2, 2, 0], sizes = [16, 16, 32], strides = [1, 1, 1]} : vector<18x18x32xf32> to vector<16x16x32xf32>
    %553 = vector.shape_cast %552 : vector<16x16x32xf32> to vector<256x32xf32>
    %554 = vector.extract_strided_slice %501 {offsets = [8, 0, 0], sizes = [1, 32, 32], strides = [1, 1, 1]} : vector<9x32x32xf32> to vector<1x32x32xf32>
    %555 = vector.shape_cast %554 : vector<1x32x32xf32> to vector<32x32xf32>
    %cst_150 = arith.constant dense<0.000000e+00> : vector<256x32xf32>
    %556 = tpu.matmul %553, %555, %cst_150 {dimension_numbers = #tpu.dot_dimension_numbers<[1], [0], [0], [1], [0, 0, 1, 1], [], []>} : vector<256x32xf32>, vector<32x32xf32>, vector<256x32xf32> -> vector<256x32xf32>
    %557 = arith.addf %551, %556 : vector<256x32xf32>
    %558 = vector.broadcast %502 : vector<1x32xf32> to vector<256x32xf32>
    %559 = arith.addf %557, %558 : vector<256x32xf32>
    %cst_151 = arith.constant 0.000000e+00 : f32
    %560 = vector.broadcast %cst_151 : f32 to vector<256x32xf32>
    %561 = arith.maximumf %559, %560 : vector<256x32xf32>
    %562 = vector.shape_cast %561 : vector<256x32xf32> to vector<16x16x32xf32>
    %c1_152 = arith.constant 1 : index
    %c1_153 = arith.constant 1 : index
    %c0_154 = arith.constant 0 : index
    %563 = vector.load %arg19[%c1_152, %c1_153, %c0_154] : memref<18x18x32xf32, #tpu.memory_space<vmem>>, vector<16x16x32xf32>
    tpu.vector_store %arg19[%c1_152, %c1_153, %c0_154], %562 {strides = array<i32>} : memref<18x18x32xf32, #tpu.memory_space<vmem>>, vector<16x16x32xf32>,
    %c0_155 = arith.constant 0 : index
    %c0_156 = arith.constant 0 : index
    %c0_157 = arith.constant 0 : index
    %564 = vector.load %arg19[%c0_155, %c0_156, %c0_157] : memref<18x18x32xf32, #tpu.memory_space<vmem>>, vector<18x18x32xf32>
    %c0_158 = arith.constant 0 : index
    %c0_159 = arith.constant 0 : index
    %c0_160 = arith.constant 0 : index
    %565 = vector.load %arg14[%c0_158, %c0_159, %c0_160] : memref<9x32x3xf32, #tpu.memory_space<vmem>>, vector<9x32x3xf32>
    %c0_161 = arith.constant 0 : index
    %c0_162 = arith.constant 0 : index
    %566 = vector.load %arg15[%c0_161, %c0_162] : memref<1x3xf32, #tpu.memory_space<vmem>>, vector<1x3xf32>
    %cst_163 = arith.constant 0.000000e+00 : f32
    %567 = vector.broadcast %cst_163 : f32 to vector<256x3xf32>
    %568 = vector.extract_strided_slice %564 {offsets = [0, 0, 0], sizes = [16, 16, 32], strides = [1, 1, 1]} : vector<18x18x32xf32> to vector<16x16x32xf32>
    %569 = vector.shape_cast %568 : vector<16x16x32xf32> to vector<256x32xf32>
    %570 = vector.extract_strided_slice %565 {offsets = [0, 0, 0], sizes = [1, 32, 3], strides = [1, 1, 1]} : vector<9x32x3xf32> to vector<1x32x3xf32>
    %571 = vector.shape_cast %570 : vector<1x32x3xf32> to vector<32x3xf32>
    %cst_164 = arith.constant dense<0.000000e+00> : vector<256x3xf32>
    %572 = tpu.matmul %569, %571, %cst_164 {dimension_numbers = #tpu.dot_dimension_numbers<[1], [0], [0], [1], [0, 0, 1, 1], [], []>} : vector<256x32xf32>, vector<32x3xf32>, vector<256x3xf32> -> vector<256x3xf32>
    %573 = arith.addf %567, %572 : vector<256x3xf32>
    %574 = vector.extract_strided_slice %564 {offsets = [0, 1, 0], sizes = [16, 16, 32], strides = [1, 1, 1]} : vector<18x18x32xf32> to vector<16x16x32xf32>
    %575 = vector.shape_cast %574 : vector<16x16x32xf32> to vector<256x32xf32>
    %576 = vector.extract_strided_slice %565 {offsets = [1, 0, 0], sizes = [1, 32, 3], strides = [1, 1, 1]} : vector<9x32x3xf32> to vector<1x32x3xf32>
    %577 = vector.shape_cast %576 : vector<1x32x3xf32> to vector<32x3xf32>
    %cst_165 = arith.constant dense<0.000000e+00> : vector<256x3xf32>
    %578 = tpu.matmul %575, %577, %cst_165 {dimension_numbers = #tpu.dot_dimension_numbers<[1], [0], [0], [1], [0, 0, 1, 1], [], []>} : vector<256x32xf32>, vector<32x3xf32>, vector<256x3xf32> -> vector<256x3xf32>
    %579 = arith.addf %573, %578 : vector<256x3xf32>
    %580 = vector.extract_strided_slice %564 {offsets = [0, 2, 0], sizes = [16, 16, 32], strides = [1, 1, 1]} : vector<18x18x32xf32> to vector<16x16x32xf32>
    %581 = vector.shape_cast %580 : vector<16x16x32xf32> to vector<256x32xf32>
    %582 = vector.extract_strided_slice %565 {offsets = [2, 0, 0], sizes = [1, 32, 3], strides = [1, 1, 1]} : vector<9x32x3xf32> to vector<1x32x3xf32>
    %583 = vector.shape_cast %582 : vector<1x32x3xf32> to vector<32x3xf32>
    %cst_166 = arith.constant dense<0.000000e+00> : vector<256x3xf32>
    %584 = tpu.matmul %581, %583, %cst_166 {dimension_numbers = #tpu.dot_dimension_numbers<[1], [0], [0], [1], [0, 0, 1, 1], [], []>} : vector<256x32xf32>, vector<32x3xf32>, vector<256x3xf32> -> vector<256x3xf32>
    %585 = arith.addf %579, %584 : vector<256x3xf32>
    %586 = vector.extract_strided_slice %564 {offsets = [1, 0, 0], sizes = [16, 16, 32], strides = [1, 1, 1]} : vector<18x18x32xf32> to vector<16x16x32xf32>
    %587 = vector.shape_cast %586 : vector<16x16x32xf32> to vector<256x32xf32>
    %588 = vector.extract_strided_slice %565 {offsets = [3, 0, 0], sizes = [1, 32, 3], strides = [1, 1, 1]} : vector<9x32x3xf32> to vector<1x32x3xf32>
    %589 = vector.shape_cast %588 : vector<1x32x3xf32> to vector<32x3xf32>
    %cst_167 = arith.constant dense<0.000000e+00> : vector<256x3xf32>
    %590 = tpu.matmul %587, %589, %cst_167 {dimension_numbers = #tpu.dot_dimension_numbers<[1], [0], [0], [1], [0, 0, 1, 1], [], []>} : vector<256x32xf32>, vector<32x3xf32>, vector<256x3xf32> -> vector<256x3xf32>
    %591 = arith.addf %585, %590 : vector<256x3xf32>
    %592 = vector.extract_strided_slice %564 {offsets = [1, 1, 0], sizes = [16, 16, 32], strides = [1, 1, 1]} : vector<18x18x32xf32> to vector<16x16x32xf32>
    %593 = vector.shape_cast %592 : vector<16x16x32xf32> to vector<256x32xf32>
    %594 = vector.extract_strided_slice %565 {offsets = [4, 0, 0], sizes = [1, 32, 3], strides = [1, 1, 1]} : vector<9x32x3xf32> to vector<1x32x3xf32>
    %595 = vector.shape_cast %594 : vector<1x32x3xf32> to vector<32x3xf32>
    %cst_168 = arith.constant dense<0.000000e+00> : vector<256x3xf32>
    %596 = tpu.matmul %593, %595, %cst_168 {dimension_numbers = #tpu.dot_dimension_numbers<[1], [0], [0], [1], [0, 0, 1, 1], [], []>} : vector<256x32xf32>, vector<32x3xf32>, vector<256x3xf32> -> vector<256x3xf32>
    %597 = arith.addf %591, %596 : vector<256x3xf32>
    %598 = vector.extract_strided_slice %564 {offsets = [1, 2, 0], sizes = [16, 16, 32], strides = [1, 1, 1]} : vector<18x18x32xf32> to vector<16x16x32xf32>
    %599 = vector.shape_cast %598 : vector<16x16x32xf32> to vector<256x32xf32>
    %600 = vector.extract_strided_slice %565 {offsets = [5, 0, 0], sizes = [1, 32, 3], strides = [1, 1, 1]} : vector<9x32x3xf32> to vector<1x32x3xf32>
    %601 = vector.shape_cast %600 : vector<1x32x3xf32> to vector<32x3xf32>
    %cst_169 = arith.constant dense<0.000000e+00> : vector<256x3xf32>
    %602 = tpu.matmul %599, %601, %cst_169 {dimension_numbers = #tpu.dot_dimension_numbers<[1], [0], [0], [1], [0, 0, 1, 1], [], []>} : vector<256x32xf32>, vector<32x3xf32>, vector<256x3xf32> -> vector<256x3xf32>
    %603 = arith.addf %597, %602 : vector<256x3xf32>
    %604 = vector.extract_strided_slice %564 {offsets = [2, 0, 0], sizes = [16, 16, 32], strides = [1, 1, 1]} : vector<18x18x32xf32> to vector<16x16x32xf32>
    %605 = vector.shape_cast %604 : vector<16x16x32xf32> to vector<256x32xf32>
    %606 = vector.extract_strided_slice %565 {offsets = [6, 0, 0], sizes = [1, 32, 3], strides = [1, 1, 1]} : vector<9x32x3xf32> to vector<1x32x3xf32>
    %607 = vector.shape_cast %606 : vector<1x32x3xf32> to vector<32x3xf32>
    %cst_170 = arith.constant dense<0.000000e+00> : vector<256x3xf32>
    %608 = tpu.matmul %605, %607, %cst_170 {dimension_numbers = #tpu.dot_dimension_numbers<[1], [0], [0], [1], [0, 0, 1, 1], [], []>} : vector<256x32xf32>, vector<32x3xf32>, vector<256x3xf32> -> vector<256x3xf32>
    %609 = arith.addf %603, %608 : vector<256x3xf32>
    %610 = vector.extract_strided_slice %564 {offsets = [2, 1, 0], sizes = [16, 16, 32], strides = [1, 1, 1]} : vector<18x18x32xf32> to vector<16x16x32xf32>
    %611 = vector.shape_cast %610 : vector<16x16x32xf32> to vector<256x32xf32>
    %612 = vector.extract_strided_slice %565 {offsets = [7, 0, 0], sizes = [1, 32, 3], strides = [1, 1, 1]} : vector<9x32x3xf32> to vector<1x32x3xf32>
    %613 = vector.shape_cast %612 : vector<1x32x3xf32> to vector<32x3xf32>
    %cst_171 = arith.constant dense<0.000000e+00> : vector<256x3xf32>
    %614 = tpu.matmul %611, %613, %cst_171 {dimension_numbers = #tpu.dot_dimension_numbers<[1], [0], [0], [1], [0, 0, 1, 1], [], []>} : vector<256x32xf32>, vector<32x3xf32>, vector<256x3xf32> -> vector<256x3xf32>
    %615 = arith.addf %609, %614 : vector<256x3xf32>
    %616 = vector.extract_strided_slice %564 {offsets = [2, 2, 0], sizes = [16, 16, 32], strides = [1, 1, 1]} : vector<18x18x32xf32> to vector<16x16x32xf32>
    %617 = vector.shape_cast %616 : vector<16x16x32xf32> to vector<256x32xf32>
    %618 = vector.extract_strided_slice %565 {offsets = [8, 0, 0], sizes = [1, 32, 3], strides = [1, 1, 1]} : vector<9x32x3xf32> to vector<1x32x3xf32>
    %619 = vector.shape_cast %618 : vector<1x32x3xf32> to vector<32x3xf32>
    %cst_172 = arith.constant dense<0.000000e+00> : vector<256x3xf32>
    %620 = tpu.matmul %617, %619, %cst_172 {dimension_numbers = #tpu.dot_dimension_numbers<[1], [0], [0], [1], [0, 0, 1, 1], [], []>} : vector<256x32xf32>, vector<32x3xf32>, vector<256x3xf32> -> vector<256x3xf32>
    %621 = arith.addf %615, %620 : vector<256x3xf32>
    %622 = vector.broadcast %566 : vector<1x3xf32> to vector<256x3xf32>
    %623 = arith.addf %621, %622 : vector<256x3xf32>
    %624 = math.tanh %623 : vector<256x3xf32>
    %625 = vector.shape_cast %624 : vector<256x3xf32> to vector<16x16x3xf32>
    %cst_173 = arith.constant 1.000000e+00 : f32
    %626 = vector.broadcast %cst_173 : f32 to vector<16x16x3xf32>
    %627 = arith.addf %625, %626 : vector<16x16x3xf32>
    %cst_174 = arith.constant 5.000000e-01 : f32
    %628 = vector.broadcast %cst_174 : f32 to vector<16x16x3xf32>
    %629 = arith.mulf %627, %628 : vector<16x16x3xf32>
    %c1_175 = arith.constant 1 : index
    %c1_176 = arith.constant 1 : index
    %c0_177 = arith.constant 0 : index
    %630 = vector.load %arg20[%c1_175, %c1_176, %c0_177] : memref<18x18x3xf32, #tpu.memory_space<vmem>>, vector<16x16x3xf32>
    tpu.vector_store %arg20[%c1_175, %c1_176, %c0_177], %629 {strides = array<i32>} : memref<18x18x3xf32, #tpu.memory_space<vmem>>, vector<16x16x3xf32>,
    %631 = vector.extract_strided_slice %629 {offsets = [0, 0, 0], sizes = [1, 16, 3], strides = [1, 1, 1]} : vector<16x16x3xf32> to vector<1x16x3xf32>
    %632 = vector.extract_strided_slice %629 {offsets = [15, 0, 0], sizes = [1, 16, 3], strides = [1, 1, 1]} : vector<16x16x3xf32> to vector<1x16x3xf32>
    %c0_178 = arith.constant 0 : index
    %c1_179 = arith.constant 1 : index
    %c0_180 = arith.constant 0 : index
    %633 = vector.load %arg20[%c0_178, %c1_179, %c0_180] : memref<18x18x3xf32, #tpu.memory_space<vmem>>, vector<1x16x3xf32>
    tpu.vector_store %arg20[%c0_178, %c1_179, %c0_180], %631 {strides = array<i32>} : memref<18x18x3xf32, #tpu.memory_space<vmem>>, vector<1x16x3xf32>,
    %c17 = arith.constant 17 : index
    %c1_181 = arith.constant 1 : index
    %c0_182 = arith.constant 0 : index
    %634 = vector.load %arg20[%c17, %c1_181, %c0_182] : memref<18x18x3xf32, #tpu.memory_space<vmem>>, vector<1x16x3xf32>
    tpu.vector_store %arg20[%c17, %c1_181, %c0_182], %632 {strides = array<i32>} : memref<18x18x3xf32, #tpu.memory_space<vmem>>, vector<1x16x3xf32>,
    %c0_183 = arith.constant 0 : index
    %c0_184 = arith.constant 0 : index
    %c0_185 = arith.constant 0 : index
    %635 = vector.load %arg20[%c0_183, %c0_184, %c0_185] : memref<18x18x3xf32, #tpu.memory_space<vmem>>, vector<18x18x3xf32>
    %636 = vector.extract_strided_slice %635 {offsets = [0, 1, 0], sizes = [18, 1, 3], strides = [1, 1, 1]} : vector<18x18x3xf32> to vector<18x1x3xf32>
    %637 = vector.extract_strided_slice %635 {offsets = [0, 16, 0], sizes = [18, 1, 3], strides = [1, 1, 1]} : vector<18x18x3xf32> to vector<18x1x3xf32>
    %c0_186 = arith.constant 0 : index
    %c0_187 = arith.constant 0 : index
    %c0_188 = arith.constant 0 : index
    %638 = vector.load %arg20[%c0_186, %c0_187, %c0_188] : memref<18x18x3xf32, #tpu.memory_space<vmem>>, vector<18x1x3xf32>
    tpu.vector_store %arg20[%c0_186, %c0_187, %c0_188], %636 {strides = array<i32>} : memref<18x18x3xf32, #tpu.memory_space<vmem>>, vector<18x1x3xf32>,
    %c0_189 = arith.constant 0 : index
    %c17_190 = arith.constant 17 : index
    %c0_191 = arith.constant 0 : index
    %639 = vector.load %arg20[%c0_189, %c17_190, %c0_191] : memref<18x18x3xf32, #tpu.memory_space<vmem>>, vector<18x1x3xf32>
    tpu.vector_store %arg20[%c0_189, %c17_190, %c0_191], %637 {strides = array<i32>} : memref<18x18x3xf32, #tpu.memory_space<vmem>>, vector<18x1x3xf32>,
    %c0_192 = arith.constant 0 : index
    %c0_193 = arith.constant 0 : index
    %c0_194 = arith.constant 0 : index
    %640 = vector.load %arg20[%c0_192, %c0_193, %c0_194] : memref<18x18x3xf32, #tpu.memory_space<vmem>>, vector<18x18x3xf32>
    %cst_195 = arith.constant 0.000000e+00 : f32
    %641 = vector.broadcast %cst_195 : f32 to vector<15x15x3xf32>
    %642 = vector.extract_strided_slice %640 {offsets = [0, 0, 0], sizes = [15, 15, 3], strides = [1, 1, 1]} : vector<18x18x3xf32> to vector<15x15x3xf32>
    %cst_196 = arith.constant 3.906250e-03 : f32
    %643 = vector.broadcast %cst_196 : f32 to vector<15x15x3xf32>
    %644 = arith.mulf %642, %643 : vector<15x15x3xf32>
    %645 = arith.addf %641, %644 : vector<15x15x3xf32>
    %646 = vector.extract_strided_slice %640 {offsets = [0, 1, 0], sizes = [15, 15, 3], strides = [1, 1, 1]} : vector<18x18x3xf32> to vector<15x15x3xf32>
    %cst_197 = arith.constant -0.03515625 : f32
    %647 = vector.broadcast %cst_197 : f32 to vector<15x15x3xf32>
    %648 = arith.mulf %646, %647 : vector<15x15x3xf32>
    %649 = arith.addf %645, %648 : vector<15x15x3xf32>
    %650 = vector.extract_strided_slice %640 {offsets = [0, 2, 0], sizes = [15, 15, 3], strides = [1, 1, 1]} : vector<18x18x3xf32> to vector<15x15x3xf32>
    %cst_198 = arith.constant -0.03515625 : f32
    %651 = vector.broadcast %cst_198 : f32 to vector<15x15x3xf32>
    %652 = arith.mulf %650, %651 : vector<15x15x3xf32>
    %653 = arith.addf %649, %652 : vector<15x15x3xf32>
    %654 = vector.extract_strided_slice %640 {offsets = [0, 3, 0], sizes = [15, 15, 3], strides = [1, 1, 1]} : vector<18x18x3xf32> to vector<15x15x3xf32>
    %cst_199 = arith.constant 3.906250e-03 : f32
    %655 = vector.broadcast %cst_199 : f32 to vector<15x15x3xf32>
    %656 = arith.mulf %654, %655 : vector<15x15x3xf32>
    %657 = arith.addf %653, %656 : vector<15x15x3xf32>
    %658 = vector.extract_strided_slice %640 {offsets = [1, 0, 0], sizes = [15, 15, 3], strides = [1, 1, 1]} : vector<18x18x3xf32> to vector<15x15x3xf32>
    %cst_200 = arith.constant -0.03515625 : f32
    %659 = vector.broadcast %cst_200 : f32 to vector<15x15x3xf32>
    %660 = arith.mulf %658, %659 : vector<15x15x3xf32>
    %661 = arith.addf %657, %660 : vector<15x15x3xf32>
    %662 = vector.extract_strided_slice %640 {offsets = [1, 1, 0], sizes = [15, 15, 3], strides = [1, 1, 1]} : vector<18x18x3xf32> to vector<15x15x3xf32>
    %cst_201 = arith.constant 0.31640625 : f32
    %663 = vector.broadcast %cst_201 : f32 to vector<15x15x3xf32>
    %664 = arith.mulf %662, %663 : vector<15x15x3xf32>
    %665 = arith.addf %661, %664 : vector<15x15x3xf32>
    %666 = vector.extract_strided_slice %640 {offsets = [1, 2, 0], sizes = [15, 15, 3], strides = [1, 1, 1]} : vector<18x18x3xf32> to vector<15x15x3xf32>
    %cst_202 = arith.constant 0.31640625 : f32
    %667 = vector.broadcast %cst_202 : f32 to vector<15x15x3xf32>
    %668 = arith.mulf %666, %667 : vector<15x15x3xf32>
    %669 = arith.addf %665, %668 : vector<15x15x3xf32>
    %670 = vector.extract_strided_slice %640 {offsets = [1, 3, 0], sizes = [15, 15, 3], strides = [1, 1, 1]} : vector<18x18x3xf32> to vector<15x15x3xf32>
    %cst_203 = arith.constant -0.03515625 : f32
    %671 = vector.broadcast %cst_203 : f32 to vector<15x15x3xf32>
    %672 = arith.mulf %670, %671 : vector<15x15x3xf32>
    %673 = arith.addf %669, %672 : vector<15x15x3xf32>
    %674 = vector.extract_strided_slice %640 {offsets = [2, 0, 0], sizes = [15, 15, 3], strides = [1, 1, 1]} : vector<18x18x3xf32> to vector<15x15x3xf32>
    %cst_204 = arith.constant -0.03515625 : f32
    %675 = vector.broadcast %cst_204 : f32 to vector<15x15x3xf32>
    %676 = arith.mulf %674, %675 : vector<15x15x3xf32>
    %677 = arith.addf %673, %676 : vector<15x15x3xf32>
    %678 = vector.extract_strided_slice %640 {offsets = [2, 1, 0], sizes = [15, 15, 3], strides = [1, 1, 1]} : vector<18x18x3xf32> to vector<15x15x3xf32>
    %cst_205 = arith.constant 0.31640625 : f32
    %679 = vector.broadcast %cst_205 : f32 to vector<15x15x3xf32>
    %680 = arith.mulf %678, %679 : vector<15x15x3xf32>
    %681 = arith.addf %677, %680 : vector<15x15x3xf32>
    %682 = vector.extract_strided_slice %640 {offsets = [2, 2, 0], sizes = [15, 15, 3], strides = [1, 1, 1]} : vector<18x18x3xf32> to vector<15x15x3xf32>
    %cst_206 = arith.constant 0.31640625 : f32
    %683 = vector.broadcast %cst_206 : f32 to vector<15x15x3xf32>
    %684 = arith.mulf %682, %683 : vector<15x15x3xf32>
    %685 = arith.addf %681, %684 : vector<15x15x3xf32>
    %686 = vector.extract_strided_slice %640 {offsets = [2, 3, 0], sizes = [15, 15, 3], strides = [1, 1, 1]} : vector<18x18x3xf32> to vector<15x15x3xf32>
    %cst_207 = arith.constant -0.03515625 : f32
    %687 = vector.broadcast %cst_207 : f32 to vector<15x15x3xf32>
    %688 = arith.mulf %686, %687 : vector<15x15x3xf32>
    %689 = arith.addf %685, %688 : vector<15x15x3xf32>
    %690 = vector.extract_strided_slice %640 {offsets = [3, 0, 0], sizes = [15, 15, 3], strides = [1, 1, 1]} : vector<18x18x3xf32> to vector<15x15x3xf32>
    %cst_208 = arith.constant 3.906250e-03 : f32
    %691 = vector.broadcast %cst_208 : f32 to vector<15x15x3xf32>
    %692 = arith.mulf %690, %691 : vector<15x15x3xf32>
    %693 = arith.addf %689, %692 : vector<15x15x3xf32>
    %694 = vector.extract_strided_slice %640 {offsets = [3, 1, 0], sizes = [15, 15, 3], strides = [1, 1, 1]} : vector<18x18x3xf32> to vector<15x15x3xf32>
    %cst_209 = arith.constant -0.03515625 : f32
    %695 = vector.broadcast %cst_209 : f32 to vector<15x15x3xf32>
    %696 = arith.mulf %694, %695 : vector<15x15x3xf32>
    %697 = arith.addf %693, %696 : vector<15x15x3xf32>
    %698 = vector.extract_strided_slice %640 {offsets = [3, 2, 0], sizes = [15, 15, 3], strides = [1, 1, 1]} : vector<18x18x3xf32> to vector<15x15x3xf32>
    %cst_210 = arith.constant -0.03515625 : f32
    %699 = vector.broadcast %cst_210 : f32 to vector<15x15x3xf32>
    %700 = arith.mulf %698, %699 : vector<15x15x3xf32>
    %701 = arith.addf %697, %700 : vector<15x15x3xf32>
    %702 = vector.extract_strided_slice %640 {offsets = [3, 3, 0], sizes = [15, 15, 3], strides = [1, 1, 1]} : vector<18x18x3xf32> to vector<15x15x3xf32>
    %cst_211 = arith.constant 3.906250e-03 : f32
    %703 = vector.broadcast %cst_211 : f32 to vector<15x15x3xf32>
    %704 = arith.mulf %702, %703 : vector<15x15x3xf32>
    %705 = arith.addf %701, %704 : vector<15x15x3xf32>
    %706 = vector.shape_cast %705 : vector<15x15x3xf32> to vector<1x15x15x3xf32>
    %c0_212 = arith.constant 0 : index
    %c0_213 = arith.constant 0 : index
    %c0_214 = arith.constant 0 : index
    %c0_215 = arith.constant 0 : index
    %707 = vector.load %arg17[%c0_212, %c0_213, %c0_214, %c0_215] : memref<1x15x15x3xf32, #tpu.memory_space<vmem>>, vector<1x15x15x3xf32>
    tpu.vector_store %arg17[%c0_212, %c0_213, %c0_214, %c0_215], %706 {strides = array<i32>} : memref<1x15x15x3xf32, #tpu.memory_space<vmem>>, vector<1x15x15x3xf32>,
    return
  }
  func.func @transform_0(%arg0: i32) -> (i32, i32, i32) {
    %c0_i32 = arith.constant 0 : i32
    %c0_i32_0 = arith.constant 0 : i32
    %c0_i32_1 = arith.constant 0 : i32
    return %arg0, %c0_i32, %c0_i32_0 : i32, i32, i32
  }
  func.func @transform_1(%arg0: i32) -> (i32, i32, i32) {
    %c0_i32 = arith.constant 0 : i32
    %c0_i32_0 = arith.constant 0 : i32
    %c0_i32_1 = arith.constant 0 : i32
    return %arg0, %c0_i32, %c0_i32_0 : i32, i32, i32
  }
  func.func @transform_2(%arg0: i32) -> (i32, i32) {
    %c0_i32 = arith.constant 0 : i32
    %c0_i32_0 = arith.constant 0 : i32
    %c0_i32_1 = arith.constant 0 : i32
    return %c0_i32, %c0_i32_0 : i32, i32
  }
  func.func @transform_3(%arg0: i32) -> (i32, i32) {
    %c0_i32 = arith.constant 0 : i32
    %c0_i32_0 = arith.constant 0 : i32
    %c0_i32_1 = arith.constant 0 : i32
    return %c0_i32, %c0_i32_0 : i32, i32
  }
  func.func @transform_4(%arg0: i32) -> (i32, i32) {
    %c0_i32 = arith.constant 0 : i32
    %c0_i32_0 = arith.constant 0 : i32
    %c0_i32_1 = arith.constant 0 : i32
    return %c0_i32, %c0_i32_0 : i32, i32
  }
  func.func @transform_5(%arg0: i32) -> (i32, i32) {
    %c0_i32 = arith.constant 0 : i32
    %c0_i32_0 = arith.constant 0 : i32
    %c0_i32_1 = arith.constant 0 : i32
    return %c0_i32, %c0_i32_0 : i32, i32
  }
  func.func @transform_6(%arg0: i32) -> (i32, i32) {
    %c0_i32 = arith.constant 0 : i32
    %c0_i32_0 = arith.constant 0 : i32
    %c0_i32_1 = arith.constant 0 : i32
    return %c0_i32, %c0_i32_0 : i32, i32
  }
  func.func @transform_7(%arg0: i32) -> (i32, i32) {
    %c0_i32 = arith.constant 0 : i32
    %c0_i32_0 = arith.constant 0 : i32
    %c0_i32_1 = arith.constant 0 : i32
    return %c0_i32, %c0_i32_0 : i32, i32
  }
  func.func @transform_8(%arg0: i32) -> (i32, i32) {
    %c0_i32 = arith.constant 0 : i32
    %c0_i32_0 = arith.constant 0 : i32
    %c0_i32_1 = arith.constant 0 : i32
    return %c0_i32, %c0_i32_0 : i32, i32
  }
  func.func @transform_9(%arg0: i32) -> (i32, i32, i32) {
    %c0_i32 = arith.constant 0 : i32
    %c0_i32_0 = arith.constant 0 : i32
    %c0_i32_1 = arith.constant 0 : i32
    %c0_i32_2 = arith.constant 0 : i32
    return %c0_i32, %c0_i32_0, %c0_i32_1 : i32, i32, i32
  }
  func.func @transform_10(%arg0: i32) -> (i32, i32) {
    %c0_i32 = arith.constant 0 : i32
    %c0_i32_0 = arith.constant 0 : i32
    %c0_i32_1 = arith.constant 0 : i32
    return %c0_i32, %c0_i32_0 : i32, i32
  }
  func.func @transform_11(%arg0: i32) -> (i32, i32, i32) {
    %c0_i32 = arith.constant 0 : i32
    %c0_i32_0 = arith.constant 0 : i32
    %c0_i32_1 = arith.constant 0 : i32
    %c0_i32_2 = arith.constant 0 : i32
    return %c0_i32, %c0_i32_0, %c0_i32_1 : i32, i32, i32
  }
  func.func @transform_12(%arg0: i32) -> (i32, i32) {
    %c0_i32 = arith.constant 0 : i32
    %c0_i32_0 = arith.constant 0 : i32
    %c0_i32_1 = arith.constant 0 : i32
    return %c0_i32, %c0_i32_0 : i32, i32
  }
  func.func @transform_13(%arg0: i32) -> (i32, i32, i32) {
    %c0_i32 = arith.constant 0 : i32
    %c0_i32_0 = arith.constant 0 : i32
    %c0_i32_1 = arith.constant 0 : i32
    %c0_i32_2 = arith.constant 0 : i32
    return %c0_i32, %c0_i32_0, %c0_i32_1 : i32, i32, i32
  }
  func.func @transform_14(%arg0: i32) -> (i32, i32) {
    %c0_i32 = arith.constant 0 : i32
    %c0_i32_0 = arith.constant 0 : i32
    %c0_i32_1 = arith.constant 0 : i32
    return %c0_i32, %c0_i32_0 : i32, i32
  }
  func.func @transform_15(%arg0: i32) -> (i32, i32, i32) {
    %c0_i32 = arith.constant 0 : i32
    %c0_i32_0 = arith.constant 0 : i32
    %c0_i32_1 = arith.constant 0 : i32
    return %arg0, %c0_i32, %c0_i32_0 : i32, i32, i32
  }
  func.func @transform_16(%arg0: i32) -> (i32, i32, i32, i32) {
    %c0_i32 = arith.constant 0 : i32
    %c0_i32_0 = arith.constant 0 : i32
    %c0_i32_1 = arith.constant 0 : i32
    %c0_i32_2 = arith.constant 0 : i32
    return %arg0, %c0_i32, %c0_i32_0, %c0_i32_1 : i32, i32, i32, i32
  }
}

</mosaic_0001>

<bundles_post_ra>
// kernel: tpu_custom_call.1
= control target key start
LH: loop header
LB: loop body
LE: loop exit
PB: predicated region body
PF: predicated region fallthrough
CT: control target
= control target key end

     0   :  { %s20583_s0 = inlined_call_operand.hbm [shape: f32[2,1,32], index: 0, kind: input, shape index: {}]   ;;  %s20584_s1 = inlined_call_operand.hbm [shape: f32[2,1,16], index: 1, kind: input, shape index: {}]   ;;  %s20585_s2 = inlined_call_operand.<no memory space> [shape: f32[1,1], index: 2, kind: input, shape index: {}]   ;;  %s20586_s3 = inlined_call_operand.vmem [shape: f32[128,128], index: 3, kind: input, shape index: {}]   ;;  %s20587_s4 = inlined_call_operand.hbm [shape: f32[128,128], index: 4, kind: input, shape index: {}]   ;;  %s20588_s5 = inlined_call_operand.vmem [shape: f32[256,64], index: 5, kind: input, shape index: {}]   ;;  %s20589_s6 = inlined_call_operand.vmem [shape: f32[128,512], index: 6, kind: input, shape index: {}]   ;;  %s20590_s7 = inlined_call_operand.vmem [shape: f32[16,512], index: 7, kind: input, shape index: {}]   ;;  %s20591_s8 = inlined_call_operand.vmem [shape: f32[1,512], index: 8, kind: input, shape index: {}]   ;;  %s20592_s9 = inlined_call_operand.hbm [shape: f32[9,32,32], index: 9, kind: input, shape index: {}]   ;;  %s20593_s10 = inlined_call_operand.vmem [shape: f32[1,32], index: 10, kind: input, shape index: {}]   ;;  %s20594_s11 = inlined_call_operand.hbm [shape: f32[9,32,32], index: 11, kind: input, shape index: {}]   ;;  %s20595_s12 = inlined_call_operand.vmem [shape: f32[1,32], index: 12, kind: input, shape index: {}]   ;;  %s20596_s13 = inlined_call_operand.vmem [shape: f32[9,32,3], index: 13, kind: input, shape index: {}]   ;;  %s20597_s14 = inlined_call_operand.vmem [shape: f32[1,3], index: 14, kind: input, shape index: {}]   ;;  %s20598_s15 = inlined_call_operand.hbm [shape: f32[2,1,128], index: 15, kind: output, shape index: {0}]   ;;  %s20599_s16 = inlined_call_operand.vmem [shape: f32[2,15,15,3], index: 16, kind: output, shape index: {1}]  }
   0x1   :  { %20765 = sst [smem:[#allocation75_spill]] %s20583_s0  ;;  %v22_v0 = vstv %s20585_s2 }
   0x2   :  { %20766 = sst [smem:[#allocation76_spill]] %s20587_s4  ;;  %23 = vst [vmem:[#allocation5] sm:$0x1] %v22_v0 }
   0x3   :  { %20767 = sst [smem:[#allocation77_spill]] %s20592_s9 }
   0x4   :  { %20768 = sst [smem:[#allocation78_spill]] %s20593_s10 }
   0x5   :  { %20769 = sst [smem:[#allocation79_spill]] %s20594_s11 }
   0x6   :  { %20770 = sst [smem:[#allocation80_spill]] %s20595_s12 }
   0x7   :  { %20771 = sst [smem:[#allocation81_spill]] %s20596_s13 }
   0x8   :  { %20772 = sst [smem:[#allocation82_spill]] %s20597_s14 }
   0x9   :  { %20773 = sst [smem:[#allocation83_spill]] %s20598_s15 }
   0xa   :  { %20774 = sst [smem:[#allocation84_spill]] %s20599_s16 }
   0xb   :  { %24 = vsyncpa [#allocation7], 0 }
   0xc   :  { %26 = vsyncpa [#allocation7 + $0x1], 0 }
   0xd   :  { %27 = vsyncpa [#allocation10], 0 }
   0xe   :  { %29 = vsyncpa [#allocation10 + $0x1], 0 }
   0xf   :  { %30 = vsyncpa [#allocation13], 0 }
  0x10   :  { %31 = vsyncpa [#allocation8], 0 }
  0x11   :  { %33 = vsyncpa [#allocation8 + $0x1], 0  ;;  %s15842_s23 = smov 0   ;;  %s15844_s24 = smov 0  }
  0x12   :  { %s15846_s25 = smov 0   ;;  %s15848_s26 = smov 0  }
  0x13 LB: > { %20775 = sst [smem:[#allocation21_spill]] %s15688_s23  ;;  %s15863_s2 = sadd.s32 4294967295, %s15700_s26   ;;  %s15700_s26 = sphi %s15848_s26, %s21066_s26   ;;  %s15696_s25 = sphi %s15846_s25, %s21065_s25   ;;  %s15692_s24 = sphi %s15844_s24, %s21064_s24   ;;  %s15688_s23 = sphi %s15842_s23, %s21063_s23  }
  0x14   : > { %s11410_s27 = sadd.s32 4294967294, %s15700_s26   ;;  %p59_p0 = scmp.ne.s32.totalorder %s15692_s24, %s15688_s23 }
  0x15   : > { %p20604_p1 = scmp.eq.s32.totalorder %s15863_s2, 0  ;;  %p388_p3 = scmp.eq.s32.totalorder %s11410_s27, 1 }
  0x16   : > { %p11411_p5 = scmp.ge.s32.totalorder %s15700_s26, 1  ;;  %p421_p7 = scmp.lt.s32.totalorder %s15700_s26, 3 }
  0x17   : > { %p15872_p4 = por %p20604_p1, %p59_p0  ;;  %p15877_p6 = por %p388_p3, %p59_p0 }
  0x18   : > { %p15882_p8 = pnand %p11411_p5, %p421_p7  ;;  %s15702_s0 = smov [#allocation11]  }
  0x19   : > { %s20776_s28 = scalar_select %p15872_p4, 1, 0 }
  0x1a   : > { %s20777_s29 = scalar_select %p15877_p6, 1, 0 }
  0x1b   : > { %s20779_s30 = scalar_select %p15882_p8, 1, 0 }
  0x1c   : > { %20778 = sst [smem:[#allocation22_spill]] %s20777_s29  ;;  %s439_s17 = sshll.u32 %s15702_s0, 4  ;;  %s15886_s17 = int_to_ptr.vmem [resolvable:$true] %s439_s17 }
  0x1d   : > { %p15230_p9 = pneg %p15882_p8  ;;  %s15703_s19 = smov [#allocation12]  }
  0x1e   : > { %s464_s20 = sshll.u32 %s15703_s19, 4  ;;  %s15704_s21 = smov [#allocation14]   ;;  %s15897_s20 = int_to_ptr.vmem [resolvable:$true] %s464_s20 }
  0x1f   : > { %p15893_p11 = pnand %p15230_p9, %p20604_p1  ;;  %s15899_s22 = sshll.u32 %s15704_s21, 4  ;;  %s481_s22 = int_to_ptr.vmem [resolvable:$true] %s15899_s22 }
  0x20   : > { %s20781_s4 = sld [smem:[#allocation76_spill]] }
  0x21   : > { %p15909_p13 = pneg %p15893_p11 }
  0x26   : > { %s15478_s29 = scalar_lea.hbm %s20781_s4, 2048 }
  0x27   : > { %p15479_p12 = scmp.ne.s32.totalorder %s20781_s4, %s15478_s29  ;;  %p15485_p5 = scmp.lt.u32.totalorder %s15478_s29, %s20781_s4 }
  0x29   : > { %p15481_p0 = pnand %p15909_p13, %p15479_p12 }
  0x2b   : > { %p15482_p3 = pneg %p15481_p0 }
  0x2d   : > { %p15487_p7 = pnand %p15485_p5, %p15482_p3 }
  0x2f   : > { %15490 = shalt.err (!%p15487_p7)
}
  0x30   : > { %s15491_s15 = scalar_lea.vmem %s15886_s17, 2048  ;;  %p15499_p2 = scmp.lt.s32.totalorder %s15886_s17, %s15886_s17 }
  0x31   : > { %p15492_p9 = scmp.ne.s32.totalorder %s15886_s17, %s15491_s15  ;;  %p15500_p6 = scmp.lt.s32.totalorder %s15491_s15, %s15491_s15 }
  0x33   : > { %p15494_p10 = pnand %p15492_p9, %p15909_p13  ;;  %p15501_p12 = por %p15500_p6, %p15499_p2 }
  0x35   : > { %p15495_p1 = pneg %p15494_p10 }
  0x37   : > { %p15502_p0 = pnand %p15501_p12, %p15495_p1 }
  0x39   : > { %15505 = shalt.err (!%p15502_p0)
}
  0x3a   : > { %s15705_s23 = smov 128   ;;  %s15706_s29 = smov 8  }
  0x3b   : > { %15233 = dma.hbm_to_vmem [thread:$0]  (!%p15893_p11), %s20781_s4, 2048, %s15886_s17, [#allocation10], %s15705_s23, %s15705_s23, %s15706_s29  }
  0x3c   : > { %s20783_s9 = sld [smem:[#allocation77_spill]] }
  0x42   : > { %s15506_s15 = scalar_lea.hbm %s20783_s9, 4608 }
  0x43   : > { %p15507_p1 = scmp.ne.s32.totalorder %s20783_s9, %s15506_s15  ;;  %p15513_p10 = scmp.lt.u32.totalorder %s15506_s15, %s20783_s9 }
  0x45   : > { %p15509_p2 = pnand %p15507_p1, %p15909_p13 }
  0x47   : > { %p15510_p6 = pneg %p15509_p2 }
  0x49   : > { %p15515_p3 = pnand %p15513_p10, %p15510_p6 }
  0x4b   : > { %15518 = shalt.err (!%p15515_p3)
}
  0x4c   : > { %s15519_s17 = scalar_lea.vmem %s15897_s20, 4608  ;;  %p15527_p12 = scmp.lt.s32.totalorder %s15897_s20, %s15897_s20 }
  0x4d   : > { %p15520_p5 = scmp.ne.s32.totalorder %s15897_s20, %s15519_s17  ;;  %p15528_p0 = scmp.lt.s32.totalorder %s15519_s17, %s15519_s17 }
  0x4f   : > { %p15522_p7 = pnand %p15520_p5, %p15909_p13  ;;  %p15529_p1 = por %p15528_p0, %p15527_p12 }
  0x51   : > { %p15523_p9 = pneg %p15522_p7 }
  0x53   : > { %p15530_p2 = pnand %p15529_p1, %p15523_p9 }
  0x55   : > { %15533 = shalt.err (!%p15530_p2)
}
  0x56   : > { %15236 = dma.hbm_to_vmem [thread:$0]  (!%p15893_p11), %s20783_s9, 4608, %s15897_s20, [#allocation13], %s15705_s23, %s15705_s23, %s15706_s29  }
  0x57   : > { %s20784_s11 = sld [smem:[#allocation79_spill]] }
  0x5d   : > { %s15534_s27 = scalar_lea.hbm %s20784_s11, 4608 }
  0x5e   : > { %p15535_p6 = scmp.ne.s32.totalorder %s20784_s11, %s15534_s27  ;;  %p15541_p5 = scmp.lt.u32.totalorder %s15534_s27, %s20784_s11 }
  0x60   : > { %p15537_p10 = pnand %p15535_p6, %p15909_p13 }
  0x62   : > { %p15538_p3 = pneg %p15537_p10 }
  0x64   : > { %p15543_p7 = pnand %p15541_p5, %p15538_p3 }
  0x66   : > { %15546 = shalt.err (!%p15543_p7)
}
  0x67   : > { %s15547_s17 = scalar_lea.vmem %s481_s22, 4608  ;;  %p15555_p1 = scmp.lt.s32.totalorder %s481_s22, %s481_s22 }
  0x68   : > { %p15548_p9 = scmp.ne.s32.totalorder %s481_s22, %s15547_s17  ;;  %p15556_p2 = scmp.lt.s32.totalorder %s15547_s17, %s15547_s17 }
  0x6a   : > { %p15550_p12 = pnand %p15548_p9, %p15909_p13  ;;  %p15557_p4 = por %p15556_p2, %p15555_p1 }
  0x6c   : > { %p15551_p0 = pneg %p15550_p12 }
  0x6e   : > { %p15558_p8 = pnand %p15557_p4, %p15551_p0 }
  0x70   : > { %15561 = shalt.err (!%p15558_p8)
}
  0x71   : > { %15239 = dma.hbm_to_vmem [thread:$0]  (!%p15893_p11), %s20784_s11, 4608, %s481_s22, [#allocation13], %s15705_s23, %s15705_s23, %s15706_s29  }
  0x72   : > { %s15982_s16 = sadd.s32 1, %s15700_s26   ;;  %s46_s12 = sadd.s32 1, %s15696_s25 }
  0x73   : > { %s43_s18 = ssub.s32 %s15700_s26, %s15982_s16  ;;  %p53_p8 = scmp.ne.s32.totalorder %s15696_s25, %s15692_s24 }
  0x74   : > { %p44_p4 = scmp.eq.s32.totalorder %s43_s18, 0  ;;  %p54_p13 = scmp.eq.s32.totalorder %s15700_s26, 0 }
  0x75   : > { %p15254_p6 = scmp.lt.s32.totalorder %s15700_s26, 2  ;;  %p20785_p3 = scmp.eq.s32.totalorder %s15863_s2, 1 }
  0x76   : > { %s15992_s13 = scalar_select %p44_p4, %s15696_s25, %s46_s12  }
  0x77   : > { %p55_p10 = por %p54_p13, %p53_p8  ;;  %p15996_p5 = por %p20785_p3, %p53_p8 }
  0x78   : > { %s16001_s27 = sand.u32 1, %s15696_s25   ;;  %s11416_s22 = sshll.u32 %s15700_s26, 4 }
  0x79   : > { %s20786_s14 = scalar_select %p15996_p5, 1, 0 }
  0x7a   : > { %s20787_s0 = sld [smem:[#allocation75_spill]]  ;;  %s506_s21 = scalar_lea.vmem [#allocation6], %s16001_s27 }
  0x7b   : > { %s513_s15 = sshll.u32 %s506_s21, 4  ;;  %p16012_p11 = pnand %p15254_p6, %p55_p10  ;;  %s16010_s15 = int_to_ptr.vmem [resolvable:$true] %s513_s15 }
  0x7c   : > { %s16020_s12 = scalar_lea.hbm %s20584_s1, %s11416_s22  ;;  %s504_s23 = scalar_lea.sflag [#allocation7], %s16001_s27 }
  0x7d   : > { %p15564_p9 = pneg %p16012_p11 }
  0x80   : > { %s16007_s19 = scalar_lea.hbm %s20787_s0, %s11416_s22  ;;  %s15567_s9 = scalar_lea.hbm %s20787_s0, 32 }
  0x81   : > { %s15562_s29 = scalar_lea.hbm %s16007_s19, 16  ;;  %p15568_p1 = scmp.lt.u32.totalorder %s16007_s19, %s20787_s0 }
  0x82   : > { %p15563_p7 = scmp.ne.s32.totalorder %s16007_s19, %s15562_s29  ;;  %p15569_p2 = scmp.lt.u32.totalorder %s15567_s9, %s15562_s29 }
  0x83   : > { %p15571_p8 = scmp.lt.u32.totalorder %s15562_s29, %s16007_s19 }
  0x84   : > { %p15565_p12 = pnand %p15564_p9, %p15563_p7  ;;  %p15570_p4 = por %p15569_p2, %p15568_p1 }
  0x86   : > { %p15566_p0 = pneg %p15565_p12  ;;  %p15572_p13 = por %p15571_p8, %p15570_p4 }
  0x88   : > { %p15573_p6 = pnand %p15572_p13, %p15566_p0 }
  0x8a   : > { %15576 = shalt.err (!%p15573_p6)
}
  0x8b   : > { %s15577_s22 = scalar_lea.vmem %s16010_s15, 16  ;;  %s15707_s4 = smov [#allocation6]  }
  0x8c   : > { %p15578_p10 = scmp.ne.s32.totalorder %s16010_s15, %s15577_s22  ;;  %s15582_s10 = sshll.u32 %s15707_s4, 4  ;;  %s15583_s10 = int_to_ptr.vmem [resolvable:$false] %s15582_s10 }
  0x8d   : > { %s15584_s11 = scalar_lea.vmem %s15583_s10, 32  ;;  %p15585_p12 = scmp.lt.s32.totalorder %s16010_s15, %s15583_s10 }
  0x8e   : > { %p15580_p3 = pnand %p15578_p10, %p15564_p9  ;;  %p15586_p1 = scmp.lt.s32.totalorder %s15584_s11, %s15577_s22 }
  0x90   : > { %p15581_p7 = pneg %p15580_p3  ;;  %p15587_p2 = por %p15586_p1, %p15585_p12 }
  0x92   : > { %p15588_p4 = pnand %p15587_p2, %p15581_p7 }
  0x94   : > { %15591 = shalt.err (!%p15588_p4)
}
  0x95   : > { %15243 = dma.hbm_to_vmem [thread:$0]  (!%p16012_p11), %s16007_s19, 16, %s16010_s15, %s504_s23  }
  0x96   : > { %s523_s9 = scalar_lea.vmem [#allocation9], %s16001_s27  ;;  %s20789_s18 = sand.u32 1, %s15700_s26  }
  0x97   : > { %s530_s20 = sshll.u32 %s523_s9, 4  ;;  %s521_s29 = scalar_lea.sflag [#allocation10], %s20789_s18  ;;  %s531_s20 = int_to_ptr.vmem [resolvable:$true] %s530_s20 }
  0x98   : > { %s15592_s21 = scalar_lea.hbm %s16020_s12, 16  ;;  %s15597_s10 = scalar_lea.hbm %s20584_s1, 32 }
  0x99   : > { %p15593_p0 = scmp.ne.s32.totalorder %s16020_s12, %s15592_s21  ;;  %p15598_p6 = scmp.lt.u32.totalorder %s16020_s12, %s20584_s1 }
  0x9a   : > { %p15599_p10 = scmp.lt.u32.totalorder %s15597_s10, %s15592_s21  ;;  %p15601_p7 = scmp.lt.u32.totalorder %s15592_s21, %s16020_s12 }
  0x9b   : > { %p15595_p8 = pnand %p15593_p0, %p15564_p9 }
  0x9c   : > { %p15600_p3 = por %p15599_p10, %p15598_p6 }
  0x9d   : > { %p15596_p13 = pneg %p15595_p8 }
  0x9e   : > { %p15602_p12 = por %p15601_p7, %p15600_p3 }
  0xa0   : > { %p15603_p1 = pnand %p15602_p12, %p15596_p13 }
  0xa2   : > { %15606 = shalt.err (!%p15603_p1)
}
  0xa3   : > { %s15607_s27 = scalar_lea.vmem %s531_s20, 16  ;;  %s15708_s19 = smov [#allocation9]  }
  0xa4   : > { %p15608_p2 = scmp.ne.s32.totalorder %s531_s20, %s15607_s27  ;;  %s15612_s15 = sshll.u32 %s15708_s19, 4  ;;  %s15613_s15 = int_to_ptr.vmem [resolvable:$false] %s15612_s15 }
  0xa5   : > { %s15614_s23 = scalar_lea.vmem %s15613_s15, 32  ;;  %p15615_p8 = scmp.lt.s32.totalorder %s531_s20, %s15613_s15 }
  0xa6   : > { %p15610_p4 = pnand %p15608_p2, %p15564_p9  ;;  %p15616_p5 = scmp.lt.s32.totalorder %s15614_s23, %s15607_s27 }
  0xa8   : > { %p15611_p0 = pneg %p15610_p4  ;;  %p15617_p6 = por %p15616_p5, %p15615_p8 }
  0xaa   : > { %p15618_p10 = pnand %p15617_p6, %p15611_p0 }
  0xac   : > { %15621 = shalt.err (!%p15618_p10)
}
  0xad   : > { %15246 = dma.hbm_to_vmem [thread:$0]  (!%p16012_p11), %s16020_s12, 16, %s531_s20, %s521_s29  }
  0xae   : > { %p20790_p13 = scmp.ne.s32.totalorder %s20779_s30, 0 }
  0xb0   : > { %539 = sbr.rel (%p20790_p13) target bundleno = 3778 (0xec2), region = 80 }
  0xb7   : > { %s16073_s0 = sand.u32 1, %s15692_s24   ;;  %p20791_p9 = scmp.ne.s32.totalorder %s20776_s28, 0 }
  0xb8   : > { %s542_s9 = scalar_lea.sflag [#allocation7], %s16073_s0  ;;  %s544_s18 = scalar_lea.vmem [#allocation6], %s16073_s0 }
  0xb9   : > { %15667 = dma.done.wait (%p20791_p9), %s542_s9, 16  }
  0xba   : > { %15669 = vsyncadd (%p20791_p9), %s542_s9, 4294967280  ;;  %s549_s17 = sand.u32 1, %s15863_s2   ;;  %s552_s30 = scalar_lea.vmem [#allocation9], %s16073_s0 }
  0xbb   : > { %s550_s12 = scalar_lea.sflag [#allocation10], %s549_s17 }
  0xbc   : > { %15671 = dma.done.wait (%p20791_p9), %s550_s12, 16  }
  0xbd   : > { %15673 = vsyncadd (%p20791_p9), %s550_s12, 4294967280  ;;  %p20792_p5 = scmp.eq.s32.totalorder %s15863_s2, 0 }
  0xbf   : > { %15675 = dma.done.wait (%p20792_p5), [#allocation10], 2048   ;;  %p20793_p11 = pmov %p20792_p5 }
  0xc0   : > { %p20794_p3 = pmov %p20792_p5 }
  0xc1   : > { %15677 = vsyncadd (%p20793_p11), [#allocation10], 4294965248 }
  0xc2   : > { %15679 = dma.done.wait (%p20794_p3), [#allocation13], 9216   ;;  %p20795_p7 = pmov %p20794_p3 }
  0xc3   : > { %v15709_v1 = vmov 1   ;;  %v15710_v2 = vmov 0   ;;  %v625_v3 = vld [vmem:[%s544_s18] sm:$0x1]  ;;  %v15711_v16 = vmov 683565275  }
  0xc4   : > { %15681 = vsyncadd (%p20795_p7), [#allocation13], 4294958080  ;;  %15341 = vset.pattern.permute.xlu1 %v15709_v1  ;;  %15340 = vset.pattern.permute.xlu0 %v15710_v2  ;;  %v16096_v4 = vmul.f32 0.5, %v625_v3  ;;  %v15712_v18 = vmov 2475754826   ;;  %s612_s27 = scalar_lea.vmem [#allocation15], %s16073_s0 }
  0xc5   : > { %v15713_v20 = vmov 2131351028   ;;  %v15714_v22 = vmov 2102212464   ;;  %v15715_v24 = vmov 920167782  }
  0xc6   : > { %v630_v5 = vand.u32 2139095040, %v16096_v4  ;;  %v627_v7 = vand.u32 2147483647, %v16096_v4  ;;  %v15716_v31 = vmov 1326507024   ;;  %vm629_vm7 = vcmp.lt.s32.totalorder %v16096_v4, 0 }
  0xc7   : > { %vm719_vm15 = vweird.f32 %v16096_v4  ;;  %s15750_s23 = smov 32   ;;  %s15751_s9 = smov 96  }
  0xc8   : > { %v631_v6 = vshrl.u32 %v630_v5, 23  ;;  %v634_v10 = vand.u32 8388607, %v627_v7  ;;  %vm628_vm8 = vcmp.le.f32.partialorder %v627_v7, 0.7853982  ;;  %s15752_s18 = smov 64  }
  0xc9   : > { %s20798_s29 = sld [smem:[#allocation78_spill]]  ;;  %s20875_s21 = sld [smem:[#allocation81_spill]] }
  0xca   : > { %v11423_v8 = vadd.s32 4294967169, %v631_v6  ;;  %v635_v13 = vor.u32 8388608, %v634_v10  ;;  %s20911_s19 = sld [smem:[#allocation80_spill]]  ;;  %s21037_s22 = sld [smem:[#allocation82_spill]] }
  0xcb   : > { %p620_p12 = scmp.lt.s32.totalorder %s15863_s2, 1  ;;  %s21057_s28 = sld [smem:[#allocation83_spill]] }
  0xcc   : > { %v637_v9 = vadd.s32 1, %v11423_v8  ;;  %v675_v33 = vshll.u32 %v635_v13, 8  ;;  %p21058_p2 = scmp.ne.s32.totalorder %s20786_s14, 0 }
  0xcd   : > { %s19663_s4 = scalar_select %p620_p12, %s15863_s2, 1 }
  0xce   : > { %vm638_vm0 = vcmp.gt.s32.totalorder %v637_v9, 0 }
  0xcf   : > { %v639_v11 = vsel %vm638_vm0, %v637_v9, 0  ;;  %s15207_s10 = smul.u32 240, %s19663_s4  ;;  %s15753_s4 = smov [#allocation15]  }
  0xd0   : > { %v641_v12 = vand.u32 31, %v639_v11  ;;  %v640_v14 = vshrl.u32 %v639_v11, 5 }
  0xd2   : > { %v642_v15 = vsub.s32 32, %v641_v12  ;;  %v644_v17 = vshll.u32 %v15711_v16, %v641_v12  ;;  %v647_v19 = vshll.u32 %v15712_v18, %v641_v12  ;;  %v650_v21 = vshll.u32 %v15713_v20, %v641_v12 }
  0xd3   : > { %v653_v23 = vshll.u32 %v15714_v22, %v641_v12  ;;  %v656_v25 = vshll.u32 %v15715_v24, %v641_v12  ;;  %vm659_vm1 = vcmp.lt.s32.totalorder %v640_v14, 1  ;;  %vm662_vm2 = vcmp.lt.s32.totalorder %v640_v14, 4 }
  0xd4   : > { %v643_v26 = vshrl.u32 %v15711_v16, %v642_v15  ;;  %v645_v27 = vshrl.u32 %v15712_v18, %v642_v15  ;;  %v648_v28 = vshrl.u32 %v15713_v20, %v642_v15  ;;  %v651_v29 = vshrl.u32 %v15714_v22, %v642_v15 }
  0xd5   : > { %v654_v30 = vshrl.u32 %v15715_v24, %v642_v15  ;;  %v657_v32 = vshrl.u32 %v15716_v31, %v642_v15  ;;  %vm660_vm3 = vcmp.lt.s32.totalorder %v640_v14, 2  ;;  %vm661_vm4 = vcmp.lt.s32.totalorder %v640_v14, 3 }
  0xd6   : > { %v646_v34 = vor.u32 %v645_v27, %v644_v17  ;;  %v649_v35 = vor.u32 %v648_v28, %v647_v19  ;;  %v652_v36 = vor.u32 %v651_v29, %v650_v21 }
  0xd7   : > { %v655_v37 = vor.u32 %v654_v30, %v653_v23  ;;  %v658_v38 = vor.u32 %v657_v32, %v656_v25 }
  0xd8   : > { %v663_v39 = vsel %vm659_vm1, %v643_v26, %v646_v34  ;;  %v664_v40 = vsel %vm662_vm2, %v652_v36, 2102212464  ;;  %v667_v41 = vsel %vm659_vm1, %v646_v34, %v649_v35  ;;  %v671_v42 = vsel %vm659_vm1, %v649_v35, %v652_v36 }
  0xd9   : > { %v665_v43 = vsel %vm661_vm4, %v649_v35, %v664_v40  ;;  %v668_v44 = vsel %vm662_vm2, %v655_v37, 920167782  ;;  %v672_v45 = vsel %vm662_vm2, %v658_v38, 1326507024  ;;  %v15719_v40 = vmov 2  }
  0xda   : > { %v669_v46 = vsel %vm661_vm4, %v652_v36, %v668_v44  ;;  %v673_v47 = vsel %vm661_vm4, %v655_v37, %v672_v45  ;;  %v666_v48 = vsel %vm660_vm3, %v663_v39, %v665_v43  ;;  %v15717_v39 = vmov 4  }
  0xdb   : > { %v670_v49 = vsel %vm660_vm3, %v667_v41, %v669_v46  ;;  %v674_v50 = vsel %vm660_vm3, %v671_v42, %v673_v47  ;;  %v682_v55 = vmul.u32 %v675_v33, %v666_v48  ;;  %v15720_v41 = vmov 6  }
  0xdc   : > { %v16102_v51 = vmul.u32.u64.low %v675_v33, %v674_v50  ;;  %v16103_v52 = vmul.u32.u64.high %v675_v33, %v674_v50, %v16102_v51  ;;  %v16105_v53 = vmul.u32.u64.low %v675_v33, %v670_v49  ;;  %v16106_v54 = vmul.u32.u64.high %v675_v33, %v670_v49, %v16105_v53 }
  0xdd   : > { %v15721_v42 = vmov 8   ;;  %v15722_v43 = vmov 3   ;;  %v15723_v44 = vmov 7   ;;  %v15724_v45 = vmov 9  }
  0xde   : > { %vm684_vm5 = vc.u32 %v16103_v52, %v16105_v53  ;;  %v685_v56 = vadd.s32 1, %v16106_v54  ;;  %v683_v5 = vadd.s32 %v16105_v53, %v16103_v52  ;;  %v15725_v46 = vmov 12  }
  0xdf   : > { %v15726_v47 = vmov 13   ;;  %v15727_v48 = vmov 14   ;;  %v15728_v49 = vmov 16   ;;  %v15729_v50 = vmov 10  }
  0xe0   : > { %v686_v57 = vsel %vm684_vm5, %v685_v56, %v16106_v54  ;;  %v15730_v51 = vmov 15   ;;  %v15731_v52 = vmov 18   ;;  %v15732_v53 = vmov 21  }
  0xe1   : > { %v687_v58 = vadd.s32 %v686_v57, %v682_v55  ;;  %v15733_v54 = vmov 19   ;;  %v15734_v55 = vmov 11   ;;  %v15735_v56 = vmov 24  }
  0xe2   : > { %v15736_v57 = vmov 25  }
  0xe3   : > { %v688_v59 = vadd.s32 536870912, %v687_v58 }
  0xe5   : > { %v689_v60 = vshrl.u32 %v688_v59, 30  ;;  %v15738_v59 = vmov 28  }
  0xe7   : > { %v690_v61 = vshll.u32 %v689_v60, 30  ;;  %v713_v19 = vsub.s32 4, %v689_v60 }
  0xe9   : > { %v691_v62 = vsub.s32 %v687_v58, %v690_v61  ;;  %v714_v22 = vsel %vm629_vm7, %v713_v19, %v689_v60  ;;  %v15737_v58 = vmov 26   ;;  %v15739_v60 = vmov 17  }
  0xea   : > { %v716_v24 = vsel %vm628_vm8, 0, %v714_v22  ;;  %v15740_v61 = vmov 27   ;;  %v15743_v19 = vmov 22  }
  0xeb   : > { %v693_v63 = vsub.s32 0, %v691_v62  ;;  %v823_v25 = vadd.s32 3, %v716_v24  ;;  %v720_v26 = vand.u32 3, %v716_v24 }
  0xed   : > { %v11424_v0 = vmin.u32 %v693_v63, %v691_v62  ;;  %v824_v27 = vand.u32 3, %v823_v25  ;;  %vm725_vm9 = vcmp.eq.s32.totalorder %v720_v26, 2  ;;  %vm722_vm11 = vcmp.eq.s32.totalorder %v720_v26, 0 }
  0xee   : > { %vm721_vm13 = vcmp.lt.s32.totalorder %v720_v26, 2  ;;  %v834_v63 = vlaneseq }
  0xef   : > { %v695_v1 = vclz %v11424_v0  ;;  %vm829_vm10 = vcmp.eq.s32.totalorder %v824_v27, 2  ;;  %vm826_vm12 = vcmp.eq.s32.totalorder %v824_v27, 0  ;;  %vm825_vm14 = vcmp.lt.s32.totalorder %v824_v27, 2 }
  0xf0   : > { %v15742_v0 = vmov 20  }
  0xf1   : > { %v11425_v3 = vadd.s32 4294967294, %v695_v1  ;;  %v16175_v1 = vand.u32 127, %v834_v63 }
  0xf3   : > { %vm11426_vm6 = vcmp.lt.s32.totalorder %v11425_v3, 0 }
  0xf4   : > { %v698_v6 = vsel %vm11426_vm6, 0, %v11425_v3  ;;  %v16179_v3 = vand.u32 15, %v16175_v1  ;;  %vm15748_vm6 = vmmov 0  }
  0xf5   : > { %v699_v8 = vsub.s32 32, %v698_v6  ;;  %v700_v9 = vshll.u32 %v691_v62, %v698_v6  ;;  %v703_v10 = vsub.s32 4294967266, %v698_v6  ;;  %v15741_v62 = vmov 30  }
  0xf6   : > { %v16184_v6 = vshrl.u32 %v834_v63, 7 }
  0xf7   : > { %v701_v11 = vshrl.u32 %v683_v5, %v699_v8  ;;  %v704_v12 = vadd.s32 127, %v703_v10  ;;  %v841_v5 = vshra.s32 %v16179_v3, 2 }
  0xf9   : > { %v702_v13 = vor.u32 %v701_v11, %v700_v9  ;;  %v705_v14 = vshll.u32 %v704_v12, 23  ;;  %v16186_v10 = vand.u32 1, %v841_v5  ;;  %v16191_v12 = vsub.s32 0, %v16184_v6 }
  0xfa   : > { %v847_v5 = vand.u32 1, %v16179_v3 }
  0xfb   : > { %v706_v15 = vor.u32 4788187, %v705_v14  ;;  %v709_v16 = vcvt.s32.f32 %v702_v13  ;;  %vm843_vm0 = vcmp.eq.s32.totalorder %v16186_v10, 0 }
  0xfc   : > { %vm16262_vm3 = vcmp.eq.s32.totalorder %v847_v5, 0 }
  0xfd   : > { %v707_v17 = vand.u32 2147483647, %v706_v15 }
  0xff   : > { %v710_v18 = vmul.f32 %v709_v16, %v707_v17 }
 0x101   : > { %v711_v20 = vxor.u32 2147483648, %v710_v18 }
 0x103   : > { %v712_v21 = vsel %vm629_vm7, %v711_v20, %v710_v18 }
 0x104   : > { %v715_v23 = vsel %vm628_vm8, %v16096_v4, %v712_v21  ;;  %v15718_v4 = vmov 5  }
 0x105   : > { %15393 = vcosq.f32 %v715_v23 }
 0x106   : > { %15395 = vsinq.f32 %v715_v23 }
 0x10f   : > { %v15394_v28 = vpop.eup %15393 }
 0x110   : > { %v15396_v29 = vpop.eup %15395  ;;  %v726_v30 = vxor.u32 2147483648, %v15394_v28 }
 0x111   : > { %v723_v7 = vxor.u32 2147483648, %v15396_v29 }
 0x112   : > { %v727_v31 = vsel %vm725_vm9, %v726_v30, %v15396_v29  ;;  %v831_v32 = vsel %vm829_vm10, %v726_v30, %v15396_v29 }
 0x113   : > { %v724_v33 = vsel %vm722_vm11, %v15394_v28, %v723_v7  ;;  %v828_v34 = vsel %vm826_vm12, %v15394_v28, %v723_v7  ;;  %v844_v7 = vshra.s32 %v16179_v3, 1 }
 0x114   : > { %v728_v35 = vsel %vm721_vm13, %v724_v33, %v727_v31  ;;  %v832_v36 = vsel %vm825_vm14, %v828_v34, %v831_v32  ;;  %vm1709_vm13 = vcmask 130048   ;;  %vm2023_vm14 = vcmask 261120  }
 0x115   : > { %v16117_v37 = vsel %vm719_vm15, nan, %v728_v35  ;;  %v16121_v38 = vsel %vm719_vm15, nan, %v832_v36  ;;  %v16218_v35 = vand.u32 1, %v844_v7  ;;  %vm2025_vm15 = vcmask 254976  }
 0x116   : > { %869 = vperm.xlu1 %15341, %v16117_v37   ;;  %851 = vperm.xlu0 %15340, %v16117_v37  }
 0x117   : > { %vm846_vm2 = vcmp.eq.s32.totalorder %v16218_v35, 0 }
 0x11a   : > { %877 = vperm.xlu1 %15341, %v16121_v38   ;;  %860 = vperm.xlu0 %15340, %v16121_v38  }
 0x11e   : > { %15343 = vset.pattern.permute.xlu1 %v15717_v39  ;;  %15342 = vset.pattern.permute.xlu0 %v15717_v39 }
 0x11f   : > { %934 = vperm.xlu1 %15343, %v16121_v38   ;;  %926 = vperm.xlu0 %15342, %v16117_v37  }
 0x123   : > { %15344 = vset.pattern.permute.xlu1 %v15718_v4  ;;  %15345 = vset.pattern.permute.xlu0 %v15718_v4 }
 0x124   : > { %943 = vperm.xlu1 %15344, %v16117_v37   ;;  %951 = vperm.xlu0 %15345, %v16121_v38  }
 0x128   : > { %15346 = vset.pattern.permute.xlu1 %v15719_v40  ;;  %15347 = vset.pattern.permute.xlu0 %v15720_v41  ;;  %v15744_v40 = vmov 23  }
 0x129   : > { %887 = vperm.xlu1 %15346, %v16117_v37   ;;  %961 = vperm.xlu0 %15347, %v16117_v37  }
 0x12d   : > { %895 = vperm.xlu1 %15346, %v16121_v38   ;;  %15350 = vset.pattern.permute.xlu0 %v15721_v42 }
 0x12e   : > { %1008 = vperm.xlu0 %15350, %v16121_v38  }
 0x131   : > { %15348 = vset.pattern.permute.xlu1 %v15720_v41 }
 0x132   : > { %969 = vperm.xlu1 %15348, %v16121_v38   ;;  %15352 = vset.pattern.permute.xlu0 %v15722_v43 }
 0x133   : > { %905 = vperm.xlu0 %15352, %v16117_v37  }
 0x136   : > { %15349 = vset.pattern.permute.xlu1 %v15721_v42 }
 0x137   : > { %1000 = vperm.xlu1 %15349, %v16117_v37   ;;  %15355 = vset.pattern.permute.xlu0 %v15723_v44 }
 0x138   : > { %987 = vperm.xlu0 %15355, %v16121_v38  }
 0x13b   : > { %15351 = vset.pattern.permute.xlu1 %v15724_v45 }
 0x13c   : > { %1017 = vperm.xlu1 %15351, %v16117_v37   ;;  %15357 = vset.pattern.permute.xlu0 %v15725_v46 }
 0x13d   : > { %1074 = vperm.xlu0 %15357, %v16117_v37  }
 0x140   : > { %1025 = vperm.xlu1 %15351, %v16121_v38  }
 0x141   : > { %15360 = vset.pattern.permute.xlu0 %v15726_v47 }
 0x142   : > { %1099 = vperm.xlu0 %15360, %v16121_v38  }
 0x144   : > { %15353 = vset.pattern.permute.xlu1 %v15722_v43 }
 0x145   : > { %913 = vperm.xlu1 %15353, %v16121_v38  }
 0x146   : > { %15362 = vset.pattern.permute.xlu0 %v15727_v48 }
 0x147   : > { %1109 = vperm.xlu0 %15362, %v16117_v37  }
 0x149   : > { %15354 = vset.pattern.permute.xlu1 %v15723_v44 }
 0x14a   : > { %979 = vperm.xlu1 %15354, %v16117_v37  }
 0x14b   : > { %15365 = vset.pattern.permute.xlu0 %v15728_v49 }
 0x14c   : > { %1156 = vperm.xlu0 %15365, %v16121_v38  }
 0x14e   : > { %15356 = vset.pattern.permute.xlu1 %v15729_v50 }
 0x14f   : > { %1035 = vperm.xlu1 %15356, %v16117_v37  }
 0x150   : > { %15367 = vset.pattern.permute.xlu0 %v15730_v51 }
 0x151   : > { %1127 = vperm.xlu0 %15367, %v16117_v37  }
 0x153   : > { %1043 = vperm.xlu1 %15356, %v16121_v38  }
 0x155   : > { %15370 = vset.pattern.permute.xlu0 %v15731_v52 }
 0x156   : > { %1191 = vperm.xlu0 %15370, %v16121_v38  }
 0x157   : > { %15358 = vset.pattern.permute.xlu1 %v15725_v46 }
 0x158   : > { %1082 = vperm.xlu1 %15358, %v16121_v38  }
 0x15a   : > { %15372 = vset.pattern.permute.xlu0 %v15732_v53 }
 0x15b   : > { %1239 = vperm.xlu0 %15372, %v16117_v37  }
 0x15c   : > { %15359 = vset.pattern.permute.xlu1 %v15726_v47 }
 0x15d   : > { %1091 = vperm.xlu1 %15359, %v16117_v37  }
 0x15f   : > { %15375 = vset.pattern.permute.xlu0 %v15733_v54 }
 0x160   : > { %1209 = vperm.xlu0 %15375, %v16121_v38  }
 0x161   : > { %15361 = vset.pattern.permute.xlu1 %v15734_v55  ;;  %v1444_v55 = vld [vmem:[%s20586_s3 + $0x8] sm:$0xff] }
 0x162   : > { %1053 = vperm.xlu1 %15361, %v16117_v37  }
 0x164   : > { %15377 = vset.pattern.permute.xlu0 %v15735_v56 }
 0x165   : > { %1296 = vperm.xlu0 %15377, %v16117_v37  }
 0x166   : > { %1061 = vperm.xlu1 %15361, %v16121_v38  }
 0x169   : > { %15380 = vset.pattern.permute.xlu0 %v15736_v57 }
 0x16a   : > { %15363 = vset.pattern.permute.xlu1 %v15727_v48  ;;  %1321 = vperm.xlu0 %15380, %v16121_v38  }
 0x16b   : > { %1117 = vperm.xlu1 %15363, %v16121_v38  }
 0x16e   : > { %15382 = vset.pattern.permute.xlu0 %v15737_v58 }
 0x16f   : > { %15364 = vset.pattern.permute.xlu1 %v15728_v49  ;;  %1331 = vperm.xlu0 %15382, %v16117_v37  }
 0x170   : > { %1148 = vperm.xlu1 %15364, %v16117_v37  }
 0x173   : > { %15385 = vset.pattern.permute.xlu0 %v15738_v59 }
 0x174   : > { %15366 = vset.pattern.permute.xlu1 %v15739_v60  ;;  %1378 = vperm.xlu0 %15385, %v16121_v38  }
 0x175   : > { %1165 = vperm.xlu1 %15366, %v16117_v37  }
 0x178   : > { %15387 = vset.pattern.permute.xlu0 %v15740_v61 }
 0x179   : > { %1173 = vperm.xlu1 %15366, %v16121_v38   ;;  %1349 = vperm.xlu0 %15387, %v16117_v37  }
 0x17d   : > { %15368 = vset.pattern.permute.xlu1 %v15730_v51  ;;  %15390 = vset.pattern.permute.xlu0 %v15741_v62 }
 0x17e   : > { %1135 = vperm.xlu1 %15368, %v16121_v38   ;;  %1413 = vperm.xlu0 %15390, %v16121_v38  }
 0x182   : > { %15369 = vset.pattern.permute.xlu1 %v15731_v52  ;;  %15392 = vset.pattern.permute.xlu0 %v15710_v2  ;;  %v838_v2 = vshra.s32 %v16179_v3, 3 }
 0x183   : > { %1183 = vperm.xlu1 %15369, %v16117_v37  }
 0x184   : > { %v16188_v11 = vand.u32 1, %v838_v2 }
 0x186   : > { %vm840_vm1 = vcmp.eq.s32.totalorder %v16188_v11, 0 }
 0x187   : > { %15371 = vset.pattern.permute.xlu1 %v15742_v0  ;;  %v15746_v0 = vmov 29  }
 0x188   : > { %1222 = vperm.xlu1 %15371, %v16117_v37  }
 0x18c   : > { %1230 = vperm.xlu1 %15371, %v16121_v38  }
 0x190   : > { %15373 = vset.pattern.permute.xlu1 %v15732_v53 }
 0x191   : > { %1247 = vperm.xlu1 %15373, %v16121_v38  }
 0x195   : > { %15374 = vset.pattern.permute.xlu1 %v15733_v54  ;;  %v870_v8 = vpop.permute.xlu1 %869  ;;  %v852_v9 = vpop.permute.xlu0 %851  ;;  %v1443_v54 = vld [vmem:[%s20586_s3] sm:$0xff] }
 0x196   : > { %1201 = vperm.xlu1 %15374, %v16117_v37   ;;  %v857_v13 = vrot.slane %v852_v9, %v16191_v12  ;;  %v875_v16 = vrot.slane %v870_v8, %v16191_v12  ;;  %v1445_v9 = vld [vmem:[%s20586_s3 + $0x10] sm:$0xff] }
 0x199   : > { %v878_v14 = vpop.permute.xlu1 %877  ;;  %v861_v15 = vpop.permute.xlu0 %860 }
 0x19a   : > { %v883_v17 = vrot.slane %v878_v14, %v16191_v12  ;;  %v866_v18 = vrot.slane %v861_v15, %v16191_v12  ;;  %15376 = vset.pattern.permute.xlu1 %v15743_v19 }
 0x19b   : > { %1257 = vperm.xlu1 %15376, %v16117_v37  }
 0x19c   : > { %v884_v20 = vsel %vm843_vm0, %v875_v16, %v883_v17  ;;  %v867_v21 = vsel %vm840_vm1, %v857_v13, %v866_v18  ;;  %v1446_v13 = vld [vmem:[%s20586_s3 + $0x18] sm:$0xff] }
 0x19d   : > { %v885_v22 = vmul.f32 %v884_v20, %v867_v21  ;;  %v14275_v15 = vpack.c.bf16 %v1446_v13, %v1445_v9  ;;  %v1447_v20 = vld [vmem:[%s20586_s3 + $0x20] sm:$0xff]  ;;  %v1448_v21 = vld [vmem:[%s20586_s3 + $0x28] sm:$0xff] }
 0x19e   : > { %v935_v23 = vpop.permute.xlu1 %934  ;;  %v927_v24 = vpop.permute.xlu0 %926  ;;  %v1550_v17 = vld [vmem:[#allocation11 + $0x18] sm:$0xff] }
 0x19f   : > { %1265 = vperm.xlu1 %15376, %v16121_v38   ;;  %v940_v25 = vrot.slane %v935_v23, %v16191_v12  ;;  %v932_v26 = vrot.slane %v927_v24, %v16191_v12  ;;  %v14278_v23 = vpack.c.bf16 %v1448_v21, %v1447_v20  ;;  %v16278_v24 = vshra.s32 %v16175_v1, 4  ;;  %v1450_v1 = vld [vmem:[%s20586_s3 + $0x38] sm:$0xff] }
 0x1a1   : > { %v941_v31 = vsel %vm840_vm1, %v932_v26, %v940_v25  ;;  %vm922_vm4 = vcmp.eq.s32.totalorder %v16278_v24, 0  ;;  %vm996_vm5 = vcmp.eq.s32.totalorder %v16278_v24, 1  ;;  %vm1070_vm7 = vcmp.eq.s32.totalorder %v16278_v24, 2 }
 0x1a2   : > { %vm1144_vm8 = vcmp.eq.s32.totalorder %v16278_v24, 3  ;;  %vm1218_vm9 = vcmp.eq.s32.totalorder %v16278_v24, 4  ;;  %vm1292_vm10 = vcmp.eq.s32.totalorder %v16278_v24, 5  ;;  %vm1366_vm11 = vcmp.eq.s32.totalorder %v16278_v24, 6 }
 0x1a3   : > { %15378 = vset.pattern.permute.xlu1 %v15735_v56  ;;  %v944_v27 = vpop.permute.xlu1 %943  ;;  %v952_v28 = vpop.permute.xlu0 %951  ;;  %vm1440_vm12 = vcmp.eq.s32.totalorder %v16278_v24, 7  ;;  %v1551_v24 = vld [vmem:[#allocation11 + $0x20] sm:$0xff] }
 0x1a4   : > { %v949_v29 = vrot.slane %v944_v27, %v16191_v12  ;;  %v957_v30 = vrot.slane %v952_v28, %v16191_v12  ;;  %1304 = vperm.xlu1 %15378, %v16121_v38  }
 0x1a6   : > { %v958_v32 = vsel %vm843_vm0, %v949_v29, %v957_v30  ;;  %v1449_v29 = vld [vmem:[%s20586_s3 + $0x30] sm:$0xff] }
 0x1a7   : > { %v959_v33 = vmul.f32 %v958_v32, %v941_v31  ;;  %v14281_v30 = vpack.c.bf16 %v1450_v1, %v1449_v29  ;;  %v1451_v32 = vld [vmem:[%s20586_s3 + $0x40] sm:$0xff] }
 0x1a8   : > { %15379 = vset.pattern.permute.xlu1 %v15736_v57  ;;  %v888_v34 = vpop.permute.xlu1 %887  ;;  %v962_v41 = vpop.permute.xlu0 %961 }
 0x1a9   : > { %1313 = vperm.xlu1 %15379, %v16117_v37   ;;  %v893_v39 = vrot.slane %v888_v34, %v16191_v12  ;;  %v967_v44 = vrot.slane %v962_v41, %v16191_v12  ;;  %v1453_v41 = vld [vmem:[%s20586_s3 + $0x50] sm:$0xff] }
 0x1ac   : > { %v896_v36 = vpop.permute.xlu1 %895 }
 0x1ad   : > { %v901_v4 = vrot.slane %v896_v36, %v16191_v12  ;;  %15381 = vset.pattern.permute.xlu1 %v15744_v40  ;;  %v1009_v50 = vpop.permute.xlu0 %1008 }
 0x1ae   : > { %1275 = vperm.xlu1 %15381, %v16117_v37   ;;  %v1014_v53 = vrot.slane %v1009_v50, %v16191_v12  ;;  %v1456_v50 = vld [vmem:[%s20586_s3 + $0x68] sm:$0xff] }
 0x1af   : > { %v902_v42 = vsel %vm846_vm2, %v893_v39, %v901_v4 }
 0x1b0   : > { %v903_v43 = vmul.f32 %v902_v42, %v885_v22  ;;  %v1454_v42 = vld [vmem:[%s20586_s3 + $0x58] sm:$0xff] }
 0x1b1   : > { %v970_v45 = vpop.permute.xlu1 %969 }
 0x1b2   : > { %v975_v46 = vrot.slane %v970_v45, %v16191_v12  ;;  %1283 = vperm.xlu1 %15381, %v16121_v38   ;;  %v906_v57 = vpop.permute.xlu0 %905  ;;  %v15747_v45 = vmov 31  }
 0x1b3   : > { %v911_v14 = vrot.slane %v906_v57, %v16191_v12 }
 0x1b4   : > { %v976_v47 = vsel %vm846_vm2, %v967_v44, %v975_v46  ;;  %v14287_v46 = vpack.c.bf16 %v1454_v42, %v1453_v41 }
 0x1b5   : > { %v977_v48 = vmul.f32 %v976_v47, %v959_v33  ;;  %v1452_v33 = vld [vmem:[%s20586_s3 + $0x48] sm:$0xff] }
 0x1b6   : > { %15383 = vset.pattern.permute.xlu1 %v15737_v58  ;;  %v1001_v49 = vpop.permute.xlu1 %1000  ;;  %v15745_v58 = vmov 0.0|0.0   ;;  %v14284_v39 = vpack.c.bf16 %v1452_v33, %v1451_v32 }
 0x1b7   : > { %1339 = vperm.xlu1 %15383, %v16121_v38   ;;  %v1006_v52 = vrot.slane %v1001_v49, %v16191_v12  ;;  %14271 = vmatprep.subr.bf16.mxu0 %v15745_v58  ;;  %v988_v19 = vpop.permute.xlu0 %987  ;;  %v1455_v49 = vld [vmem:[%s20586_s3 + $0x60] sm:$0xff] }
 0x1b8   : > { %14295 = vmatprep.subr.bf16.mxu1 %v15745_v58  ;;  %v993_v26 = vrot.slane %v988_v19, %v16191_v12 }
 0x1b9   : > { %v1015_v2 = vsel %vm840_vm1, %v1006_v52, %v1014_v53  ;;  %v14290_v53 = vpack.c.bf16 %v1456_v50, %v1455_v49 }
 0x1bb   : > { %15384 = vset.pattern.permute.xlu1 %v15738_v59  ;;  %v1018_v51 = vpop.permute.xlu1 %1017  ;;  %v14272_v59 = vpack.c.bf16 %v1444_v55, %v1443_v54  ;;  %v1457_v55 = vld [vmem:[%s20586_s3 + $0x70] sm:$0xff] }
 0x1bc   : > { %1370 = vperm.xlu1 %15384, %v16117_v37   ;;  %v1023_v60 = vrot.slane %v1018_v51, %v16191_v12  ;;  %v1075_v40 = vpop.permute.xlu0 %1074 }
 0x1bd   : > { %14273 = vmatpush3.bf16.msra.mxu0 %v14272_v59 }
 0x1be   : > { %14274 = vmatprep.subr.bf16.mxu0 %v15745_v58 }
 0x1bf   : > { %v1026_v56 = vpop.permute.xlu1 %1025 }
 0x1c0   : > { %v1031_v63 = vrot.slane %v1026_v56, %v16191_v12  ;;  %15386 = vset.pattern.permute.xlu1 %v15746_v0  ;;  %v1458_v56 = vld [vmem:[%s20586_s3 + $0x78] sm:$0xff] }
 0x1c1   : > { %1387 = vperm.xlu1 %15386, %v16117_v37   ;;  %14276 = vmatpush3.bf16.msra.mxu0 %v14275_v15  ;;  %v1100_v52 = vpop.permute.xlu0 %1099  ;;  %v14293_v59 = vpack.c.bf16 %v1458_v56, %v1457_v55 }
 0x1c2   : > { %v1032_v8 = vsel %vm843_vm0, %v1023_v60, %v1031_v63  ;;  %14277 = vmatprep.subr.bf16.mxu0 %v15745_v58  ;;  %v1105_v54 = vrot.slane %v1100_v52, %v16191_v12 }
 0x1c3   : > { %v1033_v3 = vmul.f32 %v1032_v8, %v1015_v2  ;;  %v1533_v8 = vld [vmem:[#allocation5] sm:$0x1] }
 0x1c4   : > { %v914_v16 = vpop.permute.xlu1 %913  ;;  %1536 = vperm.xlu0 %15392, %v1533_v8  }
 0x1c5   : > { %v919_v18 = vrot.slane %v914_v16, %v16191_v12  ;;  %1395 = vperm.xlu1 %15386, %v16121_v38   ;;  %14279 = vmatpush3.bf16.msra.mxu0 %v14278_v23 }
 0x1c6   : > { %14280 = vmatprep.subr.bf16.mxu0 %v15745_v58  ;;  %v1110_v15 = vpop.permute.xlu0 %1109 }
 0x1c7   : > { %v920_v22 = vsel %vm16262_vm3, %v911_v14, %v919_v18  ;;  %v1115_v19 = vrot.slane %v1110_v15, %v16191_v12 }
 0x1c8   : > { %v921_v25 = vmul.f32 %v920_v22, %v903_v43 }
 0x1c9   : > { %15388 = vset.pattern.permute.xlu1 %v15740_v61  ;;  %v980_v27 = vpop.permute.xlu1 %979  ;;  %14282 = vmatpush3.bf16.msra.mxu0 %v14281_v30 }
 0x1ca   : > { %v985_v28 = vrot.slane %v980_v27, %v16191_v12  ;;  %1357 = vperm.xlu1 %15388, %v16121_v38   ;;  %14283 = vmatprep.subr.bf16.mxu0 %v15745_v58  ;;  %v923_v34 = vsel %vm922_vm4, %v921_v25, 0.0  ;;  %vm9710_vm4 = vcmask 16384  }
 0x1cc   : > { %v994_v61 = vsel %vm16262_vm3, %v985_v28, %v993_v26  ;;  %v1157_v28 = vpop.permute.xlu0 %1156 }
 0x1cd   : > { %v995_v7 = vmul.f32 %v994_v61, %v977_v48  ;;  %14285 = vmatpush3.bf16.msra.mxu0 %v14284_v39  ;;  %v1162_v30 = vrot.slane %v1157_v28, %v16191_v12 }
 0x1ce   : > { %15389 = vset.pattern.permute.xlu1 %v15741_v62  ;;  %v1036_v31 = vpop.permute.xlu1 %1035  ;;  %14286 = vmatprep.subr.bf16.mxu0 %v15745_v58 }
 0x1cf   : > { %v997_v36 = vsel %vm996_vm5, %v995_v7, 0.0  ;;  %1405 = vperm.xlu1 %15389, %v16117_v37   ;;  %v1041_v43 = vrot.slane %v1036_v31, %v16191_v12  ;;  %vm9691_vm5 = vcmask 17409  }
 0x1d0   : > { %v998_v4 = vadd.f32 %v997_v36, %v923_v34  ;;  %v1128_v7 = vpop.permute.xlu0 %1127 }
 0x1d1   : > { %14288 = vmatpush3.bf16.msra.mxu0 %v14287_v46  ;;  %v1133_v39 = vrot.slane %v1128_v7, %v16191_v12 }
 0x1d2   : > { %v1044_v62 = vpop.permute.xlu1 %1043  ;;  %14289 = vmatprep.subr.bf16.mxu0 %v15745_v58 }
 0x1d3   : > { %v1049_v44 = vrot.slane %v1044_v62, %v16191_v12  ;;  %15391 = vset.pattern.permute.xlu1 %v15747_v45 }
 0x1d4   : > { %1423 = vperm.xlu1 %15391, %v16117_v37   ;;  %v1080_v37 = vrot.slane %v1075_v40, %v16191_v12 }
 0x1d5   : > { %v1050_v47 = vsel %vm846_vm2, %v1041_v43, %v1049_v44  ;;  %14291 = vmatpush3.bf16.msra.mxu0 %v14290_v53  ;;  %v1192_v62 = vpop.permute.xlu0 %1191 }
 0x1d6   : > { %v1051_v48 = vmul.f32 %v1050_v47, %v1033_v3  ;;  %14292 = vmatprep.subr.bf16.mxu0 %v15745_v58  ;;  %v1197_v43 = vrot.slane %v1192_v62, %v16191_v12 }
 0x1d7   : > { %v1083_v51 = vpop.permute.xlu1 %1082 }
 0x1d8   : > { %1431 = vperm.xlu1 %15391, %v16121_v38   ;;  %v1088_v57 = vrot.slane %v1083_v51, %v16191_v12  ;;  %v15749_v38 = vmov 0.0  }
 0x1d9   : > { %12981 = vmatprep.mubr.msk.f32.mxu0 %vm15748_vm6, %v15749_v38  ;;  %13016 = vmatprep.mubr.msk.f32.mxu1 %vm15748_vm6, %v15749_v38  ;;  %2027 = vst.msk [vmem:[#allocation2 + $0x10] sm:$0xff] %vm2023_vm14, %v15749_v38  ;;  %2029 = vst.msk [vmem:[#allocation2 + $0x20] sm:$0xff] %vm2023_vm14, %v15749_v38  ;;  %vm10233_vm6 = vcmask 1044480  }
 0x1da   : > { %14294 = vmatpush3.bf16.msra.mxu0 %v14293_v59  ;;  %v1089_v0 = vsel %vm840_vm1, %v1080_v37, %v1088_v57  ;;  %v1240_v52 = vpop.permute.xlu0 %1239  ;;  %2024 = vst.msk [vmem:[#allocation2] sm:$0xff] %vm2023_vm14, %v15749_v38  ;;  %2031 = vst.msk [vmem:[#allocation2 + $0x30] sm:$0xff] %vm2023_vm14, %v15749_v38 }
 0x1db   : > { %2033 = vst.msk [vmem:[#allocation2 + $0x40] sm:$0xff] %vm2023_vm14, %v15749_v38  ;;  %2035 = vst.msk [vmem:[#allocation2 + $0x50] sm:$0xff] %vm2023_vm14, %v15749_v38 }
 0x1dc   : > { %v1092_v60 = vpop.permute.xlu1 %1091  ;;  %2037 = vst.msk [vmem:[#allocation2 + $0x60] sm:$0xff] %vm2023_vm14, %v15749_v38  ;;  %2039 = vst.msk [vmem:[#allocation2 + $0x70] sm:$0xff] %vm2023_vm14, %v15749_v38 }
 0x1dd   : > { %v1097_v63 = vrot.slane %v1092_v60, %v16191_v12  ;;  %2041 = vst.msk [vmem:[#allocation2 + $0x80] sm:$0xff] %vm2023_vm14, %v15749_v38  ;;  %2043 = vst.msk [vmem:[#allocation2 + $0x90] sm:$0xff] %vm2023_vm14, %v15749_v38 }
 0x1de   : > { %3713 = vst.msk [vmem:[#allocation3] sm:$0xff] %vm2023_vm14, %v15749_v38  ;;  %3714 = vst.msk [vmem:[#allocation3 + $0x8] sm:$0xff] %vm2023_vm14, %v15749_v38 }
 0x1df   : > { %v1106_v5 = vsel %vm843_vm0, %v1097_v63, %v1105_v54  ;;  %v1210_v37 = vpop.permute.xlu0 %1209  ;;  %3716 = vst.msk [vmem:[#allocation3 + $0x18] sm:$0xff] %vm2023_vm14, %v15749_v38  ;;  %3717 = vst.msk [vmem:[#allocation3 + $0x20] sm:$0xff] %vm2023_vm14, %v15749_v38 }
 0x1e0   : > { %v1107_v2 = vmul.f32 %v1106_v5, %v1089_v0  ;;  %v1215_v54 = vrot.slane %v1210_v37, %v16191_v12  ;;  %3719 = vst.msk [vmem:[#allocation3 + $0x30] sm:$0xff] %vm2023_vm14, %v15749_v38  ;;  %3720 = vst.msk [vmem:[#allocation3 + $0x38] sm:$0xff] %vm2023_vm14, %v15749_v38 }
 0x1e1   : > { %v1054_v9 = vpop.permute.xlu1 %1053  ;;  %3722 = vst.msk [vmem:[#allocation3 + $0x48] sm:$0xff] %vm2023_vm14, %v15749_v38  ;;  %3723 = vst.msk [vmem:[#allocation3 + $0x50] sm:$0xff] %vm2023_vm14, %v15749_v38 }
 0x1e2   : > { %v1059_v3 = vrot.slane %v1054_v9, %v16191_v12  ;;  %3725 = vst.msk [vmem:[#allocation3 + $0x60] sm:$0xff] %vm2023_vm14, %v15749_v38  ;;  %3726 = vst.msk [vmem:[#allocation3 + $0x68] sm:$0xff] %vm2023_vm14, %v15749_v38 }
 0x1e3   : > { %3728 = vst.msk [vmem:[#allocation3 + $0x78] sm:$0xff] %vm2023_vm14, %v15749_v38  ;;  %3729 = vst.msk [vmem:[#allocation3 + $0x80] sm:$0xff] %vm2023_vm14, %v15749_v38 }
 0x1e4   : > { %3731 = vst.msk [vmem:[#allocation3 + $0x90] sm:$0xff] %vm2023_vm14, %v15749_v38  ;;  %3732 = vst.msk [vmem:[#allocation3 + $0x98] sm:$0xff] %vm2023_vm14, %v15749_v38 }
 0x1e5   : > { %v1062_v13 = vpop.permute.xlu1 %1061  ;;  %3734 = vst.msk [vmem:[#allocation3 + $0xa8] sm:$0xff] %vm2023_vm14, %v15749_v38  ;;  %3735 = vst.msk [vmem:[#allocation3 + $0xb0] sm:$0xff] %vm2023_vm14, %v15749_v38 }
 0x1e6   : > { %v1067_v14 = vrot.slane %v1062_v13, %v16191_v12  ;;  %3737 = vst.msk [vmem:[#allocation3 + $0xc0] sm:$0xff] %vm2023_vm14, %v15749_v38  ;;  %3738 = vst.msk [vmem:[#allocation3 + $0xc8] sm:$0xff] %vm2023_vm14, %v15749_v38 }
 0x1e7   : > { %3740 = vst.msk [vmem:[#allocation3 + $0xd8] sm:$0xff] %vm2023_vm14, %v15749_v38  ;;  %3741 = vst.msk [vmem:[#allocation3 + $0xe0] sm:$0xff] %vm2023_vm14, %v15749_v38 }
 0x1e8   : > { %v1068_v16 = vsel %vm16262_vm3, %v1059_v3, %v1067_v14  ;;  %v1297_v3 = vpop.permute.xlu0 %1296  ;;  %3743 = vst.msk [vmem:[#allocation3 + $0xf0] sm:$0xff] %vm2023_vm14, %v15749_v38  ;;  %3744 = vst.msk [vmem:[#allocation3 + $0xf8] sm:$0xff] %vm2023_vm14, %v15749_v38 }
 0x1e9   : > { %v1069_v18 = vmul.f32 %v1068_v16, %v1051_v48  ;;  %v1302_v7 = vrot.slane %v1297_v3, %v16191_v12  ;;  %3746 = vst.msk [vmem:[#allocation3 + $0x108] sm:$0xff] %vm2023_vm14, %v15749_v38  ;;  %3747 = vst.msk [vmem:[#allocation3 + $0x110] sm:$0xff] %vm2023_vm14, %v15749_v38 }
 0x1ea   : > { %v1118_v20 = vpop.permute.xlu1 %1117  ;;  %3749 = vst.msk [vmem:[#allocation3 + $0x120] sm:$0xff] %vm2023_vm14, %v15749_v38  ;;  %3750 = vst.msk [vmem:[#allocation3 + $0x128] sm:$0xff] %vm2023_vm14, %v15749_v38 }
 0x1eb   : > { %v1071_v21 = vsel %vm1070_vm7, %v1069_v18, 0.0  ;;  %v1123_v22 = vrot.slane %v1118_v20, %v16191_v12  ;;  %3752 = vst.msk [vmem:[#allocation3 + $0x138] sm:$0xff] %vm2023_vm14, %v15749_v38  ;;  %3753 = vst.msk [vmem:[#allocation3 + $0x140] sm:$0xff] %vm2023_vm14, %v15749_v38  ;;  %vm11223_vm7 = vcmask 22528  }
 0x1ec   : > { %v1072_v23 = vadd.f32 %v1071_v21, %v998_v4  ;;  %v1322_v15 = vpop.permute.xlu0 %1321  ;;  %3755 = vst.msk [vmem:[#allocation3 + $0x150] sm:$0xff] %vm2023_vm14, %v15749_v38  ;;  %3756 = vst.msk [vmem:[#allocation3 + $0x158] sm:$0xff] %vm2023_vm14, %v15749_v38 }
 0x1ed   : > { %v1124_v25 = vsel %vm846_vm2, %v1115_v19, %v1123_v22  ;;  %3758 = vst.msk [vmem:[#allocation3 + $0x168] sm:$0xff] %vm2023_vm14, %v15749_v38  ;;  %3759 = vst.msk [vmem:[#allocation3 + $0x170] sm:$0xff] %vm2023_vm14, %v15749_v38 }
 0x1ee   : > { %v1125_v26 = vmul.f32 %v1124_v25, %v1107_v2  ;;  %3761 = vst.msk [vmem:[#allocation3 + $0x180] sm:$0xff] %vm2023_vm14, %v15749_v38  ;;  %3762 = vst.msk [vmem:[#allocation3 + $0x188] sm:$0xff] %vm2023_vm14, %v15749_v38 }
 0x1ef   : > { %v1149_v27 = vpop.permute.xlu1 %1148  ;;  %3764 = vst.msk [vmem:[#allocation3 + $0x198] sm:$0xff] %vm2023_vm14, %v15749_v38  ;;  %3765 = vst.msk [vmem:[#allocation3 + $0x1a0] sm:$0xff] %vm2023_vm14, %v15749_v38 }
 0x1f0   : > { %v1154_v1 = vrot.slane %v1149_v27, %v16191_v12  ;;  %v1332_v18 = vpop.permute.xlu0 %1331  ;;  %2028 = vst.msk [vmem:[#allocation2 + $0x18] sm:$0x3] %vm2025_vm15, %v15749_v38  ;;  %2030 = vst.msk [vmem:[#allocation2 + $0x28] sm:$0x3] %vm2025_vm15, %v15749_v38 }
 0x1f1   : > { %2026 = vst.msk [vmem:[#allocation2 + $0x8] sm:$0x3] %vm2025_vm15, %v15749_v38  ;;  %2032 = vst.msk [vmem:[#allocation2 + $0x38] sm:$0x3] %vm2025_vm15, %v15749_v38 }
 0x1f2   : > { %v1163_v33 = vsel %vm840_vm1, %v1154_v1, %v1162_v30  ;;  %v1327_v1 = vrot.slane %v1322_v15, %v16191_v12  ;;  %2034 = vst.msk [vmem:[#allocation2 + $0x48] sm:$0x3] %vm2025_vm15, %v15749_v38  ;;  %2036 = vst.msk [vmem:[#allocation2 + $0x58] sm:$0x3] %vm2025_vm15, %v15749_v38 }
 0x1f3   : > { %2038 = vst.msk [vmem:[#allocation2 + $0x68] sm:$0x3] %vm2025_vm15, %v15749_v38  ;;  %2040 = vst.msk [vmem:[#allocation2 + $0x78] sm:$0x3] %vm2025_vm15, %v15749_v38 }
 0x1f4   : > { %v1166_v29 = vpop.permute.xlu1 %1165  ;;  %v1379_v20 = vpop.permute.xlu0 %1378  ;;  %2042 = vst.msk [vmem:[#allocation2 + $0x88] sm:$0x3] %vm2025_vm15, %v15749_v38  ;;  %2044 = vst.msk [vmem:[#allocation2 + $0x98] sm:$0x3] %vm2025_vm15, %v15749_v38 }
 0x1f5   : > { %v1171_v31 = vrot.slane %v1166_v29, %v16191_v12  ;;  %3715 = vst.msk [vmem:[#allocation3 + $0x10] sm:$0x3] %vm2025_vm15, %v15749_v38  ;;  %3718 = vst.msk [vmem:[#allocation3 + $0x28] sm:$0x3] %vm2025_vm15, %v15749_v38 }
 0x1f6   : > { %3721 = vst.msk [vmem:[#allocation3 + $0x40] sm:$0x3] %vm2025_vm15, %v15749_v38  ;;  %3724 = vst.msk [vmem:[#allocation3 + $0x58] sm:$0x3] %vm2025_vm15, %v15749_v38 }
 0x1f7   : > { %3727 = vst.msk [vmem:[#allocation3 + $0x70] sm:$0x3] %vm2025_vm15, %v15749_v38  ;;  %3730 = vst.msk [vmem:[#allocation3 + $0x88] sm:$0x3] %vm2025_vm15, %v15749_v38 }
 0x1f8   : > { %v1174_v61 = vpop.permute.xlu1 %1173  ;;  %v1350_v25 = vpop.permute.xlu0 %1349  ;;  %3733 = vst.msk [vmem:[#allocation3 + $0xa0] sm:$0x3] %vm2025_vm15, %v15749_v38  ;;  %3736 = vst.msk [vmem:[#allocation3 + $0xb8] sm:$0x3] %vm2025_vm15, %v15749_v38 }
 0x1f9   : > { %v1179_v32 = vrot.slane %v1174_v61, %v16191_v12  ;;  %3739 = vst.msk [vmem:[#allocation3 + $0xd0] sm:$0x3] %vm2025_vm15, %v15749_v38  ;;  %3742 = vst.msk [vmem:[#allocation3 + $0xe8] sm:$0x3] %vm2025_vm15, %v15749_v38 }
 0x1fa   : > { %3745 = vst.msk [vmem:[#allocation3 + $0x100] sm:$0x3] %vm2025_vm15, %v15749_v38  ;;  %3748 = vst.msk [vmem:[#allocation3 + $0x118] sm:$0x3] %vm2025_vm15, %v15749_v38 }
 0x1fb   : > { %v1180_v34 = vsel %vm843_vm0, %v1171_v31, %v1179_v32  ;;  %v1337_v31 = vrot.slane %v1332_v18, %v16191_v12  ;;  %3751 = vst.msk [vmem:[#allocation3 + $0x130] sm:$0x3] %vm2025_vm15, %v15749_v38  ;;  %3754 = vst.msk [vmem:[#allocation3 + $0x148] sm:$0x3] %vm2025_vm15, %v15749_v38 }
 0x1fc   : > { %v1181_v36 = vmul.f32 %v1180_v34, %v1163_v33  ;;  %3757 = vst.msk [vmem:[#allocation3 + $0x160] sm:$0x3] %vm2025_vm15, %v15749_v38  ;;  %3760 = vst.msk [vmem:[#allocation3 + $0x178] sm:$0x3] %vm2025_vm15, %v15749_v38 }
 0x1fd   : > { %v1136_v4 = vpop.permute.xlu1 %1135  ;;  %3763 = vst.msk [vmem:[#allocation3 + $0x190] sm:$0x3] %vm2025_vm15, %v15749_v38  ;;  %3766 = vst.msk [vmem:[#allocation3 + $0x1a8] sm:$0x3] %vm2025_vm15, %v15749_v38 }
 0x1fe   : > { %v1141_v40 = vrot.slane %v1136_v4, %v16191_v12  ;;  %v1355_v4 = vrot.slane %v1350_v25, %v16191_v12 }
 0x200   : > { %v1142_v41 = vsel %vm16262_vm3, %v1133_v39, %v1141_v40 }
 0x201   : > { %v1143_v42 = vmul.f32 %v1142_v41, %v1125_v26 }
 0x202   : > { %v1184_v44 = vpop.permute.xlu1 %1183 }
 0x203   : > { %v1145_v45 = vsel %vm1144_vm8, %v1143_v42, 0.0  ;;  %v1189_v46 = vrot.slane %v1184_v44, %v16191_v12  ;;  %v1414_v44 = vpop.permute.xlu0 %1413 }
 0x204   : > { %v1146_v47 = vadd.f32 %v1145_v45, %v1072_v23  ;;  %v1245_v23 = vrot.slane %v1240_v52, %v16191_v12  ;;  %v1384_v52 = vrot.slane %v1379_v20, %v16191_v12 }
 0x205   : > { %v1198_v48 = vsel %vm846_vm2, %v1189_v46, %v1197_v43 }
 0x206   : > { %v1199_v49 = vmul.f32 %v1198_v48, %v1181_v36 }
 0x207   : > { %v1223_v50 = vpop.permute.xlu1 %1222 }
 0x208   : > { %v1228_v30 = vrot.slane %v1223_v50, %v16191_v12 }
 0x20b   : > { %v1231_v51 = vpop.permute.xlu1 %1230 }
 0x20c   : > { %v1236_v26 = vrot.slane %v1231_v51, %v16191_v12 }
 0x20e   : > { %v1237_v39 = vsel %vm840_vm1, %v1228_v30, %v1236_v26  ;;  %v1549_v26 = vld [vmem:[#allocation11 + $0x10] sm:$0xff] }
 0x210   : > { %v1248_v53 = vpop.permute.xlu1 %1247 }
 0x211   : > { %v1253_v22 = vrot.slane %v1248_v53, %v16191_v12  ;;  %v1419_v53 = vrot.slane %v1414_v44, %v16191_v12  ;;  %v1704_v44 = vld [vmem:[%s20590_s7 + $0x18] sm:$0xff] }
 0x213   : > { %v1254_v61 = vsel %vm843_vm0, %v1245_v23, %v1253_v22  ;;  %v1547_v22 = vld [vmem:[#allocation11] sm:$0xff]  ;;  %v1548_v23 = vld [vmem:[#allocation11 + $0x8] sm:$0xff] }
 0x214   : > { %v1255_v45 = vmul.f32 %v1254_v61, %v1237_v39  ;;  %v14296_v25 = vpack.c.bf16 %v1548_v23, %v1547_v22  ;;  %v1555_v61 = vld [vmem:[#allocation11 + $0x40] sm:$0xff]  ;;  %v1560_v39 = vld [vmem:[#allocation11 + $0x68] sm:$0xff] }
 0x215   : > { %v1202_v55 = vpop.permute.xlu1 %1201  ;;  %v1669_v22 = vld [vmem:[%s20589_s6 + $0x100] sm:$0xff] }
 0x216   : > { %v1207_v56 = vrot.slane %v1202_v55, %v16191_v12  ;;  %14297 = vmatpush3.bf16.msra.mxu1 %v14296_v25  ;;  %v1673_v23 = vld [vmem:[%s20589_s6 + $0x120] sm:$0xff] }
 0x217   : > { %14298 = vmatprep.subr.bf16.mxu1 %v15745_v58  ;;  %v14345_v25 = vpack.c.bf16 %v1673_v23, %v1669_v22  ;;  %v1690_v22 = vld [vmem:[%s20589_s6 + $0x1a8] sm:$0xff]  ;;  %v1688_v23 = vld [vmem:[%s20589_s6 + $0x198] sm:$0xff] }
 0x218   : > { %v1216_v57 = vsel %vm16262_vm3, %v1207_v56, %v1215_v54 }
 0x219   : > { %v1217_v59 = vmul.f32 %v1216_v57, %v1199_v49 }
 0x21a   : > { %v1258_v60 = vpop.permute.xlu1 %1257 }
 0x21b   : > { %v1219_v63 = vsel %vm1218_vm9, %v1217_v59, 0.0  ;;  %v1263_v32 = vrot.slane %v1258_v60, %v16191_v12 }
 0x21c   : > { %v16372_v0 = vadd.f32 %v1219_v63, %v1146_v47 }
 0x21e   : > { %v1266_v5 = vpop.permute.xlu1 %1265 }
 0x21f   : > { %v1271_v28 = vrot.slane %v1266_v5, %v16191_v12 }
 0x221   : > { %v1272_v40 = vsel %vm846_vm2, %v1263_v32, %v1271_v28  ;;  %v1557_v32 = vld [vmem:[#allocation11 + $0x50] sm:$0xff] }
 0x222   : > { %v1273_v50 = vmul.f32 %v1272_v40, %v1255_v45  ;;  %v1561_v40 = vld [vmem:[#allocation11 + $0x70] sm:$0xff] }
 0x223   : > { %v1305_v2 = vpop.permute.xlu1 %1304 }
 0x224   : > { %v1310_v33 = vrot.slane %v1305_v2, %v16191_v12 }
 0x226   : > { %v1311_v46 = vsel %vm840_vm1, %v1302_v7, %v1310_v33  ;;  %v1556_v7 = vld [vmem:[#allocation11 + $0x48] sm:$0xff]  ;;  %v1558_v33 = vld [vmem:[#allocation11 + $0x58] sm:$0xff] }
 0x228   : > { %v1314_v8 = vpop.permute.xlu1 %1313 }
 0x229   : > { %v1319_v29 = vrot.slane %v1314_v8, %v16191_v12 }
 0x22b   : > { %v1328_v62 = vsel %vm843_vm0, %v1319_v29, %v1327_v1  ;;  %v1553_v29 = vld [vmem:[#allocation11 + $0x30] sm:$0xff]  ;;  %v1554_v1 = vld [vmem:[#allocation11 + $0x38] sm:$0xff] }
 0x22c   : > { %v1329_v51 = vmul.f32 %v1328_v62, %v1311_v46  ;;  %v14305_v30 = vpack.c.bf16 %v1554_v1, %v1553_v29  ;;  %v1562_v62 = vld [vmem:[#allocation11 + $0x78] sm:$0xff] }
 0x22d   : > { %v1276_v9 = vpop.permute.xlu1 %1275  ;;  %v1708_v46 = vld [vmem:[%s20590_s7 + $0x38] sm:$0xff] }
 0x22e   : > { %v1281_v41 = vrot.slane %v1276_v9, %v16191_v12 }
 0x231   : > { %v1284_v13 = vpop.permute.xlu1 %1283 }
 0x232   : > { %v1289_v34 = vrot.slane %v1284_v13, %v16191_v12 }
 0x234   : > { %v1290_v47 = vsel %vm16262_vm3, %v1281_v41, %v1289_v34  ;;  %v14311_v34 = vpack.c.bf16 %v1558_v33, %v1557_v32  ;;  %v14317_v41 = vpack.c.bf16 %v1562_v62, %v1561_v40  ;;  %v1707_v32 = vld [vmem:[%s20590_s7 + $0x30] sm:$0xff]  ;;  %v1640_v33 = vld [vmem:[%s20589_s6 + $0x18] sm:$0xff] }
 0x235   : > { %v1291_v57 = vmul.f32 %v1290_v47, %v1273_v50  ;;  %v1705_v47 = vld [vmem:[%s20590_s7 + $0x20] sm:$0xff]  ;;  %v1638_v50 = vld [vmem:[%s20589_s6 + $0x8] sm:$0xff]  ;;  %v1643_v40 = vld [vmem:[%s20589_s6 + $0x30] sm:$0xff] }
 0x236   : > { %v1340_v14 = vpop.permute.xlu1 %1339 }
 0x237   : > { %v1345_v36 = vrot.slane %v1340_v14, %v16191_v12  ;;  %v1293_v9 = vsel %vm1292_vm10, %v1291_v57, 0.0  ;;  %v1650_v57 = vld [vmem:[%s20589_s6 + $0x68] sm:$0xff] }
 0x238   : > { %v1294_v11 = vadd.f32 %v1293_v9, %v16372_v0  ;;  %v1552_v0 = vld [vmem:[#allocation11 + $0x28] sm:$0xff] }
 0x239   : > { %v1346_v48 = vsel %vm846_vm2, %v1337_v31, %v1345_v36  ;;  %v14302_v28 = vpack.c.bf16 %v1552_v0, %v1551_v24  ;;  %v14308_v31 = vpack.c.bf16 %v1556_v7, %v1555_v61  ;;  %v1559_v36 = vld [vmem:[#allocation11 + $0x60] sm:$0xff] }
 0x23a   : > { %v1347_v59 = vmul.f32 %v1346_v48, %v1329_v51  ;;  %v14323_v48 = vpack.c.bf16 %v1708_v46, %v1704_v44  ;;  %v1642_v51 = vld [vmem:[%s20589_s6 + $0x28] sm:$0xff]  ;;  %v1651_v46 = vld [vmem:[%s20589_s6 + $0x70] sm:$0xff] }
 0x23b   : > { %v1371_v16 = vpop.permute.xlu1 %1370 }
 0x23c   : > { %v1376_v37 = vrot.slane %v1371_v16, %v16191_v12 }
 0x23e   : > { %v1385_v2 = vsel %vm840_vm1, %v1376_v37, %v1384_v52  ;;  %v14327_v52 = vpack.c.bf16 %v1642_v51, %v1638_v50  ;;  %v1637_v37 = vld [vmem:[%s20589_s6] sm:$0xff]  ;;  %v1655_v50 = vld [vmem:[%s20589_s6 + $0x90] sm:$0xff]  ;;  %vm2477_vm1 = vcmask 1045504  }
 0x23f   : > { %v1659_v51 = vld [vmem:[%s20589_s6 + $0xb0] sm:$0xff] }
 0x240   : > { %v1388_v19 = vpop.permute.xlu1 %1387 }
 0x241   : > { %v1393_v54 = vrot.slane %v1388_v19, %v16191_v12 }
 0x244   : > { %v1396_v21 = vpop.permute.xlu1 %1395 }
 0x245   : > { %v1401_v49 = vrot.slane %v1396_v21, %v16191_v12 }
 0x247   : > { %v1402_v63 = vsel %vm843_vm0, %v1393_v54, %v1401_v49  ;;  %v1641_v54 = vld [vmem:[%s20589_s6 + $0x20] sm:$0xff]  ;;  %vm2210_vm0 = vcmask 1046528  }
 0x248   : > { %v1403_v13 = vmul.f32 %v1402_v63, %v1385_v2  ;;  %v1649_v63 = vld [vmem:[%s20589_s6 + $0x60] sm:$0xff]  ;;  %v1654_v2 = vld [vmem:[%s20589_s6 + $0x88] sm:$0xff] }
 0x249   : > { %v1358_v27 = vpop.permute.xlu1 %1357 }
 0x24a   : > { %v1363_v42 = vrot.slane %v1358_v27, %v16191_v12  ;;  %v14299_v27 = vpack.c.bf16 %v1550_v17, %v1549_v26  ;;  %v1537_v26 = vpop.permute.xlu0 %1536 }
 0x24c   : > { %v1364_v55 = vsel %vm16262_vm3, %v1355_v4, %v1363_v42  ;;  %14300 = vmatpush3.bf16.msra.mxu1 %v14299_v27  ;;  %v14314_v4 = vpack.c.bf16 %v1560_v39, %v1559_v36  ;;  %v1702_v42 = vld [vmem:[%s20590_s7 + $0x8] sm:$0xff]  ;;  %v1542_v27 = vrot.slane %v1537_v26, %v16191_v12 }
 0x24d   : > { %v1365_v5 = vmul.f32 %v1364_v55, %v1347_v59  ;;  %14301 = vmatprep.subr.bf16.mxu1 %v15745_v58  ;;  %v14329_v55 = vpack.c.bf16 %v1641_v54, %v1637_v37  ;;  %v14369_v37 = vpack.c.bf16 %v1659_v51, %v1655_v50 }
 0x24e   : > { %v1406_v43 = vpop.permute.xlu1 %1405  ;;  %15397 = vrcp.f32 %v1542_v27  ;;  %v1685_v27 = vld [vmem:[%s20589_s6 + $0x180] sm:$0xff] }
 0x24f   : > { %v1411_v56 = vrot.slane %v1406_v43, %v16191_v12  ;;  %v1367_v18 = vsel %vm1366_vm11, %v1365_v5, 0.0  ;;  %v1706_v43 = vld [vmem:[%s20590_s7 + $0x28] sm:$0xff] }
 0x250   : > { %v1368_v19 = vadd.f32 %v1367_v18, %v1294_v11  ;;  %14303 = vmatpush3.bf16.msra.mxu1 %v14302_v28  ;;  %v14319_v45 = vpack.c.bf16 %v1706_v43, %v1702_v42  ;;  %v1665_v11 = vld [vmem:[%s20589_s6 + $0xe0] sm:$0xff]  ;;  %v1652_v42 = vld [vmem:[%s20589_s6 + $0x78] sm:$0xff] }
 0x251   : > { %v1420_v8 = vsel %vm846_vm2, %v1411_v56, %v1419_v53  ;;  %14304 = vmatprep.subr.bf16.mxu1 %v15745_v58  ;;  %v16460_v53 = vld [vmem:[%s552_s30] sm:$0x1]  ;;  %v1646_v56 = vld [vmem:[%s20589_s6 + $0x48] sm:$0xff]  ;;  %vm3391_vm2 = vcmask 523264  }
 0x252   : > { %v1421_v16 = vmul.f32 %v1420_v8, %v1403_v13  ;;  %14320 = vmatprep.subr.bf16.mxu0 %v14319_v45  ;;  %v14331_v59 = vpack.c.bf16 %v1650_v57, %v1646_v56  ;;  %v1658_v8 = vld [vmem:[%s20589_s6 + $0xa8] sm:$0xff]  ;;  %v1653_v13 = vld [vmem:[%s20589_s6 + $0x80] sm:$0xff]  ;;  %v1647_v45 = vld [vmem:[%s20589_s6 + $0x50] sm:$0xff] }
 0x253   : > { %v1424_v60 = vpop.permute.xlu1 %1423  ;;  %v14335_v9 = vpack.c.bf16 %v1658_v8, %v1654_v2  ;;  %v1667_v56 = vld [vmem:[%s20589_s6 + $0xf0] sm:$0xff]  ;;  %v1672_v57 = vld [vmem:[%s20589_s6 + $0x118] sm:$0xff] }
 0x254   : > { %v1429_v14 = vrot.slane %v1424_v60, %v16191_v12  ;;  %14306 = vmatpush3.bf16.msra.mxu1 %v14305_v30  ;;  %v1645_v60 = vld [vmem:[%s20589_s6 + $0x40] sm:$0xff]  ;;  %v1675_v2 = vld [vmem:[%s20589_s6 + $0x130] sm:$0xff] }
 0x255   : > { %14307 = vmatprep.subr.bf16.mxu1 %v15745_v58  ;;  %v14333_v5 = vpack.c.bf16 %v1649_v63, %v1645_v60 }
 0x257   : > { %v1432_v3 = vpop.permute.xlu1 %1431 }
 0x258   : > { %v1437_v15 = vrot.slane %v1432_v3, %v16191_v12  ;;  %14309 = vmatpush3.bf16.msra.mxu1 %v14308_v31  ;;  %v1657_v3 = vld [vmem:[%s20589_s6 + $0xa0] sm:$0xff]  ;;  %v15398_v29 = vpop.eup %15397  ;;  %v1703_v31 = vld [vmem:[%s20590_s7 + $0x10] sm:$0xff] }
 0x259   : > { %14310 = vmatprep.subr.bf16.mxu1 %v15745_v58  ;;  %v14325_v36 = vpack.c.bf16 %v1707_v32, %v1703_v31  ;;  %v1696_v31 = vld [vmem:[%s20589_s6 + $0x1d8] sm:$0xff] }
 0x25a   : > { %v1438_v10 = vsel %vm16262_vm3, %v1429_v14, %v1437_v15  ;;  %v14337_v14 = vpack.c.bf16 %v1657_v3, %v1653_v13  ;;  %v1662_v15 = vld [vmem:[%s20589_s6 + $0xc8] sm:$0xff]  ;;  %v1680_v3 = vld [vmem:[%s20589_s6 + $0x158] sm:$0xff]  ;;  %vm9617_vm3 = vcmask 23552  }
 0x25b   : > { %v1439_v35 = vmul.f32 %v1438_v10, %v1421_v16  ;;  %v1666_v16 = vld [vmem:[%s20589_s6 + $0xe8] sm:$0xff]  ;;  %v1661_v10 = vld [vmem:[%s20589_s6 + $0xc0] sm:$0xff]  ;;  %v1700_v32 = vld [vmem:[%s20589_s6 + $0x1f8] sm:$0xff] }
 0x25c   : > { %14312 = vmatpush3.bf16.msra.mxu1 %v14311_v34  ;;  %v14339_v18 = vpack.c.bf16 %v1666_v16, %v1662_v15  ;;  %v1644_v34 = vld [vmem:[%s20589_s6 + $0x38] sm:$0xff]  ;;  %v1682_v13 = vld [vmem:[%s20589_s6 + $0x168] sm:$0xff]  ;;  %v1677_v16 = vld [vmem:[%s20589_s6 + $0x140] sm:$0xff] }
 0x25d   : > { %v1441_v20 = vsel %vm1440_vm12, %v1439_v35, 0.0  ;;  %14313 = vmatprep.subr.bf16.mxu1 %v15745_v58  ;;  %v14341_v35 = vpack.c.bf16 %v1665_v11, %v1661_v10  ;;  %v14359_v39 = vpack.c.bf16 %v1644_v34, %v1640_v33  ;;  %v1684_v15 = vld [vmem:[%s20589_s6 + $0x178] sm:$0xff]  ;;  %v1693_v33 = vld [vmem:[%s20589_s6 + $0x1c0] sm:$0xff]  ;;  %v14387_v34 = vpack.c.bf16 %v1700_v32, %v1696_v31 }
 0x25e   : > { %v1442_v21 = vadd.f32 %v1441_v20, %v1368_v19  ;;  %v1670_v19 = vld [vmem:[%s20589_s6 + $0x108] sm:$0xff]  ;;  %v14379_v10 = vpack.c.bf16 %v1684_v15, %v1680_v3 }
 0x25f   : > { %v1674_v20 = vld [vmem:[%s20589_s6 + $0x128] sm:$0xff] }
 0x260   : > { %12982 = vmatmul.mubr.f32.vlgmr.msra.gmra.mrb[0].mxu0 %v1442_v21  ;;  %14315 = vmatpush3.bf16.msra.mxu1 %v14314_v4  ;;  %v14343_v21 = vpack.c.bf16 %v1674_v20, %v1670_v19  ;;  %v1639_v4 = vld [vmem:[%s20589_s6 + $0x10] sm:$0xff]  ;;  %v1686_v20 = vld [vmem:[%s20589_s6 + $0x188] sm:$0xff] }
 0x261   : > { %1777 = vmatprep.mubr.f32.mxu0 %v15749_v38  ;;  %14316 = vmatprep.subr.bf16.mxu1 %v15745_v58  ;;  %v1701_v58 = vld [vmem:[%s20590_s7] sm:$0xff]  ;;  %v14361_v43 = vpack.c.bf16 %v1643_v40, %v1639_v4  ;;  %v1683_v19 = vld [vmem:[%s20589_s6 + $0x170] sm:$0xff]  ;;  %v14351_v26 = vpack.c.bf16 %v1690_v22, %v1686_v20 }
 0x262   : > { %v14321_v49 = vpack.c.bf16 %v1705_v47, %v1701_v58  ;;  %v1656_v58 = vld [vmem:[%s20589_s6 + $0x98] sm:$0xff]  ;;  %v1699_v4 = vld [vmem:[%s20589_s6 + $0x1f0] sm:$0xff] }
 0x263   : > { %v1660_v47 = vld [vmem:[%s20589_s6 + $0xb8] sm:$0xff] }
 0x264   : > { %14318 = vmatpush3.bf16.msra.mxu1 %v14317_v41  ;;  %14322 = vmatpush1.bf16.msra.mxu0 %v14321_v49  ;;  %v1648_v41 = vld [vmem:[%s20589_s6 + $0x58] sm:$0xff]  ;;  %v14367_v49 = vpack.c.bf16 %v1660_v47, %v1656_v58  ;;  %v2005_v58 = vsub.s32 1, %v16184_v6  ;;  %v2013_v47 = vsub.s32 3, %v16184_v6 }
 0x265   : > { %14324 = vmatprep.subr.bf16.mxu1 %v14323_v48  ;;  %14328 = vmatprep.subr.bf16.mxu0 %v14327_v52  ;;  %v14363_v44 = vpack.c.bf16 %v1652_v42, %v1648_v41  ;;  %v14365_v48 = vpack.c.bf16 %v1651_v46, %v1647_v45  ;;  %v1664_v52 = vld [vmem:[%s20589_s6 + $0xd8] sm:$0xff]  ;;  %v1997_v46 = vld [vmem:[%s20591_s8] sm:$0xf] }
 0x266   : > { %v2002_v50 = vrot.slane %v1997_v46, %v16191_v12 }
 0x267   : > { %11431 = vmatmul.mubr.msk.f32.vlgmr.msra.gmra.mrb[2].mxu0 %vm1709_vm13, %v16460_v53 }
 0x268   : > { %14330 = vmatpush1.bf16.msra.mxu0 %v14329_v55  ;;  %1919 = vmatprep.mubr.f32.mxu0 %v15749_v38  ;;  %v1663_v55 = vld [vmem:[%s20589_s6 + $0xd0] sm:$0xff] }
 0x269   : > { %14332 = vmatprep.subr.bf16.mxu0 %v14331_v59  ;;  %v1676_v59 = vld [vmem:[%s20589_s6 + $0x138] sm:$0xff]  ;;  %v14373_v60 = vpack.c.bf16 %v1667_v56, %v1663_v55 }
 0x26a   : > { %v14375_v63 = vpack.c.bf16 %v1676_v59, %v1672_v57  ;;  %v2163_v55 = vld [vmem:[#allocation12 + $0x30] sm:$0xff]  ;;  %v2164_v56 = vld [vmem:[#allocation12 + $0x38] sm:$0xff] }
 0x26c   : > { %14334 = vmatpush1.bf16.msra.mxu0 %v14333_v5  ;;  %v1671_v5 = vld [vmem:[%s20589_s6 + $0x110] sm:$0xff] }
 0x26d   : > { %14336 = vmatprep.subr.bf16.mxu0 %v14335_v9  ;;  %v14377_v8 = vpack.c.bf16 %v1675_v2, %v1671_v5  ;;  %v1678_v9 = vld [vmem:[%s20589_s6 + $0x148] sm:$0xff]  ;;  %v14395_v5 = vpack.c.bf16 %v2164_v56, %v2163_v55 }
 0x270   : > { %14338 = vmatpush1.bf16.msra.mxu0 %v14337_v14  ;;  %v14347_v14 = vpack.c.bf16 %v1682_v13, %v1678_v9  ;;  %v16831_v9 = vld [vmem:[#allocation2 + $0x8] sm:$0x3] }
 0x271   : > { %14340 = vmatprep.subr.bf16.mxu0 %v14339_v18  ;;  %v1681_v18 = vld [vmem:[%s20589_s6 + $0x160] sm:$0xff]  ;;  %v2212_v15 = vrot.slane %v16831_v9, 1 }
 0x272   : > { %v14349_v11 = vpack.c.bf16 %v1681_v18, %v1677_v16 }
 0x274   : > { %14342 = vmatpush1.bf16.msra.mxu0 %v14341_v35  ;;  %v1679_v35 = vld [vmem:[%s20589_s6 + $0x150] sm:$0xff] }
 0x275   : > { %14344 = vmatprep.subr.bf16.mxu0 %v14343_v21  ;;  %v14381_v21 = vpack.c.bf16 %v1683_v19, %v1679_v35 }
 0x278   : > { %14346 = vmatpush1.bf16.msra.mxu0 %v14345_v25  ;;  %v1692_v25 = vld [vmem:[%s20589_s6 + $0x1b8] sm:$0xff] }
 0x279   : > { %14348 = vmatprep.subr.bf16.mxu0 %v14347_v14 }
 0x27c   : > { %14350 = vmatpush1.bf16.msra.mxu0 %v14349_v11  ;;  %v2158_v11 = vld [vmem:[#allocation12 + $0x8] sm:$0xff] }
 0x27d   : > { %14352 = vmatprep.subr.bf16.mxu0 %v14351_v26 }
 0x333   : > { %v1525_v17 = vpop.f32.mrb[0].mxu0 }
 0x334   : > { %v1529_v24 = vmul.f32 %v1525_v17, %v1525_v17  ;;  %v12983_v0 = vpop.f32.mrb[1].mxu0  ;;  %v14383_v17 = vpack.c.bf16 %v1692_v25, %v1688_v23 }
 0x335   : > { %v1687_v0 = vld [vmem:[%s20589_s6 + $0x190] sm:$0xff] }
 0x336   : > { %v1530_v28 = vadd.f32 1e-12, %v1529_v24  ;;  %v1689_v24 = vld [vmem:[%s20589_s6 + $0x1a0] sm:$0xff] }
 0x338   : > { %15399 = vlog2.f32 %v1530_v28  ;;  %v14353_v28 = vpack.c.bf16 %v1689_v24, %v1685_v27  ;;  %v2159_v27 = vld [vmem:[#allocation12 + $0x10] sm:$0xff]  ;;  %v2160_v24 = vld [vmem:[#allocation12 + $0x18] sm:$0xff] }
 0x339   : > { %v14403_v32 = vpack.c.bf16 %v2160_v24, %v2159_v27 }
 0x33a   : > { %14354 = vmatpush1.bf16.msra.mxu0 %v14353_v28 }
 0x342   : > { %v15400_v1 = vpop.eup %15399 }
 0x343   : > { %v1532_v30 = vmul.f32 0.6931472, %v15400_v1  ;;  %v1694_v1 = vld [vmem:[%s20589_s6 + $0x1c8] sm:$0xff] }
 0x345   : > { %v1544_v61 = vmul.f32 %v15398_v29, %v1532_v30  ;;  %v1691_v29 = vld [vmem:[%s20589_s6 + $0x1b0] sm:$0xff]  ;;  %v1698_v30 = vld [vmem:[%s20589_s6 + $0x1e8] sm:$0xff] }
 0x347   : > { %v1545_v7 = vmul.f32 1.442695, %v1544_v61  ;;  %v14385_v61 = vpack.c.bf16 %v1691_v29, %v1687_v0 }
 0x349   : > { %15401 = vpow2.f32 %v1545_v7  ;;  %v14355_v7 = vpack.c.bf16 %v1698_v30, %v1694_v1 }
 0x34b   : > { %14356 = vmatprep.subr.bf16.mxu0 %v14355_v7 }
 0x353   : > { %v16538_v62 = vpop.eup %15401 }
 0x354   : > { %13017 = vmatmul.mubr.f32.vlgmr.msra.gmra.mrb[0].mxu1 %v16538_v62 }
 0x355   : > { %14326 = vmatpush1.bf16.msra.mxu1 %v14325_v36  ;;  %1848 = vmatprep.mubr.f32.mxu1 %v15749_v38  ;;  %v1697_v36 = vld [vmem:[%s20589_s6 + $0x1e0] sm:$0xff] }
 0x356   : > { %14360 = vmatprep.subr.bf16.mxu1 %v14359_v39  ;;  %v1695_v39 = vld [vmem:[%s20589_s6 + $0x1d0] sm:$0xff]  ;;  %v14357_v40 = vpack.c.bf16 %v1697_v36, %v1693_v33  ;;  %v2165_v36 = vld [vmem:[#allocation12 + $0x40] sm:$0xff] }
 0x357   : > { %v14389_v41 = vpack.c.bf16 %v1699_v4, %v1695_v39  ;;  %v2166_v39 = vld [vmem:[#allocation12 + $0x48] sm:$0xff] }
 0x358   : > { %11432 = vmatmul.mubr.msk.f32.vlgmr.msra.gmra.mrb[2].mxu1 %vm1709_vm13, %v16460_v53  ;;  %v1668_v53 = vld [vmem:[%s20589_s6 + $0xf8] sm:$0xff]  ;;  %14358 = vmatpush1.bf16.msra.mxu0 %v14357_v40 }
 0x359   : > { %14362 = vmatpush1.bf16.msra.mxu1 %v14361_v43  ;;  %1990 = vmatprep.mubr.f32.mxu1 %v15749_v38  ;;  %v14371_v54 = vpack.c.bf16 %v1668_v53, %v1664_v52  ;;  %v2006_v52 = vrot.slane %v1997_v46, %v2005_v58  ;;  %v2014_v53 = vrot.slane %v1997_v46, %v2013_v47 }
 0x35a   : > { %14364 = vmatprep.subr.bf16.mxu1 %v14363_v44 }
 0x35d   : > { %14366 = vmatpush1.bf16.msra.mxu1 %v14365_v48  ;;  %v2161_v48 = vld [vmem:[#allocation12 + $0x20] sm:$0xff] }
 0x35e   : > { %14368 = vmatprep.subr.bf16.mxu1 %v14367_v49  ;;  %v2162_v49 = vld [vmem:[#allocation12 + $0x28] sm:$0xff] }
 0x35f   : > { %v14391_v38 = vpack.c.bf16 %v2162_v49, %v2161_v48 }
 0x361   : > { %14370 = vmatpush1.bf16.msra.mxu1 %v14369_v37  ;;  %14392 = vmatprep.subr.bf16.mxu0 %v14391_v38 }
 0x362   : > { %14372 = vmatprep.subr.bf16.mxu1 %v14371_v54 }
 0x365   : > { %14374 = vmatpush1.bf16.msra.mxu1 %v14373_v60 }
 0x366   : > { %14376 = vmatprep.subr.bf16.mxu1 %v14375_v63 }
 0x369   : > { %14378 = vmatpush1.bf16.msra.mxu1 %v14377_v8  ;;  %v16829_v8 = vld [vmem:[#allocation2] sm:$0xff] }
 0x36a   : > { %14380 = vmatprep.subr.bf16.mxu1 %v14379_v10  ;;  %v2211_v14 = vrot.slane %v16829_v8, 1 }
 0x36c   : > { %v2213_v10 = vsel %vm2210_vm0, %v2211_v14, %v2212_v15  ;;  %v2168_v14 = vld [vmem:[#allocation12 + $0x58] sm:$0xff] }
 0x36d   : > { %14382 = vmatpush1.bf16.msra.mxu1 %v14381_v21 }
 0x36e   : > { %14384 = vmatprep.subr.bf16.mxu1 %v14383_v17 }
 0x371   : > { %14386 = vmatpush1.bf16.msra.mxu1 %v14385_v61 }
 0x372   : > { %14388 = vmatprep.subr.bf16.mxu1 %v14387_v34 }
 0x375   : > { %14390 = vmatpush1.bf16.msra.mxu1 %v14389_v41  ;;  %v14407_v41 = vpack.c.bf16 %v2166_v39, %v2165_v36 }
 0x427   : > { %v1629_v42 = vpop.f32.mrb[0].mxu1 }
 0x428   : > { %15403 = vrcp.f32 %v1629_v42  ;;  %v13018_v43 = vpop.f32.mrb[1].mxu1 }
 0x432   : > { %v15404_v44 = vpop.eup %15403 }
 0x433   : > { %v16666_v45 = vmul.f32 %v15404_v44, %v16538_v62  ;;  %v2009_v62 = vsub.s32 2, %v16184_v6 }
 0x435   : > { %1920 = vmatmul.mubr.f32.vlgmr.msra.gmra.mrb[2].mxu0 %v16666_v45  ;;  %1991 = vmatmul.mubr.f32.vlgmr.msra.gmra.mrb[2].mxu1 %v16666_v45  ;;  %1635 = vst [vmem:[%s612_s27] sm:$0x1] %v16666_v45  ;;  %v2010_v51 = vrot.slane %v1997_v46, %v2009_v62 }
 0x436   : > { %14394 = vmatpush3.bf16.msra.mxu0 %v14391_v38  ;;  %13027 = vmatprep.mubr.msk.f32.mxu0 %vm2023_vm14, %v2213_v10 }
 0x437   : > { %14396 = vmatprep.subr.bf16.mxu0 %v14395_v5 }
 0x43a   : > { %14398 = vmatpush3.bf16.msra.mxu0 %v14395_v5 }
 0x508   : > { %v1921_v37 = vpop.f32.mrb[2].mxu0  ;;  %v1992_v54 = vpop.f32.mrb[2].mxu1 }
 0x509   : > { %v2019_v57 = vadd.f32 %v2002_v50, %v1921_v37  ;;  %v2021_v59 = vadd.f32 %v2010_v51, %v1992_v54  ;;  %v1923_v60 = vpop.f32.mrb[3].mxu0  ;;  %v1994_v63 = vpop.f32.mrb[3].mxu1 }
 0x50a   : > { %v2020_v6 = vadd.f32 %v2006_v52, %v1923_v60  ;;  %v2022_v2 = vadd.f32 %v2014_v53, %v1994_v63 }
 0x50b   : > { %v2048_v13 = vrot.slane %v2019_v57, %v16191_v12  ;;  %v2094_v3 = vrot.slane %v2021_v59, %v16191_v12 }
 0x50c   : > { %v2071_v16 = vrot.slane %v2020_v6, %v16191_v12  ;;  %v2117_v18 = vrot.slane %v2022_v2, %v16191_v12  ;;  %v2157_v12 = vld [vmem:[#allocation12] sm:$0xff] }
 0x50d   : > { %2063 = vrot.lane.b32.xlu0 %v2048_v13, %s15750_s23  ;;  %2053 = vrot.lane.b32.xlu1 %v2048_v13, %s15751_s9  ;;  %2050 = vst.msk [vmem:[#allocation2 + $0x11] sm:$0x3] %vm2025_vm15, %v2048_v13  ;;  %2051 = vst.msk [vmem:[#allocation2 + $0x21] sm:$0x3] %vm2025_vm15, %v2048_v13  ;;  %v14399_v35 = vpack.c.bf16 %v2158_v11, %v2157_v12  ;;  %v2478_v12 = vrot.slane %v16829_v8, 2  ;;  %v2479_v11 = vrot.slane %v16831_v9, 2 }
 0x50e   : > { %2096 = vst.msk [vmem:[#allocation2 + $0x51] sm:$0x3] %vm2025_vm15, %v2094_v3  ;;  %2097 = vst.msk [vmem:[#allocation2 + $0x61] sm:$0x3] %vm2025_vm15, %v2094_v3 }
 0x50f   : > { %2073 = vst.msk [vmem:[#allocation2 + $0x31] sm:$0x3] %vm2025_vm15, %v2071_v16  ;;  %2074 = vst.msk [vmem:[#allocation2 + $0x41] sm:$0x3] %vm2025_vm15, %v2071_v16  ;;  %14400 = vmatprep.subr.bf16.mxu0 %v14399_v35 }
 0x510   : > { %2119 = vst.msk [vmem:[#allocation2 + $0x71] sm:$0x3] %vm2025_vm15, %v2117_v18  ;;  %2120 = vst.msk [vmem:[#allocation2 + $0x81] sm:$0x3] %vm2025_vm15, %v2117_v18 }
 0x511   : > { %2058 = vrot.lane.b32.xlu1 %v2048_v13, %s15752_s18  ;;  %2099 = vrot.lane.b32.xlu0 %v2094_v3, %s15751_s9 }
 0x515   : > { %2104 = vrot.lane.b32.xlu1 %v2094_v3, %s15752_s18  ;;  %2081 = vrot.lane.b32.xlu0 %v2071_v16, %s15752_s18 }
 0x519   : > { %2076 = vrot.lane.b32.xlu1 %v2071_v16, %s15751_s9  ;;  %2109 = vrot.lane.b32.xlu0 %v2094_v3, %s15750_s23  ;;  %v2167_v3 = vld [vmem:[#allocation12 + $0x50] sm:$0xff] }
 0x51a   : > { %v14411_v15 = vpack.c.bf16 %v2168_v14, %v2167_v3  ;;  %v2183_v14 = vld [vmem:[#allocation12 + $0xd0] sm:$0xff] }
 0x51d   : > { %2086 = vrot.lane.b32.xlu1 %v2071_v16, %s15750_s23  ;;  %2127 = vrot.lane.b32.xlu0 %v2117_v18, %s15752_s18  ;;  %v2169_v16 = vld [vmem:[#allocation12 + $0x60] sm:$0xff]  ;;  %s12116_s18 = sshll.u32 %s15863_s2, 4  ;;  %s11254_s2 = scalar_lea.sflag [#allocation8], %s16073_s0 }
 0x51e   : > { %s20154_s20 = scalar_lea.hbm %s21057_s28, %s12116_s18 }
 0x521   : > { %2122 = vrot.lane.b32.xlu1 %v2117_v18, %s15751_s9 }
 0x525   : > { %2132 = vrot.lane.b32.xlu1 %v2117_v18, %s15750_s23  ;;  %v2170_v18 = vld [vmem:[#allocation12 + $0x68] sm:$0xff] }
 0x526   : > { %v14415_v10 = vpack.c.bf16 %v2170_v18, %v2169_v16  ;;  %v2185_v18 = vld [vmem:[#allocation12 + $0xe0] sm:$0xff] }
 0x57f   : > { %v2064_v19 = vpop.permute.xlu0 %2063  ;;  %v2054_v20 = vpop.permute.xlu1 %2053 }
 0x580   : > { %2066 = vst.msk [vmem:[#allocation2 + $0x17] sm:$0x3] %vm2025_vm15, %v2064_v19  ;;  %2067 = vst.msk [vmem:[#allocation2 + $0x27] sm:$0x3] %vm2025_vm15, %v2064_v19 }
 0x581   : > { %2056 = vst.msk [vmem:[#allocation2 + $0x13] sm:$0x3] %vm2025_vm15, %v2054_v20  ;;  %2057 = vst.msk [vmem:[#allocation2 + $0x23] sm:$0x3] %vm2025_vm15, %v2054_v20  ;;  %v2171_v20 = vld [vmem:[#allocation12 + $0x70] sm:$0xff] }
 0x583   : > { %v2059_v21 = vpop.permute.xlu1 %2058  ;;  %v2100_v22 = vpop.permute.xlu0 %2099 }
 0x584   : > { %2061 = vst.msk [vmem:[#allocation2 + $0x15] sm:$0x3] %vm2025_vm15, %v2059_v21  ;;  %2062 = vst.msk [vmem:[#allocation2 + $0x25] sm:$0x3] %vm2025_vm15, %v2059_v21  ;;  %v2172_v21 = vld [vmem:[#allocation12 + $0x78] sm:$0xff] }
 0x585   : > { %2102 = vst.msk [vmem:[#allocation2 + $0x53] sm:$0x3] %vm2025_vm15, %v2100_v22  ;;  %2103 = vst.msk [vmem:[#allocation2 + $0x63] sm:$0x3] %vm2025_vm15, %v2100_v22 }
 0x587   : > { %v2105_v23 = vpop.permute.xlu1 %2104  ;;  %v2082_v25 = vpop.permute.xlu0 %2081  ;;  %v16861_v26 = vld [vmem:[#allocation2 + $0x18] sm:$0x3]  ;;  %v16863_v17 = vld [vmem:[#allocation2 + $0x28] sm:$0x3] }
 0x588   : > { %2107 = vst.msk [vmem:[#allocation2 + $0x55] sm:$0x3] %vm2025_vm15, %v2105_v23  ;;  %2108 = vst.msk [vmem:[#allocation2 + $0x65] sm:$0x3] %vm2025_vm15, %v2105_v23  ;;  %v2215_v61 = vrot.slane %v16861_v26, 1  ;;  %v2218_v31 = vrot.slane %v16863_v17, 1  ;;  %v14419_v23 = vpack.c.bf16 %v2172_v21, %v2171_v20 }
 0x589   : > { %2084 = vst.msk [vmem:[#allocation2 + $0x35] sm:$0x3] %vm2025_vm15, %v2082_v25  ;;  %2085 = vst.msk [vmem:[#allocation2 + $0x45] sm:$0x3] %vm2025_vm15, %v2082_v25  ;;  %v2482_v9 = vrot.slane %v16861_v26, 2  ;;  %v2485_v22 = vrot.slane %v16863_v17, 2 }
 0x58a   : > { %v2187_v20 = vld [vmem:[#allocation12 + $0xf0] sm:$0xff]  ;;  %v2188_v21 = vld [vmem:[#allocation12 + $0xf8] sm:$0xff] }
 0x58b   : > { %v2077_v0 = vpop.permute.xlu1 %2076  ;;  %v2110_v28 = vpop.permute.xlu0 %2109  ;;  %v16865_v29 = vld [vmem:[#allocation2 + $0x10] sm:$0xff]  ;;  %v16867_v1 = vld [vmem:[#allocation2 + $0x20] sm:$0xff] }
 0x58c   : > { %2079 = vst.msk [vmem:[#allocation2 + $0x33] sm:$0x3] %vm2025_vm15, %v2077_v0  ;;  %2080 = vst.msk [vmem:[#allocation2 + $0x43] sm:$0x3] %vm2025_vm15, %v2077_v0  ;;  %v2214_v30 = vrot.slane %v16865_v29, 1  ;;  %v2217_v7 = vrot.slane %v16867_v1, 1 }
 0x58d   : > { %2112 = vst.msk [vmem:[#allocation2 + $0x57] sm:$0x3] %vm2025_vm15, %v2110_v28  ;;  %2113 = vst.msk [vmem:[#allocation2 + $0x67] sm:$0x3] %vm2025_vm15, %v2110_v28  ;;  %v2481_v19 = vrot.slane %v16865_v29, 2  ;;  %v2173_v0 = vld [vmem:[#allocation12 + $0x80] sm:$0xff] }
 0x58e   : > { %v16878_v33 = vsel %vm2210_vm0, %v2214_v30, %v2215_v61  ;;  %v16881_v34 = vsel %vm2210_vm0, %v2217_v7, %v2218_v31  ;;  %v2174_v28 = vld [vmem:[#allocation12 + $0x88] sm:$0xff] }
 0x58f   : > { %13028 = vmatmul.mubr.msk.f32.vlgmr.msra.gmra.mrb[4].mxu0 %vm2023_vm14, %v16878_v33  ;;  %v2087_v4 = vpop.permute.xlu1 %2086  ;;  %v2128_v40 = vpop.permute.xlu0 %2127  ;;  %v16975_v25 = vsel %vm2477_vm1, %v2481_v19, %v2482_v9  ;;  %v14423_v61 = vpack.c.bf16 %v2174_v28, %v2173_v0  ;;  %v2189_v9 = vld [vmem:[#allocation12 + $0x100] sm:$0xff] }
 0x590   : > { %2089 = vst.msk [vmem:[#allocation2 + $0x37] sm:$0x3] %vm2025_vm15, %v2087_v4  ;;  %2090 = vst.msk [vmem:[#allocation2 + $0x47] sm:$0x3] %vm2025_vm15, %v2087_v4  ;;  %13030 = vmatprep.mubr.msk.f32.mxu0 %vm2023_vm14, %v16881_v34  ;;  %14402 = vmatpush3.bf16.msra.mxu0 %v14399_v35  ;;  %v2480_v35 = vsel %vm2477_vm1, %v2478_v12, %v2479_v11 }
 0x591   : > { %2130 = vst.msk [vmem:[#allocation2 + $0x75] sm:$0x3] %vm2025_vm15, %v2128_v40  ;;  %2131 = vst.msk [vmem:[#allocation2 + $0x85] sm:$0x3] %vm2025_vm15, %v2128_v40  ;;  %14404 = vmatprep.subr.bf16.mxu0 %v14403_v32 }
 0x593   : > { %v2123_v42 = vpop.permute.xlu1 %2122 }
 0x594   : > { %2125 = vst.msk [vmem:[#allocation2 + $0x73] sm:$0x3] %vm2025_vm15, %v2123_v42  ;;  %2126 = vst.msk [vmem:[#allocation2 + $0x83] sm:$0x3] %vm2025_vm15, %v2123_v42  ;;  %14406 = vmatpush3.bf16.msra.mxu0 %v14403_v32  ;;  %v16893_v43 = vld [vmem:[#allocation2 + $0x50] sm:$0xff]  ;;  %v16912_v38 = vld [vmem:[#allocation2 + $0x60] sm:$0xff] }
 0x595   : > { %14408 = vmatprep.subr.bf16.mxu0 %v14407_v41  ;;  %v16895_v44 = vld [vmem:[#allocation2 + $0x58] sm:$0x3]  ;;  %v16897_v45 = vld [vmem:[#allocation2 + $0x68] sm:$0x3]  ;;  %v2226_v37 = vrot.slane %v16893_v43, 1  ;;  %v2229_v56 = vrot.slane %v16912_v38, 1 }
 0x596   : > { %v2227_v54 = vrot.slane %v16895_v44, 1  ;;  %v2230_v57 = vrot.slane %v16897_v45, 1  ;;  %v2493_v31 = vrot.slane %v16893_v43, 2  ;;  %v2494_v32 = vrot.slane %v16895_v44, 2 }
 0x597   : > { %v2133_v62 = vpop.permute.xlu1 %2132  ;;  %v16899_v46 = vld [vmem:[#allocation2 + $0x30] sm:$0xff]  ;;  %v16901_v58 = vld [vmem:[#allocation2 + $0x38] sm:$0x3]  ;;  %v16903_v47 = vld [vmem:[#allocation2 + $0x40] sm:$0xff]  ;;  %v2496_v39 = vrot.slane %v16912_v38, 2  ;;  %v2497_v4 = vrot.slane %v16897_v45, 2 }
 0x598   : > { %2135 = vst.msk [vmem:[#allocation2 + $0x77] sm:$0x3] %vm2025_vm15, %v2133_v62  ;;  %2136 = vst.msk [vmem:[#allocation2 + $0x87] sm:$0x3] %vm2025_vm15, %v2133_v62  ;;  %v2220_v48 = vrot.slane %v16899_v46, 1  ;;  %v2221_v49 = vrot.slane %v16901_v58, 1  ;;  %v16930_v59 = vsel %vm2210_vm0, %v2226_v37, %v2227_v54  ;;  %v16935_v60 = vsel %vm2210_vm0, %v2229_v56, %v2230_v57 }
 0x599   : > { %v16909_v50 = vld [vmem:[#allocation2 + $0x48] sm:$0x3]  ;;  %v2223_v51 = vrot.slane %v16903_v47, 1  ;;  %v2487_v27 = vrot.slane %v16899_v46, 2  ;;  %v2488_v24 = vrot.slane %v16901_v58, 2  ;;  %v2490_v26 = vrot.slane %v16903_v47, 2 }
 0x59a   : > { %v2224_v52 = vrot.slane %v16909_v50, 1  ;;  %v16916_v53 = vsel %vm2210_vm0, %v2220_v48, %v2221_v49  ;;  %v2491_v17 = vrot.slane %v16909_v50, 2  ;;  %v17003_v40 = vsel %vm2477_vm1, %v2493_v31, %v2494_v32  ;;  %v2175_v62 = vld [vmem:[#allocation12 + $0x90] sm:$0xff]  ;;  %v2176_v58 = vld [vmem:[#allocation12 + $0x98] sm:$0xff]  ;;  %v2177_v49 = vld [vmem:[#allocation12 + $0xa0] sm:$0xff] }
 0x59b   : > { %13031 = vmatmul.mubr.msk.f32.gmra.mrb[6].mxu0 %vm2023_vm14, %v16916_v53  ;;  %v16989_v7 = vsel %vm2477_vm1, %v2487_v27, %v2488_v24  ;;  %v17010_v44 = vsel %vm2477_vm1, %v2496_v39, %v2497_v4  ;;  %v14427_v48 = vpack.c.bf16 %v2176_v58, %v2175_v62  ;;  %v2178_v50 = vld [vmem:[#allocation12 + $0xa8] sm:$0xff]  ;;  %v2180_v37 = vld [vmem:[#allocation12 + $0xb8] sm:$0xff]  ;;  %v2181_v56 = vld [vmem:[#allocation12 + $0xc0] sm:$0xff] }
 0x59c   : > { %v16923_v55 = vsel %vm2210_vm0, %v2223_v51, %v2224_v52  ;;  %v16996_v36 = vsel %vm2477_vm1, %v2490_v26, %v2491_v17  ;;  %v14431_v51 = vpack.c.bf16 %v2178_v50, %v2177_v49  ;;  %v2179_v52 = vld [vmem:[#allocation12 + $0xb0] sm:$0xff]  ;;  %v2182_v57 = vld [vmem:[#allocation12 + $0xc8] sm:$0xff] }
 0x59d   : > { %13033 = vmatprep.mubr.msk.f32.mxu0 %vm2023_vm14, %v16923_v55  ;;  %v14435_v54 = vpack.c.bf16 %v2180_v37, %v2179_v52  ;;  %v3858_v52 = vld [vmem:[#allocation14 + $0x20] sm:$0xff]  ;;  %v3859_v37 = vld [vmem:[#allocation14 + $0x28] sm:$0xff] }
 0x59f   : > { %13034 = vmatmul.mubr.msk.f32.gmra.mrb[8].mxu0 %vm2023_vm14, %v16930_v59  ;;  %v16937_v63 = vld [vmem:[#allocation2 + $0x70] sm:$0xff]  ;;  %v16939_v5 = vld [vmem:[#allocation2 + $0x78] sm:$0x3] }
 0x5a0   : > { %13036 = vmatprep.mubr.msk.f32.mxu0 %vm2023_vm14, %v16935_v60  ;;  %v2232_v6 = vrot.slane %v16937_v63, 1  ;;  %v2233_v2 = vrot.slane %v16939_v5, 1  ;;  %v2500_v42 = vrot.slane %v16939_v5, 2  ;;  %v14439_v5 = vpack.c.bf16 %v2182_v57, %v2181_v56 }
 0x5a1   : > { %v14479_v57 = vpack.c.bf16 %v3859_v37, %v3858_v52 }
 0x5a2   : > { %v16946_v13 = vsel %vm2210_vm0, %v2232_v6, %v2233_v2  ;;  %v2154_v6 = vld [vmem:[#allocation2 + $0x88] sm:$0x3] }
 0x5a3   : > { %13037 = vmatmul.mubr.msk.f32.gmra.mrb[10].mxu0 %vm2023_vm14, %v16946_v13  ;;  %v2749_v2 = vrot.slane %v2154_v6, 1 }
 0x5a4   : > { %13047 = vmatprep.mubr.msk.f32.mxu0 %vm2023_vm14, %v16829_v8  ;;  %v2484_v8 = vrot.slane %v16867_v1, 2 }
 0x5a6   : > { %v16982_v30 = vsel %vm2477_vm1, %v2484_v8, %v2485_v22  ;;  %v14451_v8 = vpack.c.bf16 %v2188_v21, %v2187_v20  ;;  %v2190_v22 = vld [vmem:[#allocation12 + $0x108] sm:$0xff]  ;;  %v3371_v20 = vld [vmem:[%s20588_s5 + $0x60] sm:$0xff] }
 0x5a7   : > { %13048 = vmatmul.mubr.msk.f32.vlgmr.msra.gmra.mrb[4].mxu0 %vm2023_vm14, %v16865_v29  ;;  %v3372_v21 = vld [vmem:[%s20588_s5 + $0x68] sm:$0xff] }
 0x5a8   : > { %14410 = vmatpush3.bf16.msra.mxu0 %v14407_v41  ;;  %13050 = vmatprep.mubr.msk.f32.mxu0 %vm2023_vm14, %v16867_v1  ;;  %v2499_v41 = vrot.slane %v16937_v63, 2 }
 0x5a9   : > { %14412 = vmatprep.subr.bf16.mxu0 %v14411_v15 }
 0x5aa   : > { %v17015_v45 = vsel %vm2477_vm1, %v2499_v41, %v2500_v42 }
 0x5ab   : > { %13051 = vmatmul.mubr.msk.f32.gmra.mrb[6].mxu0 %vm2023_vm14, %v16899_v46 }
 0x5ac   : > { %13053 = vmatprep.mubr.msk.f32.mxu0 %vm2023_vm14, %v16903_v47  ;;  %14414 = vmatpush3.bf16.msra.mxu0 %v14411_v15  ;;  %v2184_v15 = vld [vmem:[#allocation12 + $0xd8] sm:$0xff] }
 0x5ad   : > { %14416 = vmatprep.subr.bf16.mxu0 %v14415_v10  ;;  %v14443_v16 = vpack.c.bf16 %v2184_v15, %v2183_v14  ;;  %v3362_v14 = vld [vmem:[%s20588_s5 + $0x18] sm:$0xff]  ;;  %v3363_v15 = vld [vmem:[%s20588_s5 + $0x20] sm:$0xff] }
 0x5af   : > { %13054 = vmatmul.mubr.msk.f32.gmra.mrb[8].mxu0 %vm2023_vm14, %v16893_v43 }
 0x5b0   : > { %13056 = vmatprep.mubr.msk.f32.mxu0 %vm2023_vm14, %v16912_v38 }
 0x5b3   : > { %13057 = vmatmul.mubr.msk.f32.gmra.mrb[10].mxu0 %vm2023_vm14, %v16937_v63 }
 0x5b4   : > { %13067 = vmatprep.mubr.msk.f32.mxu0 %vm2023_vm14, %v2480_v35  ;;  %v2867_v35 = vrot.slane %v2154_v6, 2  ;;  %v3861_v6 = vld [vmem:[#allocation14 + $0x38] sm:$0xff] }
 0x5b7   : > { %13068 = vmatmul.mubr.msk.f32.vlgmr.msra.gmra.mrb[4].mxu0 %vm2023_vm14, %v16975_v25 }
 0x5b8   : > { %14418 = vmatpush3.bf16.msra.mxu0 %v14415_v10  ;;  %13070 = vmatprep.mubr.msk.f32.mxu0 %vm2023_vm14, %v16982_v30  ;;  %v2186_v10 = vld [vmem:[#allocation12 + $0xe8] sm:$0xff] }
 0x5b9   : > { %14420 = vmatprep.subr.bf16.mxu0 %v14419_v23  ;;  %v14447_v12 = vpack.c.bf16 %v2186_v10, %v2185_v18  ;;  %v3365_v18 = vld [vmem:[%s20588_s5 + $0x30] sm:$0xff]  ;;  %v3366_v10 = vld [vmem:[%s20588_s5 + $0x38] sm:$0xff] }
 0x5bb   : > { %13071 = vmatmul.mubr.msk.f32.gmra.mrb[6].mxu0 %vm2023_vm14, %v16989_v7 }
 0x5bc   : > { %13073 = vmatprep.mubr.msk.f32.mxu0 %vm2023_vm14, %v16996_v36  ;;  %14422 = vmatpush3.bf16.msra.mxu0 %v14419_v23  ;;  %v14455_v23 = vpack.c.bf16 %v2190_v22, %v2189_v9  ;;  %v3374_v9 = vld [vmem:[%s20588_s5 + $0x78] sm:$0xff]  ;;  %v3375_v22 = vld [vmem:[%s20588_s5 + $0x80] sm:$0xff] }
 0x5bd   : > { %14424 = vmatprep.subr.bf16.mxu0 %v14423_v61 }
 0x5bf   : > { %13074 = vmatmul.mubr.msk.f32.gmra.mrb[8].mxu0 %vm2023_vm14, %v17003_v40 }
 0x5c0   : > { %13076 = vmatprep.mubr.msk.f32.mxu0 %vm2023_vm14, %v17010_v44 }
 0x5c3   : > { %13077 = vmatmul.mubr.msk.f32.gmra.mrb[10].mxu0 %vm2023_vm14, %v17015_v45 }
 0x5c4   : > { %13087 = vmatprep.mubr.msk.f32.mxu0 %vm2023_vm14, %v16865_v29  ;;  %v2153_v29 = vld [vmem:[#allocation2 + $0x80] sm:$0xff] }
 0x5c5   : > { %v2866_v11 = vrot.slane %v2153_v29, 2 }
 0x5c7   : > { %13088 = vmatmul.mubr.msk.f32.vlgmr.msra.gmra.mrb[4].mxu0 %vm2023_vm14, %v16867_v1  ;;  %v2868_v19 = vsel %vm2477_vm1, %v2866_v11, %v2867_v35  ;;  %v3368_v11 = vld [vmem:[%s20588_s5 + $0x48] sm:$0xff]  ;;  %v3369_v35 = vld [vmem:[%s20588_s5 + $0x50] sm:$0xff] }
 0x5c8   : > { %14426 = vmatpush3.bf16.msra.mxu0 %v14423_v61  ;;  %13090 = vmatprep.mubr.msk.f32.mxu0 %vm2023_vm14, %v16899_v46 }
 0x5c9   : > { %14428 = vmatprep.subr.bf16.mxu0 %v14427_v48 }
 0x5cb   : > { %13091 = vmatmul.mubr.msk.f32.gmra.mrb[6].mxu0 %vm2023_vm14, %v16903_v47 }
 0x5cc   : > { %13093 = vmatprep.mubr.msk.f32.mxu0 %vm2023_vm14, %v16893_v43  ;;  %14430 = vmatpush3.bf16.msra.mxu0 %v14427_v48 }
 0x5cd   : > { %14432 = vmatprep.subr.bf16.mxu0 %v14431_v51 }
 0x5cf   : > { %13094 = vmatmul.mubr.msk.f32.gmra.mrb[8].mxu0 %vm2023_vm14, %v16912_v38 }
 0x5d0   : > { %13096 = vmatprep.mubr.msk.f32.mxu0 %vm2023_vm14, %v16937_v63 }
 0x5d3   : > { %13097 = vmatmul.mubr.msk.f32.gmra.mrb[10].mxu0 %vm2023_vm14, %v2153_v29 }
 0x5d4   : > { %13107 = vmatprep.mubr.msk.f32.mxu0 %vm2023_vm14, %v16878_v33  ;;  %v2748_v33 = vrot.slane %v2153_v29, 1 }
 0x5d6   : > { %v2750_v3 = vsel %vm2210_vm0, %v2748_v33, %v2749_v2  ;;  %v3360_v33 = vld [vmem:[%s20588_s5 + $0x8] sm:$0xff]  ;;  %v3361_v2 = vld [vmem:[%s20588_s5 + $0x10] sm:$0xff] }
 0x5d7   : > { %13108 = vmatmul.mubr.msk.f32.vlgmr.msra.gmra.mrb[4].mxu0 %vm2023_vm14, %v16881_v34 }
 0x5d8   : > { %14434 = vmatpush3.bf16.msra.mxu0 %v14431_v51  ;;  %13110 = vmatprep.mubr.msk.f32.mxu0 %vm2023_vm14, %v16916_v53 }
 0x5d9   : > { %14436 = vmatprep.subr.bf16.mxu0 %v14435_v54 }
 0x5db   : > { %13111 = vmatmul.mubr.msk.f32.gmra.mrb[6].mxu0 %vm2023_vm14, %v16923_v55 }
 0x5dc   : > { %13113 = vmatprep.mubr.msk.f32.mxu0 %vm2023_vm14, %v16930_v59  ;;  %14438 = vmatpush3.bf16.msra.mxu0 %v14435_v54 }
 0x5dd   : > { %14440 = vmatprep.subr.bf16.mxu0 %v14439_v5 }
 0x5df   : > { %13114 = vmatmul.mubr.msk.f32.gmra.mrb[8].mxu0 %vm2023_vm14, %v16935_v60 }
 0x5e0   : > { %13116 = vmatprep.mubr.msk.f32.mxu0 %vm2023_vm14, %v16946_v13 }
 0x5e3   : > { %13117 = vmatmul.mubr.msk.f32.gmra.mrb[10].mxu0 %vm2023_vm14, %v2750_v3 }
 0x5e4   : > { %13127 = vmatprep.mubr.msk.f32.mxu0 %vm2023_vm14, %v16975_v25  ;;  %v2192_v25 = vld [vmem:[#allocation12 + $0x118] sm:$0xff] }
 0x5e7   : > { %13128 = vmatmul.mubr.msk.f32.vlgmr.msra.gmra.mrb[4].mxu0 %vm2023_vm14, %v16982_v30 }
 0x5e8   : > { %14442 = vmatpush3.bf16.msra.mxu0 %v14439_v5  ;;  %13130 = vmatprep.mubr.msk.f32.mxu0 %vm2023_vm14, %v16989_v7  ;;  %v3860_v5 = vld [vmem:[#allocation14 + $0x30] sm:$0xff] }
 0x5e9   : > { %14444 = vmatprep.subr.bf16.mxu0 %v14443_v16 }
 0x5eb   : > { %13131 = vmatmul.mubr.msk.f32.gmra.mrb[6].mxu0 %vm2023_vm14, %v16996_v36 }
 0x5ec   : > { %13133 = vmatprep.mubr.msk.f32.mxu0 %vm2023_vm14, %v17003_v40  ;;  %14446 = vmatpush3.bf16.msra.mxu0 %v14443_v16  ;;  %v3364_v16 = vld [vmem:[%s20588_s5 + $0x28] sm:$0xff] }
 0x5ed   : > { %14448 = vmatprep.subr.bf16.mxu0 %v14447_v12 }
 0x5ef   : > { %13134 = vmatmul.mubr.msk.f32.gmra.mrb[8].mxu0 %vm2023_vm14, %v17010_v44 }
 0x5f0   : > { %13136 = vmatprep.mubr.msk.f32.mxu0 %vm2023_vm14, %v17015_v45 }
 0x5f3   : > { %13137 = vmatmul.mubr.msk.f32.gmra.mrb[10].mxu0 %vm2023_vm14, %v2868_v19 }
 0x5f4   : > { %13147 = vmatprep.mubr.msk.f32.mxu0 %vm2023_vm14, %v16867_v1  ;;  %v2155_v1 = vld [vmem:[#allocation2 + $0x90] sm:$0xff] }
 0x5f7   : > { %13148 = vmatmul.mubr.msk.f32.vlgmr.msra.gmra.mrb[4].mxu0 %vm2023_vm14, %v16899_v46  ;;  %v2191_v46 = vld [vmem:[#allocation12 + $0x110] sm:$0xff] }
 0x5f8   : > { %14450 = vmatpush3.bf16.msra.mxu0 %v14447_v12  ;;  %13150 = vmatprep.mubr.msk.f32.mxu0 %vm2023_vm14, %v16903_v47  ;;  %v14459_v47 = vpack.c.bf16 %v2192_v25, %v2191_v46  ;;  %v3367_v12 = vld [vmem:[%s20588_s5 + $0x40] sm:$0xff]  ;;  %v3378_v46 = vld [vmem:[%s20588_s5 + $0x98] sm:$0xff] }
 0x5f9   : > { %14452 = vmatprep.subr.bf16.mxu0 %v14451_v8  ;;  %v3379_v25 = vld [vmem:[%s20588_s5 + $0xa0] sm:$0xff] }
 0x5fb   : > { %13151 = vmatmul.mubr.msk.f32.gmra.mrb[6].mxu0 %vm2023_vm14, %v16893_v43  ;;  %v2156_v43 = vld [vmem:[#allocation2 + $0x98] sm:$0x3] }
 0x5fc   : > { %13153 = vmatprep.mubr.msk.f32.mxu0 %vm2023_vm14, %v16912_v38  ;;  %14454 = vmatpush3.bf16.msra.mxu0 %v14451_v8  ;;  %v3101_v38 = vrot.slane %v2155_v1, 1  ;;  %v3373_v8 = vld [vmem:[%s20588_s5 + $0x70] sm:$0xff] }
 0x5fd   : > { %14456 = vmatprep.subr.bf16.mxu0 %v14455_v23 }
 0x5ff   : > { %13154 = vmatmul.mubr.msk.f32.gmra.mrb[8].mxu0 %vm2023_vm14, %v16937_v63  ;;  %v3102_v63 = vrot.slane %v2156_v43, 1 }
 0x600   : > { %13156 = vmatprep.mubr.msk.f32.mxu0 %vm2023_vm14, %v2153_v29 }
 0x603   : > { %13157 = vmatmul.mubr.msk.f32.gmra.mrb[10].mxu0 %vm2023_vm14, %v2155_v1 }
 0x604   : > { %13167 = vmatprep.mubr.msk.f32.mxu0 %vm2023_vm14, %v16881_v34  ;;  %v3103_v34 = vsel %vm2210_vm0, %v3101_v38, %v3102_v63  ;;  %v3382_v38 = vld [vmem:[%s20588_s5 + $0xb8] sm:$0xff]  ;;  %v3383_v63 = vld [vmem:[%s20588_s5 + $0xc0] sm:$0xff] }
 0x607   : > { %13168 = vmatmul.mubr.msk.f32.vlgmr.msra.gmra.mrb[4].mxu0 %vm2023_vm14, %v16916_v53  ;;  %v3219_v53 = vrot.slane %v2155_v1, 2  ;;  %v3377_v1 = vld [vmem:[%s20588_s5 + $0x90] sm:$0xff] }
 0x608   : > { %14458 = vmatpush3.bf16.msra.mxu0 %v14455_v23  ;;  %13170 = vmatprep.mubr.msk.f32.mxu0 %vm2023_vm14, %v16923_v55  ;;  %v3220_v55 = vrot.slane %v2156_v43, 2  ;;  %v3376_v23 = vld [vmem:[%s20588_s5 + $0x88] sm:$0xff]  ;;  %v3381_v43 = vld [vmem:[%s20588_s5 + $0xb0] sm:$0xff] }
 0x609   : > { %14460 = vmatprep.subr.bf16.mxu0 %v14459_v47 }
 0x60b   : > { %13171 = vmatmul.mubr.msk.f32.gmra.mrb[6].mxu0 %vm2023_vm14, %v16930_v59  ;;  %v3221_v59 = vsel %vm2477_vm1, %v3219_v53, %v3220_v55  ;;  %v3385_v53 = vld [vmem:[%s20588_s5 + $0xd0] sm:$0xff]  ;;  %v3386_v55 = vld [vmem:[%s20588_s5 + $0xd8] sm:$0xff] }
 0x60c   : > { %13173 = vmatprep.mubr.msk.f32.mxu0 %vm2023_vm14, %v16935_v60  ;;  %14462 = vmatpush3.bf16.msra.mxu0 %v14459_v47  ;;  %v3359_v60 = vld [vmem:[%s20588_s5] sm:$0xff]  ;;  %v3380_v47 = vld [vmem:[%s20588_s5 + $0xa8] sm:$0xff] }
 0x60d   : > { %13215 = vmatprep.mubr.msk.f32.mxu1 %vm3391_vm2, %v3359_v60  ;;  %v3388_v60 = vld [vmem:[%s20588_s5 + $0xe8] sm:$0xff] }
 0x60f   : > { %13174 = vmatmul.mubr.msk.f32.gmra.mrb[8].mxu0 %vm2023_vm14, %v16946_v13  ;;  %v11505_v13 = vld [vmem:[%s20798_s29] ss:$0 sm:$0xff]  ;;  %s11271_s29 = sshll.u32 %s612_s27, 4  ;;  %s20162_s29 = int_to_ptr.vmem [resolvable:$true] %s11271_s29 }
 0x610   : > { %13176 = vmatprep.mubr.msk.f32.mxu0 %vm2023_vm14, %v2750_v3  ;;  %v14483_v3 = vpack.c.bf16 %v3861_v6, %v3860_v5  ;;  %s15622_s27 = scalar_lea.vmem %s20162_s29, 16 }
 0x611   : > { %p15623_p1 = scmp.ne.s32.totalorder %s20162_s29, %s15622_s27 }
 0x613   : > { %13177 = vmatmul.mubr.msk.f32.gmra.mrb[10].mxu0 %vm2023_vm14, %v3103_v34  ;;  %v3384_v34 = vld [vmem:[%s20588_s5 + $0xc8] sm:$0xff]  ;;  %p15624_p4 = pnand %p15623_p1, %p21058_p2 }
 0x614   : > { %13187 = vmatprep.mubr.msk.f32.mxu0 %vm2023_vm14, %v16982_v30 }
 0x615   : > { %p15625_p0 = pneg %p15624_p4 }
 0x617   : > { %13188 = vmatmul.mubr.msk.f32.vlgmr.msra.gmra.mrb[4].mxu0 %vm2023_vm14, %v16989_v7 }
 0x618   : > { %13190 = vmatprep.mubr.msk.f32.mxu0 %vm2023_vm14, %v16996_v36 }
 0x61b   : > { %13191 = vmatmul.mubr.msk.f32.gmra.mrb[6].mxu0 %vm2023_vm14, %v17003_v40 }
 0x61c   : > { %13193 = vmatprep.mubr.msk.f32.mxu0 %vm2023_vm14, %v17010_v44 }
 0x61f   : > { %13194 = vmatmul.mubr.msk.f32.gmra.mrb[8].mxu0 %vm2023_vm14, %v17015_v45 }
 0x620   : > { %13196 = vmatprep.mubr.msk.f32.mxu0 %vm2023_vm14, %v2868_v19  ;;  %v3370_v19 = vld [vmem:[%s20588_s5 + $0x58] sm:$0xff] }
 0x623   : > { %13197 = vmatmul.mubr.msk.f32.gmra.mrb[10].mxu0 %vm2023_vm14, %v3221_v59  ;;  %v3387_v59 = vld [vmem:[%s20588_s5 + $0xe0] sm:$0xff] }
 0x6ea   : > { %v13189_v27 = vpop.f32.mrb[4].mxu0 }
 0x6eb   : > { %v3344_v24 = vadd.f32 %v13189_v27, %v11505_v13  ;;  %v3290_v0 = vpop.f32.mrb[5].mxu0  ;;  %v3390_v27 = vld [vmem:[%s20588_s5 + $0xf8] sm:$0xff] }
 0x6ec   : > { %v3343_v28 = vadd.f32 %v11505_v13, %v3290_v0  ;;  %v17243_v0 = vld [vmem:[#allocation3 + $0x8] sm:$0xff] }
 0x6ed   : > { %v3352_v30 = vmax.f32 %v3344_v24, 0.0  ;;  %v17241_v24 = vld [vmem:[#allocation3] sm:$0xff] }
 0x6ee   : > { %v3351_v26 = vmax.f32 %v3343_v28, 0.0  ;;  %v13192_v17 = vpop.f32.mrb[6].mxu0  ;;  %v3939_v28 = vrot.slane %v17241_v24, 1 }
 0x6ef   : > { %v3346_v61 = vadd.f32 %v13192_v17, %v11505_v13  ;;  %v3300_v7 = vpop.f32.mrb[7].mxu0 }
 0x6f0   : > { %v14463_v31 = vpack.c.bf16 %v3352_v30, %v3351_v26  ;;  %v3345_v32 = vadd.f32 %v11505_v13, %v3300_v7  ;;  %v3940_v30 = vrot.slane %v17243_v0, 1  ;;  %v17247_v26 = vld [vmem:[#allocation3 + $0x10] sm:$0x3]  ;;  %v3854_v7 = vld [vmem:[#allocation14] sm:$0xff] }
 0x6f1   : > { %v3354_v36 = vmax.f32 %v3346_v61, 0.0  ;;  %v3942_v17 = vrot.slane %v17247_v26, 1 }
 0x6f2   : > { %v3353_v39 = vmax.f32 %v3345_v32, 0.0  ;;  %v13195_v4 = vpop.f32.mrb[8].mxu0  ;;  %14464 = vmatprep.subr.bf16.mxu1 %v14463_v31  ;;  %v3941_v61 = vsel %vm2210_vm0, %v3939_v28, %v3940_v30 }
 0x6f3   : > { %v3348_v40 = vadd.f32 %v13195_v4, %v11505_v13  ;;  %v3310_v41 = vpop.f32.mrb[9].mxu0  ;;  %14466 = vmatpush3.bf16.msra.mxu1 %v14463_v31  ;;  %v3855_v31 = vld [vmem:[#allocation14 + $0x8] sm:$0xff]  ;;  %v3943_v32 = vsel %vm2210_vm0, %v3940_v30, %v3942_v17  ;;  %v3857_v4 = vld [vmem:[#allocation14 + $0x18] sm:$0xff] }
 0x6f4   : > { %v14467_v42 = vpack.c.bf16 %v3354_v36, %v3353_v39  ;;  %v3347_v44 = vadd.f32 %v11505_v13, %v3310_v41  ;;  %v14487_v36 = vpack.c.bf16 %v3855_v31, %v3854_v7  ;;  %v3856_v39 = vld [vmem:[#allocation14 + $0x10] sm:$0xff]  ;;  %v3862_v41 = vld [vmem:[#allocation14 + $0x40] sm:$0xff] }
 0x6f5   : > { %v3356_v45 = vmax.f32 %v3348_v40, 0.0  ;;  %v14491_v40 = vpack.c.bf16 %v3857_v4, %v3856_v39 }
 0x6f6   : > { %v3355_v62 = vmax.f32 %v3347_v44, 0.0  ;;  %v13198_v58 = vpop.f32.mrb[10].mxu0  ;;  %14468 = vmatprep.subr.bf16.mxu1 %v14467_v42 }
 0x6f7   : > { %v3350_v48 = vadd.f32 %v13198_v58, %v11505_v13  ;;  %v3320_v49 = vpop.f32.mrb[11].mxu0  ;;  %14470 = vmatpush3.bf16.msra.mxu1 %v14467_v42  ;;  %v3863_v42 = vld [vmem:[#allocation14 + $0x48] sm:$0xff] }
 0x6f8   : > { %v14471_v50 = vpack.c.bf16 %v3356_v45, %v3355_v62  ;;  %v3349_v51 = vadd.f32 %v11505_v13, %v3320_v49  ;;  %v3389_v13 = vld [vmem:[%s20588_s5 + $0xf0] sm:$0xff]  ;;  %v17254_v44 = vpack.c.bf16 %v3863_v42, %v3862_v41 }
 0x6f9   : > { %v3358_v29 = vmax.f32 %v3350_v48, 0.0 }
 0x6fa   : > { %v3357_v54 = vmax.f32 %v3349_v51, 0.0  ;;  %14472 = vmatprep.subr.bf16.mxu1 %v14471_v50 }
 0x6fb   : > { %14474 = vmatpush3.bf16.msra.mxu1 %v14471_v50 }
 0x6fc   : > { %v14475_v56 = vpack.c.bf16 %v3358_v29, %v3357_v54 }
 0x6fe   : > { %14476 = vmatprep.subr.bf16.mxu1 %v14475_v56 }
 0x6ff   : > { %14478 = vmatpush3.bf16.msra.mxu1 %v14475_v56 }
 0x700   : > { %14480 = vmatprep.subr.bf16.mxu1 %v14479_v57 }
 0x702   : > { %13216 = vmatmul.mubr.msk.f32.vlgmr.msra.gmra.mrb[4].mxu1 %vm3391_vm2, %v3360_v33 }
 0x703   : > { %13218 = vmatprep.mubr.msk.f32.mxu1 %vm3391_vm2, %v3361_v2  ;;  %14482 = vmatpush3.bf16.msra.mxu1 %v14479_v57 }
 0x704   : > { %14484 = vmatprep.subr.bf16.mxu1 %v14483_v3 }
 0x706   : > { %13219 = vmatmul.mubr.msk.f32.gmra.mrb[6].mxu1 %vm3391_vm2, %v3362_v14 }
 0x707   : > { %13221 = vmatprep.mubr.msk.f32.mxu1 %vm3391_vm2, %v3363_v15  ;;  %14486 = vmatpush3.bf16.msra.mxu1 %v14483_v3 }
 0x708   : > { %14488 = vmatprep.subr.bf16.mxu1 %v14487_v36 }
 0x70a   : > { %13222 = vmatmul.mubr.msk.f32.gmra.mrb[8].mxu1 %vm3391_vm2, %v3364_v16 }
 0x70b   : > { %13224 = vmatprep.mubr.msk.f32.mxu1 %vm3391_vm2, %v3365_v18 }
 0x70e   : > { %13225 = vmatmul.mubr.msk.f32.gmra.mrb[10].mxu1 %vm3391_vm2, %v3366_v10 }
 0x70f   : > { %13227 = vmatprep.mubr.msk.f32.mxu1 %vm3391_vm2, %v3367_v12 }
 0x712   : > { %13228 = vmatmul.mubr.msk.f32.gmra.mrb[12].mxu1 %vm3391_vm2, %v3368_v11 }
 0x713   : > { %13230 = vmatprep.mubr.msk.f32.mxu1 %vm3391_vm2, %v3369_v35 }
 0x716   : > { %13231 = vmatmul.mubr.msk.f32.gmra.mrb[14].mxu1 %vm3391_vm2, %v3370_v19 }
 0x717   : > { %13233 = vmatprep.mubr.msk.f32.mxu1 %vm3391_vm2, %v3371_v20 }
 0x71a   : > { %13234 = vmatmul.mubr.msk.f32.gmra.mrb[16].mxu1 %vm3391_vm2, %v3372_v21 }
 0x71b   : > { %13236 = vmatprep.mubr.msk.f32.mxu1 %vm3391_vm2, %v3373_v8 }
 0x71e   : > { %13237 = vmatmul.mubr.msk.f32.gmra.mrb[18].mxu1 %vm3391_vm2, %v3374_v9 }
 0x71f   : > { %13239 = vmatprep.mubr.msk.f32.mxu1 %vm3391_vm2, %v3375_v22 }
 0x722   : > { %13240 = vmatmul.mubr.msk.f32.gmra.mrb[20].mxu1 %vm3391_vm2, %v3376_v23 }
 0x723   : > { %13242 = vmatprep.mubr.msk.f32.mxu1 %vm3391_vm2, %v3377_v1 }
 0x726   : > { %13243 = vmatmul.mubr.msk.f32.gmra.mrb[22].mxu1 %vm3391_vm2, %v3378_v46 }
 0x727   : > { %13245 = vmatprep.mubr.msk.f32.mxu1 %vm3391_vm2, %v3379_v25 }
 0x72a   : > { %13246 = vmatmul.mubr.msk.f32.gmra.mrb[24].mxu1 %vm3391_vm2, %v3380_v47 }
 0x72b   : > { %13248 = vmatprep.mubr.msk.f32.mxu1 %vm3391_vm2, %v3381_v43 }
 0x72e   : > { %13249 = vmatmul.mubr.msk.f32.gmra.mrb[26].mxu1 %vm3391_vm2, %v3382_v38 }
 0x72f   : > { %13251 = vmatprep.mubr.msk.f32.mxu1 %vm3391_vm2, %v3383_v63 }
 0x732   : > { %13252 = vmatmul.mubr.msk.f32.gmra.mrb[28].mxu1 %vm3391_vm2, %v3384_v34 }
 0x733   : > { %13254 = vmatprep.mubr.msk.f32.mxu1 %vm3391_vm2, %v3385_v53 }
 0x736   : > { %13255 = vmatmul.mubr.msk.f32.gmra.mrb[30].mxu1 %vm3391_vm2, %v3386_v55 }
 0x737   : > { %13257 = vmatprep.mubr.msk.f32.mxu1 %vm3391_vm2, %v3387_v59 }
 0x73a   : > { %13258 = vmatmul.mubr.msk.f32.gmra.mrb[32].mxu1 %vm3391_vm2, %v3388_v60 }
 0x73b   : > { %13260 = vmatprep.mubr.msk.f32.mxu1 %vm3391_vm2, %v3389_v13 }
 0x73e   : > { %13261 = vmatmul.mubr.msk.f32.gmra.mrb[34].mxu1 %vm3391_vm2, %v3390_v27 }
 0x73f   : > { %13271 = vmatprep.mubr.msk.f32.mxu1 %vm2023_vm14, %v3941_v61 }
 0x742   : > { %13272 = vmatmul.mubr.msk.f32.vlgmr.msra.gmra.mrb[36].mxu1 %vm2023_vm14, %v3943_v32 }
 0x743   : > { %14490 = vmatpush3.bf16.msra.mxu1 %v14487_v36 }
 0x744   : > { %14492 = vmatprep.subr.bf16.mxu1 %v14491_v40 }
 0x747   : > { %14494 = vmatpush3.bf16.msra.mxu1 %v14491_v40 }
 0x748   : > { %14496 = vmatprep.subr.bf16.mxu1 %v17254_v44 }
 0x7d5   : > { %v13217_v45 = vpop.f32.mrb[4].mxu1 }
 0x7d6   : > { %3769 = vst.msk [vmem:[#allocation3 + $0x21] sm:$0xff] %vm2023_vm14, %v13217_v45  ;;  %v3554_v62 = vpop.f32.mrb[5].mxu1 }
 0x7d7   : > { %3768 = vst.msk [vmem:[#allocation3 + $0x19] sm:$0xff] %vm2023_vm14, %v3554_v62 }
 0x7d9   : > { %v13220_v58 = vpop.f32.mrb[6].mxu1 }
 0x7da   : > { %3771 = vst.msk [vmem:[#allocation3 + $0x39] sm:$0xff] %vm2023_vm14, %v13220_v58  ;;  %v3564_v48 = vpop.f32.mrb[7].mxu1 }
 0x7db   : > { %3770 = vst.msk [vmem:[#allocation3 + $0x31] sm:$0xff] %vm2023_vm14, %v3564_v48 }
 0x7dd   : > { %v13223_v49 = vpop.f32.mrb[8].mxu1  ;;  %v17261_v50 = vld [vmem:[#allocation3 + $0x28] sm:$0x3] }
 0x7de   : > { %3773 = vst.msk [vmem:[#allocation3 + $0x51] sm:$0xff] %vm2023_vm14, %v13223_v49  ;;  %v3574_v51 = vpop.f32.mrb[9].mxu1  ;;  %v17264_v29 = vld [vmem:[#allocation3 + $0x18] sm:$0xff]  ;;  %v17266_v52 = vld [vmem:[#allocation3 + $0x20] sm:$0xff]  ;;  %v3947_v37 = vrot.slane %v17261_v50, 1 }
 0x7df   : > { %3772 = vst.msk [vmem:[#allocation3 + $0x49] sm:$0xff] %vm2023_vm14, %v3574_v51  ;;  %v3944_v54 = vrot.slane %v17264_v29, 1  ;;  %v3945_v56 = vrot.slane %v17266_v52, 1 }
 0x7e1   : > { %v13226_v57 = vpop.f32.mrb[10].mxu1  ;;  %v17273_v5 = vsel %vm2210_vm0, %v3944_v54, %v3945_v56  ;;  %v17276_v6 = vsel %vm2210_vm0, %v3945_v56, %v3947_v37  ;;  %v17278_v33 = vld [vmem:[#allocation3 + $0x40] sm:$0x3] }
 0x7e2   : > { %3775 = vst.msk [vmem:[#allocation3 + $0x69] sm:$0xff] %vm2023_vm14, %v13226_v57  ;;  %v3584_v2 = vpop.f32.mrb[11].mxu1  ;;  %13274 = vmatprep.mubr.msk.f32.mxu1 %vm2023_vm14, %v17273_v5  ;;  %v17283_v3 = vld [vmem:[#allocation3 + $0x30] sm:$0xff]  ;;  %v17285_v14 = vld [vmem:[#allocation3 + $0x38] sm:$0xff]  ;;  %v3952_v15 = vrot.slane %v17278_v33, 1 }
 0x7e3   : > { %3774 = vst.msk [vmem:[#allocation3 + $0x61] sm:$0xff] %vm2023_vm14, %v3584_v2  ;;  %13275 = vmatmul.mubr.msk.f32.gmra.mrb[38].mxu1 %vm2023_vm14, %v17276_v6  ;;  %v3949_v16 = vrot.slane %v17283_v3, 1  ;;  %v3950_v18 = vrot.slane %v17285_v14, 1 }
 0x7e5   : > { %v13229_v10 = vpop.f32.mrb[12].mxu1  ;;  %v17294_v12 = vsel %vm2210_vm0, %v3949_v16, %v3950_v18  ;;  %v17297_v11 = vsel %vm2210_vm0, %v3950_v18, %v3952_v15  ;;  %v17299_v35 = vld [vmem:[#allocation3 + $0x58] sm:$0x3] }
 0x7e6   : > { %20799 = vst [vmem:[#allocation23_spill] sm:$0xff] %v17294_v12  ;;  %20800 = vst [vmem:[#allocation24_spill] sm:$0xff] %v17297_v11  ;;  %v3594_v19 = vpop.f32.mrb[13].mxu1  ;;  %13277 = vmatprep.mubr.msk.f32.mxu1 %vm2023_vm14, %v17294_v12  ;;  %v17304_v20 = vld [vmem:[#allocation3 + $0x48] sm:$0xff]  ;;  %v17306_v21 = vld [vmem:[#allocation3 + $0x50] sm:$0xff]  ;;  %v3957_v8 = vrot.slane %v17299_v35, 1 }
 0x7e7   : > { %3777 = vst.msk [vmem:[#allocation3 + $0x81] sm:$0xff] %vm2023_vm14, %v13229_v10  ;;  %3776 = vst.msk [vmem:[#allocation3 + $0x79] sm:$0xff] %vm2023_vm14, %v3594_v19  ;;  %13278 = vmatmul.mubr.msk.f32.gmra.mrb[40].mxu1 %vm2023_vm14, %v17297_v11  ;;  %v3954_v9 = vrot.slane %v17304_v20, 1  ;;  %v3955_v22 = vrot.slane %v17306_v21, 1  ;;  %v4608_v11 = vrot.slane %v17285_v14, 2 }
 0x7e9   : > { %v13232_v23 = vpop.f32.mrb[14].mxu1  ;;  %v17315_v1 = vsel %vm2210_vm0, %v3954_v9, %v3955_v22  ;;  %v17318_v46 = vsel %vm2210_vm0, %v3955_v22, %v3957_v8  ;;  %v17320_v25 = vld [vmem:[#allocation3 + $0x70] sm:$0x3] }
 0x7ea   : > { %20801 = vst [vmem:[#allocation25_spill] sm:$0xff] %v17315_v1  ;;  %20802 = vst [vmem:[#allocation26_spill] sm:$0xff] %v17318_v46  ;;  %v3604_v47 = vpop.f32.mrb[15].mxu1  ;;  %13280 = vmatprep.mubr.msk.f32.mxu1 %vm2023_vm14, %v17315_v1  ;;  %v17325_v43 = vld [vmem:[#allocation3 + $0x60] sm:$0xff]  ;;  %v17327_v38 = vld [vmem:[#allocation3 + $0x68] sm:$0xff]  ;;  %v3962_v63 = vrot.slane %v17320_v25, 1 }
 0x7eb   : > { %3779 = vst.msk [vmem:[#allocation3 + $0x99] sm:$0xff] %vm2023_vm14, %v13232_v23  ;;  %3778 = vst.msk [vmem:[#allocation3 + $0x91] sm:$0xff] %vm2023_vm14, %v3604_v47  ;;  %13281 = vmatmul.mubr.msk.f32.gmra.mrb[42].mxu1 %vm2023_vm14, %v17318_v46  ;;  %v3959_v34 = vrot.slane %v17325_v43, 1  ;;  %v3960_v53 = vrot.slane %v17327_v38, 1  ;;  %v3867_v46 = vld [vmem:[#allocation14 + $0x68] sm:$0xff]  ;;  %v4607_v1 = vrot.slane %v17283_v3, 2 }
 0x7ed   : > { %v13235_v55 = vpop.f32.mrb[16].mxu1  ;;  %v17336_v59 = vsel %vm2210_vm0, %v3959_v34, %v3960_v53  ;;  %v17339_v60 = vsel %vm2210_vm0, %v3960_v53, %v3962_v63 }
 0x7ee   : > { %20803 = vst [vmem:[#allocation27_spill] sm:$0xff] %v17336_v59  ;;  %20804 = vst [vmem:[#allocation28_spill] sm:$0xff] %v17339_v60  ;;  %v17341_v13 = vld [vmem:[#allocation3 + $0x88] sm:$0x3]  ;;  %v3614_v27 = vpop.f32.mrb[17].mxu1  ;;  %13283 = vmatprep.mubr.msk.f32.mxu1 %vm2023_vm14, %v17336_v59  ;;  %v17346_v28 = vld [vmem:[#allocation3 + $0x78] sm:$0xff] }
 0x7ef   : > { %3781 = vst.msk [vmem:[#allocation3 + $0xb1] sm:$0xff] %vm2023_vm14, %v13235_v55  ;;  %v17348_v30 = vld [vmem:[#allocation3 + $0x80] sm:$0xff]  ;;  %v3967_v17 = vrot.slane %v17341_v13, 1  ;;  %3780 = vst.msk [vmem:[#allocation3 + $0xa9] sm:$0xff] %vm2023_vm14, %v3614_v27  ;;  %13284 = vmatmul.mubr.msk.f32.gmra.mrb[44].mxu1 %vm2023_vm14, %v17339_v60  ;;  %v3964_v61 = vrot.slane %v17346_v28, 1 }
 0x7f0   : > { %v3965_v7 = vrot.slane %v17348_v30, 1  ;;  %v3865_v60 = vld [vmem:[#allocation14 + $0x58] sm:$0xff]  ;;  %v3866_v59 = vld [vmem:[#allocation14 + $0x60] sm:$0xff] }
 0x7f1   : > { %v13238_v31 = vpop.f32.mrb[18].mxu1 }
 0x7f2   : > { %v17357_v32 = vsel %vm2210_vm0, %v3964_v61, %v3965_v7  ;;  %v17360_v36 = vsel %vm2210_vm0, %v3965_v7, %v3967_v17  ;;  %v17362_v39 = vld [vmem:[#allocation3 + $0xa0] sm:$0x3]  ;;  %3783 = vst.msk [vmem:[#allocation3 + $0xc9] sm:$0xff] %vm2023_vm14, %v13238_v31  ;;  %v3624_v4 = vpop.f32.mrb[19].mxu1  ;;  %v17367_v40 = vld [vmem:[#allocation3 + $0x90] sm:$0xff]  ;;  %v17369_v41 = vld [vmem:[#allocation3 + $0x98] sm:$0xff] }
 0x7f3   : > { %20805 = vst [vmem:[#allocation29_spill] sm:$0xff] %v17357_v32  ;;  %20806 = vst [vmem:[#allocation30_spill] sm:$0xff] %v17360_v36  ;;  %13286 = vmatprep.mubr.msk.f32.mxu1 %vm2023_vm14, %v17357_v32  ;;  %v3972_v42 = vrot.slane %v17362_v39, 1  ;;  %v3969_v45 = vrot.slane %v17367_v40, 1  ;;  %v3970_v62 = vrot.slane %v17369_v41, 1 }
 0x7f4   : > { %3782 = vst.msk [vmem:[#allocation3 + $0xc1] sm:$0xff] %vm2023_vm14, %v3624_v4  ;;  %13287 = vmatmul.mubr.msk.f32.gmra.mrb[46].mxu1 %vm2023_vm14, %v17360_v36 }
 0x7f5   : > { %v13241_v58 = vpop.f32.mrb[20].mxu1  ;;  %v17378_v48 = vsel %vm2210_vm0, %v3969_v45, %v3970_v62  ;;  %v17381_v49 = vsel %vm2210_vm0, %v3970_v62, %v3972_v42 }
 0x7f6   : > { %20807 = vst [vmem:[#allocation31_spill] sm:$0xff] %v17378_v48  ;;  %20808 = vst [vmem:[#allocation32_spill] sm:$0xff] %v17381_v49  ;;  %v17383_v51 = vld [vmem:[#allocation3 + $0xb8] sm:$0x3]  ;;  %v3634_v37 = vpop.f32.mrb[21].mxu1  ;;  %13289 = vmatprep.mubr.msk.f32.mxu1 %vm2023_vm14, %v17378_v48  ;;  %v17388_v54 = vld [vmem:[#allocation3 + $0xa8] sm:$0xff] }
 0x7f7   : > { %3785 = vst.msk [vmem:[#allocation3 + $0xe1] sm:$0xff] %vm2023_vm14, %v13241_v58  ;;  %v17390_v56 = vld [vmem:[#allocation3 + $0xb0] sm:$0xff]  ;;  %v3977_v57 = vrot.slane %v17383_v51, 1  ;;  %3784 = vst.msk [vmem:[#allocation3 + $0xd9] sm:$0xff] %vm2023_vm14, %v3634_v37  ;;  %v3974_v2 = vrot.slane %v17388_v54, 1 }
 0x7f8   : > { %13290 = vmatmul.mubr.msk.f32.gmra.mrb[48].mxu1 %vm2023_vm14, %v17381_v49  ;;  %v3975_v15 = vrot.slane %v17390_v56, 1 }
 0x7f9   : > { %v13244_v16 = vpop.f32.mrb[22].mxu1  ;;  %v17404_v19 = vld [vmem:[#allocation3 + $0xd0] sm:$0x3] }
 0x7fa   : > { %v17399_v18 = vsel %vm2210_vm0, %v3974_v2, %v3975_v15  ;;  %v17402_v10 = vsel %vm2210_vm0, %v3975_v15, %v3977_v57  ;;  %3787 = vst.msk [vmem:[#allocation3 + $0xf9] sm:$0xff] %vm2023_vm14, %v13244_v16  ;;  %v3644_v8 = vpop.f32.mrb[23].mxu1  ;;  %v3982_v23 = vrot.slane %v17404_v19, 1 }
 0x7fb   : > { %20809 = vst [vmem:[#allocation33_spill] sm:$0xff] %v17399_v18  ;;  %20810 = vst [vmem:[#allocation34_spill] sm:$0xff] %v17402_v10  ;;  %13292 = vmatprep.mubr.msk.f32.mxu1 %vm2023_vm14, %v17399_v18  ;;  %v17409_v9 = vld [vmem:[#allocation3 + $0xc0] sm:$0xff]  ;;  %v17411_v22 = vld [vmem:[#allocation3 + $0xc8] sm:$0xff] }
 0x7fc   : > { %3786 = vst.msk [vmem:[#allocation3 + $0xf1] sm:$0xff] %vm2023_vm14, %v3644_v8  ;;  %13293 = vmatmul.mubr.msk.f32.gmra.mrb[50].mxu1 %vm2023_vm14, %v17402_v10  ;;  %v3979_v47 = vrot.slane %v17409_v9, 1  ;;  %v3980_v63 = vrot.slane %v17411_v22, 1 }
 0x7fd   : > { %v13247_v34 = vpop.f32.mrb[24].mxu1 }
 0x7fe   : > { %v17420_v53 = vsel %vm2210_vm0, %v3979_v47, %v3980_v63  ;;  %v17423_v55 = vsel %vm2210_vm0, %v3980_v63, %v3982_v23  ;;  %v17425_v27 = vld [vmem:[#allocation3 + $0xe8] sm:$0x3]  ;;  %3789 = vst.msk [vmem:[#allocation3 + $0x111] sm:$0xff] %vm2023_vm14, %v13247_v34  ;;  %v3654_v17 = vpop.f32.mrb[25].mxu1  ;;  %v17430_v61 = vld [vmem:[#allocation3 + $0xd8] sm:$0xff]  ;;  %v17432_v7 = vld [vmem:[#allocation3 + $0xe0] sm:$0xff] }
 0x7ff   : > { %20811 = vst [vmem:[#allocation35_spill] sm:$0xff] %v17420_v53  ;;  %20812 = vst [vmem:[#allocation36_spill] sm:$0xff] %v17423_v55  ;;  %13295 = vmatprep.mubr.msk.f32.mxu1 %vm2023_vm14, %v17420_v53  ;;  %v3987_v31 = vrot.slane %v17425_v27, 1  ;;  %v3984_v4 = vrot.slane %v17430_v61, 1  ;;  %v3985_v42 = vrot.slane %v17432_v7, 1 }
 0x800   : > { %3788 = vst.msk [vmem:[#allocation3 + $0x109] sm:$0xff] %vm2023_vm14, %v3654_v17  ;;  %13296 = vmatmul.mubr.msk.f32.gmra.mrb[52].mxu1 %vm2023_vm14, %v17423_v55 }
 0x801   : > { %v13250_v45 = vpop.f32.mrb[26].mxu1  ;;  %v17441_v62 = vsel %vm2210_vm0, %v3984_v4, %v3985_v42  ;;  %v17444_v58 = vsel %vm2210_vm0, %v3985_v42, %v3987_v31  ;;  %v17446_v37 = vld [vmem:[#allocation3 + $0x100] sm:$0x3] }
 0x802   : > { %20813 = vst [vmem:[#allocation37_spill] sm:$0xff] %v17441_v62  ;;  %20814 = vst [vmem:[#allocation38_spill] sm:$0xff] %v17444_v58  ;;  %v3664_v57 = vpop.f32.mrb[27].mxu1  ;;  %13298 = vmatprep.mubr.msk.f32.mxu1 %vm2023_vm14, %v17441_v62  ;;  %v3992_v16 = vrot.slane %v17446_v37, 1 }
 0x803   : > { %3791 = vst.msk [vmem:[#allocation3 + $0x129] sm:$0xff] %vm2023_vm14, %v13250_v45  ;;  %v17451_v2 = vld [vmem:[#allocation3 + $0xf0] sm:$0xff]  ;;  %v17453_v15 = vld [vmem:[#allocation3 + $0xf8] sm:$0xff]  ;;  %3790 = vst.msk [vmem:[#allocation3 + $0x121] sm:$0xff] %vm2023_vm14, %v3664_v57 }
 0x804   : > { %13299 = vmatmul.mubr.msk.f32.gmra.mrb[54].mxu1 %vm2023_vm14, %v17444_v58  ;;  %v3989_v8 = vrot.slane %v17451_v2, 1  ;;  %v3990_v23 = vrot.slane %v17453_v15, 1 }
 0x805   : > { %v13253_v47 = vpop.f32.mrb[28].mxu1  ;;  %v17467_v17 = vld [vmem:[#allocation3 + $0x118] sm:$0x3] }
 0x806   : > { %v17462_v63 = vsel %vm2210_vm0, %v3989_v8, %v3990_v23  ;;  %v17465_v34 = vsel %vm2210_vm0, %v3990_v23, %v3992_v16  ;;  %3793 = vst.msk [vmem:[#allocation3 + $0x141] sm:$0xff] %vm2023_vm14, %v13253_v47  ;;  %v3674_v31 = vpop.f32.mrb[29].mxu1  ;;  %v3997_v45 = vrot.slane %v17467_v17, 1 }
 0x807   : > { %20815 = vst [vmem:[#allocation39_spill] sm:$0xff] %v17462_v63  ;;  %20816 = vst [vmem:[#allocation40_spill] sm:$0xff] %v17465_v34  ;;  %13301 = vmatprep.mubr.msk.f32.mxu1 %vm2023_vm14, %v17462_v63  ;;  %v17472_v4 = vld [vmem:[#allocation3 + $0x108] sm:$0xff]  ;;  %v17474_v42 = vld [vmem:[#allocation3 + $0x110] sm:$0xff] }
 0x808   : > { %3792 = vst.msk [vmem:[#allocation3 + $0x139] sm:$0xff] %vm2023_vm14, %v3674_v31  ;;  %13302 = vmatmul.mubr.msk.f32.gmra.mrb[56].mxu1 %vm2023_vm14, %v17465_v34  ;;  %v3994_v57 = vrot.slane %v17472_v4, 1  ;;  %v3995_v16 = vrot.slane %v17474_v42, 1 }
 0x809   : > { %v13256_v8 = vpop.f32.mrb[30].mxu1 }
 0x80a   : > { %v17483_v23 = vsel %vm2210_vm0, %v3994_v57, %v3995_v16  ;;  %v17486_v47 = vsel %vm2210_vm0, %v3995_v16, %v3997_v45  ;;  %v17488_v63 = vld [vmem:[#allocation3 + $0x130] sm:$0x3]  ;;  %3795 = vst.msk [vmem:[#allocation3 + $0x159] sm:$0xff] %vm2023_vm14, %v13256_v8  ;;  %v3684_v58 = vpop.f32.mrb[31].mxu1  ;;  %v17493_v31 = vld [vmem:[#allocation3 + $0x120] sm:$0xff]  ;;  %v17495_v34 = vld [vmem:[#allocation3 + $0x128] sm:$0xff] }
 0x80b   : > { %20817 = vst [vmem:[#allocation41_spill] sm:$0xff] %v17483_v23  ;;  %20818 = vst [vmem:[#allocation42_spill] sm:$0xff] %v17486_v47  ;;  %13304 = vmatprep.mubr.msk.f32.mxu1 %vm2023_vm14, %v17483_v23  ;;  %v4002_v62 = vrot.slane %v17488_v63, 1  ;;  %v3999_v45 = vrot.slane %v17493_v31, 1  ;;  %v4000_v57 = vrot.slane %v17495_v34, 1 }
 0x80c   : > { %3794 = vst.msk [vmem:[#allocation3 + $0x151] sm:$0xff] %vm2023_vm14, %v3684_v58  ;;  %13305 = vmatmul.mubr.msk.f32.gmra.mrb[58].mxu1 %vm2023_vm14, %v17486_v47 }
 0x80d   : > { %v13259_v16 = vpop.f32.mrb[32].mxu1  ;;  %v17504_v8 = vsel %vm2210_vm0, %v3999_v45, %v4000_v57  ;;  %v17507_v23 = vsel %vm2210_vm0, %v4000_v57, %v4002_v62  ;;  %v17509_v55 = vld [vmem:[#allocation3 + $0x148] sm:$0x3] }
 0x80e   : > { %20819 = vst [vmem:[#allocation43_spill] sm:$0xff] %v17504_v8  ;;  %20820 = vst [vmem:[#allocation44_spill] sm:$0xff] %v17507_v23  ;;  %v3694_v53 = vpop.f32.mrb[33].mxu1  ;;  %13307 = vmatprep.mubr.msk.f32.mxu1 %vm2023_vm14, %v17504_v8  ;;  %v4007_v10 = vrot.slane %v17509_v55, 1 }
 0x80f   : > { %3797 = vst.msk [vmem:[#allocation3 + $0x171] sm:$0xff] %vm2023_vm14, %v13259_v16  ;;  %v17514_v58 = vld [vmem:[#allocation3 + $0x138] sm:$0xff]  ;;  %v17516_v47 = vld [vmem:[#allocation3 + $0x140] sm:$0xff]  ;;  %3796 = vst.msk [vmem:[#allocation3 + $0x169] sm:$0xff] %vm2023_vm14, %v3694_v53 }
 0x810   : > { %13308 = vmatmul.mubr.msk.f32.gmra.mrb[60].mxu1 %vm2023_vm14, %v17507_v23  ;;  %v4004_v62 = vrot.slane %v17514_v58, 1  ;;  %v4005_v45 = vrot.slane %v17516_v47, 1 }
 0x811   : > { %v17530_v8 = vld [vmem:[#allocation3 + $0x160] sm:$0x3] }
 0x812   : > { %v17525_v57 = vsel %vm2210_vm0, %v4004_v62, %v4005_v45  ;;  %v17528_v16 = vsel %vm2210_vm0, %v4005_v45, %v4007_v10  ;;  %v4012_v23 = vrot.slane %v17530_v8, 1 }
 0x813   : > { %20821 = vst [vmem:[#allocation45_spill] sm:$0xff] %v17525_v57  ;;  %20822 = vst [vmem:[#allocation46_spill] sm:$0xff] %v17528_v16  ;;  %13310 = vmatprep.mubr.msk.f32.mxu1 %vm2023_vm14, %v17525_v57  ;;  %v17534_v18 = vld [vmem:[#allocation3 + $0x150] sm:$0xff]  ;;  %v17536_v53 = vld [vmem:[#allocation3 + $0x158] sm:$0xff] }
 0x814   : > { %13311 = vmatmul.mubr.msk.f32.gmra.mrb[62].mxu1 %vm2023_vm14, %v17528_v16  ;;  %v4009_v62 = vrot.slane %v17534_v18, 1  ;;  %v4010_v49 = vrot.slane %v17536_v53, 1 }
 0x816   : > { %v17544_v10 = vsel %vm2210_vm0, %v4009_v62, %v4010_v49  ;;  %v17547_v45 = vsel %vm2210_vm0, %v4010_v49, %v4012_v23  ;;  %v17549_v57 = vld [vmem:[#allocation3 + $0x178] sm:$0x3]  ;;  %v17553_v48 = vld [vmem:[#allocation3 + $0x168] sm:$0xff]  ;;  %v17555_v36 = vld [vmem:[#allocation3 + $0x170] sm:$0xff] }
 0x817   : > { %20823 = vst [vmem:[#allocation47_spill] sm:$0xff] %v17544_v10  ;;  %20824 = vst [vmem:[#allocation48_spill] sm:$0xff] %v17547_v45  ;;  %13313 = vmatprep.mubr.msk.f32.mxu1 %vm2023_vm14, %v17544_v10  ;;  %v4017_v16 = vrot.slane %v17549_v57, 1  ;;  %v4014_v62 = vrot.slane %v17553_v48, 1  ;;  %v4015_v32 = vrot.slane %v17555_v36, 1  ;;  %v3864_v10 = vld [vmem:[#allocation14 + $0x50] sm:$0xff] }
 0x818   : > { %13314 = vmatmul.mubr.msk.f32.gmra.mrb[64].mxu1 %vm2023_vm14, %v17547_v45  ;;  %v14499_v45 = vpack.c.bf16 %v3865_v60, %v3864_v10  ;;  %v4598_v60 = vrot.slane %v17243_v0, 2 }
 0x819   : > { %v17563_v49 = vsel %vm2210_vm0, %v4014_v62, %v4015_v32  ;;  %v17566_v23 = vsel %vm2210_vm0, %v4015_v32, %v4017_v16  ;;  %v14503_v32 = vpack.c.bf16 %v3867_v46, %v3866_v59  ;;  %v4597_v59 = vrot.slane %v17241_v24, 2  ;;  %v3869_v62 = vld [vmem:[#allocation14 + $0x78] sm:$0xff] }
 0x81a   : > { %20825 = vst [vmem:[#allocation49_spill] sm:$0xff] %v17563_v49  ;;  %20826 = vst [vmem:[#allocation50_spill] sm:$0xff] %v17566_v23  ;;  %13316 = vmatprep.mubr.msk.f32.mxu1 %vm2023_vm14, %v17563_v49  ;;  %v4600_v16 = vrot.slane %v17247_v26, 2  ;;  %v3870_v49 = vld [vmem:[#allocation14 + $0x80] sm:$0xff]  ;;  %v3871_v26 = vld [vmem:[#allocation14 + $0x88] sm:$0xff] }
 0x81b   : > { %v4599_v10 = vsel %vm2477_vm1, %v4597_v59, %v4598_v60 }
 0x81c   : > { %13317 = vmatmul.mubr.msk.f32.gmra.mrb[66].mxu1 %vm2023_vm14, %v17566_v23  ;;  %v4605_v23 = vrot.slane %v17261_v50, 2 }
 0x81d   : > { %13327 = vmatprep.mubr.msk.f32.mxu1 %vm2023_vm14, %v17241_v24  ;;  %v4603_v24 = vrot.slane %v17266_v52, 2 }
 0x81f   : > { %v17659_v50 = vsel %vm2477_vm1, %v4603_v24, %v4605_v23  ;;  %v4617_v23 = vrot.slane %v17325_v43, 2 }
 0x820   : > { %13328 = vmatmul.mubr.msk.f32.vlgmr.msra.gmra.mrb[36].mxu1 %vm2023_vm14, %v17243_v0  ;;  %v4601_v0 = vsel %vm2477_vm1, %v4598_v60, %v4600_v16  ;;  %v17656_v60 = vpack.c.bf16 %v3871_v26, %v3870_v49  ;;  %v4610_v16 = vrot.slane %v17278_v33, 2  ;;  %v4615_v33 = vrot.slane %v17299_v35, 2 }
 0x821   : > { %14498 = vmatpush3.bf16.msra.mxu1 %v17254_v44  ;;  %13330 = vmatprep.mubr.msk.f32.mxu1 %vm2023_vm14, %v17264_v29  ;;  %v13262_v44 = vpop.f32.mrb[34].mxu1  ;;  %v4625_v26 = vrot.slane %v17341_v13, 2 }
 0x822   : > { %14500 = vmatprep.subr.bf16.mxu1 %v14499_v45  ;;  %3799 = vst.msk [vmem:[#allocation3 + $0x189] sm:$0xff] %vm2023_vm14, %v13262_v44  ;;  %v3704_v46 = vpop.f32.mrb[35].mxu1  ;;  %v4602_v44 = vrot.slane %v17264_v29, 2  ;;  %v17673_v49 = vsel %vm2477_vm1, %v4608_v11, %v4610_v16  ;;  %v4627_v16 = vrot.slane %v17367_v40, 2 }
 0x823   : > { %3798 = vst.msk [vmem:[#allocation3 + $0x181] sm:$0xff] %vm2023_vm14, %v3704_v46 }
 0x824   : > { %13331 = vmatmul.mubr.msk.f32.gmra.mrb[38].mxu1 %vm2023_vm14, %v17266_v52  ;;  %v17650_v59 = vsel %vm2477_vm1, %v4602_v44, %v4603_v24  ;;  %v4622_v24 = vrot.slane %v17346_v28, 2 }
 0x825   : > { %13333 = vmatprep.mubr.msk.f32.mxu1 %vm2023_vm14, %v17283_v3  ;;  %14502 = vmatpush3.bf16.msra.mxu1 %v14499_v45  ;;  %v3868_v45 = vld [vmem:[#allocation14 + $0x70] sm:$0xff] }
 0x826   : > { %14504 = vmatprep.subr.bf16.mxu1 %v14503_v32  ;;  %v14507_v46 = vpack.c.bf16 %v3869_v62, %v3868_v45  ;;  %v4612_v45 = vrot.slane %v17304_v20, 2  ;;  %v4618_v62 = vrot.slane %v17327_v38, 2 }
 0x828   : > { %13334 = vmatmul.mubr.msk.f32.gmra.mrb[40].mxu1 %vm2023_vm14, %v17285_v14  ;;  %v17692_v35 = vsel %vm2477_vm1, %v4617_v23, %v4618_v62  ;;  %v4632_v23 = vrot.slane %v17388_v54, 2 }
 0x829   : > { %13336 = vmatprep.mubr.msk.f32.mxu1 %vm2023_vm14, %v17304_v20 }
 0x82c   : > { %13337 = vmatmul.mubr.msk.f32.gmra.mrb[42].mxu1 %vm2023_vm14, %v17306_v21 }
 0x82d   : > { %13339 = vmatprep.mubr.msk.f32.mxu1 %vm2023_vm14, %v17325_v43 }
 0x830   : > { %13340 = vmatmul.mubr.msk.f32.gmra.mrb[44].mxu1 %vm2023_vm14, %v17327_v38 }
 0x831   : > { %13342 = vmatprep.mubr.msk.f32.mxu1 %vm2023_vm14, %v17346_v28 }
 0x834   : > { %13343 = vmatmul.mubr.msk.f32.gmra.mrb[46].mxu1 %vm2023_vm14, %v17348_v30 }
 0x835   : > { %13345 = vmatprep.mubr.msk.f32.mxu1 %vm2023_vm14, %v17367_v40 }
 0x838   : > { %13346 = vmatmul.mubr.msk.f32.gmra.mrb[48].mxu1 %vm2023_vm14, %v17369_v41 }
 0x839   : > { %13348 = vmatprep.mubr.msk.f32.mxu1 %vm2023_vm14, %v17388_v54 }
 0x83c   : > { %13349 = vmatmul.mubr.msk.f32.gmra.mrb[50].mxu1 %vm2023_vm14, %v17390_v56 }
 0x83d   : > { %13351 = vmatprep.mubr.msk.f32.mxu1 %vm2023_vm14, %v17409_v9 }
 0x840   : > { %13352 = vmatmul.mubr.msk.f32.gmra.mrb[52].mxu1 %vm2023_vm14, %v17411_v22 }
 0x841   : > { %13354 = vmatprep.mubr.msk.f32.mxu1 %vm2023_vm14, %v17430_v61 }
 0x844   : > { %13355 = vmatmul.mubr.msk.f32.gmra.mrb[54].mxu1 %vm2023_vm14, %v17432_v7 }
 0x845   : > { %13357 = vmatprep.mubr.msk.f32.mxu1 %vm2023_vm14, %v17451_v2 }
 0x848   : > { %13358 = vmatmul.mubr.msk.f32.gmra.mrb[56].mxu1 %vm2023_vm14, %v17453_v15 }
 0x849   : > { %13360 = vmatprep.mubr.msk.f32.mxu1 %vm2023_vm14, %v17472_v4 }
 0x84c   : > { %13361 = vmatmul.mubr.msk.f32.gmra.mrb[58].mxu1 %vm2023_vm14, %v17474_v42 }
 0x84d   : > { %13363 = vmatprep.mubr.msk.f32.mxu1 %vm2023_vm14, %v17493_v31 }
 0x850   : > { %13364 = vmatmul.mubr.msk.f32.gmra.mrb[60].mxu1 %vm2023_vm14, %v17495_v34 }
 0x851   : > { %13366 = vmatprep.mubr.msk.f32.mxu1 %vm2023_vm14, %v17514_v58 }
 0x854   : > { %13367 = vmatmul.mubr.msk.f32.gmra.mrb[62].mxu1 %vm2023_vm14, %v17516_v47 }
 0x855   : > { %13369 = vmatprep.mubr.msk.f32.mxu1 %vm2023_vm14, %v17534_v18 }
 0x858   : > { %13370 = vmatmul.mubr.msk.f32.gmra.mrb[64].mxu1 %vm2023_vm14, %v17536_v53 }
 0x859   : > { %13372 = vmatprep.mubr.msk.f32.mxu1 %vm2023_vm14, %v17553_v48 }
 0x85c   : > { %13373 = vmatmul.mubr.msk.f32.gmra.mrb[66].mxu1 %vm2023_vm14, %v17555_v36 }
 0x85d   : > { %13383 = vmatprep.mubr.msk.f32.mxu1 %vm2023_vm14, %v4599_v10  ;;  %v17665_v10 = vsel %vm2477_vm1, %v4607_v1, %v4608_v11  ;;  %v4620_v11 = vrot.slane %v17320_v25, 2 }
 0x860   : > { %13384 = vmatmul.mubr.msk.f32.vlgmr.msra.gmra.mrb[36].mxu1 %vm2023_vm14, %v4601_v0  ;;  %v4623_v0 = vrot.slane %v17348_v30, 2 }
 0x861   : > { %14506 = vmatpush3.bf16.msra.mxu1 %v14503_v32  ;;  %13386 = vmatprep.mubr.msk.f32.mxu1 %vm2023_vm14, %v17650_v59  ;;  %v4613_v32 = vrot.slane %v17306_v21, 2 }
 0x862   : > { %14508 = vmatprep.subr.bf16.mxu1 %v14507_v46  ;;  %v17705_v25 = vsel %vm2477_vm1, %v4622_v24, %v4623_v0  ;;  %v4635_v24 = vrot.slane %v17383_v51, 2 }
 0x863   : > { %v17679_v1 = vsel %vm2477_vm1, %v4612_v45, %v4613_v32  ;;  %v17686_v44 = vsel %vm2477_vm1, %v4613_v32, %v4615_v33  ;;  %v4628_v45 = vrot.slane %v17369_v41, 2  ;;  %v17712_v32 = vsel %vm2477_vm1, %v4623_v0, %v4625_v26 }
 0x864   : > { %13387 = vmatmul.mubr.msk.f32.gmra.mrb[38].mxu1 %vm2023_vm14, %v17659_v50  ;;  %v4630_v33 = vrot.slane %v17362_v39, 2  ;;  %v4637_v0 = vrot.slane %v17409_v9, 2  ;;  %v4638_v26 = vrot.slane %v17411_v22, 2 }
 0x865   : > { %13389 = vmatprep.mubr.msk.f32.mxu1 %vm2023_vm14, %v17665_v10  ;;  %14510 = vmatpush3.bf16.msra.mxu1 %v14507_v46  ;;  %v17699_v46 = vsel %vm2477_vm1, %v4618_v62, %v4620_v11  ;;  %v17718_v13 = vsel %vm2477_vm1, %v4627_v16, %v4628_v45  ;;  %v4633_v62 = vrot.slane %v17390_v56, 2 }
 0x866   : > { %14512 = vmatprep.subr.bf16.mxu1 %v17656_v60  ;;  %v17725_v11 = vsel %vm2477_vm1, %v4628_v45, %v4630_v33  ;;  %v4640_v45 = vrot.slane %v17404_v19, 2  ;;  %v17744_v51 = vsel %vm2477_vm1, %v4637_v0, %v4638_v26  ;;  %v4642_v33 = vrot.slane %v17430_v61, 2 }
 0x867   : > { %v17731_v39 = vsel %vm2477_vm1, %v4632_v23, %v4633_v62  ;;  %v17738_v16 = vsel %vm2477_vm1, %v4633_v62, %v4635_v24  ;;  %20828 = vst [vmem:[#allocation52_spill] sm:$0xff] %v17744_v51  ;;  %v4643_v23 = vrot.slane %v17432_v7, 2  ;;  %v4645_v62 = vrot.slane %v17425_v27, 2 }
 0x868   : > { %13390 = vmatmul.mubr.msk.f32.gmra.mrb[40].mxu1 %vm2023_vm14, %v17673_v49  ;;  %20827 = vst [vmem:[#allocation51_spill] sm:$0xff] %v17731_v39  ;;  %v4647_v24 = vrot.slane %v17451_v2, 2  ;;  %v4648_v0 = vrot.slane %v17453_v15, 2 }
 0x869   : > { %13392 = vmatprep.mubr.msk.f32.mxu1 %vm2023_vm14, %v17679_v1  ;;  %v17757_v19 = vsel %vm2477_vm1, %v4642_v33, %v4643_v23  ;;  %v4653_v33 = vrot.slane %v17474_v42, 2 }
 0x86a   : > { %20829 = vst [vmem:[#allocation53_spill] sm:$0xff] %v17757_v19  ;;  %v17770_v27 = vsel %vm2477_vm1, %v4647_v24, %v4648_v0  ;;  %v4658_v24 = vrot.slane %v17495_v34, 2 }
 0x86b   : > { %20830 = vst [vmem:[#allocation54_spill] sm:$0xff] %v17770_v27 }
 0x86c   : > { %13393 = vmatmul.mubr.msk.f32.gmra.mrb[42].mxu1 %vm2023_vm14, %v17686_v44 }
 0x86d   : > { %13395 = vmatprep.mubr.msk.f32.mxu1 %vm2023_vm14, %v17692_v35 }
 0x870   : > { %13396 = vmatmul.mubr.msk.f32.gmra.mrb[44].mxu1 %vm2023_vm14, %v17699_v46 }
 0x871   : > { %13398 = vmatprep.mubr.msk.f32.mxu1 %vm2023_vm14, %v17705_v25 }
 0x874   : > { %13399 = vmatmul.mubr.msk.f32.gmra.mrb[46].mxu1 %vm2023_vm14, %v17712_v32 }
 0x875   : > { %13401 = vmatprep.mubr.msk.f32.mxu1 %vm2023_vm14, %v17718_v13 }
 0x878   : > { %13402 = vmatmul.mubr.msk.f32.gmra.mrb[48].mxu1 %vm2023_vm14, %v17725_v11 }
 0x879   : > { %13404 = vmatprep.mubr.msk.f32.mxu1 %vm2023_vm14, %v17731_v39  ;;  %v17751_v39 = vsel %vm2477_vm1, %v4638_v26, %v4640_v45  ;;  %v4650_v26 = vrot.slane %v17446_v37, 2  ;;  %v4652_v45 = vrot.slane %v17472_v4, 2 }
 0x87b   : > { %v17783_v37 = vsel %vm2477_vm1, %v4652_v45, %v4653_v33  ;;  %v4663_v45 = vrot.slane %v17516_v47, 2 }
 0x87c   : > { %13405 = vmatmul.mubr.msk.f32.gmra.mrb[50].mxu1 %vm2023_vm14, %v17738_v16  ;;  %20831 = vst [vmem:[#allocation55_spill] sm:$0xff] %v17783_v37 }
 0x87d   : > { %13407 = vmatprep.mubr.msk.f32.mxu1 %vm2023_vm14, %v17744_v51  ;;  %v17764_v51 = vsel %vm2477_vm1, %v4643_v23, %v4645_v62  ;;  %v4655_v23 = vrot.slane %v17467_v17, 2  ;;  %v4657_v62 = vrot.slane %v17493_v31, 2 }
 0x87f   : > { %v17796_v17 = vsel %vm2477_vm1, %v4657_v62, %v4658_v24  ;;  %v4668_v62 = vrot.slane %v17536_v53, 2 }
 0x880   : > { %13408 = vmatmul.mubr.msk.f32.gmra.mrb[52].mxu1 %vm2023_vm14, %v17751_v39  ;;  %20832 = vst [vmem:[#allocation56_spill] sm:$0xff] %v17796_v17 }
 0x881   : > { %13410 = vmatprep.mubr.msk.f32.mxu1 %vm2023_vm14, %v17757_v19  ;;  %v17777_v19 = vsel %vm2477_vm1, %v4648_v0, %v4650_v26  ;;  %v4660_v0 = vrot.slane %v17488_v63, 2  ;;  %v4662_v26 = vrot.slane %v17514_v58, 2 }
 0x883   : > { %v17809_v63 = vsel %vm2477_vm1, %v4662_v26, %v4663_v45  ;;  %v4673_v26 = vrot.slane %v17555_v36, 2 }
 0x884   : > { %13411 = vmatmul.mubr.msk.f32.gmra.mrb[54].mxu1 %vm2023_vm14, %v17764_v51  ;;  %20834 = vst [vmem:[#allocation58_spill] sm:$0xff] %v17809_v63 }
 0x885   : > { %13413 = vmatprep.mubr.msk.f32.mxu1 %vm2023_vm14, %v17770_v27  ;;  %v17790_v27 = vsel %vm2477_vm1, %v4653_v33, %v4655_v23  ;;  %v4665_v33 = vrot.slane %v17509_v55, 2  ;;  %v4667_v23 = vrot.slane %v17534_v18, 2 }
 0x887   : > { %v17822_v55 = vsel %vm2477_vm1, %v4667_v23, %v4668_v62  ;;  %v3872_v23 = vld [vmem:[#allocation14 + $0x90] sm:$0xff] }
 0x888   : > { %13414 = vmatmul.mubr.msk.f32.gmra.mrb[56].mxu1 %vm2023_vm14, %v17777_v19  ;;  %20836 = vst [vmem:[#allocation60_spill] sm:$0xff] %v17822_v55 }
 0x889   : > { %13416 = vmatprep.mubr.msk.f32.mxu1 %vm2023_vm14, %v17783_v37  ;;  %v17803_v37 = vsel %vm2477_vm1, %v4658_v24, %v4660_v0  ;;  %v4670_v24 = vrot.slane %v17530_v8, 2  ;;  %v4672_v0 = vrot.slane %v17553_v48, 2 }
 0x88a   : > { %20833 = vst [vmem:[#allocation57_spill] sm:$0xff] %v17803_v37 }
 0x88b   : > { %v17835_v8 = vsel %vm2477_vm1, %v4672_v0, %v4673_v26 }
 0x88c   : > { %13417 = vmatmul.mubr.msk.f32.gmra.mrb[58].mxu1 %vm2023_vm14, %v17790_v27  ;;  %20838 = vst [vmem:[#allocation62_spill] sm:$0xff] %v17835_v8 }
 0x88d   : > { %13419 = vmatprep.mubr.msk.f32.mxu1 %vm2023_vm14, %v17796_v17  ;;  %v17816_v17 = vsel %vm2477_vm1, %v4663_v45, %v4665_v33  ;;  %v4675_v45 = vrot.slane %v17549_v57, 2 }
 0x88e   : > { %20835 = vst [vmem:[#allocation59_spill] sm:$0xff] %v17816_v17 }
 0x88f   : > { %v17840_v33 = vsel %vm2477_vm1, %v4673_v26, %v4675_v45  ;;  %v3878_v45 = vld [vmem:[#allocation14 + $0xc0] sm:$0xff] }
 0x890   : > { %13420 = vmatmul.mubr.msk.f32.gmra.mrb[60].mxu1 %vm2023_vm14, %v17803_v37  ;;  %20839 = vst [vmem:[#allocation63_spill] sm:$0xff] %v17840_v33 }
 0x891   : > { %13422 = vmatprep.mubr.msk.f32.mxu1 %vm2023_vm14, %v17809_v63  ;;  %v17829_v63 = vsel %vm2477_vm1, %v4668_v62, %v4670_v24  ;;  %v3874_v62 = vld [vmem:[#allocation14 + $0xa0] sm:$0xff]  ;;  %v3875_v24 = vld [vmem:[#allocation14 + $0xa8] sm:$0xff] }
 0x892   : > { %20837 = vst [vmem:[#allocation61_spill] sm:$0xff] %v17829_v63  ;;  %v14519_v0 = vpack.c.bf16 %v3875_v24, %v3874_v62  ;;  %v20840_v62 = vld [vmem:[#allocation24_spill] sm:$0xff]  ;;  %v20841_v24 = vld [vmem:[#allocation25_spill] sm:$0xff] }
 0x894   : > { %13423 = vmatmul.mubr.msk.f32.gmra.mrb[62].mxu1 %vm2023_vm14, %v17816_v17  ;;  %v3873_v17 = vld [vmem:[#allocation14 + $0x98] sm:$0xff] }
 0x895   : > { %13425 = vmatprep.mubr.msk.f32.mxu1 %vm2023_vm14, %v17822_v55  ;;  %v14515_v57 = vpack.c.bf16 %v3873_v17, %v3872_v23  ;;  %v3877_v17 = vld [vmem:[#allocation14 + $0xb8] sm:$0xff]  ;;  %v3879_v23 = vld [vmem:[#allocation14 + $0xc8] sm:$0xff] }
 0x898   : > { %13426 = vmatmul.mubr.msk.f32.gmra.mrb[64].mxu1 %vm2023_vm14, %v17829_v63 }
 0x899   : > { %13428 = vmatprep.mubr.msk.f32.mxu1 %vm2023_vm14, %v17835_v8 }
 0x89c   : > { %13429 = vmatmul.mubr.msk.f32.gmra.mrb[66].mxu1 %vm2023_vm14, %v17840_v33 }
 0x89d   : > { %13439 = vmatprep.mubr.msk.f32.mxu1 %vm2023_vm14, %v17264_v29  ;;  %v17905_v29 = vld [vmem:[#allocation3 + $0x180] sm:$0xff] }
 0x8a0   : > { %13440 = vmatmul.mubr.msk.f32.vlgmr.msra.gmra.mrb[36].mxu1 %vm2023_vm14, %v17266_v52  ;;  %v17909_v52 = vld [vmem:[#allocation3 + $0x188] sm:$0xff] }
 0x8a1   : > { %14514 = vmatpush3.bf16.msra.mxu1 %v17656_v60  ;;  %13442 = vmatprep.mubr.msk.f32.mxu1 %vm2023_vm14, %v17283_v3  ;;  %v3876_v60 = vld [vmem:[#allocation14 + $0xb0] sm:$0xff] }
 0x8a2   : > { %14516 = vmatprep.subr.bf16.mxu1 %v14515_v57  ;;  %v14523_v26 = vpack.c.bf16 %v3877_v17, %v3876_v60  ;;  %v20843_v60 = vld [vmem:[#allocation27_spill] sm:$0xff]  ;;  %v20846_v17 = vld [vmem:[#allocation30_spill] sm:$0xff] }
 0x8a4   : > { %13443 = vmatmul.mubr.msk.f32.gmra.mrb[38].mxu1 %vm2023_vm14, %v17285_v14 }
 0x8a5   : > { %13445 = vmatprep.mubr.msk.f32.mxu1 %vm2023_vm14, %v17304_v20  ;;  %14518 = vmatpush3.bf16.msra.mxu1 %v14515_v57  ;;  %v14527_v57 = vpack.c.bf16 %v3879_v23, %v3878_v45  ;;  %v20847_v45 = vld [vmem:[#allocation31_spill] sm:$0xff]  ;;  %v20849_v23 = vld [vmem:[#allocation33_spill] sm:$0xff] }
 0x8a6   : > { %14520 = vmatprep.subr.bf16.mxu1 %v14519_v0 }
 0x8a8   : > { %13446 = vmatmul.mubr.msk.f32.gmra.mrb[40].mxu1 %vm2023_vm14, %v17306_v21 }
 0x8a9   : > { %13448 = vmatprep.mubr.msk.f32.mxu1 %vm2023_vm14, %v17325_v43 }
 0x8ac   : > { %13449 = vmatmul.mubr.msk.f32.gmra.mrb[42].mxu1 %vm2023_vm14, %v17327_v38 }
 0x8ad   : > { %13451 = vmatprep.mubr.msk.f32.mxu1 %vm2023_vm14, %v17346_v28 }
 0x8b0   : > { %13452 = vmatmul.mubr.msk.f32.gmra.mrb[44].mxu1 %vm2023_vm14, %v17348_v30 }
 0x8b1   : > { %13454 = vmatprep.mubr.msk.f32.mxu1 %vm2023_vm14, %v17367_v40 }
 0x8b4   : > { %13455 = vmatmul.mubr.msk.f32.gmra.mrb[46].mxu1 %vm2023_vm14, %v17369_v41 }
 0x8b5   : > { %13457 = vmatprep.mubr.msk.f32.mxu1 %vm2023_vm14, %v17388_v54 }
 0x8b8   : > { %13458 = vmatmul.mubr.msk.f32.gmra.mrb[48].mxu1 %vm2023_vm14, %v17390_v56 }
 0x8b9   : > { %13460 = vmatprep.mubr.msk.f32.mxu1 %vm2023_vm14, %v17409_v9 }
 0x8bc   : > { %13461 = vmatmul.mubr.msk.f32.gmra.mrb[50].mxu1 %vm2023_vm14, %v17411_v22 }
 0x8bd   : > { %13463 = vmatprep.mubr.msk.f32.mxu1 %vm2023_vm14, %v17430_v61 }
 0x8c0   : > { %13464 = vmatmul.mubr.msk.f32.gmra.mrb[52].mxu1 %vm2023_vm14, %v17432_v7 }
 0x8c1   : > { %13466 = vmatprep.mubr.msk.f32.mxu1 %vm2023_vm14, %v17451_v2 }
 0x8c4   : > { %13467 = vmatmul.mubr.msk.f32.gmra.mrb[54].mxu1 %vm2023_vm14, %v17453_v15 }
 0x8c5   : > { %13469 = vmatprep.mubr.msk.f32.mxu1 %vm2023_vm14, %v17472_v4 }
 0x8c8   : > { %13470 = vmatmul.mubr.msk.f32.gmra.mrb[56].mxu1 %vm2023_vm14, %v17474_v42 }
 0x8c9   : > { %13472 = vmatprep.mubr.msk.f32.mxu1 %vm2023_vm14, %v17493_v31 }
 0x8cc   : > { %13473 = vmatmul.mubr.msk.f32.gmra.mrb[58].mxu1 %vm2023_vm14, %v17495_v34 }
 0x8cd   : > { %13475 = vmatprep.mubr.msk.f32.mxu1 %vm2023_vm14, %v17514_v58 }
 0x8d0   : > { %13476 = vmatmul.mubr.msk.f32.gmra.mrb[60].mxu1 %vm2023_vm14, %v17516_v47 }
 0x8d1   : > { %13478 = vmatprep.mubr.msk.f32.mxu1 %vm2023_vm14, %v17534_v18 }
 0x8d4   : > { %13479 = vmatmul.mubr.msk.f32.gmra.mrb[62].mxu1 %vm2023_vm14, %v17536_v53 }
 0x8d5   : > { %13481 = vmatprep.mubr.msk.f32.mxu1 %vm2023_vm14, %v17553_v48 }
 0x8d8   : > { %13482 = vmatmul.mubr.msk.f32.gmra.mrb[64].mxu1 %vm2023_vm14, %v17555_v36 }
 0x8d9   : > { %13484 = vmatprep.mubr.msk.f32.mxu1 %vm2023_vm14, %v17905_v29 }
 0x8dc   : > { %13485 = vmatmul.mubr.msk.f32.gmra.mrb[66].mxu1 %vm2023_vm14, %v17909_v52 }
 0x8dd   : > { %13495 = vmatprep.mubr.msk.f32.mxu1 %vm2023_vm14, %v17273_v5  ;;  %v20842_v5 = vld [vmem:[#allocation26_spill] sm:$0xff] }
 0x8e0   : > { %13496 = vmatmul.mubr.msk.f32.vlgmr.msra.gmra.mrb[36].mxu1 %vm2023_vm14, %v17276_v6  ;;  %v20844_v6 = vld [vmem:[#allocation28_spill] sm:$0xff] }
 0x8e1   : > { %14522 = vmatpush3.bf16.msra.mxu1 %v14519_v0  ;;  %13498 = vmatprep.mubr.msk.f32.mxu1 %vm2023_vm14, %v17294_v12  ;;  %v20845_v0 = vld [vmem:[#allocation29_spill] sm:$0xff]  ;;  %v3882_v12 = vld [vmem:[#allocation14 + $0xe0] sm:$0xff] }
 0x8e2   : > { %14524 = vmatprep.subr.bf16.mxu1 %v14523_v26 }
 0x8e4   : > { %13499 = vmatmul.mubr.msk.f32.gmra.mrb[38].mxu1 %vm2023_vm14, %v20840_v62  ;;  %v20866_v62 = vld [vmem:[#allocation50_spill] sm:$0xff] }
 0x8e5   : > { %13501 = vmatprep.mubr.msk.f32.mxu1 %vm2023_vm14, %v20841_v24  ;;  %14526 = vmatpush3.bf16.msra.mxu1 %v14523_v26  ;;  %v20848_v26 = vld [vmem:[#allocation32_spill] sm:$0xff]  ;;  %v20865_v24 = vld [vmem:[#allocation49_spill] sm:$0xff] }
 0x8e6   : > { %14528 = vmatprep.subr.bf16.mxu1 %v14527_v57 }
 0x8e8   : > { %13502 = vmatmul.mubr.msk.f32.gmra.mrb[40].mxu1 %vm2023_vm14, %v20842_v5  ;;  %v20850_v5 = vld [vmem:[#allocation34_spill] sm:$0xff] }
 0x8e9   : > { %13504 = vmatprep.mubr.msk.f32.mxu1 %vm2023_vm14, %v20843_v60  ;;  %v20851_v60 = vld [vmem:[#allocation35_spill] sm:$0xff] }
 0x8ec   : > { %13505 = vmatmul.mubr.msk.f32.gmra.mrb[42].mxu1 %vm2023_vm14, %v20844_v6  ;;  %v20852_v6 = vld [vmem:[#allocation36_spill] sm:$0xff] }
 0x8ed   : > { %13507 = vmatprep.mubr.msk.f32.mxu1 %vm2023_vm14, %v20845_v0  ;;  %v20853_v0 = vld [vmem:[#allocation37_spill] sm:$0xff] }
 0x8f0   : > { %13508 = vmatmul.mubr.msk.f32.gmra.mrb[44].mxu1 %vm2023_vm14, %v20846_v17  ;;  %v20854_v17 = vld [vmem:[#allocation38_spill] sm:$0xff] }
 0x8f1   : > { %13510 = vmatprep.mubr.msk.f32.mxu1 %vm2023_vm14, %v20847_v45  ;;  %v20855_v45 = vld [vmem:[#allocation39_spill] sm:$0xff] }
 0x8f4   : > { %13511 = vmatmul.mubr.msk.f32.gmra.mrb[46].mxu1 %vm2023_vm14, %v20848_v26  ;;  %v20856_v26 = vld [vmem:[#allocation40_spill] sm:$0xff] }
 0x8f5   : > { %13513 = vmatprep.mubr.msk.f32.mxu1 %vm2023_vm14, %v20849_v23  ;;  %v20857_v23 = vld [vmem:[#allocation41_spill] sm:$0xff] }
 0x8f8   : > { %13514 = vmatmul.mubr.msk.f32.gmra.mrb[48].mxu1 %vm2023_vm14, %v20850_v5  ;;  %v20858_v5 = vld [vmem:[#allocation42_spill] sm:$0xff] }
 0x8f9   : > { %13516 = vmatprep.mubr.msk.f32.mxu1 %vm2023_vm14, %v20851_v60  ;;  %v20859_v60 = vld [vmem:[#allocation43_spill] sm:$0xff] }
 0x8fc   : > { %13517 = vmatmul.mubr.msk.f32.gmra.mrb[50].mxu1 %vm2023_vm14, %v20852_v6  ;;  %v20860_v6 = vld [vmem:[#allocation44_spill] sm:$0xff] }
 0x8fd   : > { %13519 = vmatprep.mubr.msk.f32.mxu1 %vm2023_vm14, %v20853_v0  ;;  %v20861_v0 = vld [vmem:[#allocation45_spill] sm:$0xff] }
 0x900   : > { %13520 = vmatmul.mubr.msk.f32.gmra.mrb[52].mxu1 %vm2023_vm14, %v20854_v17  ;;  %v20862_v17 = vld [vmem:[#allocation46_spill] sm:$0xff] }
 0x901   : > { %13522 = vmatprep.mubr.msk.f32.mxu1 %vm2023_vm14, %v20855_v45  ;;  %v20863_v45 = vld [vmem:[#allocation47_spill] sm:$0xff] }
 0x904   : > { %13523 = vmatmul.mubr.msk.f32.gmra.mrb[54].mxu1 %vm2023_vm14, %v20856_v26  ;;  %v20864_v26 = vld [vmem:[#allocation48_spill] sm:$0xff] }
 0x905   : > { %13525 = vmatprep.mubr.msk.f32.mxu1 %vm2023_vm14, %v20857_v23  ;;  %v5263_v23 = vrot.slane %v17909_v52, 1 }
 0x908   : > { %13526 = vmatmul.mubr.msk.f32.gmra.mrb[56].mxu1 %vm2023_vm14, %v20858_v5  ;;  %v5262_v5 = vrot.slane %v17905_v29, 1 }
 0x909   : > { %13528 = vmatprep.mubr.msk.f32.mxu1 %vm2023_vm14, %v20859_v60  ;;  %v3850_v60 = vld [vmem:[#allocation3 + $0x190] sm:$0x3] }
 0x90c   : > { %13529 = vmatmul.mubr.msk.f32.gmra.mrb[58].mxu1 %vm2023_vm14, %v20860_v6  ;;  %v5265_v6 = vrot.slane %v3850_v60, 1 }
 0x90d   : > { %13531 = vmatprep.mubr.msk.f32.mxu1 %vm2023_vm14, %v20861_v0  ;;  %v3881_v0 = vld [vmem:[#allocation14 + $0xd8] sm:$0xff] }
 0x910   : > { %13532 = vmatmul.mubr.msk.f32.gmra.mrb[60].mxu1 %vm2023_vm14, %v20862_v17  ;;  %v17976_v17 = vsel %vm2210_vm0, %v5262_v5, %v5263_v23 }
 0x911   : > { %13534 = vmatprep.mubr.msk.f32.mxu1 %vm2023_vm14, %v20863_v45  ;;  %v3880_v45 = vld [vmem:[#allocation14 + $0xd0] sm:$0xff] }
 0x914   : > { %13535 = vmatmul.mubr.msk.f32.gmra.mrb[62].mxu1 %vm2023_vm14, %v20864_v26  ;;  %v17981_v26 = vsel %vm2210_vm0, %v5263_v23, %v5265_v6  ;;  %v20873_v6 = vld [vmem:[#allocation58_spill] sm:$0xff]  ;;  %v5529_v23 = vrot.slane %v17909_v52, 2 }
 0x915   : > { %13537 = vmatprep.mubr.msk.f32.mxu1 %vm2023_vm14, %v20865_v24  ;;  %v14531_v24 = vpack.c.bf16 %v3881_v0, %v3880_v45  ;;  %v20874_v0 = vld [vmem:[#allocation59_spill] sm:$0xff]  ;;  %v5528_v45 = vrot.slane %v17905_v29, 2 }
 0x918   : > { %13538 = vmatmul.mubr.msk.f32.gmra.mrb[64].mxu1 %vm2023_vm14, %v20866_v62  ;;  %v3883_v62 = vld [vmem:[#allocation14 + $0xe8] sm:$0xff] }
 0x919   : > { %13540 = vmatprep.mubr.msk.f32.mxu1 %vm2023_vm14, %v17976_v17  ;;  %v14535_v5 = vpack.c.bf16 %v3883_v62, %v3882_v12  ;;  %v20867_v12 = vld [vmem:[#allocation51_spill] sm:$0xff] }
 0x91a   : > { %v20871_v62 = vld [vmem:[#allocation55_spill] sm:$0xff] }
 0x91c   : > { %13541 = vmatmul.mubr.msk.f32.gmra.mrb[66].mxu1 %vm2023_vm14, %v17981_v26 }
 0x91d   : > { %13551 = vmatprep.mubr.msk.f32.mxu1 %vm2023_vm14, %v17650_v59  ;;  %v20868_v59 = vld [vmem:[#allocation52_spill] sm:$0xff] }
 0x920   : > { %13552 = vmatmul.mubr.msk.f32.vlgmr.msra.gmra.mrb[36].mxu1 %vm2023_vm14, %v17659_v50  ;;  %v20869_v50 = vld [vmem:[#allocation53_spill] sm:$0xff] }
 0x921   : > { %14530 = vmatpush3.bf16.msra.mxu1 %v14527_v57  ;;  %13554 = vmatprep.mubr.msk.f32.mxu1 %vm2023_vm14, %v17665_v10  ;;  %v20870_v57 = vld [vmem:[#allocation54_spill] sm:$0xff] }
 0x922   : > { %14532 = vmatprep.subr.bf16.mxu1 %v14531_v24 }
 0x924   : > { %13555 = vmatmul.mubr.msk.f32.gmra.mrb[38].mxu1 %vm2023_vm14, %v17673_v49 }
 0x925   : > { %13557 = vmatprep.mubr.msk.f32.mxu1 %vm2023_vm14, %v17679_v1  ;;  %14534 = vmatpush3.bf16.msra.mxu1 %v14531_v24  ;;  %v20872_v24 = vld [vmem:[#allocation56_spill] sm:$0xff] }
 0x926   : > { %14536 = vmatprep.subr.bf16.mxu1 %v14535_v5 }
 0x928   : > { %13558 = vmatmul.mubr.msk.f32.gmra.mrb[40].mxu1 %vm2023_vm14, %v17686_v44 }
 0x929   : > { %13560 = vmatprep.mubr.msk.f32.mxu1 %vm2023_vm14, %v17692_v35 }
 0x92c   : > { %13561 = vmatmul.mubr.msk.f32.gmra.mrb[42].mxu1 %vm2023_vm14, %v17699_v46 }
 0x92d   : > { %13563 = vmatprep.mubr.msk.f32.mxu1 %vm2023_vm14, %v17705_v25 }
 0x930   : > { %13564 = vmatmul.mubr.msk.f32.gmra.mrb[44].mxu1 %vm2023_vm14, %v17712_v32 }
 0x931   : > { %13566 = vmatprep.mubr.msk.f32.mxu1 %vm2023_vm14, %v17718_v13 }
 0x934   : > { %13567 = vmatmul.mubr.msk.f32.gmra.mrb[46].mxu1 %vm2023_vm14, %v17725_v11 }
 0x935   : > { %13569 = vmatprep.mubr.msk.f32.mxu1 %vm2023_vm14, %v20867_v12 }
 0x938   : > { %13570 = vmatmul.mubr.msk.f32.gmra.mrb[48].mxu1 %vm2023_vm14, %v17738_v16 }
 0x939   : > { %13572 = vmatprep.mubr.msk.f32.mxu1 %vm2023_vm14, %v20868_v59 }
 0x93c   : > { %13573 = vmatmul.mubr.msk.f32.gmra.mrb[50].mxu1 %vm2023_vm14, %v17751_v39 }
 0x93d   : > { %13575 = vmatprep.mubr.msk.f32.mxu1 %vm2023_vm14, %v20869_v50 }
 0x940   : > { %13576 = vmatmul.mubr.msk.f32.gmra.mrb[52].mxu1 %vm2023_vm14, %v17764_v51 }
 0x941   : > { %13578 = vmatprep.mubr.msk.f32.mxu1 %vm2023_vm14, %v20870_v57 }
 0x944   : > { %13579 = vmatmul.mubr.msk.f32.gmra.mrb[54].mxu1 %vm2023_vm14, %v17777_v19 }
 0x945   : > { %13581 = vmatprep.mubr.msk.f32.mxu1 %vm2023_vm14, %v20871_v62 }
 0x948   : > { %13582 = vmatmul.mubr.msk.f32.gmra.mrb[56].mxu1 %vm2023_vm14, %v17790_v27 }
 0x949   : > { %13584 = vmatprep.mubr.msk.f32.mxu1 %vm2023_vm14, %v20872_v24 }
 0x94c   : > { %13585 = vmatmul.mubr.msk.f32.gmra.mrb[58].mxu1 %vm2023_vm14, %v17803_v37  ;;  %v5531_v37 = vrot.slane %v3850_v60, 2 }
 0x94d   : > { %13587 = vmatprep.mubr.msk.f32.mxu1 %vm2023_vm14, %v20873_v6  ;;  %v18048_v6 = vsel %vm2477_vm1, %v5528_v45, %v5529_v23 }
 0x950   : > { %13588 = vmatmul.mubr.msk.f32.gmra.mrb[60].mxu1 %vm2023_vm14, %v20874_v0  ;;  %v3885_v0 = vld [vmem:[#allocation14 + $0xf8] sm:$0xff] }
 0x951   : > { %13590 = vmatprep.mubr.msk.f32.mxu1 %vm2023_vm14, %v17822_v55  ;;  %v18053_v55 = vsel %vm2477_vm1, %v5529_v23, %v5531_v37 }
 0x954   : > { %13591 = vmatmul.mubr.msk.f32.gmra.mrb[62].mxu1 %vm2023_vm14, %v17829_v63  ;;  %v3884_v63 = vld [vmem:[#allocation14 + $0xf0] sm:$0xff] }
 0x955   : > { %13593 = vmatprep.mubr.msk.f32.mxu1 %vm2023_vm14, %v17835_v8  ;;  %v14539_v60 = vpack.c.bf16 %v3885_v0, %v3884_v63  ;;  %v3886_v8 = vld [vmem:[#allocation14 + $0x100] sm:$0xff]  ;;  %v20902_v0 = vld [vmem:[#allocation49_spill] sm:$0xff] }
 0x956   : > { %v20896_v63 = vld [vmem:[#allocation43_spill] sm:$0xff] }
 0x958   : > { %13594 = vmatmul.mubr.msk.f32.gmra.mrb[64].mxu1 %vm2023_vm14, %v17840_v33  ;;  %v3887_v33 = vld [vmem:[#allocation14 + $0x108] sm:$0xff] }
 0x959   : > { %13596 = vmatprep.mubr.msk.f32.mxu1 %vm2023_vm14, %v18048_v6  ;;  %v14543_v37 = vpack.c.bf16 %v3887_v33, %v3886_v8  ;;  %v20897_v8 = vld [vmem:[#allocation44_spill] sm:$0xff]  ;;  %v20898_v33 = vld [vmem:[#allocation45_spill] sm:$0xff] }
 0x95c   : > { %13597 = vmatmul.mubr.msk.f32.gmra.mrb[66].mxu1 %vm2023_vm14, %v18053_v55 }
 0x95d   : > { %13607 = vmatprep.mubr.msk.f32.mxu1 %vm2023_vm14, %v17283_v3  ;;  %v18115_v3 = vld [vmem:[#allocation3 + $0x198] sm:$0xff] }
 0x95e   : > { %v6058_v45 = vrot.slane %v18115_v3, 1 }
 0x960   : > { %13608 = vmatmul.mubr.msk.f32.vlgmr.msra.gmra.mrb[36].mxu1 %vm2023_vm14, %v17285_v14  ;;  %v18121_v14 = vld [vmem:[#allocation3 + $0x1a0] sm:$0xff] }
 0x961   : > { %14538 = vmatpush3.bf16.msra.mxu1 %v14535_v5  ;;  %13610 = vmatprep.mubr.msk.f32.mxu1 %vm2023_vm14, %v17304_v20  ;;  %v3888_v20 = vld [vmem:[#allocation14 + $0x110] sm:$0xff]  ;;  %v6059_v23 = vrot.slane %v18121_v14, 1 }
 0x962   : > { %14540 = vmatprep.subr.bf16.mxu1 %v14539_v60  ;;  %v20901_v5 = vld [vmem:[#allocation48_spill] sm:$0xff] }
 0x964   : > { %13611 = vmatmul.mubr.msk.f32.gmra.mrb[38].mxu1 %vm2023_vm14, %v17306_v21  ;;  %v3889_v21 = vld [vmem:[#allocation14 + $0x118] sm:$0xff] }
 0x965   : > { %13613 = vmatprep.mubr.msk.f32.mxu1 %vm2023_vm14, %v17325_v43  ;;  %14542 = vmatpush3.bf16.msra.mxu1 %v14539_v60  ;;  %v6750_v43 = vld [vmem:[%s20875_s21 + $0x20] sm:$0xff]  ;;  %v3853_v60 = vld [vmem:[#allocation3 + $0x1a8] sm:$0x3] }
 0x966   : > { %14544 = vmatprep.subr.bf16.mxu1 %v14543_v37 }
 0x968   : > { %13614 = vmatmul.mubr.msk.f32.gmra.mrb[40].mxu1 %vm2023_vm14, %v17327_v38  ;;  %v6751_v38 = vld [vmem:[%s20875_s21 + $0x28] sm:$0xff] }
 0x969   : > { %13616 = vmatprep.mubr.msk.f32.mxu1 %vm2023_vm14, %v17346_v28  ;;  %v20876_v28 = vld [vmem:[#allocation23_spill] sm:$0xff] }
 0x96c   : > { %13617 = vmatmul.mubr.msk.f32.gmra.mrb[42].mxu1 %vm2023_vm14, %v17348_v30  ;;  %v14551_v30 = vpack.c.bf16 %v6751_v38, %v6750_v43  ;;  %v6749_v38 = vld [vmem:[%s20875_s21 + $0x18] sm:$0xff] }
 0x96d   : > { %13619 = vmatprep.mubr.msk.f32.mxu1 %vm2023_vm14, %v17367_v40  ;;  %v20877_v40 = vld [vmem:[#allocation24_spill] sm:$0xff] }
 0x96e   : > { %14552 = vmatprep.subr.bf16.mxu0 %v14551_v30 }
 0x96f   : > { %14554 = vmatpush3.bf16.msra.mxu0 %v14551_v30 }
 0x970   : > { %13620 = vmatmul.mubr.msk.f32.gmra.mrb[44].mxu1 %vm2023_vm14, %v17369_v41  ;;  %v20878_v41 = vld [vmem:[#allocation25_spill] sm:$0xff] }
 0x971   : > { %13622 = vmatprep.mubr.msk.f32.mxu1 %vm2023_vm14, %v17388_v54  ;;  %v20880_v54 = vld [vmem:[#allocation27_spill] sm:$0xff] }
 0x974   : > { %13623 = vmatmul.mubr.msk.f32.gmra.mrb[46].mxu1 %vm2023_vm14, %v17390_v56  ;;  %v20881_v56 = vld [vmem:[#allocation28_spill] sm:$0xff] }
 0x975   : > { %13625 = vmatprep.mubr.msk.f32.mxu1 %vm2023_vm14, %v17409_v9  ;;  %v20883_v9 = vld [vmem:[#allocation30_spill] sm:$0xff] }
 0x978   : > { %13626 = vmatmul.mubr.msk.f32.gmra.mrb[48].mxu1 %vm2023_vm14, %v17411_v22  ;;  %v20884_v22 = vld [vmem:[#allocation31_spill] sm:$0xff] }
 0x979   : > { %13628 = vmatprep.mubr.msk.f32.mxu1 %vm2023_vm14, %v17430_v61  ;;  %v20885_v61 = vld [vmem:[#allocation32_spill] sm:$0xff] }
 0x97c   : > { %13629 = vmatmul.mubr.msk.f32.gmra.mrb[50].mxu1 %vm2023_vm14, %v17432_v7  ;;  %v20886_v7 = vld [vmem:[#allocation33_spill] sm:$0xff] }
 0x97d   : > { %13631 = vmatprep.mubr.msk.f32.mxu1 %vm2023_vm14, %v17451_v2  ;;  %v20887_v2 = vld [vmem:[#allocation34_spill] sm:$0xff] }
 0x980   : > { %13632 = vmatmul.mubr.msk.f32.gmra.mrb[52].mxu1 %vm2023_vm14, %v17453_v15  ;;  %v20888_v15 = vld [vmem:[#allocation35_spill] sm:$0xff] }
 0x981   : > { %13634 = vmatprep.mubr.msk.f32.mxu1 %vm2023_vm14, %v17472_v4  ;;  %v20890_v4 = vld [vmem:[#allocation37_spill] sm:$0xff] }
 0x984   : > { %13635 = vmatmul.mubr.msk.f32.gmra.mrb[54].mxu1 %vm2023_vm14, %v17474_v42  ;;  %v20891_v42 = vld [vmem:[#allocation38_spill] sm:$0xff] }
 0x985   : > { %13637 = vmatprep.mubr.msk.f32.mxu1 %vm2023_vm14, %v17493_v31  ;;  %v20893_v31 = vld [vmem:[#allocation40_spill] sm:$0xff] }
 0x988   : > { %13638 = vmatmul.mubr.msk.f32.gmra.mrb[56].mxu1 %vm2023_vm14, %v17495_v34  ;;  %v20889_v34 = vld [vmem:[#allocation36_spill] sm:$0xff] }
 0x989   : > { %13640 = vmatprep.mubr.msk.f32.mxu1 %vm2023_vm14, %v17514_v58  ;;  %v20894_v58 = vld [vmem:[#allocation41_spill] sm:$0xff] }
 0x98c   : > { %13641 = vmatmul.mubr.msk.f32.gmra.mrb[58].mxu1 %vm2023_vm14, %v17516_v47  ;;  %v20892_v47 = vld [vmem:[#allocation39_spill] sm:$0xff] }
 0x98d   : > { %13643 = vmatprep.mubr.msk.f32.mxu1 %vm2023_vm14, %v17534_v18  ;;  %v20882_v18 = vld [vmem:[#allocation29_spill] sm:$0xff] }
 0x990   : > { %13644 = vmatmul.mubr.msk.f32.gmra.mrb[60].mxu1 %vm2023_vm14, %v17536_v53  ;;  %v20895_v53 = vld [vmem:[#allocation42_spill] sm:$0xff] }
 0x991   : > { %13646 = vmatprep.mubr.msk.f32.mxu1 %vm2023_vm14, %v17553_v48  ;;  %v20879_v48 = vld [vmem:[#allocation26_spill] sm:$0xff] }
 0x994   : > { %13647 = vmatmul.mubr.msk.f32.gmra.mrb[62].mxu1 %vm2023_vm14, %v17555_v36  ;;  %v14547_v36 = vpack.c.bf16 %v3889_v21, %v3888_v20  ;;  %v6061_v20 = vrot.slane %v3853_v60, 1  ;;  %v6060_v21 = vsel %vm2210_vm0, %v6058_v45, %v6059_v23 }
 0x995   : > { %13649 = vmatprep.mubr.msk.f32.mxu1 %vm2023_vm14, %v17905_v29  ;;  %v20899_v29 = vld [vmem:[#allocation46_spill] sm:$0xff] }
 0x996   : > { %v6062_v43 = vsel %vm2210_vm0, %v6059_v23, %v6061_v20 }
 0x998   : > { %13650 = vmatmul.mubr.msk.f32.gmra.mrb[64].mxu1 %vm2023_vm14, %v17909_v52  ;;  %v20900_v52 = vld [vmem:[#allocation47_spill] sm:$0xff] }
 0x999   : > { %13652 = vmatprep.mubr.msk.f32.mxu1 %vm2023_vm14, %v18115_v3 }
 0x99c   : > { %13653 = vmatmul.mubr.msk.f32.gmra.mrb[66].mxu1 %vm2023_vm14, %v18121_v14 }
 0x99d   : > { %13663 = vmatprep.mubr.msk.f32.mxu1 %vm2023_vm14, %v20876_v28 }
 0x9a0   : > { %13664 = vmatmul.mubr.msk.f32.vlgmr.msra.gmra.mrb[36].mxu1 %vm2023_vm14, %v20877_v40 }
 0x9a1   : > { %14546 = vmatpush3.bf16.msra.mxu1 %v14543_v37  ;;  %13666 = vmatprep.mubr.msk.f32.mxu1 %vm2023_vm14, %v20878_v41  ;;  %v20903_v37 = vld [vmem:[#allocation50_spill] sm:$0xff] }
 0x9a2   : > { %14548 = vmatprep.subr.bf16.mxu1 %v14547_v36  ;;  %v18306_v41 = vld [vmem:[%s20911_s19] ss:$0 sm:$0xff]  ;;  %s21039_s19 = sld [smem:[#allocation84_spill]] }
 0x9a4   : > { %13667 = vmatmul.mubr.msk.f32.gmra.mrb[38].mxu1 %vm2023_vm14, %v20879_v48 }
 0x9a5   : > { %13669 = vmatprep.mubr.msk.f32.mxu1 %vm2023_vm14, %v20880_v54  ;;  %14550 = vmatpush3.bf16.msra.mxu1 %v14547_v36  ;;  %v6755_v36 = vld [vmem:[%s20875_s21 + $0x48] sm:$0xff] }
 0x9a6   : > { %14623 = vmatprep.subr.bf16.mxu1 %v14551_v30 }
 0x9a8   : > { %13670 = vmatmul.mubr.msk.f32.gmra.mrb[40].mxu1 %vm2023_vm14, %v20881_v56  ;;  %s19686_s15 = scalar_lea.vmem %s21039_s19, %s15207_s10  ;;  %s15626_s10 = sshll.u32 %s15753_s4, 4  ;;  %s15627_s10 = int_to_ptr.vmem [resolvable:$false] %s15626_s10 }
 0x9a9   : > { %13672 = vmatprep.mubr.msk.f32.mxu1 %vm2023_vm14, %v20882_v18  ;;  %s15628_s11 = scalar_lea.vmem %s15627_s10, 32  ;;  %p15629_p8 = scmp.lt.s32.totalorder %s20162_s29, %s15627_s10 }
 0x9aa   : > { %p15630_p6 = scmp.lt.s32.totalorder %s15628_s11, %s15622_s27 }
 0x9ac   : > { %13673 = vmatmul.mubr.msk.f32.gmra.mrb[42].mxu1 %vm2023_vm14, %v20883_v9  ;;  %p15631_p10 = por %p15630_p6, %p15629_p8 }
 0x9ad   : > { %13675 = vmatprep.mubr.msk.f32.mxu1 %vm2023_vm14, %v20884_v22 }
 0x9ae   : > { %p15632_p13 = pnand %p15631_p10, %p15625_p0 }
 0x9b0   : > { %13676 = vmatmul.mubr.msk.f32.gmra.mrb[44].mxu1 %vm2023_vm14, %v20885_v61 }
 0x9b1   : > { %13678 = vmatprep.mubr.msk.f32.mxu1 %vm2023_vm14, %v20886_v7 }
 0x9b4   : > { %13679 = vmatmul.mubr.msk.f32.gmra.mrb[46].mxu1 %vm2023_vm14, %v20887_v2 }
 0x9b5   : > { %13681 = vmatprep.mubr.msk.f32.mxu1 %vm2023_vm14, %v20888_v15 }
 0x9b8   : > { %13682 = vmatmul.mubr.msk.f32.gmra.mrb[48].mxu1 %vm2023_vm14, %v20889_v34 }
 0x9b9   : > { %13684 = vmatprep.mubr.msk.f32.mxu1 %vm2023_vm14, %v20890_v4 }
 0x9bc   : > { %13685 = vmatmul.mubr.msk.f32.gmra.mrb[50].mxu1 %vm2023_vm14, %v20891_v42 }
 0x9bd   : > { %13687 = vmatprep.mubr.msk.f32.mxu1 %vm2023_vm14, %v20892_v47 }
 0x9c0   : > { %13688 = vmatmul.mubr.msk.f32.gmra.mrb[52].mxu1 %vm2023_vm14, %v20893_v31 }
 0x9c1   : > { %13690 = vmatprep.mubr.msk.f32.mxu1 %vm2023_vm14, %v20894_v58 }
 0x9c4   : > { %13691 = vmatmul.mubr.msk.f32.gmra.mrb[54].mxu1 %vm2023_vm14, %v20895_v53 }
 0x9c5   : > { %13693 = vmatprep.mubr.msk.f32.mxu1 %vm2023_vm14, %v20896_v63 }
 0x9c8   : > { %13694 = vmatmul.mubr.msk.f32.gmra.mrb[56].mxu1 %vm2023_vm14, %v20897_v8 }
 0x9c9   : > { %13696 = vmatprep.mubr.msk.f32.mxu1 %vm2023_vm14, %v20898_v33 }
 0x9cc   : > { %13697 = vmatmul.mubr.msk.f32.gmra.mrb[58].mxu1 %vm2023_vm14, %v20899_v29 }
 0x9cd   : > { %13699 = vmatprep.mubr.msk.f32.mxu1 %vm2023_vm14, %v20900_v52 }
 0x9d0   : > { %13700 = vmatmul.mubr.msk.f32.gmra.mrb[60].mxu1 %vm2023_vm14, %v20901_v5 }
 0x9d1   : > { %13702 = vmatprep.mubr.msk.f32.mxu1 %vm2023_vm14, %v20902_v0 }
 0x9d4   : > { %13703 = vmatmul.mubr.msk.f32.gmra.mrb[62].mxu1 %vm2023_vm14, %v20903_v37 }
 0x9d5   : > { %13705 = vmatprep.mubr.msk.f32.mxu1 %vm2023_vm14, %v17976_v17  ;;  %v18269_v17 = vld [vmem:[#allocation3] sm:$0xff] }
 0x9d8   : > { %13706 = vmatmul.mubr.msk.f32.gmra.mrb[64].mxu1 %vm2023_vm14, %v17981_v26  ;;  %v18271_v26 = vld [vmem:[#allocation3 + $0x8] sm:$0xff] }
 0x9d9   : > { %13708 = vmatprep.mubr.msk.f32.mxu1 %vm2023_vm14, %v6060_v21 }
 0x9dc   : > { %13709 = vmatmul.mubr.msk.f32.gmra.mrb[66].mxu1 %vm2023_vm14, %v6062_v43 }
 0x9dd   : > { %13719 = vmatprep.mubr.msk.f32.mxu1 %vm2023_vm14, %v17665_v10  ;;  %v20904_v10 = vld [vmem:[#allocation57_spill] sm:$0xff] }
 0x9e0   : > { %13720 = vmatmul.mubr.msk.f32.vlgmr.msra.gmra.mrb[36].mxu1 %vm2023_vm14, %v17673_v49  ;;  %v20905_v49 = vld [vmem:[#allocation58_spill] sm:$0xff] }
 0x9e1   : > { %13722 = vmatprep.mubr.msk.f32.mxu1 %vm2023_vm14, %v17679_v1  ;;  %14625 = vmatpush3.bf16.msra.mxu1 %v14551_v30  ;;  %v20906_v1 = vld [vmem:[#allocation59_spill] sm:$0xff] }
 0x9e2   : > { %v6754_v30 = vld [vmem:[%s20875_s21 + $0x40] sm:$0xff] }
 0x9e3   : > { %v18300_v40 = vpack.c.bf16 %v6755_v36, %v6754_v30 }
 0x9e4   : > { %13723 = vmatmul.mubr.msk.f32.gmra.mrb[38].mxu1 %vm2023_vm14, %v17686_v44  ;;  %v20907_v44 = vld [vmem:[#allocation60_spill] sm:$0xff] }
 0x9e5   : > { %13725 = vmatprep.mubr.msk.f32.mxu1 %vm2023_vm14, %v17692_v35  ;;  %v20908_v35 = vld [vmem:[#allocation61_spill] sm:$0xff] }
 0x9e8   : > { %13726 = vmatmul.mubr.msk.f32.gmra.mrb[40].mxu1 %vm2023_vm14, %v17699_v46  ;;  %v20909_v46 = vld [vmem:[#allocation62_spill] sm:$0xff] }
 0x9e9   : > { %13728 = vmatprep.mubr.msk.f32.mxu1 %vm2023_vm14, %v17705_v25  ;;  %v6324_v25 = vrot.slane %v18115_v3, 2 }
 0x9ec   : > { %13729 = vmatmul.mubr.msk.f32.gmra.mrb[42].mxu1 %vm2023_vm14, %v17712_v32  ;;  %v6325_v32 = vrot.slane %v18121_v14, 2  ;;  %v6748_v14 = vld [vmem:[%s20875_s21 + $0x10] sm:$0xff] }
 0x9ed   : > { %13731 = vmatprep.mubr.msk.f32.mxu1 %vm2023_vm14, %v17718_v13  ;;  %v20910_v13 = vld [vmem:[#allocation63_spill] sm:$0xff]  ;;  %v14563_v28 = vpack.c.bf16 %v6749_v38, %v6748_v14 }
 0x9f0   : > { %13732 = vmatmul.mubr.msk.f32.gmra.mrb[44].mxu1 %vm2023_vm14, %v17725_v11  ;;  %v6327_v11 = vrot.slane %v3853_v60, 2 }
 0x9f1   : > { %13734 = vmatprep.mubr.msk.f32.mxu1 %vm2023_vm14, %v20867_v12  ;;  %v6832_v12 = vrot.slane %v18271_v26, 1 }
 0x9f4   : > { %13735 = vmatmul.mubr.msk.f32.gmra.mrb[46].mxu1 %vm2023_vm14, %v17738_v16  ;;  %v6328_v16 = vsel %vm2477_vm1, %v6325_v32, %v6327_v11 }
 0x9f5   : > { %13737 = vmatprep.mubr.msk.f32.mxu1 %vm2023_vm14, %v20868_v59  ;;  %v18275_v59 = vld [vmem:[#allocation3 + $0x10] sm:$0x3] }
 0x9f8   : > { %13738 = vmatmul.mubr.msk.f32.gmra.mrb[48].mxu1 %vm2023_vm14, %v17751_v39  ;;  %v6326_v39 = vsel %vm2477_vm1, %v6324_v25, %v6325_v32 }
 0x9f9   : > { %13740 = vmatprep.mubr.msk.f32.mxu1 %vm2023_vm14, %v20869_v50  ;;  %v6834_v50 = vrot.slane %v18275_v59, 1 }
 0x9fc   : > { %13741 = vmatmul.mubr.msk.f32.gmra.mrb[50].mxu1 %vm2023_vm14, %v17764_v51  ;;  %v6752_v51 = vld [vmem:[%s20875_s21 + $0x30] sm:$0xff] }
 0x9fd   : > { %13743 = vmatprep.mubr.msk.f32.mxu1 %vm2023_vm14, %v20870_v57 }
 0xa00   : > { %13744 = vmatmul.mubr.msk.f32.gmra.mrb[52].mxu1 %vm2023_vm14, %v17777_v19  ;;  %v6753_v19 = vld [vmem:[%s20875_s21 + $0x38] sm:$0xff] }
 0xa01   : > { %13746 = vmatprep.mubr.msk.f32.mxu1 %vm2023_vm14, %v20871_v62  ;;  %v6835_v62 = vsel %vm2210_vm0, %v6832_v12, %v6834_v50 }
 0xa04   : > { %13747 = vmatmul.mubr.msk.f32.gmra.mrb[54].mxu1 %vm2023_vm14, %v17790_v27  ;;  %v14555_v27 = vpack.c.bf16 %v6753_v19, %v6752_v51 }
 0xa05   : > { %13749 = vmatprep.mubr.msk.f32.mxu1 %vm2023_vm14, %v20872_v24  ;;  %v6746_v24 = vld [vmem:[%s20875_s21] sm:$0xff] }
 0xa06   : > { %14556 = vmatprep.subr.bf16.mxu0 %v14555_v27  ;;  %14624 = vmatprep.subr.bf16.mxu1 %v14555_v27 }
 0xa07   : > { %14558 = vmatpush3.bf16.msra.mxu0 %v14555_v27  ;;  %14626 = vmatpush3.bf16.msra.mxu1 %v14555_v27 }
 0xa08   : > { %13750 = vmatmul.mubr.msk.f32.gmra.mrb[56].mxu1 %vm2023_vm14, %v20904_v10 }
 0xa09   : > { %13752 = vmatprep.mubr.msk.f32.mxu1 %vm2023_vm14, %v20905_v49 }
 0xa0c   : > { %13753 = vmatmul.mubr.msk.f32.gmra.mrb[58].mxu1 %vm2023_vm14, %v20906_v1 }
 0xa0d   : > { %13755 = vmatprep.mubr.msk.f32.mxu1 %vm2023_vm14, %v20907_v44 }
 0xa10   : > { %13756 = vmatmul.mubr.msk.f32.gmra.mrb[60].mxu1 %vm2023_vm14, %v20908_v35 }
 0xa11   : > { %13758 = vmatprep.mubr.msk.f32.mxu1 %vm2023_vm14, %v20909_v46 }
 0xa14   : > { %13759 = vmatmul.mubr.msk.f32.gmra.mrb[62].mxu1 %vm2023_vm14, %v20910_v13 }
 0xa15   : > { %13761 = vmatprep.mubr.msk.f32.mxu1 %vm2023_vm14, %v18048_v6  ;;  %v6747_v6 = vld [vmem:[%s20875_s21 + $0x8] sm:$0xff] }
 0xa16   : > { %v14559_v3 = vpack.c.bf16 %v6747_v6, %v6746_v24 }
 0xa18   : > { %13762 = vmatmul.mubr.msk.f32.gmra.mrb[64].mxu1 %vm2023_vm14, %v18053_v55  ;;  %v6831_v55 = vrot.slane %v18269_v17, 1  ;;  %14560 = vmatprep.subr.bf16.mxu0 %v14559_v3 }
 0xa19   : > { %13764 = vmatprep.mubr.msk.f32.mxu1 %vm2023_vm14, %v6326_v39 }
 0xa1a   : > { %v6833_v57 = vsel %vm2210_vm0, %v6831_v55, %v6832_v12 }
 0xa1b   : > { %13775 = vmatprep.mubr.msk.f32.mxu0 %vm2023_vm14, %v6833_v57 }
 0xa1c   : > { %13765 = vmatmul.mubr.msk.f32.gmra.mrb[66].mxu1 %vm2023_vm14, %v6328_v16  ;;  %13776 = vmatmul.mubr.msk.f32.vlgmr.msra.gmra.mrb[12].mxu0 %vm2023_vm14, %v6835_v62 }
 0xa1d   : > { %14562 = vmatpush3.bf16.msra.mxu0 %v14559_v3 }
 0xa1e   : > { %14564 = vmatprep.subr.bf16.mxu0 %v14563_v28 }
 0xa21   : > { %14566 = vmatpush3.bf16.msra.mxu0 %v14563_v28 }
 0xa22   : > { %14568 = vmatprep.subr.bf16.mxu0 %v18300_v40 }
 0xab3   : > { %v13721_v48 = vpop.f32.mrb[36].mxu1 }
 0xab4   : > { %v6597_v54 = vadd.f32 %v13721_v48, %v18306_v41  ;;  %v6399_v56 = vpop.f32.mrb[37].mxu1 }
 0xab5   : > { %v6596_v18 = vadd.f32 %v18306_v41, %v6399_v56 }
 0xab6   : > { %v6629_v9 = vmax.f32 %v6597_v54, 0.0 }
 0xab7   : > { %v6628_v22 = vmax.f32 %v6596_v18, 0.0  ;;  %v13724_v61 = vpop.f32.mrb[38].mxu1 }
 0xab8   : > { %6661 = vst.msk [vmem:[#allocation3 + $0x21] sm:$0xff] %vm2023_vm14, %v6629_v9  ;;  %v6599_v7 = vadd.f32 %v13724_v61, %v18306_v41  ;;  %v6409_v2 = vpop.f32.mrb[39].mxu1 }
 0xab9   : > { %6660 = vst.msk [vmem:[#allocation3 + $0x19] sm:$0xff] %vm2023_vm14, %v6628_v22  ;;  %v6598_v15 = vadd.f32 %v18306_v41, %v6409_v2 }
 0xaba   : > { %v6631_v34 = vmax.f32 %v6599_v7, 0.0 }
 0xabb   : > { %v6630_v4 = vmax.f32 %v6598_v15, 0.0  ;;  %v13727_v42 = vpop.f32.mrb[40].mxu1 }
 0xabc   : > { %6663 = vst.msk [vmem:[#allocation3 + $0x39] sm:$0xff] %vm2023_vm14, %v6631_v34  ;;  %v6601_v47 = vadd.f32 %v13727_v42, %v18306_v41  ;;  %v6419_v31 = vpop.f32.mrb[41].mxu1 }
 0xabd   : > { %6662 = vst.msk [vmem:[#allocation3 + $0x31] sm:$0xff] %vm2023_vm14, %v6630_v4  ;;  %v6600_v58 = vadd.f32 %v18306_v41, %v6419_v31 }
 0xabe   : > { %v6633_v53 = vmax.f32 %v6601_v47, 0.0 }
 0xabf   : > { %v6632_v63 = vmax.f32 %v6600_v58, 0.0  ;;  %v13730_v8 = vpop.f32.mrb[42].mxu1  ;;  %v18318_v33 = vld [vmem:[#allocation3 + $0x28] sm:$0x3] }
 0xac0   : > { %6665 = vst.msk [vmem:[#allocation3 + $0x51] sm:$0xff] %vm2023_vm14, %v6633_v53  ;;  %v6603_v29 = vadd.f32 %v13730_v8, %v18306_v41  ;;  %v6429_v52 = vpop.f32.mrb[43].mxu1  ;;  %v18322_v5 = vld [vmem:[#allocation3 + $0x18] sm:$0xff]  ;;  %v18324_v0 = vld [vmem:[#allocation3 + $0x20] sm:$0xff]  ;;  %v6839_v45 = vrot.slane %v18318_v33, 1 }
 0xac1   : > { %6664 = vst.msk [vmem:[#allocation3 + $0x49] sm:$0xff] %vm2023_vm14, %v6632_v63  ;;  %v6602_v23 = vadd.f32 %v18306_v41, %v6429_v52  ;;  %v6836_v60 = vrot.slane %v18322_v5, 1  ;;  %v6837_v37 = vrot.slane %v18324_v0, 1 }
 0xac2   : > { %v6635_v20 = vmax.f32 %v6603_v29, 0.0 }
 0xac3   : > { %v6634_v21 = vmax.f32 %v6602_v23, 0.0  ;;  %v13733_v43 = vpop.f32.mrb[44].mxu1  ;;  %v18332_v10 = vsel %vm2210_vm0, %v6836_v60, %v6837_v37  ;;  %v18335_v49 = vsel %vm2210_vm0, %v6837_v37, %v6839_v45  ;;  %v18337_v1 = vld [vmem:[#allocation3 + $0x40] sm:$0x3] }
 0xac4   : > { %6667 = vst.msk [vmem:[#allocation3 + $0x69] sm:$0xff] %vm2023_vm14, %v6635_v20  ;;  %v6605_v44 = vadd.f32 %v13733_v43, %v18306_v41  ;;  %v6439_v35 = vpop.f32.mrb[45].mxu1  ;;  %13778 = vmatprep.mubr.msk.f32.mxu0 %vm2023_vm14, %v18332_v10  ;;  %v18343_v46 = vld [vmem:[#allocation3 + $0x30] sm:$0xff]  ;;  %v18345_v25 = vld [vmem:[#allocation3 + $0x38] sm:$0xff]  ;;  %v6844_v32 = vrot.slane %v18337_v1, 1 }
 0xac5   : > { %6666 = vst.msk [vmem:[#allocation3 + $0x61] sm:$0xff] %vm2023_vm14, %v6634_v21  ;;  %v6604_v13 = vadd.f32 %v18306_v41, %v6439_v35  ;;  %13779 = vmatmul.mubr.msk.f32.gmra.mrb[14].mxu0 %vm2023_vm14, %v18335_v49  ;;  %v6841_v11 = vrot.slane %v18343_v46, 1  ;;  %v6842_v39 = vrot.slane %v18345_v25, 1 }
 0xac6   : > { %v6637_v16 = vmax.f32 %v6605_v44, 0.0 }
 0xac7   : > { %v6636_v51 = vmax.f32 %v6604_v13, 0.0  ;;  %v13736_v19 = vpop.f32.mrb[46].mxu1  ;;  %v18355_v27 = vsel %vm2210_vm0, %v6841_v11, %v6842_v39  ;;  %v18358_v55 = vsel %vm2210_vm0, %v6842_v39, %v6844_v32  ;;  %v18360_v12 = vld [vmem:[#allocation3 + $0x58] sm:$0x3] }
 0xac8   : > { %6669 = vst.msk [vmem:[#allocation3 + $0x81] sm:$0xff] %vm2023_vm14, %v6637_v16  ;;  %v6607_v50 = vadd.f32 %v13736_v19, %v18306_v41  ;;  %v6449_v57 = vpop.f32.mrb[47].mxu1  ;;  %13781 = vmatprep.mubr.msk.f32.mxu0 %vm2023_vm14, %v18355_v27  ;;  %v18366_v62 = vld [vmem:[#allocation3 + $0x48] sm:$0xff]  ;;  %v18368_v24 = vld [vmem:[#allocation3 + $0x50] sm:$0xff]  ;;  %v6849_v6 = vrot.slane %v18360_v12, 1 }
 0xac9   : > { %6668 = vst.msk [vmem:[#allocation3 + $0x79] sm:$0xff] %vm2023_vm14, %v6636_v51  ;;  %v6606_v3 = vadd.f32 %v18306_v41, %v6449_v57  ;;  %13782 = vmatmul.mubr.msk.f32.gmra.mrb[16].mxu0 %vm2023_vm14, %v18358_v55  ;;  %v6846_v14 = vrot.slane %v18366_v62, 1  ;;  %v6847_v38 = vrot.slane %v18368_v24, 1 }
 0xaca   : > { %v6639_v28 = vmax.f32 %v6607_v50, 0.0 }
 0xacb   : > { %v6638_v30 = vmax.f32 %v6606_v3, 0.0  ;;  %v13739_v36 = vpop.f32.mrb[48].mxu1  ;;  %v18378_v48 = vsel %vm2210_vm0, %v6846_v14, %v6847_v38  ;;  %v18381_v54 = vsel %vm2210_vm0, %v6847_v38, %v6849_v6  ;;  %v18383_v56 = vld [vmem:[#allocation3 + $0x70] sm:$0x3] }
 0xacc   : > { %20912 = vst [vmem:[#allocation51_spill] sm:$0xff] %v18381_v54  ;;  %6671 = vst.msk [vmem:[#allocation3 + $0x99] sm:$0xff] %vm2023_vm14, %v6639_v28  ;;  %v6609_v18 = vadd.f32 %v13739_v36, %v18306_v41  ;;  %v6459_v9 = vpop.f32.mrb[49].mxu1  ;;  %13784 = vmatprep.mubr.msk.f32.mxu0 %vm2023_vm14, %v18378_v48  ;;  %v18389_v22 = vld [vmem:[#allocation3 + $0x60] sm:$0xff]  ;;  %v18391_v61 = vld [vmem:[#allocation3 + $0x68] sm:$0xff]  ;;  %v6854_v7 = vrot.slane %v18383_v56, 1 }
 0xacd   : > { %6670 = vst.msk [vmem:[#allocation3 + $0x91] sm:$0xff] %vm2023_vm14, %v6638_v30  ;;  %v6608_v2 = vadd.f32 %v18306_v41, %v6459_v9  ;;  %13785 = vmatmul.mubr.msk.f32.gmra.mrb[18].mxu0 %vm2023_vm14, %v18381_v54  ;;  %v6851_v15 = vrot.slane %v18389_v22, 1  ;;  %v6852_v34 = vrot.slane %v18391_v61, 1  ;;  %v6756_v36 = vld [vmem:[%s20875_s21 + $0x50] sm:$0xff] }
 0xace   : > { %v6641_v4 = vmax.f32 %v6609_v18, 0.0 }
 0xacf   : > { %v6640_v42 = vmax.f32 %v6608_v2, 0.0  ;;  %v13742_v47 = vpop.f32.mrb[50].mxu1  ;;  %v18401_v31 = vsel %vm2210_vm0, %v6851_v15, %v6852_v34  ;;  %v18404_v58 = vsel %vm2210_vm0, %v6852_v34, %v6854_v7  ;;  %v18406_v53 = vld [vmem:[#allocation3 + $0x88] sm:$0x3]  ;;  %v6757_v34 = vld [vmem:[%s20875_s21 + $0x58] sm:$0xff] }
 0xad0   : > { %20913 = vst [vmem:[#allocation52_spill] sm:$0xff] %v18401_v31  ;;  %20914 = vst [vmem:[#allocation53_spill] sm:$0xff] %v18404_v58  ;;  %v6611_v63 = vadd.f32 %v13742_v47, %v18306_v41  ;;  %v6469_v8 = vpop.f32.mrb[51].mxu1  ;;  %13787 = vmatprep.mubr.msk.f32.mxu0 %vm2023_vm14, %v18401_v31  ;;  %v18412_v29 = vld [vmem:[#allocation3 + $0x78] sm:$0xff]  ;;  %v18414_v52 = vld [vmem:[#allocation3 + $0x80] sm:$0xff]  ;;  %v6859_v45 = vrot.slane %v18406_v53, 1 }
 0xad1   : > { %6673 = vst.msk [vmem:[#allocation3 + $0xb1] sm:$0xff] %vm2023_vm14, %v6641_v4  ;;  %6672 = vst.msk [vmem:[#allocation3 + $0xa9] sm:$0xff] %vm2023_vm14, %v6640_v42  ;;  %v6610_v23 = vadd.f32 %v18306_v41, %v6469_v8  ;;  %13788 = vmatmul.mubr.msk.f32.gmra.mrb[20].mxu0 %vm2023_vm14, %v18404_v58  ;;  %v6856_v60 = vrot.slane %v18412_v29, 1  ;;  %v6857_v37 = vrot.slane %v18414_v52, 1  ;;  %v6762_v58 = vld [vmem:[%s20875_s21 + $0x80] sm:$0xff]  ;;  %v6763_v31 = vld [vmem:[%s20875_s21 + $0x88] sm:$0xff] }
 0xad2   : > { %v6643_v20 = vmax.f32 %v6611_v63, 0.0 }
 0xad3   : > { %v6642_v21 = vmax.f32 %v6610_v23, 0.0  ;;  %v13745_v43 = vpop.f32.mrb[52].mxu1  ;;  %v18424_v44 = vsel %vm2210_vm0, %v6856_v60, %v6857_v37  ;;  %v18427_v35 = vsel %vm2210_vm0, %v6857_v37, %v6859_v45  ;;  %v18429_v32 = vld [vmem:[#allocation3 + $0xa0] sm:$0x3] }
 0xad4   : > { %20915 = vst [vmem:[#allocation54_spill] sm:$0xff] %v18424_v44  ;;  %20916 = vst [vmem:[#allocation55_spill] sm:$0xff] %v18427_v35  ;;  %v6613_v13 = vadd.f32 %v13745_v43, %v18306_v41  ;;  %v6479_v11 = vpop.f32.mrb[53].mxu1  ;;  %13790 = vmatprep.mubr.msk.f32.mxu0 %vm2023_vm14, %v18424_v44  ;;  %v18435_v39 = vld [vmem:[#allocation3 + $0x90] sm:$0xff]  ;;  %v18437_v16 = vld [vmem:[#allocation3 + $0x98] sm:$0xff]  ;;  %v6864_v51 = vrot.slane %v18429_v32, 1 }
 0xad5   : > { %6675 = vst.msk [vmem:[#allocation3 + $0xc9] sm:$0xff] %vm2023_vm14, %v6643_v20  ;;  %6674 = vst.msk [vmem:[#allocation3 + $0xc1] sm:$0xff] %vm2023_vm14, %v6642_v21  ;;  %v6612_v19 = vadd.f32 %v18306_v41, %v6479_v11  ;;  %13791 = vmatmul.mubr.msk.f32.gmra.mrb[22].mxu0 %vm2023_vm14, %v18427_v35  ;;  %v6861_v50 = vrot.slane %v18435_v39, 1  ;;  %v6862_v57 = vrot.slane %v18437_v16, 1  ;;  %v14571_v20 = vpack.c.bf16 %v6757_v34, %v6756_v36  ;;  %v6758_v21 = vld [vmem:[%s20875_s21 + $0x60] sm:$0xff] }
 0xad6   : > { %v6645_v6 = vmax.f32 %v6613_v13, 0.0  ;;  %v7497_v44 = vrot.slane %v18318_v33, 2  ;;  %v18767_v33 = vpack.c.bf16 %v6763_v31, %v6762_v58 }
 0xad7   : > { %v6644_v3 = vmax.f32 %v6612_v19, 0.0  ;;  %v13748_v14 = vpop.f32.mrb[54].mxu1  ;;  %v18447_v38 = vsel %vm2210_vm0, %v6861_v50, %v6862_v57  ;;  %v18450_v28 = vsel %vm2210_vm0, %v6862_v57, %v6864_v51  ;;  %v6759_v50 = vld [vmem:[%s20875_s21 + $0x68] sm:$0xff] }
 0xad8   : > { %20917 = vst [vmem:[#allocation56_spill] sm:$0xff] %v18447_v38  ;;  %20918 = vst [vmem:[#allocation23_spill] sm:$0xff] %v18450_v28  ;;  %v18452_v30 = vld [vmem:[#allocation3 + $0xb8] sm:$0x3]  ;;  %v6615_v18 = vadd.f32 %v13748_v14, %v18306_v41  ;;  %v6489_v9 = vpop.f32.mrb[55].mxu1  ;;  %13793 = vmatprep.mubr.msk.f32.mxu0 %vm2023_vm14, %v18447_v38  ;;  %v18461_v7 = vld [vmem:[#allocation3 + $0xa8] sm:$0xff] }
 0xad9   : > { %6677 = vst.msk [vmem:[#allocation3 + $0xe1] sm:$0xff] %vm2023_vm14, %v6645_v6  ;;  %v18463_v2 = vld [vmem:[#allocation3 + $0xb0] sm:$0xff]  ;;  %v6869_v15 = vrot.slane %v18452_v30, 1  ;;  %6676 = vst.msk [vmem:[#allocation3 + $0xd9] sm:$0xff] %vm2023_vm14, %v6644_v3  ;;  %v6614_v4 = vadd.f32 %v18306_v41, %v6489_v9  ;;  %13794 = vmatmul.mubr.msk.f32.gmra.mrb[24].mxu0 %vm2023_vm14, %v18450_v28  ;;  %v6866_v42 = vrot.slane %v18461_v7, 1 }
 0xada   : > { %v6867_v47 = vrot.slane %v18463_v2, 1  ;;  %v6647_v63 = vmax.f32 %v6615_v18, 0.0  ;;  %13831 = vmatprep.mubr.msk.f32.mxu0 %vm2023_vm14, %v18269_v17 }
 0xadb   : > { %v6646_v8 = vmax.f32 %v6614_v4, 0.0  ;;  %v13751_v45 = vpop.f32.mrb[56].mxu1  ;;  %v18519_v4 = vpack.c.bf16 %v6759_v50, %v6758_v21 }
 0xadc   : > { %v18478_v23 = vsel %vm2210_vm0, %v6866_v42, %v6867_v47  ;;  %v18481_v60 = vsel %vm2210_vm0, %v6867_v47, %v6869_v15  ;;  %v18483_v37 = vld [vmem:[#allocation3 + $0xd0] sm:$0x3]  ;;  %6679 = vst.msk [vmem:[#allocation3 + $0xf9] sm:$0xff] %vm2023_vm14, %v6647_v63  ;;  %v6617_v43 = vadd.f32 %v13751_v45, %v18306_v41  ;;  %v6499_v13 = vpop.f32.mrb[57].mxu1  ;;  %v18492_v11 = vld [vmem:[#allocation3 + $0xc0] sm:$0xff]  ;;  %v18494_v51 = vld [vmem:[#allocation3 + $0xc8] sm:$0xff] }
 0xadd   : > { %20919 = vst [vmem:[#allocation24_spill] sm:$0xff] %v18478_v23  ;;  %20920 = vst [vmem:[#allocation25_spill] sm:$0xff] %v18481_v60  ;;  %13796 = vmatprep.mubr.msk.f32.mxu1 %vm2023_vm14, %v18478_v23  ;;  %v6874_v19 = vrot.slane %v18483_v37, 1  ;;  %v6616_v57 = vadd.f32 %v18306_v41, %v6499_v13  ;;  %13832 = vmatmul.mubr.msk.f32.vlgmr.msra.gmra.mrb[12].mxu0 %vm2023_vm14, %v18271_v26  ;;  %v6871_v6 = vrot.slane %v18492_v11, 1  ;;  %v6872_v3 = vrot.slane %v18494_v51, 1 }
 0xade   : > { %6678 = vst.msk [vmem:[#allocation3 + $0xf1] sm:$0xff] %vm2023_vm14, %v6646_v8  ;;  %13797 = vmatmul.mubr.msk.f32.vlgmr.msra.gmra.mrb[68].mxu1 %vm2023_vm14, %v18481_v60  ;;  %v6649_v14 = vmax.f32 %v6617_v43, 0.0  ;;  %14570 = vmatpush3.bf16.msra.mxu0 %v18300_v40 }
 0xadf   : > { %13834 = vmatprep.mubr.msk.f32.mxu0 %vm2023_vm14, %v18322_v5  ;;  %v6648_v36 = vmax.f32 %v6616_v57, 0.0  ;;  %v13754_v18 = vpop.f32.mrb[58].mxu1  ;;  %v18512_v9 = vsel %vm2210_vm0, %v6871_v6, %v6872_v3  ;;  %v18515_v15 = vsel %vm2210_vm0, %v6872_v3, %v6874_v19  ;;  %14572 = vmatprep.subr.bf16.mxu0 %v14571_v20 }
 0xae0   : > { %20921 = vst [vmem:[#allocation26_spill] sm:$0xff] %v18512_v9  ;;  %20922 = vst [vmem:[#allocation27_spill] sm:$0xff] %v18515_v15  ;;  %v18517_v34 = vld [vmem:[#allocation3 + $0xe8] sm:$0x3]  ;;  %v6619_v40 = vadd.f32 %v13754_v18, %v18306_v41  ;;  %v6509_v42 = vpop.f32.mrb[59].mxu1  ;;  %13799 = vmatprep.mubr.msk.f32.mxu1 %vm2023_vm14, %v18512_v9  ;;  %v18525_v47 = vld [vmem:[#allocation3 + $0xd8] sm:$0xff] }
 0xae1   : > { %6681 = vst.msk [vmem:[#allocation3 + $0x111] sm:$0xff] %vm2023_vm14, %v6649_v14  ;;  %v18527_v63 = vld [vmem:[#allocation3 + $0xe0] sm:$0xff]  ;;  %v6879_v8 = vrot.slane %v18517_v34, 1  ;;  %6680 = vst.msk [vmem:[#allocation3 + $0x109] sm:$0xff] %vm2023_vm14, %v6648_v36  ;;  %v6618_v45 = vadd.f32 %v18306_v41, %v6509_v42  ;;  %13835 = vmatmul.mubr.msk.f32.gmra.mrb[14].mxu0 %vm2023_vm14, %v18324_v0  ;;  %v6876_v21 = vrot.slane %v18525_v47, 1 }
 0xae2   : > { %13800 = vmatmul.mubr.msk.f32.gmra.mrb[70].mxu1 %vm2023_vm14, %v18515_v15  ;;  %v6877_v43 = vrot.slane %v18527_v63, 1  ;;  %v6651_v13 = vmax.f32 %v6619_v40, 0.0  ;;  %13837 = vmatprep.mubr.msk.f32.mxu0 %vm2023_vm14, %v18343_v46 }
 0xae3   : > { %14574 = vmatpush3.bf16.msra.mxu0 %v14571_v20  ;;  %v6650_v19 = vmax.f32 %v6618_v45, 0.0  ;;  %v13757_v50 = vpop.f32.mrb[60].mxu1  ;;  %v18546_v3 = vld [vmem:[#allocation3 + $0x100] sm:$0x3] }
 0xae4   : > { %v18541_v57 = vsel %vm2210_vm0, %v6876_v21, %v6877_v43  ;;  %v18544_v6 = vsel %vm2210_vm0, %v6877_v43, %v6879_v8  ;;  %14576 = vmatprep.subr.bf16.mxu0 %v18519_v4  ;;  %6683 = vst.msk [vmem:[#allocation3 + $0x129] sm:$0xff] %vm2023_vm14, %v6651_v13  ;;  %v6621_v14 = vadd.f32 %v13757_v50, %v18306_v41  ;;  %v6519_v36 = vpop.f32.mrb[61].mxu1  ;;  %v6884_v40 = vrot.slane %v18546_v3, 1 }
 0xae5   : > { %20923 = vst [vmem:[#allocation28_spill] sm:$0xff] %v18541_v57  ;;  %20924 = vst [vmem:[#allocation29_spill] sm:$0xff] %v18544_v6  ;;  %13802 = vmatprep.mubr.msk.f32.mxu1 %vm2023_vm14, %v18541_v57  ;;  %v18553_v20 = vld [vmem:[#allocation3 + $0xf0] sm:$0xff]  ;;  %v18555_v18 = vld [vmem:[#allocation3 + $0xf8] sm:$0xff]  ;;  %v6620_v42 = vadd.f32 %v18306_v41, %v6519_v36  ;;  %13838 = vmatmul.mubr.msk.f32.gmra.mrb[16].mxu0 %vm2023_vm14, %v18345_v25 }
 0xae6   : > { %6682 = vst.msk [vmem:[#allocation3 + $0x121] sm:$0xff] %vm2023_vm14, %v6650_v19  ;;  %13803 = vmatmul.mubr.msk.f32.gmra.mrb[72].mxu1 %vm2023_vm14, %v18544_v6  ;;  %v6881_v8 = vrot.slane %v18553_v20, 1  ;;  %v6882_v45 = vrot.slane %v18555_v18, 1  ;;  %v6653_v21 = vmax.f32 %v6621_v14, 0.0  ;;  %13840 = vmatprep.mubr.msk.f32.mxu0 %vm2023_vm14, %v18366_v62 }
 0xae7   : > { %v6652_v43 = vmax.f32 %v6620_v42, 0.0  ;;  %v13760_v13 = vpop.f32.mrb[62].mxu1 }
 0xae8   : > { %v18569_v19 = vsel %vm2210_vm0, %v6881_v8, %v6882_v45  ;;  %v18572_v50 = vsel %vm2210_vm0, %v6882_v45, %v6884_v40  ;;  %v18574_v36 = vld [vmem:[#allocation3 + $0x118] sm:$0x3]  ;;  %6685 = vst.msk [vmem:[#allocation3 + $0x141] sm:$0xff] %vm2023_vm14, %v6653_v21  ;;  %v6623_v6 = vadd.f32 %v13760_v13, %v18306_v41  ;;  %v6529_v57 = vpop.f32.mrb[63].mxu1  ;;  %v18580_v14 = vld [vmem:[#allocation3 + $0x108] sm:$0xff]  ;;  %v18582_v42 = vld [vmem:[#allocation3 + $0x110] sm:$0xff] }
 0xae9   : > { %20925 = vst [vmem:[#allocation30_spill] sm:$0xff] %v18569_v19  ;;  %20926 = vst [vmem:[#allocation31_spill] sm:$0xff] %v18572_v50  ;;  %13805 = vmatprep.mubr.msk.f32.mxu1 %vm2023_vm14, %v18569_v19  ;;  %v6889_v8 = vrot.slane %v18574_v36, 1  ;;  %v6622_v40 = vadd.f32 %v18306_v41, %v6529_v57  ;;  %13841 = vmatmul.mubr.msk.f32.gmra.mrb[18].mxu0 %vm2023_vm14, %v18368_v24  ;;  %v6886_v45 = vrot.slane %v18580_v14, 1  ;;  %v6887_v21 = vrot.slane %v18582_v42, 1 }
 0xaea   : > { %6684 = vst.msk [vmem:[#allocation3 + $0x139] sm:$0xff] %vm2023_vm14, %v6652_v43  ;;  %13806 = vmatmul.mubr.msk.f32.gmra.mrb[74].mxu1 %vm2023_vm14, %v18572_v50  ;;  %v6655_v13 = vmax.f32 %v6623_v6, 0.0  ;;  %13843 = vmatprep.mubr.msk.f32.mxu0 %vm2023_vm14, %v18389_v22 }
 0xaeb   : > { %v6654_v19 = vmax.f32 %v6622_v40, 0.0  ;;  %v13763_v15 = vpop.f32.mrb[64].mxu1  ;;  %v18596_v43 = vsel %vm2210_vm0, %v6886_v45, %v6887_v21  ;;  %v18599_v57 = vsel %vm2210_vm0, %v6887_v21, %v6889_v8  ;;  %v18601_v50 = vld [vmem:[#allocation3 + $0x130] sm:$0x3] }
 0xaec   : > { %20927 = vst [vmem:[#allocation32_spill] sm:$0xff] %v18596_v43  ;;  %20928 = vst [vmem:[#allocation33_spill] sm:$0xff] %v18599_v57  ;;  %v6625_v9 = vadd.f32 %v13763_v15, %v18306_v41  ;;  %v6539_v60 = vpop.f32.mrb[65].mxu1  ;;  %13808 = vmatprep.mubr.msk.f32.mxu1 %vm2023_vm14, %v18596_v43  ;;  %v6894_v45 = vrot.slane %v18601_v50, 1 }
 0xaed   : > { %6687 = vst.msk [vmem:[#allocation3 + $0x159] sm:$0xff] %vm2023_vm14, %v6655_v13  ;;  %v18607_v6 = vld [vmem:[#allocation3 + $0x120] sm:$0xff]  ;;  %v18609_v40 = vld [vmem:[#allocation3 + $0x128] sm:$0xff]  ;;  %6686 = vst.msk [vmem:[#allocation3 + $0x151] sm:$0xff] %vm2023_vm14, %v6654_v19  ;;  %v6624_v8 = vadd.f32 %v18306_v41, %v6539_v60  ;;  %13844 = vmatmul.mubr.msk.f32.gmra.mrb[20].mxu0 %vm2023_vm14, %v18391_v61 }
 0xaee   : > { %13809 = vmatmul.mubr.msk.f32.gmra.mrb[76].mxu1 %vm2023_vm14, %v18599_v57  ;;  %v6891_v15 = vrot.slane %v18607_v6, 1  ;;  %v6892_v21 = vrot.slane %v18609_v40, 1  ;;  %v6657_v13 = vmax.f32 %v6625_v9, 0.0  ;;  %13846 = vmatprep.mubr.msk.f32.mxu0 %vm2023_vm14, %v18412_v29 }
 0xaef   : > { %v6656_v43 = vmax.f32 %v6624_v8, 0.0  ;;  %v13766_v23 = vpop.f32.mrb[66].mxu1  ;;  %v18628_v57 = vld [vmem:[#allocation3 + $0x148] sm:$0x3] }
 0xaf0   : > { %v18623_v19 = vsel %vm2210_vm0, %v6891_v15, %v6892_v21  ;;  %v18626_v60 = vsel %vm2210_vm0, %v6892_v21, %v6894_v45  ;;  %6689 = vst.msk [vmem:[#allocation3 + $0x171] sm:$0xff] %vm2023_vm14, %v6657_v13  ;;  %v6627_v28 = vadd.f32 %v13766_v23, %v18306_v41  ;;  %v6549_v38 = vpop.f32.mrb[67].mxu1  ;;  %v6899_v15 = vrot.slane %v18628_v57, 1 }
 0xaf1   : > { %20929 = vst [vmem:[#allocation34_spill] sm:$0xff] %v18623_v19  ;;  %20930 = vst [vmem:[#allocation35_spill] sm:$0xff] %v18626_v60  ;;  %13811 = vmatprep.mubr.msk.f32.mxu1 %vm2023_vm14, %v18623_v19  ;;  %v18634_v9 = vld [vmem:[#allocation3 + $0x138] sm:$0xff]  ;;  %v18636_v8 = vld [vmem:[#allocation3 + $0x140] sm:$0xff]  ;;  %v6626_v45 = vadd.f32 %v18306_v41, %v6549_v38  ;;  %13847 = vmatmul.mubr.msk.f32.gmra.mrb[22].mxu0 %vm2023_vm14, %v18414_v52 }
 0xaf2   : > { %6688 = vst.msk [vmem:[#allocation3 + $0x169] sm:$0xff] %vm2023_vm14, %v6656_v43  ;;  %13812 = vmatmul.mubr.msk.f32.gmra.mrb[78].mxu1 %vm2023_vm14, %v18626_v60  ;;  %v6896_v23 = vrot.slane %v18634_v9, 1  ;;  %v6897_v21 = vrot.slane %v18636_v8, 1  ;;  %v6659_v13 = vmax.f32 %v6627_v28, 0.0  ;;  %13849 = vmatprep.mubr.msk.f32.mxu0 %vm2023_vm14, %v18435_v39 }
 0xaf3   : > { %v6658_v19 = vmax.f32 %v6626_v45, 0.0 }
 0xaf4   : > { %v18650_v35 = vsel %vm2210_vm0, %v6896_v23, %v6897_v21  ;;  %v18653_v41 = vsel %vm2210_vm0, %v6897_v21, %v6899_v15  ;;  %v18655_v38 = vld [vmem:[#allocation3 + $0x160] sm:$0x3]  ;;  %6691 = vst.msk [vmem:[#allocation3 + $0x189] sm:$0xff] %vm2023_vm14, %v6659_v13  ;;  %v18660_v43 = vld [vmem:[#allocation3 + $0x150] sm:$0xff]  ;;  %v18662_v28 = vld [vmem:[#allocation3 + $0x158] sm:$0xff] }
 0xaf5   : > { %20931 = vst [vmem:[#allocation36_spill] sm:$0xff] %v18650_v35  ;;  %20932 = vst [vmem:[#allocation37_spill] sm:$0xff] %v18653_v41  ;;  %13814 = vmatprep.mubr.msk.f32.mxu1 %vm2023_vm14, %v18650_v35  ;;  %v6904_v60 = vrot.slane %v18655_v38, 1  ;;  %13850 = vmatmul.mubr.msk.f32.gmra.mrb[24].mxu0 %vm2023_vm14, %v18437_v16  ;;  %v6901_v15 = vrot.slane %v18660_v43, 1  ;;  %v6902_v45 = vrot.slane %v18662_v28, 1 }
 0xaf6   : > { %6690 = vst.msk [vmem:[#allocation3 + $0x181] sm:$0xff] %vm2023_vm14, %v6658_v19  ;;  %13815 = vmatmul.mubr.msk.f32.gmra.mrb[80].mxu1 %vm2023_vm14, %v18653_v41  ;;  %13852 = vmatprep.mubr.msk.f32.mxu0 %vm2023_vm14, %v18461_v7 }
 0xaf7   : > { %v18675_v23 = vsel %vm2210_vm0, %v6901_v15, %v6902_v45  ;;  %v18678_v21 = vsel %vm2210_vm0, %v6902_v45, %v6904_v60  ;;  %v18680_v19 = vld [vmem:[#allocation3 + $0x178] sm:$0x3] }
 0xaf8   : > { %20933 = vst [vmem:[#allocation38_spill] sm:$0xff] %v18675_v23  ;;  %20934 = vst [vmem:[#allocation39_spill] sm:$0xff] %v18678_v21  ;;  %13817 = vmatprep.mubr.msk.f32.mxu1 %vm2023_vm14, %v18675_v23  ;;  %v6909_v35 = vrot.slane %v18680_v19, 1 }
 0xaf9   : > { %v18684_v13 = vld [vmem:[#allocation3 + $0x168] sm:$0xff]  ;;  %v18686_v41 = vld [vmem:[#allocation3 + $0x170] sm:$0xff]  ;;  %13853 = vmatmul.mubr.msk.f32.gmra.mrb[26].mxu0 %vm2023_vm14, %v18463_v2 }
 0xafa   : > { %13818 = vmatmul.mubr.msk.f32.gmra.mrb[82].mxu1 %vm2023_vm14, %v18678_v21  ;;  %v6906_v60 = vrot.slane %v18684_v13, 1  ;;  %v6907_v15 = vrot.slane %v18686_v41, 1  ;;  %13855 = vmatprep.mubr.msk.f32.mxu0 %vm2023_vm14, %v18492_v11  ;;  %v7495_v21 = vrot.slane %v18324_v0, 2 }
 0xafc   : > { %v18698_v45 = vsel %vm2210_vm0, %v6906_v60, %v6907_v15  ;;  %v18701_v23 = vsel %vm2210_vm0, %v6907_v15, %v6909_v35  ;;  %v7489_v35 = vrot.slane %v18269_v17, 2  ;;  %v7490_v60 = vrot.slane %v18271_v26, 2  ;;  %v6761_v17 = vld [vmem:[%s20875_s21 + $0x78] sm:$0xff] }
 0xafd   : > { %20935 = vst [vmem:[#allocation40_spill] sm:$0xff] %v18698_v45  ;;  %20936 = vst [vmem:[#allocation41_spill] sm:$0xff] %v18701_v23  ;;  %13820 = vmatprep.mubr.msk.f32.mxu1 %vm2023_vm14, %v18698_v45  ;;  %13856 = vmatmul.mubr.msk.f32.gmra.mrb[28].mxu0 %vm2023_vm14, %v18494_v51  ;;  %v7492_v15 = vrot.slane %v18275_v59, 2  ;;  %v6760_v45 = vld [vmem:[%s20875_s21 + $0x70] sm:$0xff]  ;;  %v7494_v26 = vrot.slane %v18322_v5, 2 }
 0xafe   : > { %13821 = vmatmul.mubr.msk.f32.gmra.mrb[84].mxu1 %vm2023_vm14, %v18701_v23  ;;  %13858 = vmatprep.mubr.msk.f32.mxu0 %vm2023_vm14, %v18525_v47  ;;  %v7491_v23 = vsel %vm2477_vm1, %v7489_v35, %v7490_v60  ;;  %v14579_v35 = vpack.c.bf16 %v6761_v17, %v6760_v45  ;;  %v18770_v45 = vsel %vm2477_vm1, %v7495_v21, %v7497_v44  ;;  %v7509_v44 = vrot.slane %v18389_v22, 2 }
 0xaff   : > { %v7493_v59 = vsel %vm2477_vm1, %v7490_v60, %v7492_v15  ;;  %v18760_v54 = vsel %vm2477_vm1, %v7494_v26, %v7495_v21  ;;  %v7500_v60 = vrot.slane %v18345_v25, 2  ;;  %v7502_v15 = vrot.slane %v18337_v1, 2 }
 0xb00   : > { %v7504_v26 = vrot.slane %v18366_v62, 2  ;;  %v7507_v1 = vrot.slane %v18360_v12, 2  ;;  %v7510_v21 = vrot.slane %v18391_v61, 2 }
 0xb01   : > { %13859 = vmatmul.mubr.msk.f32.gmra.mrb[30].mxu0 %vm2023_vm14, %v18527_v63  ;;  %v18784_v31 = vsel %vm2477_vm1, %v7500_v60, %v7502_v15 }
 0xb02   : > { %13861 = vmatprep.mubr.msk.f32.mxu0 %vm2023_vm14, %v18553_v20  ;;  %v18803_v12 = vsel %vm2477_vm1, %v7509_v44, %v7510_v21 }
 0xb05   : > { %13862 = vmatmul.mubr.msk.f32.gmra.mrb[32].mxu0 %vm2023_vm14, %v18555_v18 }
 0xb06   : > { %13864 = vmatprep.mubr.msk.f32.mxu0 %vm2023_vm14, %v18580_v14 }
 0xb09   : > { %13865 = vmatmul.mubr.msk.f32.gmra.mrb[34].mxu0 %vm2023_vm14, %v18582_v42 }
 0xb0a   : > { %13867 = vmatprep.mubr.msk.f32.mxu0 %vm2023_vm14, %v18607_v6 }
 0xb0d   : > { %13868 = vmatmul.mubr.msk.f32.gmra.mrb[36].mxu0 %vm2023_vm14, %v18609_v40 }
 0xb0e   : > { %13870 = vmatprep.mubr.msk.f32.mxu0 %vm2023_vm14, %v18634_v9 }
 0xb11   : > { %13871 = vmatmul.mubr.msk.f32.gmra.mrb[38].mxu0 %vm2023_vm14, %v18636_v8 }
 0xb12   : > { %13873 = vmatprep.mubr.msk.f32.mxu0 %vm2023_vm14, %v18660_v43 }
 0xb15   : > { %13874 = vmatmul.mubr.msk.f32.gmra.mrb[40].mxu0 %vm2023_vm14, %v18662_v28 }
 0xb16   : > { %13876 = vmatprep.mubr.msk.f32.mxu0 %vm2023_vm14, %v18684_v13 }
 0xb19   : > { %13877 = vmatmul.mubr.msk.f32.gmra.mrb[42].mxu0 %vm2023_vm14, %v18686_v41 }
 0xb1a   : > { %13887 = vmatprep.mubr.msk.f32.mxu0 %vm2023_vm14, %v7491_v23  ;;  %v7499_v23 = vrot.slane %v18343_v46, 2 }
 0xb1c   : > { %v18776_v17 = vsel %vm2477_vm1, %v7499_v23, %v7500_v60  ;;  %v7514_v23 = vrot.slane %v18412_v29, 2  ;;  %v7515_v60 = vrot.slane %v18414_v52, 2 }
 0xb1d   : > { %13888 = vmatmul.mubr.msk.f32.vlgmr.msra.gmra.mrb[12].mxu0 %vm2023_vm14, %v7493_v59 }
 0xb1e   : > { %14578 = vmatpush3.bf16.msra.mxu0 %v18519_v4  ;;  %13890 = vmatprep.mubr.msk.f32.mxu0 %vm2023_vm14, %v18760_v54  ;;  %v7505_v4 = vrot.slane %v18368_v24, 2 }
 0xb1f   : > { %14580 = vmatprep.subr.bf16.mxu0 %v14579_v35 }
 0xb20   : > { %v18790_v58 = vsel %vm2477_vm1, %v7504_v26, %v7505_v4  ;;  %v18797_v59 = vsel %vm2477_vm1, %v7505_v4, %v7507_v1  ;;  %v7517_v26 = vrot.slane %v18406_v53, 2  ;;  %v7519_v4 = vrot.slane %v18435_v39, 2 }
 0xb21   : > { %13891 = vmatmul.mubr.msk.f32.gmra.mrb[14].mxu0 %vm2023_vm14, %v18770_v45  ;;  %v7520_v1 = vrot.slane %v18437_v16, 2 }
 0xb22   : > { %13893 = vmatprep.mubr.msk.f32.mxu0 %vm2023_vm14, %v18776_v17  ;;  %14582 = vmatpush3.bf16.msra.mxu0 %v14579_v35  ;;  %v7512_v35 = vrot.slane %v18383_v56, 2  ;;  %v18816_v56 = vsel %vm2477_vm1, %v7514_v23, %v7515_v60  ;;  %v18823_v44 = vsel %vm2477_vm1, %v7515_v60, %v7517_v26  ;;  %v7525_v23 = vrot.slane %v18463_v2, 2 }
 0xb23   : > { %14584 = vmatprep.subr.bf16.mxu0 %v18767_v33  ;;  %20937 = vst [vmem:[#allocation42_spill] sm:$0xff] %v18816_v56  ;;  %v18829_v53 = vsel %vm2477_vm1, %v7519_v4, %v7520_v1  ;;  %v7527_v60 = vrot.slane %v18452_v30, 2  ;;  %v7529_v26 = vrot.slane %v18492_v11, 2  ;;  %v7530_v4 = vrot.slane %v18494_v51, 2 }
 0xb24   : > { %v18810_v15 = vsel %vm2477_vm1, %v7510_v21, %v7512_v35  ;;  %v7522_v21 = vrot.slane %v18429_v32, 2  ;;  %20938 = vst [vmem:[#allocation43_spill] sm:$0xff] %v18829_v53  ;;  %v7524_v35 = vrot.slane %v18461_v7, 2 }
 0xb25   : > { %13894 = vmatmul.mubr.msk.f32.gmra.mrb[16].mxu0 %vm2023_vm14, %v18784_v31  ;;  %v18855_v30 = vsel %vm2477_vm1, %v7529_v26, %v7530_v4  ;;  %v7540_v26 = vrot.slane %v18555_v18, 2 }
 0xb26   : > { %13896 = vmatprep.mubr.msk.f32.mxu0 %vm2023_vm14, %v18790_v58  ;;  %v18842_v32 = vsel %vm2477_vm1, %v7524_v35, %v7525_v23  ;;  %20940 = vst [vmem:[#allocation45_spill] sm:$0xff] %v18855_v30  ;;  %v7535_v35 = vrot.slane %v18527_v63, 2 }
 0xb27   : > { %20939 = vst [vmem:[#allocation44_spill] sm:$0xff] %v18842_v32 }
 0xb29   : > { %13897 = vmatmul.mubr.msk.f32.gmra.mrb[18].mxu0 %vm2023_vm14, %v18797_v59 }
 0xb2a   : > { %13899 = vmatprep.mubr.msk.f32.mxu0 %vm2023_vm14, %v18803_v12 }
 0xb2d   : > { %13900 = vmatmul.mubr.msk.f32.gmra.mrb[20].mxu0 %vm2023_vm14, %v18810_v15 }
 0xb2e   : > { %13902 = vmatprep.mubr.msk.f32.mxu0 %vm2023_vm14, %v18816_v56  ;;  %v18836_v56 = vsel %vm2477_vm1, %v7520_v1, %v7522_v21  ;;  %v7532_v1 = vrot.slane %v18483_v37, 2  ;;  %v7534_v21 = vrot.slane %v18525_v47, 2 }
 0xb30   : > { %v18868_v37 = vsel %vm2477_vm1, %v7534_v21, %v7535_v35  ;;  %v7545_v21 = vrot.slane %v18582_v42, 2 }
 0xb31   : > { %13903 = vmatmul.mubr.msk.f32.gmra.mrb[22].mxu0 %vm2023_vm14, %v18823_v44  ;;  %20941 = vst [vmem:[#allocation46_spill] sm:$0xff] %v18868_v37 }
 0xb32   : > { %13905 = vmatprep.mubr.msk.f32.mxu0 %vm2023_vm14, %v18829_v53  ;;  %v18849_v53 = vsel %vm2477_vm1, %v7525_v23, %v7527_v60  ;;  %v7537_v23 = vrot.slane %v18517_v34, 2  ;;  %v7539_v60 = vrot.slane %v18553_v20, 2 }
 0xb34   : > { %v18881_v34 = vsel %vm2477_vm1, %v7539_v60, %v7540_v26  ;;  %v7550_v60 = vrot.slane %v18609_v40, 2 }
 0xb35   : > { %13906 = vmatmul.mubr.msk.f32.gmra.mrb[24].mxu0 %vm2023_vm14, %v18836_v56  ;;  %20942 = vst [vmem:[#allocation47_spill] sm:$0xff] %v18881_v34 }
 0xb36   : > { %13908 = vmatprep.mubr.msk.f32.mxu0 %vm2023_vm14, %v18842_v32  ;;  %v18862_v32 = vsel %vm2477_vm1, %v7530_v4, %v7532_v1  ;;  %v7542_v4 = vrot.slane %v18546_v3, 2  ;;  %v7544_v1 = vrot.slane %v18580_v14, 2 }
 0xb38   : > { %v18894_v3 = vsel %vm2477_vm1, %v7544_v1, %v7545_v21  ;;  %v7555_v1 = vrot.slane %v18636_v8, 2 }
 0xb39   : > { %13909 = vmatmul.mubr.msk.f32.gmra.mrb[26].mxu0 %vm2023_vm14, %v18849_v53  ;;  %20944 = vst [vmem:[#allocation49_spill] sm:$0xff] %v18894_v3 }
 0xb3a   : > { %13911 = vmatprep.mubr.msk.f32.mxu0 %vm2023_vm14, %v18855_v30  ;;  %v18875_v30 = vsel %vm2477_vm1, %v7535_v35, %v7537_v23  ;;  %v7547_v35 = vrot.slane %v18574_v36, 2  ;;  %v7549_v23 = vrot.slane %v18607_v6, 2 }
 0xb3c   : > { %v18907_v36 = vsel %vm2477_vm1, %v7549_v23, %v7550_v60  ;;  %v7560_v23 = vrot.slane %v18662_v28, 2 }
 0xb3d   : > { %13912 = vmatmul.mubr.msk.f32.gmra.mrb[28].mxu0 %vm2023_vm14, %v18862_v32  ;;  %20945 = vst [vmem:[#allocation50_spill] sm:$0xff] %v18907_v36 }
 0xb3e   : > { %13914 = vmatprep.mubr.msk.f32.mxu0 %vm2023_vm14, %v18868_v37  ;;  %v18888_v37 = vsel %vm2477_vm1, %v7540_v26, %v7542_v4  ;;  %v7552_v26 = vrot.slane %v18601_v50, 2  ;;  %v7554_v4 = vrot.slane %v18634_v9, 2 }
 0xb3f   : > { %20943 = vst [vmem:[#allocation48_spill] sm:$0xff] %v18888_v37 }
 0xb40   : > { %v18920_v50 = vsel %vm2477_vm1, %v7554_v4, %v7555_v1  ;;  %v7565_v4 = vrot.slane %v18686_v41, 2 }
 0xb41   : > { %13915 = vmatmul.mubr.msk.f32.gmra.mrb[30].mxu0 %vm2023_vm14, %v18875_v30  ;;  %20947 = vst [vmem:[#allocation58_spill] sm:$0xff] %v18920_v50 }
 0xb42   : > { %13917 = vmatprep.mubr.msk.f32.mxu0 %vm2023_vm14, %v18881_v34  ;;  %v18901_v34 = vsel %vm2477_vm1, %v7545_v21, %v7547_v35  ;;  %v7557_v21 = vrot.slane %v18628_v57, 2  ;;  %v7559_v35 = vrot.slane %v18660_v43, 2 }
 0xb44   : > { %v18933_v57 = vsel %vm2477_vm1, %v7559_v35, %v7560_v23  ;;  %v6764_v35 = vld [vmem:[%s20875_s21 + $0x90] sm:$0xff] }
 0xb45   : > { %13918 = vmatmul.mubr.msk.f32.gmra.mrb[32].mxu0 %vm2023_vm14, %v18888_v37  ;;  %20949 = vst [vmem:[#allocation60_spill] sm:$0xff] %v18933_v57 }
 0xb46   : > { %13920 = vmatprep.mubr.msk.f32.mxu0 %vm2023_vm14, %v18894_v3  ;;  %v18914_v3 = vsel %vm2477_vm1, %v7550_v60, %v7552_v26  ;;  %v7562_v60 = vrot.slane %v18655_v38, 2  ;;  %v7564_v26 = vrot.slane %v18684_v13, 2 }
 0xb47   : > { %20946 = vst [vmem:[#allocation57_spill] sm:$0xff] %v18914_v3 }
 0xb48   : > { %v18946_v38 = vsel %vm2477_vm1, %v7564_v26, %v7565_v4  ;;  %v6767_v26 = vld [vmem:[%s20875_s21 + $0xa8] sm:$0xff] }
 0xb49   : > { %13921 = vmatmul.mubr.msk.f32.gmra.mrb[34].mxu0 %vm2023_vm14, %v18901_v34  ;;  %20951 = vst [vmem:[#allocation62_spill] sm:$0xff] %v18946_v38 }
 0xb4a   : > { %13923 = vmatprep.mubr.msk.f32.mxu0 %vm2023_vm14, %v18907_v36  ;;  %v18927_v36 = vsel %vm2477_vm1, %v7555_v1, %v7557_v21  ;;  %v7567_v1 = vrot.slane %v18680_v19, 2  ;;  %v6765_v19 = vld [vmem:[%s20875_s21 + $0x98] sm:$0xff] }
 0xb4b   : > { %20948 = vst [vmem:[#allocation59_spill] sm:$0xff] %v18927_v36 }
 0xb4c   : > { %v18951_v21 = vsel %vm2477_vm1, %v7565_v4, %v7567_v1  ;;  %v20958_v1 = vld [vmem:[#allocation56_spill] sm:$0xff] }
 0xb4d   : > { %13924 = vmatmul.mubr.msk.f32.gmra.mrb[36].mxu0 %vm2023_vm14, %v18914_v3  ;;  %20952 = vst [vmem:[#allocation63_spill] sm:$0xff] %v18951_v21 }
 0xb4e   : > { %13926 = vmatprep.mubr.msk.f32.mxu0 %vm2023_vm14, %v18920_v50  ;;  %v18940_v50 = vsel %vm2477_vm1, %v7560_v23, %v7562_v60  ;;  %v14587_v23 = vpack.c.bf16 %v6765_v19, %v6764_v35  ;;  %v6766_v60 = vld [vmem:[%s20875_s21 + $0xa0] sm:$0xff] }
 0xb4f   : > { %20950 = vst [vmem:[#allocation61_spill] sm:$0xff] %v18940_v50  ;;  %v14591_v4 = vpack.c.bf16 %v6767_v26, %v6766_v60  ;;  %v20962_v60 = vld [vmem:[#allocation24_spill] sm:$0xff] }
 0xb51   : > { %13927 = vmatmul.mubr.msk.f32.gmra.mrb[38].mxu0 %vm2023_vm14, %v18927_v36 }
 0xb52   : > { %13929 = vmatprep.mubr.msk.f32.mxu0 %vm2023_vm14, %v18933_v57 }
 0xb55   : > { %13930 = vmatmul.mubr.msk.f32.gmra.mrb[40].mxu0 %vm2023_vm14, %v18940_v50 }
 0xb56   : > { %13932 = vmatprep.mubr.msk.f32.mxu0 %vm2023_vm14, %v18946_v38 }
 0xb59   : > { %13933 = vmatmul.mubr.msk.f32.gmra.mrb[42].mxu0 %vm2023_vm14, %v18951_v21 }
 0xb5a   : > { %13943 = vmatprep.mubr.msk.f32.mxu0 %vm2023_vm14, %v18322_v5  ;;  %v19028_v5 = vld [vmem:[#allocation3 + $0x180] sm:$0xff] }
 0xb5d   : > { %13944 = vmatmul.mubr.msk.f32.vlgmr.msra.gmra.mrb[12].mxu0 %vm2023_vm14, %v18324_v0  ;;  %v19032_v0 = vld [vmem:[#allocation3 + $0x188] sm:$0xff] }
 0xb5e   : > { %14586 = vmatpush3.bf16.msra.mxu0 %v18767_v33  ;;  %13946 = vmatprep.mubr.msk.f32.mxu0 %vm2023_vm14, %v18343_v46  ;;  %v6768_v46 = vld [vmem:[%s20875_s21 + $0xb0] sm:$0xff]  ;;  %v20957_v33 = vld [vmem:[#allocation55_spill] sm:$0xff] }
 0xb5f   : > { %14588 = vmatprep.subr.bf16.mxu0 %v14587_v23 }
 0xb61   : > { %13947 = vmatmul.mubr.msk.f32.gmra.mrb[14].mxu0 %vm2023_vm14, %v18345_v25  ;;  %v6769_v25 = vld [vmem:[%s20875_s21 + $0xb8] sm:$0xff] }
 0xb62   : > { %13949 = vmatprep.mubr.msk.f32.mxu0 %vm2023_vm14, %v18366_v62  ;;  %14590 = vmatpush3.bf16.msra.mxu0 %v14587_v23  ;;  %v14595_v62 = vpack.c.bf16 %v6769_v25, %v6768_v46  ;;  %v20961_v23 = vld [vmem:[#allocation23_spill] sm:$0xff]  ;;  %v20965_v46 = vld [vmem:[#allocation25_spill] sm:$0xff]  ;;  %v20966_v25 = vld [vmem:[#allocation26_spill] sm:$0xff] }
 0xb63   : > { %14592 = vmatprep.subr.bf16.mxu0 %v14591_v4 }
 0xb65   : > { %13950 = vmatmul.mubr.msk.f32.gmra.mrb[16].mxu0 %vm2023_vm14, %v18368_v24  ;;  %v6770_v24 = vld [vmem:[%s20875_s21 + $0xc0] sm:$0xff] }
 0xb66   : > { %13952 = vmatprep.mubr.msk.f32.mxu0 %vm2023_vm14, %v18389_v22  ;;  %v6771_v22 = vld [vmem:[%s20875_s21 + $0xc8] sm:$0xff] }
 0xb69   : > { %13953 = vmatmul.mubr.msk.f32.gmra.mrb[18].mxu0 %vm2023_vm14, %v18391_v61  ;;  %v19054_v61 = vpack.c.bf16 %v6771_v22, %v6770_v24  ;;  %v20969_v22 = vld [vmem:[#allocation27_spill] sm:$0xff] }
 0xb6a   : > { %13955 = vmatprep.mubr.msk.f32.mxu0 %vm2023_vm14, %v18412_v29  ;;  %v20955_v29 = vld [vmem:[#allocation53_spill] sm:$0xff] }
 0xb6d   : > { %13956 = vmatmul.mubr.msk.f32.gmra.mrb[20].mxu0 %vm2023_vm14, %v18414_v52  ;;  %v20956_v52 = vld [vmem:[#allocation54_spill] sm:$0xff] }
 0xb6e   : > { %13958 = vmatprep.mubr.msk.f32.mxu0 %vm2023_vm14, %v18435_v39 }
 0xb71   : > { %13959 = vmatmul.mubr.msk.f32.gmra.mrb[22].mxu0 %vm2023_vm14, %v18437_v16 }
 0xb72   : > { %13961 = vmatprep.mubr.msk.f32.mxu0 %vm2023_vm14, %v18461_v7 }
 0xb75   : > { %13962 = vmatmul.mubr.msk.f32.gmra.mrb[24].mxu0 %vm2023_vm14, %v18463_v2 }
 0xb76   : > { %13964 = vmatprep.mubr.msk.f32.mxu0 %vm2023_vm14, %v18492_v11 }
 0xb79   : > { %13965 = vmatmul.mubr.msk.f32.gmra.mrb[26].mxu0 %vm2023_vm14, %v18494_v51 }
 0xb7a   : > { %13967 = vmatprep.mubr.msk.f32.mxu0 %vm2023_vm14, %v18525_v47 }
 0xb7d   : > { %13968 = vmatmul.mubr.msk.f32.gmra.mrb[28].mxu0 %vm2023_vm14, %v18527_v63 }
 0xb7e   : > { %13970 = vmatprep.mubr.msk.f32.mxu0 %vm2023_vm14, %v18553_v20 }
 0xb81   : > { %13971 = vmatmul.mubr.msk.f32.gmra.mrb[30].mxu0 %vm2023_vm14, %v18555_v18 }
 0xb82   : > { %13973 = vmatprep.mubr.msk.f32.mxu0 %vm2023_vm14, %v18580_v14 }
 0xb85   : > { %13974 = vmatmul.mubr.msk.f32.gmra.mrb[32].mxu0 %vm2023_vm14, %v18582_v42 }
 0xb86   : > { %13976 = vmatprep.mubr.msk.f32.mxu0 %vm2023_vm14, %v18607_v6 }
 0xb89   : > { %13977 = vmatmul.mubr.msk.f32.gmra.mrb[34].mxu0 %vm2023_vm14, %v18609_v40 }
 0xb8a   : > { %13979 = vmatprep.mubr.msk.f32.mxu0 %vm2023_vm14, %v18634_v9 }
 0xb8d   : > { %13980 = vmatmul.mubr.msk.f32.gmra.mrb[36].mxu0 %vm2023_vm14, %v18636_v8 }
 0xb8e   : > { %13982 = vmatprep.mubr.msk.f32.mxu0 %vm2023_vm14, %v18660_v43 }
 0xb91   : > { %13983 = vmatmul.mubr.msk.f32.gmra.mrb[38].mxu0 %vm2023_vm14, %v18662_v28 }
 0xb92   : > { %13985 = vmatprep.mubr.msk.f32.mxu0 %vm2023_vm14, %v18684_v13 }
 0xb95   : > { %13986 = vmatmul.mubr.msk.f32.gmra.mrb[40].mxu0 %vm2023_vm14, %v18686_v41 }
 0xb96   : > { %13988 = vmatprep.mubr.msk.f32.mxu0 %vm2023_vm14, %v19028_v5 }
 0xb99   : > { %13989 = vmatmul.mubr.msk.f32.gmra.mrb[42].mxu0 %vm2023_vm14, %v19032_v0 }
 0xb9a   : > { %13999 = vmatprep.mubr.msk.f32.mxu0 %vm2023_vm14, %v18332_v10  ;;  %v20953_v10 = vld [vmem:[#allocation51_spill] sm:$0xff] }
 0xb9d   : > { %14000 = vmatmul.mubr.msk.f32.vlgmr.msra.gmra.mrb[12].mxu0 %vm2023_vm14, %v18335_v49  ;;  %v20954_v49 = vld [vmem:[#allocation52_spill] sm:$0xff] }
 0xb9e   : > { %14594 = vmatpush3.bf16.msra.mxu0 %v14591_v4  ;;  %14002 = vmatprep.mubr.msk.f32.mxu0 %vm2023_vm14, %v18355_v27 }
 0xb9f   : > { %14596 = vmatprep.subr.bf16.mxu0 %v14595_v62 }
 0xba1   : > { %14003 = vmatmul.mubr.msk.f32.gmra.mrb[14].mxu0 %vm2023_vm14, %v18358_v55 }
 0xba2   : > { %14005 = vmatprep.mubr.msk.f32.mxu0 %vm2023_vm14, %v18378_v48  ;;  %14598 = vmatpush3.bf16.msra.mxu0 %v14595_v62 }
 0xba3   : > { %14600 = vmatprep.subr.bf16.mxu0 %v19054_v61 }
 0xba5   : > { %14006 = vmatmul.mubr.msk.f32.gmra.mrb[16].mxu0 %vm2023_vm14, %v20953_v10 }
 0xba6   : > { %14008 = vmatprep.mubr.msk.f32.mxu0 %vm2023_vm14, %v20954_v49 }
 0xba9   : > { %14009 = vmatmul.mubr.msk.f32.gmra.mrb[18].mxu0 %vm2023_vm14, %v20955_v29 }
 0xbaa   : > { %14011 = vmatprep.mubr.msk.f32.mxu0 %vm2023_vm14, %v20956_v52 }
 0xbad   : > { %14012 = vmatmul.mubr.msk.f32.gmra.mrb[20].mxu0 %vm2023_vm14, %v20957_v33 }
 0xbae   : > { %14014 = vmatprep.mubr.msk.f32.mxu0 %vm2023_vm14, %v20958_v1 }
 0xbb1   : > { %v19073_v35 = vpop.f32.mrb[68].mxu1  ;;  %14015 = vmatmul.mubr.msk.f32.gmra.mrb[22].mxu0 %vm2023_vm14, %v20961_v23 }
 0xbb2   : > { %20959 = vst [vmem:[#allocation51_spill] sm:$0xff] %v19073_v35  ;;  %v19075_v19 = vpop.f32.mrb[69].mxu1  ;;  %14017 = vmatprep.mubr.msk.f32.mxu0 %vm2023_vm14, %v20962_v60  ;;  %v20993_v60 = vld [vmem:[#allocation39_spill] sm:$0xff] }
 0xbb3   : > { %20960 = vst [vmem:[#allocation52_spill] sm:$0xff] %v19075_v19  ;;  %v20970_v19 = vld [vmem:[#allocation28_spill] sm:$0xff] }
 0xbb5   : > { %v19081_v26 = vpop.f32.mrb[70].mxu1  ;;  %14018 = vmatmul.mubr.msk.f32.gmra.mrb[24].mxu0 %vm2023_vm14, %v20965_v46  ;;  %v20974_v46 = vld [vmem:[#allocation30_spill] sm:$0xff] }
 0xbb6   : > { %20963 = vst [vmem:[#allocation53_spill] sm:$0xff] %v19081_v26  ;;  %v19083_v4 = vpop.f32.mrb[71].mxu1  ;;  %14020 = vmatprep.mubr.msk.f32.mxu0 %vm2023_vm14, %v20966_v25 }
 0xbb7   : > { %20964 = vst [vmem:[#allocation54_spill] sm:$0xff] %v19083_v4  ;;  %v20973_v4 = vld [vmem:[#allocation29_spill] sm:$0xff] }
 0xbb9   : > { %v19089_v62 = vpop.f32.mrb[72].mxu1  ;;  %14021 = vmatmul.mubr.msk.f32.gmra.mrb[26].mxu0 %vm2023_vm14, %v20969_v22  ;;  %v20978_v22 = vld [vmem:[#allocation32_spill] sm:$0xff] }
 0xbba   : > { %20967 = vst [vmem:[#allocation55_spill] sm:$0xff] %v19089_v62  ;;  %v19091_v24 = vpop.f32.mrb[73].mxu1  ;;  %14023 = vmatprep.mubr.msk.f32.mxu0 %vm2023_vm14, %v20970_v19 }
 0xbbb   : > { %20968 = vst [vmem:[#allocation56_spill] sm:$0xff] %v19091_v24  ;;  %v20977_v24 = vld [vmem:[#allocation31_spill] sm:$0xff] }
 0xbbd   : > { %v19097_v35 = vpop.f32.mrb[74].mxu1  ;;  %14024 = vmatmul.mubr.msk.f32.gmra.mrb[28].mxu0 %vm2023_vm14, %v20973_v4  ;;  %v20982_v4 = vld [vmem:[#allocation34_spill] sm:$0xff] }
 0xbbe   : > { %20971 = vst [vmem:[#allocation23_spill] sm:$0xff] %v19097_v35  ;;  %v19099_v26 = vpop.f32.mrb[75].mxu1  ;;  %14026 = vmatprep.mubr.msk.f32.mxu0 %vm2023_vm14, %v20974_v46 }
 0xbbf   : > { %20972 = vst [vmem:[#allocation64_spill] sm:$0xff] %v19099_v26  ;;  %v20981_v26 = vld [vmem:[#allocation33_spill] sm:$0xff] }
 0xbc1   : > { %v19105_v25 = vpop.f32.mrb[76].mxu1  ;;  %14027 = vmatmul.mubr.msk.f32.gmra.mrb[30].mxu0 %vm2023_vm14, %v20977_v24  ;;  %v20986_v24 = vld [vmem:[#allocation36_spill] sm:$0xff] }
 0xbc2   : > { %20975 = vst [vmem:[#allocation65_spill] sm:$0xff] %v19105_v25  ;;  %v19107_v62 = vpop.f32.mrb[77].mxu1  ;;  %14029 = vmatprep.mubr.msk.f32.mxu0 %vm2023_vm14, %v20978_v22 }
 0xbc3   : > { %20976 = vst [vmem:[#allocation66_spill] sm:$0xff] %v19107_v62  ;;  %v20985_v62 = vld [vmem:[#allocation35_spill] sm:$0xff] }
 0xbc5   : > { %v19113_v19 = vpop.f32.mrb[78].mxu1  ;;  %14030 = vmatmul.mubr.msk.f32.gmra.mrb[32].mxu0 %vm2023_vm14, %v20981_v26  ;;  %v20990_v26 = vld [vmem:[#allocation38_spill] sm:$0xff] }
 0xbc6   : > { %20979 = vst [vmem:[#allocation67_spill] sm:$0xff] %v19113_v19  ;;  %v19115_v35 = vpop.f32.mrb[79].mxu1  ;;  %14032 = vmatprep.mubr.msk.f32.mxu0 %vm2023_vm14, %v20982_v4 }
 0xbc7   : > { %20980 = vst [vmem:[#allocation68_spill] sm:$0xff] %v19115_v35  ;;  %v20989_v35 = vld [vmem:[#allocation37_spill] sm:$0xff] }
 0xbc9   : > { %v19121_v46 = vpop.f32.mrb[80].mxu1  ;;  %14033 = vmatmul.mubr.msk.f32.gmra.mrb[34].mxu0 %vm2023_vm14, %v20985_v62 }
 0xbca   : > { %20983 = vst [vmem:[#allocation69_spill] sm:$0xff] %v19121_v46  ;;  %v19123_v25 = vpop.f32.mrb[81].mxu1  ;;  %14035 = vmatprep.mubr.msk.f32.mxu0 %vm2023_vm14, %v20986_v24  ;;  %v8155_v46 = vrot.slane %v19032_v0, 1  ;;  %v20994_v24 = vld [vmem:[#allocation40_spill] sm:$0xff] }
 0xbcb   : > { %20984 = vst [vmem:[#allocation70_spill] sm:$0xff] %v19123_v25  ;;  %v8154_v25 = vrot.slane %v19028_v5, 1 }
 0xbcd   : > { %v19129_v22 = vpop.f32.mrb[82].mxu1  ;;  %14036 = vmatmul.mubr.msk.f32.gmra.mrb[36].mxu0 %vm2023_vm14, %v20989_v35  ;;  %v20995_v35 = vld [vmem:[#allocation41_spill] sm:$0xff] }
 0xbce   : > { %20987 = vst [vmem:[#allocation71_spill] sm:$0xff] %v19129_v22  ;;  %v19131_v19 = vpop.f32.mrb[83].mxu1  ;;  %14038 = vmatprep.mubr.msk.f32.mxu0 %vm2023_vm14, %v20990_v26  ;;  %v6742_v22 = vld [vmem:[#allocation3 + $0x190] sm:$0x3]  ;;  %v19150_v26 = vsel %vm2210_vm0, %v8154_v25, %v8155_v46 }
 0xbcf   : > { %20988 = vst [vmem:[#allocation72_spill] sm:$0xff] %v19131_v19  ;;  %v8157_v19 = vrot.slane %v6742_v22, 1 }
 0xbd1   : > { %v19137_v4 = vpop.f32.mrb[84].mxu1  ;;  %14039 = vmatmul.mubr.msk.f32.gmra.mrb[38].mxu0 %vm2023_vm14, %v20993_v60 }
 0xbd2   : > { %20991 = vst [vmem:[#allocation73_spill] sm:$0xff] %v19137_v4  ;;  %v19141_v62 = vpop.f32.mrb[85].mxu1  ;;  %14041 = vmatprep.mubr.msk.f32.mxu0 %vm2023_vm14, %v20994_v24  ;;  %v19155_v4 = vsel %vm2210_vm0, %v8155_v46, %v8157_v19  ;;  %v6773_v24 = vld [vmem:[%s20875_s21 + $0xd8] sm:$0xff]  ;;  %v6774_v19 = vld [vmem:[%s20875_s21 + $0xe0] sm:$0xff]  ;;  %v6775_v46 = vld [vmem:[%s20875_s21 + $0xe8] sm:$0xff] }
 0xbd3   : > { %20992 = vst [vmem:[#allocation74_spill] sm:$0xff] %v19141_v62  ;;  %20996 = vst [vmem:[#allocation39_spill] sm:$0xff] %v19155_v4  ;;  %v6772_v62 = vld [vmem:[%s20875_s21 + $0xd0] sm:$0xff] }
 0xbd4   : > { %v14603_v25 = vpack.c.bf16 %v6773_v24, %v6772_v62  ;;  %v21000_v62 = vld [vmem:[#allocation45_spill] sm:$0xff]  ;;  %v21001_v24 = vld [vmem:[#allocation46_spill] sm:$0xff] }
 0xbd5   : > { %14042 = vmatmul.mubr.msk.f32.gmra.mrb[40].mxu0 %vm2023_vm14, %v20995_v35 }
 0xbd6   : > { %14044 = vmatprep.mubr.msk.f32.mxu0 %vm2023_vm14, %v19150_v26 }
 0xbd9   : > { %14045 = vmatmul.mubr.msk.f32.gmra.mrb[42].mxu0 %vm2023_vm14, %v19155_v4  ;;  %v14607_v4 = vpack.c.bf16 %v6775_v46, %v6774_v19  ;;  %v21003_v19 = vld [vmem:[#allocation49_spill] sm:$0xff]  ;;  %v21004_v46 = vld [vmem:[#allocation50_spill] sm:$0xff] }
 0xbda   : > { %14055 = vmatprep.mubr.msk.f32.mxu0 %vm2023_vm14, %v18760_v54  ;;  %v20997_v54 = vld [vmem:[#allocation42_spill] sm:$0xff] }
 0xbdd   : > { %14056 = vmatmul.mubr.msk.f32.vlgmr.msra.gmra.mrb[12].mxu0 %vm2023_vm14, %v18770_v45  ;;  %v20998_v45 = vld [vmem:[#allocation43_spill] sm:$0xff] }
 0xbde   : > { %14602 = vmatpush3.bf16.msra.mxu0 %v19054_v61  ;;  %14058 = vmatprep.mubr.msk.f32.mxu0 %vm2023_vm14, %v18776_v17  ;;  %v20999_v61 = vld [vmem:[#allocation44_spill] sm:$0xff] }
 0xbdf   : > { %14604 = vmatprep.subr.bf16.mxu0 %v14603_v25 }
 0xbe1   : > { %14059 = vmatmul.mubr.msk.f32.gmra.mrb[14].mxu0 %vm2023_vm14, %v18784_v31 }
 0xbe2   : > { %14061 = vmatprep.mubr.msk.f32.mxu0 %vm2023_vm14, %v18790_v58  ;;  %14606 = vmatpush3.bf16.msra.mxu0 %v14603_v25  ;;  %v21002_v25 = vld [vmem:[#allocation47_spill] sm:$0xff] }
 0xbe3   : > { %14608 = vmatprep.subr.bf16.mxu0 %v14607_v4 }
 0xbe5   : > { %14062 = vmatmul.mubr.msk.f32.gmra.mrb[16].mxu0 %vm2023_vm14, %v18797_v59 }
 0xbe6   : > { %14064 = vmatprep.mubr.msk.f32.mxu0 %vm2023_vm14, %v18803_v12 }
 0xbe9   : > { %14065 = vmatmul.mubr.msk.f32.gmra.mrb[18].mxu0 %vm2023_vm14, %v18810_v15 }
 0xbea   : > { %14067 = vmatprep.mubr.msk.f32.mxu0 %vm2023_vm14, %v20997_v54 }
 0xbed   : > { %14068 = vmatmul.mubr.msk.f32.gmra.mrb[20].mxu0 %vm2023_vm14, %v18823_v44 }
 0xbee   : > { %14070 = vmatprep.mubr.msk.f32.mxu0 %vm2023_vm14, %v20998_v45 }
 0xbf1   : > { %14071 = vmatmul.mubr.msk.f32.gmra.mrb[22].mxu0 %vm2023_vm14, %v18836_v56 }
 0xbf2   : > { %14073 = vmatprep.mubr.msk.f32.mxu0 %vm2023_vm14, %v20999_v61 }
 0xbf5   : > { %14074 = vmatmul.mubr.msk.f32.gmra.mrb[24].mxu0 %vm2023_vm14, %v18849_v53 }
 0xbf6   : > { %14076 = vmatprep.mubr.msk.f32.mxu0 %vm2023_vm14, %v21000_v62 }
 0xbf9   : > { %14077 = vmatmul.mubr.msk.f32.gmra.mrb[26].mxu0 %vm2023_vm14, %v18862_v32 }
 0xbfa   : > { %14079 = vmatprep.mubr.msk.f32.mxu0 %vm2023_vm14, %v21001_v24  ;;  %v21005_v24 = vld [vmem:[#allocation58_spill] sm:$0xff] }
 0xbfd   : > { %14080 = vmatmul.mubr.msk.f32.gmra.mrb[28].mxu0 %vm2023_vm14, %v18875_v30 }
 0xbfe   : > { %14082 = vmatprep.mubr.msk.f32.mxu0 %vm2023_vm14, %v21002_v25 }
 0xc01   : > { %14083 = vmatmul.mubr.msk.f32.gmra.mrb[30].mxu0 %vm2023_vm14, %v18888_v37  ;;  %v8421_v37 = vrot.slane %v19032_v0, 2 }
 0xc02   : > { %14085 = vmatprep.mubr.msk.f32.mxu0 %vm2023_vm14, %v21003_v19  ;;  %v8420_v19 = vrot.slane %v19028_v5, 2 }
 0xc05   : > { %14086 = vmatmul.mubr.msk.f32.gmra.mrb[32].mxu0 %vm2023_vm14, %v18901_v34 }
 0xc06   : > { %14088 = vmatprep.mubr.msk.f32.mxu0 %vm2023_vm14, %v21004_v46 }
 0xc09   : > { %14089 = vmatmul.mubr.msk.f32.gmra.mrb[34].mxu0 %vm2023_vm14, %v18914_v3  ;;  %v8423_v3 = vrot.slane %v6742_v22, 2  ;;  %v6777_v22 = vld [vmem:[%s20875_s21 + $0xf8] sm:$0xff] }
 0xc0a   : > { %14091 = vmatprep.mubr.msk.f32.mxu0 %vm2023_vm14, %v21005_v24  ;;  %v19235_v24 = vsel %vm2477_vm1, %v8420_v19, %v8421_v37 }
 0xc0b   : > { %21006 = vst [vmem:[#allocation41_spill] sm:$0xff] %v19235_v24 }
 0xc0d   : > { %14092 = vmatmul.mubr.msk.f32.gmra.mrb[36].mxu0 %vm2023_vm14, %v18927_v36  ;;  %v15472_v36 = vld [vmem:[#allocation3 + $0x50] sm:$0xff] }
 0xc0e   : > { %14094 = vmatprep.mubr.msk.f32.mxu0 %vm2023_vm14, %v18933_v57  ;;  %v19240_v57 = vsel %vm2477_vm1, %v8421_v37, %v8423_v3  ;;  %v6778_v37 = vld [vmem:[%s20875_s21 + $0x100] sm:$0xff]  ;;  %v6779_v3 = vld [vmem:[%s20875_s21 + $0x108] sm:$0xff] }
 0xc0f   : > { %21007 = vst [vmem:[#allocation42_spill] sm:$0xff] %v19240_v57 }
 0xc11   : > { %14095 = vmatmul.mubr.msk.f32.gmra.mrb[38].mxu0 %vm2023_vm14, %v18940_v50  ;;  %v6776_v50 = vld [vmem:[%s20875_s21 + $0xf0] sm:$0xff] }
 0xc12   : > { %14097 = vmatprep.mubr.msk.f32.mxu0 %vm2023_vm14, %v18946_v38  ;;  %v14611_v19 = vpack.c.bf16 %v6777_v22, %v6776_v50  ;;  %v15471_v38 = vld [vmem:[#allocation3 + $0x48] sm:$0xff]  ;;  %v15473_v50 = vld [vmem:[#allocation3 + $0x60] sm:$0xff]  ;;  %v15475_v22 = vld [vmem:[#allocation3 + $0x78] sm:$0xff] }
 0xc15   : > { %14098 = vmatmul.mubr.msk.f32.gmra.mrb[40].mxu0 %vm2023_vm14, %v18951_v21  ;;  %v15469_v21 = vld [vmem:[#allocation3 + $0x30] sm:$0xff] }
 0xc16   : > { %14100 = vmatprep.mubr.msk.f32.mxu0 %vm2023_vm14, %v19235_v24  ;;  %v15470_v24 = vld [vmem:[#allocation3 + $0x38] sm:$0xff] }
 0xc19   : > { %14101 = vmatmul.mubr.msk.f32.gmra.mrb[42].mxu0 %vm2023_vm14, %v19240_v57  ;;  %v14615_v57 = vpack.c.bf16 %v6779_v3, %v6778_v37 }
 0xc1a   : > { %14111 = vmatprep.mubr.msk.f32.mxu0 %vm2023_vm14, %v15469_v21  ;;  %v15474_v21 = vld [vmem:[#allocation3 + $0x68] sm:$0xff] }
 0xc1d   : > { %14112 = vmatmul.mubr.msk.f32.vlgmr.msra.gmra.mrb[12].mxu0 %vm2023_vm14, %v15470_v24 }
 0xc1e   : > { %14610 = vmatpush3.bf16.msra.mxu0 %v14607_v4  ;;  %14114 = vmatprep.mubr.msk.f32.mxu0 %vm2023_vm14, %v15471_v38  ;;  %v15476_v4 = vld [vmem:[#allocation3 + $0x80] sm:$0xff] }
 0xc1f   : > { %14612 = vmatprep.subr.bf16.mxu0 %v14611_v19 }
 0xc21   : > { %14115 = vmatmul.mubr.msk.f32.gmra.mrb[14].mxu0 %vm2023_vm14, %v15472_v36  ;;  %v6745_v36 = vld [vmem:[#allocation3 + $0x1a8] sm:$0x3] }
 0xc22   : > { %14117 = vmatprep.mubr.msk.f32.mxu0 %vm2023_vm14, %v15473_v50  ;;  %14614 = vmatpush3.bf16.msra.mxu0 %v14611_v19 }
 0xc23   : > { %14616 = vmatprep.subr.bf16.mxu0 %v14615_v57 }
 0xc25   : > { %14118 = vmatmul.mubr.msk.f32.gmra.mrb[16].mxu0 %vm2023_vm14, %v15474_v21 }
 0xc26   : > { %14120 = vmatprep.mubr.msk.f32.mxu0 %vm2023_vm14, %v15475_v22 }
 0xc29   : > { %14121 = vmatmul.mubr.msk.f32.gmra.mrb[18].mxu0 %vm2023_vm14, %v15476_v4 }
 0xc2a   : > { %14123 = vmatprep.mubr.msk.f32.mxu0 %vm2023_vm14, %v18435_v39  ;;  %v19306_v39 = vld [vmem:[#allocation3 + $0x198] sm:$0xff] }
 0xc2d   : > { %14124 = vmatmul.mubr.msk.f32.gmra.mrb[20].mxu0 %vm2023_vm14, %v18437_v16  ;;  %v19312_v16 = vld [vmem:[#allocation3 + $0x1a0] sm:$0xff] }
 0xc2e   : > { %14126 = vmatprep.mubr.msk.f32.mxu0 %vm2023_vm14, %v18461_v7  ;;  %v6780_v7 = vld [vmem:[%s20875_s21 + $0x110] sm:$0xff] }
 0xc31   : > { %14127 = vmatmul.mubr.msk.f32.gmra.mrb[22].mxu0 %vm2023_vm14, %v18463_v2  ;;  %v6781_v2 = vld [vmem:[%s20875_s21 + $0x118] sm:$0xff] }
 0xc32   : > { %14129 = vmatprep.mubr.msk.f32.mxu0 %vm2023_vm14, %v18492_v11  ;;  %v14619_v11 = vpack.c.bf16 %v6781_v2, %v6780_v7 }
 0xc35   : > { %14130 = vmatmul.mubr.msk.f32.gmra.mrb[24].mxu0 %vm2023_vm14, %v18494_v51  ;;  %v21011_v51 = vld [vmem:[#allocation27_spill] sm:$0xff] }
 0xc36   : > { %14132 = vmatprep.mubr.msk.f32.mxu0 %vm2023_vm14, %v18525_v47  ;;  %v21012_v47 = vld [vmem:[#allocation28_spill] sm:$0xff] }
 0xc39   : > { %14133 = vmatmul.mubr.msk.f32.gmra.mrb[26].mxu0 %vm2023_vm14, %v18527_v63  ;;  %v21013_v63 = vld [vmem:[#allocation29_spill] sm:$0xff] }
 0xc3a   : > { %14135 = vmatprep.mubr.msk.f32.mxu0 %vm2023_vm14, %v18553_v20  ;;  %v21014_v20 = vld [vmem:[#allocation30_spill] sm:$0xff] }
 0xc3d   : > { %14136 = vmatmul.mubr.msk.f32.gmra.mrb[28].mxu0 %vm2023_vm14, %v18555_v18  ;;  %v21015_v18 = vld [vmem:[#allocation31_spill] sm:$0xff] }
 0xc3e   : > { %14138 = vmatprep.mubr.msk.f32.mxu0 %vm2023_vm14, %v18580_v14  ;;  %v21016_v14 = vld [vmem:[#allocation32_spill] sm:$0xff] }
 0xc41   : > { %14139 = vmatmul.mubr.msk.f32.gmra.mrb[30].mxu0 %vm2023_vm14, %v18582_v42  ;;  %v21017_v42 = vld [vmem:[#allocation33_spill] sm:$0xff] }
 0xc42   : > { %14141 = vmatprep.mubr.msk.f32.mxu0 %vm2023_vm14, %v18607_v6  ;;  %v21018_v6 = vld [vmem:[#allocation34_spill] sm:$0xff] }
 0xc45   : > { %14142 = vmatmul.mubr.msk.f32.gmra.mrb[32].mxu0 %vm2023_vm14, %v18609_v40  ;;  %v21019_v40 = vld [vmem:[#allocation35_spill] sm:$0xff] }
 0xc46   : > { %14144 = vmatprep.mubr.msk.f32.mxu0 %vm2023_vm14, %v18634_v9  ;;  %v21020_v9 = vld [vmem:[#allocation36_spill] sm:$0xff] }
 0xc49   : > { %14145 = vmatmul.mubr.msk.f32.gmra.mrb[34].mxu0 %vm2023_vm14, %v18636_v8  ;;  %v21021_v8 = vld [vmem:[#allocation37_spill] sm:$0xff] }
 0xc4a   : > { %14147 = vmatprep.mubr.msk.f32.mxu0 %vm2023_vm14, %v18660_v43  ;;  %v21023_v43 = vld [vmem:[#allocation40_spill] sm:$0xff] }
 0xc4d   : > { %14148 = vmatmul.mubr.msk.f32.gmra.mrb[36].mxu0 %vm2023_vm14, %v18662_v28  ;;  %v8950_v28 = vrot.slane %v19306_v39, 1 }
 0xc4e   : > { %14150 = vmatprep.mubr.msk.f32.mxu0 %vm2023_vm14, %v18684_v13  ;;  %v8951_v13 = vrot.slane %v19312_v16, 1 }
 0xc50   : > { %v8952_v38 = vsel %vm2210_vm0, %v8950_v28, %v8951_v13 }
 0xc51   : > { %14151 = vmatmul.mubr.msk.f32.gmra.mrb[38].mxu0 %vm2023_vm14, %v18686_v41  ;;  %v21022_v41 = vld [vmem:[#allocation38_spill] sm:$0xff] }
 0xc52   : > { %14153 = vmatprep.mubr.msk.f32.mxu0 %vm2023_vm14, %v19028_v5  ;;  %v21024_v5 = vld [vmem:[#allocation39_spill] sm:$0xff] }
 0xc55   : > { %14154 = vmatmul.mubr.msk.f32.gmra.mrb[40].mxu0 %vm2023_vm14, %v19032_v0 }
 0xc56   : > { %14156 = vmatprep.mubr.msk.f32.mxu0 %vm2023_vm14, %v19306_v39 }
 0xc59   : > { %14157 = vmatmul.mubr.msk.f32.gmra.mrb[42].mxu0 %vm2023_vm14, %v19312_v16 }
 0xc5a   : > { %14167 = vmatprep.mubr.msk.f32.mxu0 %vm2023_vm14, %v18355_v27  ;;  %v21008_v27 = vld [vmem:[#allocation24_spill] sm:$0xff] }
 0xc5d   : > { %14168 = vmatmul.mubr.msk.f32.vlgmr.msra.gmra.mrb[12].mxu0 %vm2023_vm14, %v18358_v55  ;;  %v21009_v55 = vld [vmem:[#allocation25_spill] sm:$0xff] }
 0xc5e   : > { %14618 = vmatpush3.bf16.msra.mxu0 %v14615_v57  ;;  %14170 = vmatprep.mubr.msk.f32.mxu0 %vm2023_vm14, %v18378_v48  ;;  %v21010_v48 = vld [vmem:[#allocation26_spill] sm:$0xff]  ;;  %v8953_v57 = vrot.slane %v6745_v36, 1 }
 0xc5f   : > { %14620 = vmatprep.subr.bf16.mxu0 %v14619_v11 }
 0xc60   : > { %v8954_v0 = vsel %vm2210_vm0, %v8951_v13, %v8953_v57 }
 0xc61   : > { %14171 = vmatmul.mubr.msk.f32.gmra.mrb[14].mxu0 %vm2023_vm14, %v20953_v10  ;;  %v21035_v10 = vld [vmem:[#allocation41_spill] sm:$0xff] }
 0xc62   : > { %14173 = vmatprep.mubr.msk.f32.mxu0 %vm2023_vm14, %v20954_v49  ;;  %14622 = vmatpush3.bf16.msra.mxu0 %v14619_v11  ;;  %v9219_v49 = vrot.slane %v6745_v36, 2 }
 0xc65   : > { %14174 = vmatmul.mubr.msk.f32.gmra.mrb[16].mxu0 %vm2023_vm14, %v20955_v29 }
 0xc66   : > { %14176 = vmatprep.mubr.msk.f32.mxu0 %vm2023_vm14, %v20956_v52  ;;  %v21036_v52 = vld [vmem:[#allocation42_spill] sm:$0xff] }
 0xc69   : > { %14177 = vmatmul.mubr.msk.f32.gmra.mrb[18].mxu0 %vm2023_vm14, %v20957_v33 }
 0xc6a   : > { %14179 = vmatprep.mubr.msk.f32.mxu0 %vm2023_vm14, %v20958_v1  ;;  %v19457_v1 = vld [vmem:[%s21037_s22] ss:$0 sm:$0xff] }
 0xc6d   : > { %14180 = vmatmul.mubr.msk.f32.gmra.mrb[20].mxu0 %vm2023_vm14, %v20961_v23 }
 0xc6e   : > { %14182 = vmatprep.mubr.msk.f32.mxu0 %vm2023_vm14, %v21008_v27 }
 0xc71   : > { %14183 = vmatmul.mubr.msk.f32.gmra.mrb[22].mxu0 %vm2023_vm14, %v21009_v55 }
 0xc72   : > { %14185 = vmatprep.mubr.msk.f32.mxu0 %vm2023_vm14, %v21010_v48 }
 0xc75   : > { %14186 = vmatmul.mubr.msk.f32.gmra.mrb[24].mxu0 %vm2023_vm14, %v21011_v51 }
 0xc76   : > { %14188 = vmatprep.mubr.msk.f32.mxu0 %vm2023_vm14, %v21012_v47 }
 0xc79   : > { %14189 = vmatmul.mubr.msk.f32.gmra.mrb[26].mxu0 %vm2023_vm14, %v21013_v63 }
 0xc7a   : > { %14191 = vmatprep.mubr.msk.f32.mxu0 %vm2023_vm14, %v21014_v20 }
 0xc7d   : > { %14192 = vmatmul.mubr.msk.f32.gmra.mrb[28].mxu0 %vm2023_vm14, %v21015_v18 }
 0xc7e   : > { %14194 = vmatprep.mubr.msk.f32.mxu0 %vm2023_vm14, %v21016_v14 }
 0xc81   : > { %14195 = vmatmul.mubr.msk.f32.gmra.mrb[30].mxu0 %vm2023_vm14, %v21017_v42 }
 0xc82   : > { %14197 = vmatprep.mubr.msk.f32.mxu0 %vm2023_vm14, %v21018_v6 }
 0xc85   : > { %14198 = vmatmul.mubr.msk.f32.gmra.mrb[32].mxu0 %vm2023_vm14, %v21019_v40 }
 0xc86   : > { %14200 = vmatprep.mubr.msk.f32.mxu0 %vm2023_vm14, %v21020_v9 }
 0xc89   : > { %14201 = vmatmul.mubr.msk.f32.gmra.mrb[34].mxu0 %vm2023_vm14, %v21021_v8 }
 0xc8a   : > { %14203 = vmatprep.mubr.msk.f32.mxu0 %vm2023_vm14, %v21022_v41 }
 0xc8d   : > { %14204 = vmatmul.mubr.msk.f32.gmra.mrb[36].mxu0 %vm2023_vm14, %v20993_v60 }
 0xc8e   : > { %14206 = vmatprep.mubr.msk.f32.mxu0 %vm2023_vm14, %v21023_v43 }
 0xc91   : > { %14207 = vmatmul.mubr.msk.f32.gmra.mrb[38].mxu0 %vm2023_vm14, %v20995_v35 }
 0xc92   : > { %14209 = vmatprep.mubr.msk.f32.mxu0 %vm2023_vm14, %v19150_v26 }
 0xc95   : > { %14210 = vmatmul.mubr.msk.f32.gmra.mrb[40].mxu0 %vm2023_vm14, %v21024_v5 }
 0xc96   : > { %14212 = vmatprep.mubr.msk.f32.mxu0 %vm2023_vm14, %v8952_v38 }
 0xc99   : > { %14213 = vmatmul.mubr.msk.f32.gmra.mrb[42].mxu0 %vm2023_vm14, %v8954_v0 }
 0xc9a   : > { %14223 = vmatprep.mubr.msk.f32.mxu0 %vm2023_vm14, %v18776_v17  ;;  %v21025_v17 = vld [vmem:[#allocation46_spill] sm:$0xff] }
 0xc9d   : > { %14224 = vmatmul.mubr.msk.f32.vlgmr.msra.gmra.mrb[12].mxu0 %vm2023_vm14, %v18784_v31  ;;  %v21026_v31 = vld [vmem:[#allocation48_spill] sm:$0xff] }
 0xc9e   : > { %14226 = vmatprep.mubr.msk.f32.mxu0 %vm2023_vm14, %v18790_v58  ;;  %v21027_v58 = vld [vmem:[#allocation49_spill] sm:$0xff] }
 0xca1   : > { %14227 = vmatmul.mubr.msk.f32.gmra.mrb[14].mxu0 %vm2023_vm14, %v18797_v59  ;;  %v21028_v59 = vld [vmem:[#allocation57_spill] sm:$0xff] }
 0xca2   : > { %14229 = vmatprep.mubr.msk.f32.mxu0 %vm2023_vm14, %v18803_v12  ;;  %v21029_v12 = vld [vmem:[#allocation58_spill] sm:$0xff] }
 0xca5   : > { %14230 = vmatmul.mubr.msk.f32.gmra.mrb[16].mxu0 %vm2023_vm14, %v18810_v15  ;;  %v21030_v15 = vld [vmem:[#allocation59_spill] sm:$0xff] }
 0xca6   : > { %14232 = vmatprep.mubr.msk.f32.mxu0 %vm2023_vm14, %v20997_v54 }
 0xca9   : > { %14233 = vmatmul.mubr.msk.f32.gmra.mrb[18].mxu0 %vm2023_vm14, %v18823_v44  ;;  %v21032_v44 = vld [vmem:[#allocation61_spill] sm:$0xff] }
 0xcaa   : > { %14235 = vmatprep.mubr.msk.f32.mxu0 %vm2023_vm14, %v20998_v45 }
 0xcad   : > { %14236 = vmatmul.mubr.msk.f32.gmra.mrb[20].mxu0 %vm2023_vm14, %v18836_v56  ;;  %v21031_v56 = vld [vmem:[#allocation60_spill] sm:$0xff] }
 0xcae   : > { %14238 = vmatprep.mubr.msk.f32.mxu0 %vm2023_vm14, %v20999_v61 }
 0xcb1   : > { %14239 = vmatmul.mubr.msk.f32.gmra.mrb[22].mxu0 %vm2023_vm14, %v18849_v53  ;;  %v21033_v53 = vld [vmem:[#allocation62_spill] sm:$0xff] }
 0xcb2   : > { %14241 = vmatprep.mubr.msk.f32.mxu0 %vm2023_vm14, %v21000_v62 }
 0xcb5   : > { %14242 = vmatmul.mubr.msk.f32.gmra.mrb[24].mxu0 %vm2023_vm14, %v18862_v32  ;;  %v9216_v32 = vrot.slane %v19306_v39, 2 }
 0xcb6   : > { %14244 = vmatprep.mubr.msk.f32.mxu0 %vm2023_vm14, %v21025_v17 }
 0xcb9   : > { %14245 = vmatmul.mubr.msk.f32.gmra.mrb[26].mxu0 %vm2023_vm14, %v18875_v30  ;;  %v9217_v30 = vrot.slane %v19312_v16, 2 }
 0xcba   : > { %14247 = vmatprep.mubr.msk.f32.mxu0 %vm2023_vm14, %v21002_v25 }
 0xcbb   : > { %v9218_v29 = vsel %vm2477_vm1, %v9216_v32, %v9217_v30  ;;  %v9220_v33 = vsel %vm2477_vm1, %v9217_v30, %v9219_v49 }
 0xcbd   : > { %14248 = vmatmul.mubr.msk.f32.gmra.mrb[28].mxu0 %vm2023_vm14, %v21026_v31 }
 0xcbe   : > { %14250 = vmatprep.mubr.msk.f32.mxu0 %vm2023_vm14, %v21027_v58 }
 0xcc1   : > { %14251 = vmatmul.mubr.msk.f32.gmra.mrb[30].mxu0 %vm2023_vm14, %v18901_v34  ;;  %v21034_v34 = vld [vmem:[#allocation63_spill] sm:$0xff] }
 0xcc2   : > { %14253 = vmatprep.mubr.msk.f32.mxu0 %vm2023_vm14, %v21004_v46 }
 0xcc5   : > { %14254 = vmatmul.mubr.msk.f32.gmra.mrb[32].mxu0 %vm2023_vm14, %v21028_v59 }
 0xcc6   : > { %14256 = vmatprep.mubr.msk.f32.mxu0 %vm2023_vm14, %v21029_v12 }
 0xcc9   : > { %14257 = vmatmul.mubr.msk.f32.gmra.mrb[34].mxu0 %vm2023_vm14, %v21030_v15 }
 0xcca   : > { %14259 = vmatprep.mubr.msk.f32.mxu0 %vm2023_vm14, %v21031_v56 }
 0xccd   : > { %14260 = vmatmul.mubr.msk.f32.gmra.mrb[36].mxu0 %vm2023_vm14, %v21032_v44 }
 0xcce   : > { %14262 = vmatprep.mubr.msk.f32.mxu0 %vm2023_vm14, %v21033_v53 }
 0xcd1   : > { %14263 = vmatmul.mubr.msk.f32.gmra.mrb[38].mxu0 %vm2023_vm14, %v21034_v34 }
 0xcd2   : > { %14265 = vmatprep.mubr.msk.f32.mxu0 %vm2023_vm14, %v21035_v10 }
 0xcd5   : > { %14266 = vmatmul.mubr.msk.f32.gmra.mrb[40].mxu0 %vm2023_vm14, %v21036_v52 }
 0xcd6   : > { %14268 = vmatprep.mubr.msk.f32.mxu0 %vm2023_vm14, %v9218_v29 }
 0xcd9   : > { %14269 = vmatmul.mubr.msk.f32.gmra.mrb[42].mxu0 %vm2023_vm14, %v9220_v33 }
 0xd70   : > { %v14225_v35 = vpop.f32.mrb[12].mxu0 }
 0xd71   : > { %v9489_v23 = vadd.f32 %v14225_v35, %v19457_v1  ;;  %v9291_v60 = vpop.f32.mrb[13].mxu0 }
 0xd72   : > { %v9488_v26 = vadd.f32 %v19457_v1, %v9291_v60 }
 0xd73   : > { %15405 = vtanh.f32 %v9489_v23 }
 0xd74   : > { %15407 = vtanh.f32 %v9488_v26  ;;  %v14228_v54 = vpop.f32.mrb[14].mxu0 }
 0xd75   : > { %v9491_v45 = vadd.f32 %v14228_v54, %v19457_v1  ;;  %v9301_v61 = vpop.f32.mrb[15].mxu0 }
 0xd76   : > { %v9490_v62 = vadd.f32 %v19457_v1, %v9301_v61 }
 0xd77   : > { %15409 = vtanh.f32 %v9491_v45 }
 0xd78   : > { %15411 = vtanh.f32 %v9490_v62  ;;  %v14231_v24 = vpop.f32.mrb[16].mxu0 }
 0xd79   : > { %v9493_v25 = vadd.f32 %v14231_v24, %v19457_v1  ;;  %v9311_v46 = vpop.f32.mrb[17].mxu0 }
 0xd7a   : > { %v9492_v19 = vadd.f32 %v19457_v1, %v9311_v46 }
 0xd7b   : > { %15413 = vtanh.f32 %v9493_v25 }
 0xd7c   : > { %15415 = vtanh.f32 %v9492_v19  ;;  %v14234_v37 = vpop.f32.mrb[18].mxu0  ;;  %v21038_v19 = vld [vmem:[#allocation51_spill] sm:$0xff] }
 0xd7d   : > { %v15406_v3 = vpop.eup %15405  ;;  %v9495_v50 = vadd.f32 %v14234_v37, %v19457_v1  ;;  %v9321_v21 = vpop.f32.mrb[19].mxu0 }
 0xd7e   : > { %v15408_v22 = vpop.eup %15407  ;;  %v9553_v4 = vadd.f32 1.0, %v15406_v3  ;;  %v9494_v39 = vadd.f32 %v19457_v1, %v9321_v21 }
 0xd7f   : > { %v9552_v16 = vadd.f32 1.0, %v15408_v22  ;;  %15417 = vtanh.f32 %v9495_v50 }
 0xd80   : > { %v9585_v7 = vmul.f32 0.5, %v9553_v4  ;;  %15419 = vtanh.f32 %v9494_v39  ;;  %v14237_v2 = vpop.f32.mrb[20].mxu0 }
 0xd81   : > { %v15410_v11 = vpop.eup %15409  ;;  %v9584_v27 = vmul.f32 0.5, %v9552_v16  ;;  %v9331_v55 = vpop.f32.mrb[21].mxu0  ;;  %v9497_v58 = vadd.f32 %v14237_v2, %v19457_v1 }
 0xd82   : > { %v15412_v48 = vpop.eup %15411  ;;  %9619 = vst.msk [vmem:[#allocation4 + $0x21] sm:$0xff] %vm9617_vm3, %v9585_v7  ;;  %9651 = vst.msk [vmem:[#allocation4 + $0x9] sm:$0xff] %vm9617_vm3, %v9585_v7  ;;  %v9555_v51 = vadd.f32 1.0, %v15410_v11  ;;  %v9496_v15 = vadd.f32 %v19457_v1, %v9331_v55 }
 0xd83   : > { %9618 = vst.msk [vmem:[#allocation4 + $0x19] sm:$0xff] %vm9617_vm3, %v9584_v27  ;;  %9650 = vst.msk [vmem:[#allocation4 + $0x1] sm:$0xff] %vm9617_vm3, %v9584_v27  ;;  %v9554_v47 = vadd.f32 1.0, %v15412_v48  ;;  %15421 = vtanh.f32 %v9497_v58 }
 0xd84   : > { %v9587_v63 = vmul.f32 0.5, %v9555_v51  ;;  %v14240_v20 = vpop.f32.mrb[22].mxu0  ;;  %15423 = vtanh.f32 %v9496_v15 }
 0xd85   : > { %v15414_v18 = vpop.eup %15413  ;;  %v9586_v14 = vmul.f32 0.5, %v9554_v47  ;;  %v9341_v42 = vpop.f32.mrb[23].mxu0  ;;  %v9499_v32 = vadd.f32 %v14240_v20, %v19457_v1 }
 0xd86   : > { %v15416_v6 = vpop.eup %15415  ;;  %9621 = vst.msk [vmem:[#allocation4 + $0x39] sm:$0xff] %vm9617_vm3, %v9587_v63  ;;  %v9557_v40 = vadd.f32 1.0, %v15414_v18  ;;  %v9498_v33 = vadd.f32 %v19457_v1, %v9341_v42 }
 0xd87   : > { %9620 = vst.msk [vmem:[#allocation4 + $0x31] sm:$0xff] %vm9617_vm3, %v9586_v14  ;;  %v9556_v9 = vadd.f32 1.0, %v15416_v6  ;;  %15425 = vtanh.f32 %v9499_v32 }
 0xd88   : > { %v9589_v8 = vmul.f32 0.5, %v9557_v40  ;;  %v14243_v41 = vpop.f32.mrb[24].mxu0  ;;  %15427 = vtanh.f32 %v9498_v33 }
 0xd89   : > { %v15418_v43 = vpop.eup %15417  ;;  %v9656_v28 = vld [vmem:[#allocation4 + $0x10] sm:$0x3]  ;;  %v9658_v13 = vld [vmem:[#allocation4 + $0x28] sm:$0x3]  ;;  %v9588_v36 = vmul.f32 0.5, %v9556_v9  ;;  %v9351_v57 = vpop.f32.mrb[25].mxu0  ;;  %v9501_v23 = vadd.f32 %v14243_v41, %v19457_v1 }
 0xd8a   : > { %v15420_v38 = vpop.eup %15419  ;;  %9711 = vst.msk [vmem:[#allocation4 + $0x11] sm:$0x1] %vm9710_vm4, %v9656_v28  ;;  %9712 = vst.msk [vmem:[#allocation4 + $0x29] sm:$0x1] %vm9710_vm4, %v9658_v13  ;;  %v9655_v5 = vld [vmem:[#allocation4] sm:$0xff]  ;;  %v9657_v0 = vld [vmem:[#allocation4 + $0x18] sm:$0xff]  ;;  %v19512_v39 = vadd.f32 %v19457_v1, %v9351_v57 }
 0xd8b   : > { %v9730_v17 = vld [vmem:[#allocation4 + $0x8] sm:$0xff]  ;;  %9623 = vst.msk [vmem:[#allocation4 + $0x51] sm:$0xff] %vm9617_vm3, %v9589_v8  ;;  %v9559_v31 = vadd.f32 1.0, %v15418_v43  ;;  %v9733_v59 = vld [vmem:[#allocation4 + $0x20] sm:$0xff]  ;;  %9622 = vst.msk [vmem:[#allocation4 + $0x49] sm:$0xff] %vm9617_vm3, %v9588_v36  ;;  %v9558_v12 = vadd.f32 1.0, %v15420_v38  ;;  %15429 = vtanh.f32 %v9501_v23 }
 0xd8c   : > { %9692 = vst.msk [vmem:[#allocation4 - $0x1] sm:$0x2] %vm9691_vm5, %v9655_v5  ;;  %9693 = vst.msk [vmem:[#allocation4 + $0x17] sm:$0x2] %vm9691_vm5, %v9657_v0  ;;  %v19481_v56 = vmul.f32 0.00390625, %v9730_v17  ;;  %v19483_v44 = vmul.f32 -0.03515625, %v9730_v17  ;;  %15431 = vtanh.f32 %v19512_v39 }
 0xd8d   : > { %v9591_v53 = vmul.f32 0.5, %v9559_v31  ;;  %v14246_v30 = vpop.f32.mrb[26].mxu0  ;;  %v19486_v34 = vmul.f32 0.00390625, %v9733_v59  ;;  %v19488_v10 = vmul.f32 -0.03515625, %v9733_v59  ;;  %v9660_v49 = vld [vmem:[#allocation4 + $0x40] sm:$0x3]  ;;  %v15422_v5 = vpop.eup %15421 }
 0xd8e   : > { %v9590_v29 = vmul.f32 0.5, %v9558_v12  ;;  %9713 = vst.msk [vmem:[#allocation4 + $0x41] sm:$0x1] %vm9710_vm4, %v9660_v49  ;;  %v9659_v52 = vld [vmem:[#allocation4 + $0x30] sm:$0xff]  ;;  %v19493_v35 = vmul.f32 0.31640625, %v9733_v59  ;;  %v19498_v60 = vpop.f32.mrb[27].mxu0  ;;  %v19509_v37 = vadd.f32 %v14246_v30, %v21038_v19  ;;  %v19538_v12 = vpop.eup %15423 }
 0xd8f   : > { %9625 = vst.msk [vmem:[#allocation4 + $0x69] sm:$0xff] %vm9617_vm3, %v9591_v53  ;;  %v9904_v26 = vrot.slane %v19483_v44, 1  ;;  %v10039_v54 = vrot.slane %v19483_v44, 2  ;;  %v10235_v45 = vrot.slane %v19481_v56, 3  ;;  %v9907_v24 = vrot.slane %v19488_v10, 1  ;;  %v9736_v11 = vld [vmem:[#allocation4 + $0x38] sm:$0xff] }
 0xd90   : > { %9694 = vst.msk [vmem:[#allocation4 + $0x2f] sm:$0x2] %vm9691_vm5, %v9659_v52  ;;  %v19503_v61 = vpop.f32.mrb[28].mxu0  ;;  %v10044_v25 = vrot.slane %v19488_v10, 2  ;;  %v10240_v46 = vrot.slane %v19486_v34, 3  ;;  %v10462_v2 = vrot.slane %v19493_v35, 1 }
 0xd91   : > { %9624 = vst.msk [vmem:[#allocation4 + $0x61] sm:$0xff] %vm9617_vm3, %v9590_v29  ;;  %v9731_v62 = vld [vmem:[#allocation4 + $0x10] sm:$0x3]  ;;  %v9734_v3 = vld [vmem:[#allocation4 + $0x28] sm:$0x3]  ;;  %v9979_v48 = vadd.f32 %v9904_v26, %v19481_v56  ;;  %v10597_v51 = vrot.slane %v19493_v35, 2  ;;  %v9981_v31 = vadd.f32 %v9907_v24, %v19486_v34  ;;  %v19548_v49 = vpop.eup %15425 }
 0xd92   : > { %v10008_v50 = vmul.f32 -0.03515625, %v9731_v62  ;;  %v10173_v21 = vmul.f32 0.00390625, %v9731_v62  ;;  %v9662_v27 = vld [vmem:[#allocation4 + $0x58] sm:$0x3]  ;;  %v10736_v47 = vrot.slane %v19488_v10, 3  ;;  %v9661_v63 = vld [vmem:[#allocation4 + $0x48] sm:$0xff] }
 0xd93   : > { %v9729_v22 = vld [vmem:[#allocation4] sm:$0xff]  ;;  %v9732_v4 = vld [vmem:[#allocation4 + $0x18] sm:$0xff]  ;;  %9714 = vst.msk [vmem:[#allocation4 + $0x59] sm:$0x1] %vm9710_vm4, %v9662_v27  ;;  %v19519_v20 = vmul.f32 -0.03515625, %v9734_v3  ;;  %v10566_v6 = vmul.f32 0.31640625, %v9734_v3 }
 0xd94   : > { %v9783_v16 = vmul.f32 0.00390625, %v9729_v22  ;;  %v9843_v7 = vmul.f32 -0.03515625, %v9729_v22  ;;  %v10041_v55 = vrot.slane %v10008_v50, 2  ;;  %v10237_v18 = vrot.slane %v10173_v21, 3  ;;  %9695 = vst.msk [vmem:[#allocation4 + $0x47] sm:$0x2] %vm9691_vm5, %v9661_v63 }
 0xd95   : > { %v19521_v14 = vmul.f32 -0.03515625, %v9732_v4  ;;  %v19525_v8 = vmul.f32 0.00390625, %v9736_v11  ;;  %v19531_v38 = vpop.f32.mrb[29].mxu0  ;;  %v10174_v0 = vmul.f32 0.00390625, %v9734_v3  ;;  %v19534_v58 = vmul.f32 -0.03515625, %v9736_v11  ;;  %v19556_v3 = vpop.eup %15427 }
 0xd96   : > { %v9903_v42 = vrot.slane %v9843_v7, 1  ;;  %v10038_v40 = vrot.slane %v9843_v7, 2  ;;  %v10042_v9 = vsel %vm2477_vm1, %v10039_v54, %v10041_v55  ;;  %v9664_v41 = vld [vmem:[#allocation4 + $0x70] sm:$0x3]  ;;  %v10234_v57 = vrot.slane %v9783_v16, 3  ;;  %v19536_v59 = vpop.f32.mrb[30].mxu0  ;;  %v19559_v7 = vpop.eup %15429 }
 0xd97   : > { %v9906_v13 = vrot.slane %v19521_v14, 1  ;;  %v10144_v36 = vadd.f32 %v10042_v9, %v9979_v48  ;;  %9715 = vst.msk [vmem:[#allocation4 + $0x71] sm:$0x1] %vm9710_vm4, %v9664_v41  ;;  %v10046_v15 = vrot.slane %v19519_v20, 2  ;;  %v10238_v32 = vsel %vm10233_vm6, %v10235_v45, %v10237_v18  ;;  %v19546_v30 = vpop.f32.mrb[31].mxu0  ;;  %v9735_v18 = vld [vmem:[#allocation4 + $0x30] sm:$0xff] }
 0xd98   : > { %v9663_v43 = vld [vmem:[#allocation4 + $0x60] sm:$0xff]  ;;  %v9905_v28 = vsel %vm2210_vm0, %v9903_v42, %v9904_v26  ;;  %v10040_v53 = vsel %vm2477_vm1, %v10038_v40, %v10039_v54  ;;  %v9785_v29 = vmul.f32 0.00390625, %v9732_v4  ;;  %v19550_v23 = vmul.f32 0.31640625, %v9736_v11 }
 0xd99   : > { %9696 = vst.msk [vmem:[#allocation4 + $0x5f] sm:$0x2] %vm9691_vm5, %v9663_v43  ;;  %v9978_v17 = vadd.f32 %v9905_v28, %v9783_v16  ;;  %v9908_v44 = vsel %vm2210_vm0, %v9906_v13, %v9907_v24  ;;  %v10340_v33 = vadd.f32 %v10238_v32, %v10144_v36  ;;  %v10599_v26 = vrot.slane %v10566_v6, 2  ;;  %v9737_v19 = vld [vmem:[#allocation4 + $0x40] sm:$0x3] }
 0xd9a   : > { %v10043_v62 = vrot.slane %v19521_v14, 2  ;;  %v10236_v54 = vsel %vm10233_vm6, %v10234_v57, %v10235_v45  ;;  %v10401_v24 = vmul.f32 0.31640625, %v9732_v4  ;;  %v10242_v50 = vrot.slane %v10174_v0, 3  ;;  %v19590_v57 = vpop.f32.mrb[32].mxu0 }
 0xd9b   : > { %v10143_v52 = vadd.f32 %v10040_v53, %v9978_v17  ;;  %v9980_v21 = vadd.f32 %v9908_v44, %v9785_v29  ;;  %v10372_v16 = vadd.f32 %v10340_v33, %v19488_v10  ;;  %v10738_v11 = vrot.slane %v19519_v20, 3  ;;  %v19599_v35 = vpop.f32.mrb[33].mxu0 }
 0xd9c   : > { %v10047_v27 = vsel %vm2477_vm1, %v10044_v25, %v10046_v15  ;;  %v10461_v56 = vrot.slane %v10401_v24, 1  ;;  %v10596_v55 = vrot.slane %v10401_v24, 2  ;;  %v10239_v45 = vrot.slane %v9785_v29, 3 }
 0xd9d   : > { %v10339_v22 = vadd.f32 %v10236_v54, %v10143_v52  ;;  %v10537_v48 = vadd.f32 %v10462_v2, %v10372_v16  ;;  %v19568_v63 = vmul.f32 -0.03515625, %v9737_v19  ;;  %v10045_v42 = vsel %vm2477_vm1, %v10043_v62, %v10044_v25 }
 0xd9e   : > { %v10463_v20 = vsel %vm2210_vm0, %v10461_v56, %v10462_v2  ;;  %v10600_v6 = vsel %vm2477_vm1, %v10597_v51, %v10599_v26  ;;  %v19579_v40 = vadd.f32 1.0, %v15422_v5  ;;  %v10145_v9 = vadd.f32 %v10045_v42, %v9980_v21  ;;  %v9738_v42 = vld [vmem:[#allocation4 + $0x48] sm:$0xff] }
 0xd9f   : > { %v10371_v4 = vadd.f32 %v10339_v22, %v19521_v14  ;;  %v10146_v41 = vadd.f32 %v10047_v27, %v9981_v31  ;;  %v10702_v28 = vadd.f32 %v10600_v6, %v10537_v48  ;;  %v10243_v13 = vsel %vm10233_vm6, %v10240_v46, %v10242_v50 }
 0xda0   : > { %v10598_v25 = vsel %vm2477_vm1, %v10596_v55, %v10597_v51  ;;  %v10735_v2 = vrot.slane %v19521_v14, 3  ;;  %v19588_v36 = vmul.f32 -0.03515625, %v9735_v18  ;;  %v10241_v5 = vsel %vm10233_vm6, %v10239_v45, %v10240_v46  ;;  %v9740_v45 = vld [vmem:[#allocation4 + $0x58] sm:$0x3] }
 0xda1   : > { %v10536_v43 = vadd.f32 %v10463_v20, %v10371_v4  ;;  %v10739_v17 = vsel %vm10233_vm6, %v10736_v47, %v10738_v11  ;;  %v10051_v31 = vrot.slane %v19568_v63, 2  ;;  %v10175_v51 = vmul.f32 0.00390625, %v9737_v19 }
 0xda2   : > { %v9787_v15 = vmul.f32 0.00390625, %v9735_v18  ;;  %v9909_v14 = vrot.slane %v19588_v36, 1  ;;  %v9910_v44 = vrot.slane %v19534_v58, 1  ;;  %v10341_v53 = vadd.f32 %v10241_v5, %v10145_v9 }
 0xda3   : > { %v10701_v0 = vadd.f32 %v10598_v25, %v10536_v43  ;;  %v10342_v32 = vadd.f32 %v10243_v13, %v10146_v41  ;;  %v10841_v34 = vadd.f32 %v10739_v17, %v10702_v28  ;;  %v10245_v46 = vrot.slane %v19525_v8, 3  ;;  %v9739_v41 = vld [vmem:[#allocation4 + $0x50] sm:$0xff] }
 0xda4   : > { %v10737_v29 = vsel %vm10233_vm6, %v10735_v2, %v10736_v47  ;;  %v10567_v52 = vmul.f32 0.31640625, %v9737_v19  ;;  %v9911_v33 = vsel %vm2210_vm0, %v9909_v14, %v9910_v44  ;;  %v10049_v26 = vrot.slane %v19534_v58, 2 }
 0xda5   : > { %v10840_v62 = vadd.f32 %v10737_v29, %v10701_v0  ;;  %v10048_v54 = vrot.slane %v19588_v36, 2  ;;  %v10403_v24 = vmul.f32 0.31640625, %v9735_v18  ;;  %v19611_v50 = vadd.f32 1.0, %v19538_v12 }
 0xda6   : > { %v10247_v21 = vrot.slane %v10175_v51, 3  ;;  %v9982_v22 = vadd.f32 %v9911_v33, %v9787_v15  ;;  %v10052_v16 = vsel %vm2477_vm1, %v10049_v26, %v10051_v31  ;;  %v10244_v11 = vrot.slane %v9787_v15, 3 }
 0xda7   : > { %v9983_v10 = vadd.f32 %v9910_v44, %v19525_v8  ;;  %v10374_v47 = vadd.f32 %v10342_v32, %v19534_v58  ;;  %v10873_v19 = vadd.f32 %v10841_v34, %v19534_v58  ;;  %v10604_v27 = vrot.slane %v10567_v52, 2 }
 0xda8   : > { %v10743_v56 = vrot.slane %v19568_v63, 3  ;;  %v10373_v55 = vadd.f32 %v10341_v53, %v19588_v36  ;;  %v10464_v12 = vrot.slane %v10403_v24, 1  ;;  %v10050_v4 = vsel %vm2477_vm1, %v10048_v54, %v10049_v26 }
 0xda9   : > { %v10148_v48 = vadd.f32 %v10052_v16, %v9983_v10  ;;  %v10465_v18 = vrot.slane %v19550_v23, 1  ;;  %v10872_v8 = vadd.f32 %v10840_v62, %v19588_v36  ;;  %v10147_v20 = vadd.f32 %v10050_v4, %v9982_v22 }
 0xdaa   : > { %v10246_v6 = vsel %vm10233_vm6, %v10244_v11, %v10245_v46  ;;  %v10248_v39 = vsel %vm10233_vm6, %v10245_v46, %v10247_v21  ;;  %v10602_v9 = vrot.slane %v19550_v23, 2  ;;  %v10601_v28 = vrot.slane %v10403_v24, 2  ;;  %v19640_v24 = vpop.f32.mrb[34].mxu0  ;;  %v19642_v21 = vpop.eup %15431 }
 0xdab   : > { %v10539_v43 = vadd.f32 %v10465_v18, %v10374_v47  ;;  %v10912_v13 = vadd.f32 %v10873_v19, %v10465_v18  ;;  %v19626_v25 = vmul.f32 -0.03515625, %v9740_v45  ;;  %v10466_v2 = vsel %vm2210_vm0, %v10464_v12, %v10465_v18 }
 0xdac   : > { %v10176_v5 = vmul.f32 0.00390625, %v9740_v45  ;;  %v9789_v0 = vmul.f32 0.00390625, %v9738_v42  ;;  %v19629_v17 = vmul.f32 -0.03515625, %v9738_v42  ;;  %v10344_v31 = vadd.f32 %v10248_v39, %v10148_v48 }
 0xdad   : > { %v10538_v51 = vadd.f32 %v10466_v2, %v10373_v55  ;;  %v10911_v15 = vadd.f32 %v10872_v8, %v10466_v2  ;;  %v19631_v14 = vmul.f32 -0.03515625, %v9739_v41  ;;  %v10343_v44 = vadd.f32 %v10246_v6, %v10147_v20  ;;  %v19656_v6 = vpop.f32.mrb[35].mxu0 }
 0xdae   : > { %v10605_v23 = vsel %vm2477_vm1, %v10602_v9, %v10604_v27  ;;  %v19634_v53 = vmul.f32 0.31640625, %v9740_v45  ;;  %v9790_v32 = vmul.f32 0.00390625, %v9739_v41  ;;  %v10603_v34 = vsel %vm2477_vm1, %v10601_v28, %v10602_v9  ;;  %v9743_v28 = vld [vmem:[#allocation4 + $0x70] sm:$0x3] }
 0xdaf   : > { %v10704_v46 = vadd.f32 %v10605_v23, %v10539_v43  ;;  %v10951_v29 = vadd.f32 %v10912_v13, %v10605_v23  ;;  %v9912_v52 = vrot.slane %v19629_v17, 1  ;;  %v10056_v33 = vrot.slane %v19626_v25, 2 }
 0xdb0   : > { %v10252_v26 = vrot.slane %v10176_v5, 3  ;;  %v10748_v62 = vrot.slane %v19626_v25, 3  ;;  %v10249_v54 = vrot.slane %v9789_v0, 3  ;;  %v10703_v22 = vadd.f32 %v10603_v34, %v10538_v51 }
 0xdb1   : > { %v10950_v16 = vadd.f32 %v10911_v15, %v10603_v34  ;;  %v9913_v11 = vrot.slane %v19631_v14, 1  ;;  %v10405_v10 = vmul.f32 0.31640625, %v9738_v42  ;;  %v10609_v47 = vrot.slane %v19634_v53, 2 }
 0xdb2   : > { %v10053_v19 = vrot.slane %v19629_v17, 2  ;;  %v10250_v27 = vrot.slane %v9790_v32, 3  ;;  %v10740_v55 = vrot.slane %v19588_v36, 3  ;;  %v10054_v45 = vrot.slane %v19631_v14, 2 }
 0xdb3   : > { %v9914_v12 = vsel %vm2210_vm0, %v9912_v52, %v9913_v11  ;;  %v10375_v4 = vadd.f32 %v10343_v44, %v19629_v17  ;;  %v10741_v48 = vrot.slane %v19534_v58, 3  ;;  %v10376_v42 = vadd.f32 %v10344_v31, %v19631_v14 }
 0xdb4   : > { %v10251_v18 = vsel %vm10233_vm6, %v10249_v54, %v10250_v27  ;;  %v10253_v8 = vsel %vm10233_vm6, %v10250_v27, %v10252_v26  ;;  %v10406_v20 = vmul.f32 0.31640625, %v9739_v41  ;;  %v10057_v39 = vsel %vm2477_vm1, %v10054_v45, %v10056_v33  ;;  %v9741_v54 = vld [vmem:[#allocation4 + $0x60] sm:$0xff] }
 0xdb5   : > { %v10467_v36 = vrot.slane %v10405_v10, 1  ;;  %v10606_v9 = vrot.slane %v10405_v10, 2  ;;  %v10742_v43 = vsel %vm10233_vm6, %v10740_v55, %v10741_v48  ;;  %v9984_v58 = vadd.f32 %v9914_v12, %v9789_v0 }
 0xdb6   : > { %v9985_v13 = vadd.f32 %v9913_v11, %v9790_v32  ;;  %v10744_v2 = vsel %vm10233_vm6, %v10741_v48, %v10743_v56  ;;  %v10842_v41 = vadd.f32 %v10742_v43, %v10703_v22  ;;  %v10055_v5 = vsel %vm2477_vm1, %v10053_v19, %v10054_v45 }
 0xdb7   : > { %v10843_v31 = vadd.f32 %v10744_v2, %v10704_v46  ;;  %v10991_v51 = vadd.f32 %v10950_v16, %v10742_v43  ;;  %v10992_v15 = vadd.f32 %v10951_v29, %v10744_v2  ;;  %v10468_v23 = vrot.slane %v10406_v20, 1  ;;  %v9742_v16 = vld [vmem:[#allocation4 + $0x68] sm:$0xff] }
 0xdb8   : > { %v10150_v44 = vadd.f32 %v10057_v39, %v9985_v13  ;;  %v10607_v53 = vrot.slane %v10406_v20, 2  ;;  %v19669_v34 = vmul.f32 -0.03515625, %v9743_v28  ;;  %v10874_v52 = vadd.f32 %v10842_v41, %v19629_v17 }
 0xdb9   : > { %v11027_v33 = vadd.f32 %v10991_v51, %v9789_v0  ;;  %v11028_v26 = vadd.f32 %v10992_v15, %v9790_v32  ;;  %v10177_v63 = vmul.f32 0.00390625, %v9743_v28  ;;  %v10149_v56 = vadd.f32 %v10055_v5, %v9984_v58 }
 0xdba   : > { %v10469_v22 = vsel %vm2210_vm0, %v10467_v36, %v10468_v23  ;;  %v10541_v10 = vadd.f32 %v10468_v23, %v10376_v42  ;;  %v10608_v46 = vsel %vm2477_vm1, %v10606_v9, %v10607_v53  ;;  %v10875_v19 = vadd.f32 %v10843_v31, %v19631_v14 }
 0xdbb   : > { %v10540_v29 = vadd.f32 %v10469_v22, %v10375_v4  ;;  %v11076_v27 = vadd.f32 %v11027_v33, %v9914_v12  ;;  %v11077_v55 = vadd.f32 %v11028_v26, %v9913_v11  ;;  %v10610_v45 = vsel %vm2477_vm1, %v10607_v53, %v10609_v47 }
 0xdbc   : > { %v19677_v48 = vmul.f32 0.31640625, %v9743_v28  ;;  %v9791_v0 = vmul.f32 0.00390625, %v9741_v54  ;;  %v19679_v32 = vmul.f32 -0.03515625, %v9741_v54  ;;  %v10913_v20 = vadd.f32 %v10874_v52, %v10469_v22  ;;  %v19700_v52 = vpop.f32.mrb[36].mxu0 }
 0xdbd   : > { %v11129_v43 = vadd.f32 %v11076_v27, %v10055_v5  ;;  %v11130_v58 = vadd.f32 %v11077_v55, %v10057_v39  ;;  %v19681_v36 = vmul.f32 -0.03515625, %v9742_v16  ;;  %v10345_v11 = vadd.f32 %v10251_v18, %v10149_v56  ;;  %v19704_v22 = vpop.f32.mrb[37].mxu0 }
 0xdbe   : > { %v10346_v12 = vadd.f32 %v10253_v8, %v10150_v44  ;;  %v10706_v47 = vadd.f32 %v10610_v45, %v10541_v10  ;;  %v9792_v4 = vmul.f32 0.00390625, %v9742_v16  ;;  %v10705_v42 = vadd.f32 %v10608_v46, %v10540_v29 }
 0xdbf   : > { %v10914_v9 = vadd.f32 %v10875_v19, %v10468_v23  ;;  %v11192_v28 = vadd.f32 %v11129_v43, %v10251_v18  ;;  %v11193_v13 = vadd.f32 %v11130_v58, %v10253_v8  ;;  %v10061_v2 = vrot.slane %v19669_v34, 2 }
 0xdc0   : > { %v10257_v39 = vrot.slane %v10177_v63, 3  ;;  %v9915_v41 = vrot.slane %v19679_v32, 1  ;;  %v10254_v5 = vrot.slane %v9791_v0, 3  ;;  %v10952_v31 = vadd.f32 %v10913_v20, %v10608_v46 }
 0xdc1   : > { %11222 = vst.msk [vmem:[%s19686_s15] sm:$0xff] %vm9617_vm3, %v11192_v28  ;;  %v10614_v51 = vrot.slane %v19677_v48, 2  ;;  %v10753_v15 = vrot.slane %v19669_v34, 3  ;;  %v9916_v44 = vrot.slane %v19681_v36, 1  ;;  %v10058_v18 = vrot.slane %v19679_v32, 2 }
 0xdc2   : > { %11224 = vst.msk [vmem:[%s19686_s15 + $0x8] sm:$0x7f] %vm11223_vm7, %v11193_v13  ;;  %v10255_v8 = vrot.slane %v9792_v4, 3  ;;  %v10745_v23 = vrot.slane %v19629_v17, 3  ;;  %v9593_v53 = vmul.f32 0.5, %v19579_v40  ;;  %v10953_v33 = vadd.f32 %v10914_v9, %v10610_v45 }
 0xdc3   : > { %v10059_v26 = vrot.slane %v19681_v36, 2  ;;  %v10407_v63 = vmul.f32 0.31640625, %v9741_v54  ;;  %v10746_v56 = vrot.slane %v19631_v14, 3  ;;  %v9917_v10 = vsel %vm2210_vm0, %v9915_v41, %v9916_v44 }
 0xdc4   : > { %v19708_v46 = vsel %vm10233_vm6, %v10254_v5, %v10255_v8  ;;  %v19711_v29 = vsel %vm10233_vm6, %v10255_v8, %v10257_v39  ;;  %v10408_v17 = vmul.f32 0.31640625, %v9742_v16  ;;  %9627 = vst.msk [vmem:[#allocation4 + $0x81] sm:$0xff] %vm9617_vm3, %v9593_v53  ;;  %v9987_v40 = vadd.f32 %v9916_v44, %v9792_v4 }
 0xdc5   : > { %v10377_v19 = vadd.f32 %v10345_v11, %v19679_v32  ;;  %v10747_v54 = vsel %vm10233_vm6, %v10745_v23, %v10746_v56  ;;  %v10749_v14 = vsel %vm10233_vm6, %v10746_v56, %v10748_v62  ;;  %v10060_v27 = vsel %vm2477_vm1, %v10058_v18, %v10059_v26 }
 0xdc6   : > { %v10062_v55 = vsel %vm2477_vm1, %v10059_v26, %v10061_v2  ;;  %v10844_v45 = vadd.f32 %v10747_v54, %v10705_v42  ;;  %v10845_v48 = vadd.f32 %v10749_v14, %v10706_v47  ;;  %v9986_v20 = vadd.f32 %v9917_v10, %v9791_v0 }
 0xdc7   : > { %v10470_v43 = vrot.slane %v10407_v63, 1  ;;  %v10993_v16 = vadd.f32 %v10952_v31, %v10747_v54  ;;  %v10994_v58 = vadd.f32 %v10953_v33, %v10749_v14  ;;  %v10378_v9 = vadd.f32 %v10346_v12, %v19681_v36  ;;  %v21041_v14 = vld [vmem:[#allocation53_spill] sm:$0xff] }
 0xdc8   : > { %v10471_v28 = vrot.slane %v10408_v17, 1  ;;  %v10877_v11 = vadd.f32 %v10845_v48, %v19681_v36  ;;  %v9592_v13 = vmul.f32 0.5, %v19611_v50  ;;  %v10611_v25 = vrot.slane %v10407_v63, 2 }
 0xdc9   : > { %v10612_v39 = vrot.slane %v10408_v17, 2  ;;  %v11029_v62 = vadd.f32 %v10993_v16, %v9791_v0  ;;  %v11030_v41 = vadd.f32 %v10994_v58, %v9792_v4  ;;  %v10876_v5 = vadd.f32 %v10844_v45, %v19679_v32  ;;  %v21042_v45 = vld [vmem:[#allocation54_spill] sm:$0xff] }
 0xdca   : > { %9626 = vst.msk [vmem:[#allocation4 + $0x79] sm:$0xff] %vm9617_vm3, %v9592_v13  ;;  %v9563_v47 = vadd.f32 1.0, %v19548_v49  ;;  %v9562_v42 = vadd.f32 1.0, %v19556_v3  ;;  %v9565_v2 = vadd.f32 1.0, %v19559_v7  ;;  %v10472_v12 = vsel %vm2210_vm0, %v10470_v43, %v10471_v28 }
 0xdcb   : > { %v10916_v31 = vadd.f32 %v10877_v11, %v10471_v28  ;;  %v11078_v18 = vadd.f32 %v11029_v62, %v9917_v10  ;;  %v11079_v8 = vadd.f32 %v11030_v41, %v9916_v44  ;;  %v9666_v50 = vld [vmem:[#allocation4 + $0x88] sm:$0x3]  ;;  %v10152_v23 = vadd.f32 %v10062_v55, %v9987_v40  ;;  %v21045_v11 = vld [vmem:[#allocation23_spill] sm:$0xff] }
 0xdcc   : > { %v10542_v53 = vadd.f32 %v10472_v12, %v10377_v19  ;;  %v10543_v0 = vadd.f32 %v10471_v28, %v10378_v9  ;;  %9716 = vst.msk [vmem:[#allocation4 + $0x89] sm:$0x1] %vm9710_vm4, %v9666_v50  ;;  %v9595_v4 = vmul.f32 0.5, %v9563_v47  ;;  %v10613_v33 = vsel %vm2477_vm1, %v10611_v25, %v10612_v39  ;;  %v21040_v19 = vld [vmem:[#allocation52_spill] sm:$0xff] }
 0xdcd   : > { %v10615_v49 = vsel %vm2477_vm1, %v10612_v39, %v10614_v51  ;;  %v11131_v26 = vadd.f32 %v11078_v18, %v10060_v27  ;;  %v11132_v3 = vadd.f32 %v11079_v8, %v10062_v55  ;;  %v10915_v7 = vadd.f32 %v10876_v5, %v10472_v12  ;;  %v21044_v9 = vld [vmem:[#allocation56_spill] sm:$0xff]  ;;  %v19779_v8 = vpop.f32.mrb[38].mxu0 }
 0xdce   : > { %9629 = vst.msk [vmem:[#allocation4 + $0x99] sm:$0xff] %vm9617_vm3, %v9595_v4  ;;  %v9594_v63 = vmul.f32 0.5, %v9562_v42  ;;  %v9597_v44 = vmul.f32 0.5, %v9565_v2  ;;  %v9564_v56 = vadd.f32 1.0, %v19642_v21  ;;  %v10955_v10 = vadd.f32 %v10916_v31, %v10615_v49  ;;  %v21043_v21 = vld [vmem:[#allocation55_spill] sm:$0xff] }
 0xdcf   : > { %v11194_v17 = vadd.f32 %v11131_v26, %v19708_v46  ;;  %v11195_v40 = vadd.f32 %v11132_v3, %v19711_v29  ;;  %v14628_v54 = vadd.f32 %v19498_v60, %v21040_v19  ;;  %v14629_v55 = vadd.f32 %v19503_v61, %v21041_v14 }
 0xdd0   : > { %9628 = vst.msk [vmem:[#allocation4 + $0x91] sm:$0xff] %vm9617_vm3, %v9594_v63  ;;  %9631 = vst.msk [vmem:[#allocation4 + $0xb1] sm:$0xff] %vm9617_vm3, %v9597_v44  ;;  %v9596_v51 = vmul.f32 0.5, %v9564_v56  ;;  %v14630_v48 = vadd.f32 %v19531_v38, %v21042_v45  ;;  %v14631_v43 = vadd.f32 %v19536_v59, %v21043_v21  ;;  %v10750_v60 = vrot.slane %v19679_v32, 3 }
 0xdd1   : > { %11225 = vst.msk [vmem:[%s19686_s15 + $0x10] sm:$0xff] %vm9617_vm3, %v11194_v17  ;;  %v9665_v16 = vld [vmem:[#allocation4 + $0x78] sm:$0xff]  ;;  %v10751_v58 = vrot.slane %v19681_v36, 3  ;;  %v14632_v28 = vadd.f32 %v19546_v30, %v21044_v9  ;;  %v19757_v61 = vadd.f32 %v19590_v57, %v21045_v11  ;;  %v10151_v38 = vadd.f32 %v10060_v27, %v9986_v20  ;;  %v9745_v59 = vld [vmem:[#allocation4 + $0x80] sm:$0xff] }
 0xdd2   : > { %11226 = vst.msk [vmem:[%s19686_s15 + $0x18] sm:$0x7f] %vm11223_vm7, %v11195_v40  ;;  %v10707_v13 = vadd.f32 %v10613_v33, %v10542_v53  ;;  %v10708_v25 = vadd.f32 %v10615_v49, %v10543_v0  ;;  %v10954_v39 = vadd.f32 %v10915_v7, %v10613_v33  ;;  %v9503_v30 = vadd.f32 %v19509_v37, %v19457_v1  ;;  %v19790_v53 = vpop.f32.mrb[39].mxu0 }
 0xdd3   : > { %9697 = vst.msk [vmem:[#allocation4 + $0x77] sm:$0x2] %vm9691_vm5, %v9665_v16  ;;  %v9746_v62 = vld [vmem:[#allocation4 + $0x88] sm:$0x3]  ;;  %v10754_v32 = vsel %vm10233_vm6, %v10751_v58, %v10753_v15  ;;  %v9502_v57 = vadd.f32 %v14628_v54, %v19457_v1  ;;  %v10348_v27 = vadd.f32 %v19711_v29, %v10152_v23  ;;  %v19770_v41 = vmul.f32 -0.03515625, %v9745_v59 }
 0xdd4   : > { %9630 = vst.msk [vmem:[#allocation4 + $0xa9] sm:$0xff] %vm9617_vm3, %v9596_v51  ;;  %v10996_v36 = vadd.f32 %v10955_v10, %v10754_v32  ;;  %v19768_v20 = vmul.f32 -0.03515625, %v9746_v62  ;;  %v10752_v5 = vsel %vm10233_vm6, %v10750_v60, %v10751_v58  ;;  %v10347_v42 = vadd.f32 %v19708_v46, %v10151_v38 }
 0xdd5   : > { %v9668_v47 = vld [vmem:[#allocation4 + $0xa0] sm:$0x3]  ;;  %v19774_v34 = vmul.f32 0.00390625, %v9745_v59  ;;  %v10846_v15 = vadd.f32 %v10752_v5, %v10707_v13  ;;  %v10847_v2 = vadd.f32 %v10754_v32, %v10708_v25  ;;  %v10178_v37 = vmul.f32 0.00390625, %v9746_v62 }
 0xdd6   : > { %9717 = vst.msk [vmem:[#allocation4 + $0xa1] sm:$0x1] %vm9710_vm4, %v9668_v47  ;;  %v19777_v12 = vmul.f32 0.31640625, %v9745_v59  ;;  %v10995_v31 = vadd.f32 %v10954_v39, %v10752_v5  ;;  %15433 = vtanh.f32 %v9503_v30  ;;  %v19785_v46 = vadd.f32 %v14629_v55, %v19457_v1 }
 0xdd7   : > { %v9667_v29 = vld [vmem:[#allocation4 + $0x90] sm:$0xff]  ;;  %v9670_v18 = vld [vmem:[#allocation4 + $0xb8] sm:$0x3]  ;;  %v11032_v50 = vadd.f32 %v10996_v36, %v19774_v34  ;;  %15435 = vtanh.f32 %v9502_v57  ;;  %v19788_v23 = vadd.f32 %v14630_v48, %v19457_v1  ;;  %v10066_v0 = vrot.slane %v19768_v20, 2 }
 0xdd8   : > { %9698 = vst.msk [vmem:[#allocation4 + $0x8f] sm:$0x2] %vm9691_vm5, %v9667_v29  ;;  %v10570_v4 = vmul.f32 0.31640625, %v9746_v62  ;;  %v9919_v49 = vrot.slane %v19770_v41, 1  ;;  %v19795_v3 = vadd.f32 %v14631_v43, %v19457_v1  ;;  %v10064_v44 = vrot.slane %v19770_v41, 2  ;;  %v9748_v25 = vld [vmem:[#allocation4 + $0x98] sm:$0xff] }
 0xdd9   : > { %9718 = vst.msk [vmem:[#allocation4 + $0xb9] sm:$0x1] %vm9710_vm4, %v9670_v18  ;;  %v19802_v56 = vadd.f32 %v14632_v28, %v19457_v1  ;;  %v10262_v10 = vrot.slane %v10178_v37, 3  ;;  %v10260_v17 = vrot.slane %v19774_v34, 3  ;;  %v10380_v14 = vadd.f32 %v10348_v27, %v19770_v41 }
 0xdda   : > { %v9744_v33 = vld [vmem:[#allocation4 + $0x78] sm:$0xff]  ;;  %v11081_v19 = vadd.f32 %v11032_v50, %v9919_v49  ;;  %v10474_v55 = vrot.slane %v19777_v12, 1  ;;  %v10619_v45 = vrot.slane %v10570_v4, 2  ;;  %v10758_v48 = vrot.slane %v19768_v20, 3 }
 0xddb   : > { %v9669_v26 = vld [vmem:[#allocation4 + $0xa8] sm:$0xff]  ;;  %v9793_v7 = vmul.f32 0.00390625, %v9744_v33  ;;  %v19797_v63 = vmul.f32 -0.03515625, %v9744_v33  ;;  %v10409_v40 = vmul.f32 0.31640625, %v9744_v33  ;;  %v10067_v21 = vsel %vm2477_vm1, %v10064_v44, %v10066_v0 }
 0xddc   : > { %9699 = vst.msk [vmem:[#allocation4 + $0xa7] sm:$0x2] %vm9691_vm5, %v9669_v26  ;;  %v9989_v16 = vadd.f32 %v9919_v49, %v19774_v34  ;;  %v11134_v58 = vadd.f32 %v11081_v19, %v10067_v21  ;;  %v10263_v28 = vsel %vm10233_vm6, %v10260_v17, %v10262_v10  ;;  %v10879_v38 = vadd.f32 %v10847_v2, %v19770_v41 }
 0xddd   : > { %v9918_v54 = vrot.slane %v19797_v63, 1  ;;  %v10063_v51 = vrot.slane %v19797_v63, 2  ;;  %v11031_v1 = vadd.f32 %v10995_v31, %v9793_v7  ;;  %v10259_v60 = vrot.slane %v9793_v7, 3  ;;  %v9749_v9 = vld [vmem:[#allocation4 + $0xa0] sm:$0x3] }
 0xdde   : > { %v10473_v11 = vrot.slane %v10409_v40, 1  ;;  %v10379_v39 = vadd.f32 %v10347_v42, %v19797_v63  ;;  %v10878_v62 = vadd.f32 %v10846_v15, %v19797_v63  ;;  %v11197_v32 = vadd.f32 %v11134_v58, %v10263_v28 }
 0xddf   : > { %v9920_v43 = vsel %vm2210_vm0, %v9918_v54, %v9919_v49  ;;  %v10065_v59 = vsel %vm2477_vm1, %v10063_v51, %v10064_v44  ;;  %v10545_v57 = vadd.f32 %v10474_v55, %v10380_v14  ;;  %v19820_v5 = vmul.f32 -0.03515625, %v9749_v9  ;;  %v9747_v47 = vld [vmem:[#allocation4 + $0x90] sm:$0xff]  ;;  %v19839_v54 = vpop.f32.mrb[40].mxu0 }
 0xde0   : > { %v11080_v13 = vadd.f32 %v11031_v1, %v9920_v43  ;;  %v19818_v30 = vpop.eup %15433  ;;  %v9988_v36 = vadd.f32 %v9920_v43, %v9793_v7  ;;  %v10154_v2 = vadd.f32 %v10067_v21, %v9989_v16  ;;  %v10261_v37 = vsel %vm10233_vm6, %v10259_v60, %v10260_v17  ;;  %11228 = vst.msk [vmem:[%s19686_s15 + $0x28] sm:$0x7f] %vm11223_vm7, %v11197_v32  ;;  %v9752_v20 = vld [vmem:[#allocation4 + $0xb8] sm:$0x3] }
 0xde1   : > { %v19822_v34 = vpop.eup %15435  ;;  %v10617_v31 = vrot.slane %v19777_v12, 2  ;;  %v19828_v42 = vmul.f32 -0.03515625, %v9748_v25  ;;  %v10475_v15 = vsel %vm2210_vm0, %v10473_v11, %v10474_v55  ;;  %v10616_v29 = vrot.slane %v10409_v40, 2 }
 0xde2   : > { %v11133_v27 = vadd.f32 %v11080_v13, %v10065_v59  ;;  %v9796_v50 = vmul.f32 0.00390625, %v9748_v25  ;;  %v10544_v0 = vadd.f32 %v10475_v15, %v10379_v39  ;;  %v10917_v4 = vadd.f32 %v10878_v62, %v10475_v15 }
 0xde3   : > { %v10918_v33 = vadd.f32 %v10879_v38, %v10474_v55  ;;  %v19831_v49 = vmul.f32 -0.03515625, %v9747_v47  ;;  %v10153_v26 = vadd.f32 %v10065_v59, %v9988_v36  ;;  %v10620_v7 = vsel %vm2477_vm1, %v10617_v31, %v10619_v45 }
 0xde4   : > { %v11196_v18 = vadd.f32 %v11133_v27, %v10261_v37  ;;  %v10071_v12 = vrot.slane %v19820_v5, 2  ;;  %v10179_v44 = vmul.f32 0.00390625, %v9749_v9  ;;  %v10350_v10 = vadd.f32 %v10263_v28, %v10154_v2 }
 0xde5   : > { %v10710_v17 = vadd.f32 %v10620_v7, %v10545_v57  ;;  %v9921_v19 = vrot.slane %v19831_v49, 1  ;;  %v9922_v40 = vrot.slane %v19828_v42, 1  ;;  %v10618_v51 = vsel %vm2477_vm1, %v10616_v29, %v10617_v31 }
 0xde6   : > { %11227 = vst.msk [vmem:[%s19686_s15 + $0x20] sm:$0xff] %vm9617_vm3, %v11196_v18  ;;  %v10571_v14 = vmul.f32 0.31640625, %v9749_v9  ;;  %v9795_v55 = vmul.f32 0.00390625, %v9747_v47  ;;  %v10069_v21 = vrot.slane %v19828_v42, 2  ;;  %v10709_v45 = vadd.f32 %v10618_v51, %v10544_v0 }
 0xde7   : > { %v10956_v1 = vadd.f32 %v10917_v4, %v10618_v51  ;;  %v10957_v43 = vadd.f32 %v10918_v33, %v10620_v7  ;;  %v10411_v16 = vmul.f32 0.31640625, %v9747_v47  ;;  %v10349_v60 = vadd.f32 %v10261_v37, %v10153_v26  ;;  %v9750_v7 = vld [vmem:[#allocation4 + $0xa8] sm:$0xff] }
 0xde8   : > { %v10267_v58 = vrot.slane %v10179_v44, 3  ;;  %v10763_v28 = vrot.slane %v19820_v5, 3  ;;  %v10072_v11 = vsel %vm2477_vm1, %v10069_v21, %v10071_v12  ;;  %v9923_v38 = vsel %vm2210_vm0, %v9921_v19, %v9922_v40 }
 0xde9   : > { %v9991_v13 = vadd.f32 %v9922_v40, %v9796_v50  ;;  %v10412_v59 = vmul.f32 0.31640625, %v9748_v25  ;;  %v10755_v39 = vrot.slane %v19797_v63, 3  ;;  %v10624_v9 = vrot.slane %v10571_v14, 2 }
 0xdea   : > { %v10068_v62 = vrot.slane %v19831_v49, 2  ;;  %v10264_v32 = vrot.slane %v9795_v55, 3  ;;  %v10756_v36 = vrot.slane %v19770_v41, 3  ;;  %v10265_v27 = vrot.slane %v9796_v50, 3 }
 0xdeb   : > { %v10156_v57 = vadd.f32 %v10072_v11, %v9991_v13  ;;  %v10382_v47 = vadd.f32 %v10350_v10, %v19828_v42  ;;  %v10476_v2 = vrot.slane %v10411_v16, 1  ;;  %v9990_v37 = vadd.f32 %v9923_v38, %v9795_v55 }
 0xdec   : > { %v10381_v31 = vadd.f32 %v10349_v60, %v19831_v49  ;;  %v10757_v15 = vsel %vm10233_vm6, %v10755_v39, %v10756_v36  ;;  %v10759_v63 = vsel %vm10233_vm6, %v10756_v36, %v10758_v48  ;;  %v10268_v25 = vsel %vm10233_vm6, %v10265_v27, %v10267_v58  ;;  %v9751_v58 = vld [vmem:[#allocation4 + $0xb0] sm:$0xff] }
 0xded   : > { %v10477_v29 = vrot.slane %v10412_v59, 1  ;;  %v10997_v18 = vadd.f32 %v10956_v1, %v10757_v15  ;;  %v10998_v0 = vadd.f32 %v10957_v43, %v10759_v63  ;;  %v10070_v41 = vsel %vm2477_vm1, %v10068_v62, %v10069_v21 }
 0xdee   : > { %v10266_v4 = vsel %vm10233_vm6, %v10264_v32, %v10265_v27  ;;  %v10848_v33 = vadd.f32 %v10757_v15, %v10709_v45  ;;  %v10849_v26 = vadd.f32 %v10759_v63, %v10710_v17  ;;  %v10622_v44 = vrot.slane %v10412_v59, 2  ;;  %v19862_v45 = vpop.f32.mrb[41].mxu0 }
 0xdef   : > { %v10478_v12 = vsel %vm2210_vm0, %v10476_v2, %v10477_v29  ;;  %v11033_v10 = vadd.f32 %v10997_v18, %v9795_v55  ;;  %v11034_v19 = vadd.f32 %v10998_v0, %v9796_v50  ;;  %v10155_v51 = vadd.f32 %v10070_v41, %v9990_v37 }
 0xdf0   : > { %v10546_v48 = vadd.f32 %v10478_v12, %v10381_v31  ;;  %v10547_v14 = vadd.f32 %v10477_v29, %v10382_v47  ;;  %v10621_v60 = vrot.slane %v10411_v16, 2  ;;  %v10625_v1 = vsel %vm2477_vm1, %v10622_v44, %v10624_v9 }
 0xdf1   : > { %v11082_v43 = vadd.f32 %v11033_v10, %v9923_v38  ;;  %v11083_v21 = vadd.f32 %v11034_v19, %v9922_v40  ;;  %v19860_v13 = vmul.f32 -0.03515625, %v9750_v7  ;;  %v10880_v17 = vadd.f32 %v10848_v33, %v19831_v49 }
 0xdf2   : > { %v10881_v59 = vadd.f32 %v10849_v26, %v19828_v42  ;;  %v19866_v55 = vmul.f32 -0.03515625, %v9752_v20  ;;  %v10180_v50 = vmul.f32 0.00390625, %v9752_v20  ;;  %v9797_v16 = vmul.f32 0.00390625, %v9750_v7 }
 0xdf3   : > { %v11135_v39 = vadd.f32 %v11082_v43, %v10070_v41  ;;  %v11136_v62 = vadd.f32 %v11083_v21, %v10072_v11  ;;  %v19868_v32 = vmul.f32 -0.03515625, %v9751_v58  ;;  %v10352_v38 = vadd.f32 %v10268_v25, %v10156_v57 }
 0xdf4   : > { %v10623_v40 = vsel %vm2477_vm1, %v10621_v60, %v10622_v44  ;;  %v10712_v9 = vadd.f32 %v10625_v1, %v10547_v14  ;;  %v19871_v36 = vmul.f32 0.31640625, %v9752_v20  ;;  %v9798_v2 = vmul.f32 0.00390625, %v9751_v58 }
 0xdf5   : > { %v11198_v27 = vadd.f32 %v11135_v39, %v10266_v4  ;;  %v11199_v47 = vadd.f32 %v11136_v62, %v10268_v25  ;;  %v9924_v37 = vrot.slane %v19860_v13, 1  ;;  %v10351_v31 = vadd.f32 %v10266_v4, %v10155_v51 }
 0xdf6   : > { %v10711_v15 = vadd.f32 %v10623_v40, %v10546_v48  ;;  %v10919_v63 = vadd.f32 %v10880_v17, %v10478_v12  ;;  %v10920_v18 = vadd.f32 %v10881_v59, %v10477_v29  ;;  %v10076_v11 = vrot.slane %v19866_v55, 2  ;;  %v19885_v12 = vpop.f32.mrb[42].mxu0 }
 0xdf7   : > { %11229 = vst.msk [vmem:[%s19686_s15 + $0x30] sm:$0xff] %vm9617_vm3, %v11198_v27  ;;  %v10272_v57 = vrot.slane %v10180_v50, 3  ;;  %v9925_v0 = vrot.slane %v19868_v32, 1  ;;  %v10269_v41 = vrot.slane %v9797_v16, 3  ;;  %v10629_v33 = vrot.slane %v19871_v36, 2  ;;  %v19904_v59 = vpop.f32.mrb[43].mxu0 }
 0xdf8   : > { %11230 = vst.msk [vmem:[%s19686_s15 + $0x38] sm:$0x7f] %vm11223_vm7, %v11199_v47  ;;  %v10768_v25 = vrot.slane %v19866_v55, 3  ;;  %v19882_v26 = vmul.f32 0.31640625, %v9750_v7  ;;  %v10760_v4 = vrot.slane %v19831_v49, 3  ;;  %v10073_v44 = vrot.slane %v19860_v13, 2 }
 0xdf9   : > { %v9926_v29 = vsel %vm2210_vm0, %v9924_v37, %v9925_v0  ;;  %v10270_v10 = vrot.slane %v9798_v2, 3  ;;  %v10761_v19 = vrot.slane %v19828_v42, 3  ;;  %v10958_v20 = vadd.f32 %v10919_v63, %v10623_v40 }
 0xdfa   : > { %v10959_v51 = vadd.f32 %v10920_v18, %v10625_v1  ;;  %v10074_v48 = vrot.slane %v19868_v32, 2  ;;  %v19891_v14 = vmul.f32 0.31640625, %v9751_v58  ;;  %v9993_v60 = vadd.f32 %v9925_v0, %v9798_v2 }
 0xdfb   : > { %v19894_v7 = vsel %vm10233_vm6, %v10269_v41, %v10270_v10  ;;  %v19897_v49 = vsel %vm10233_vm6, %v10270_v10, %v10272_v57  ;;  %v10762_v43 = vsel %vm10233_vm6, %v10760_v4, %v10761_v19  ;;  %v9992_v21 = vadd.f32 %v9926_v29, %v9797_v16 }
 0xdfc   : > { %v10479_v17 = vrot.slane %v19882_v26, 1  ;;  %v10764_v42 = vsel %vm10233_vm6, %v10761_v19, %v10763_v28  ;;  %v10850_v1 = vadd.f32 %v10762_v43, %v10711_v15  ;;  %v10075_v58 = vsel %vm2477_vm1, %v10073_v44, %v10074_v48 }
 0xdfd   : > { %v10077_v50 = vsel %vm2477_vm1, %v10074_v48, %v10076_v11  ;;  %v10383_v39 = vadd.f32 %v10351_v31, %v19860_v13  ;;  %v10851_v62 = vadd.f32 %v10764_v42, %v10712_v9  ;;  %v10384_v40 = vadd.f32 %v10352_v38, %v19868_v32 }
 0xdfe   : > { %v10480_v27 = vrot.slane %v19891_v14, 1  ;;  %v10999_v47 = vadd.f32 %v10958_v20, %v10762_v43  ;;  %v11000_v37 = vadd.f32 %v10959_v51, %v10764_v42  ;;  %v10626_v5 = vrot.slane %v19882_v26, 2  ;;  %v21048_v20 = vld [vmem:[#allocation66_spill] sm:$0xff]  ;;  %v21050_v43 = vld [vmem:[#allocation68_spill] sm:$0xff] }
 0xdff   : > { %v10627_v28 = vrot.slane %v19891_v14, 2  ;;  %v9567_v15 = vadd.f32 1.0, %v19818_v30  ;;  %v9566_v63 = vadd.f32 1.0, %v19822_v34  ;;  %v10882_v11 = vadd.f32 %v10850_v1, %v19860_v13  ;;  %v19926_v34 = vld [vmem:[%s21037_s22] ss:$0 sm:$0xff] }
 0xe00   : > { %v10481_v18 = vsel %vm2210_vm0, %v10479_v17, %v10480_v27  ;;  %v11035_v31 = vadd.f32 %v10999_v47, %v9797_v16  ;;  %v11036_v9 = vadd.f32 %v11000_v37, %v9798_v2  ;;  %v10883_v38 = vadd.f32 %v10851_v62, %v19868_v32  ;;  %v21046_v16 = vld [vmem:[#allocation64_spill] sm:$0xff] }
 0xe01   : > { %v9599_v57 = vmul.f32 0.5, %v9567_v15  ;;  %v9598_v41 = vmul.f32 0.5, %v9566_v63  ;;  %15437 = vtanh.f32 %v19785_v46  ;;  %v10549_v4 = vadd.f32 %v10480_v27, %v10384_v40  ;;  %v21056_v15 = vld [vmem:[#allocation74_spill] sm:$0xff] }
 0xe02   : > { %v11084_v26 = vadd.f32 %v11035_v31, %v9926_v29  ;;  %v11085_v44 = vadd.f32 %v11036_v9, %v9925_v0  ;;  %15439 = vtanh.f32 %v19788_v23  ;;  %v10548_v30 = vadd.f32 %v10481_v18, %v10383_v39  ;;  %v21051_v39 = vld [vmem:[#allocation69_spill] sm:$0xff] }
 0xe03   : > { %9633 = vst.msk [vmem:[#allocation4 + $0xc9] sm:$0xff] %vm9617_vm3, %v9599_v57  ;;  %9632 = vst.msk [vmem:[#allocation4 + $0xc1] sm:$0xff] %vm9617_vm3, %v9598_v41  ;;  %15441 = vtanh.f32 %v19795_v3  ;;  %v9509_v46 = vadd.f32 %v19926_v34, %v19757_v61  ;;  %v14634_v2 = vadd.f32 %v19599_v35, %v21046_v16  ;;  %v10921_v0 = vadd.f32 %v10882_v11, %v10481_v18  ;;  %v21047_v3 = vld [vmem:[#allocation65_spill] sm:$0xff]  ;;  %v21049_v35 = vld [vmem:[#allocation67_spill] sm:$0xff] }
 0xe04   : > { %v11137_v23 = vadd.f32 %v11084_v26, %v10075_v58  ;;  %v11138_v29 = vadd.f32 %v11085_v44, %v10077_v50  ;;  %15443 = vtanh.f32 %v19802_v56  ;;  %v10922_v10 = vadd.f32 %v10883_v38, %v10480_v27 }
 0xe05   : > { %15445 = vtanh.f32 %v9509_v46  ;;  %v14635_v19 = vadd.f32 %v19640_v24, %v21047_v3  ;;  %v14636_v51 = vadd.f32 %v19656_v6, %v21048_v20  ;;  %v14637_v14 = vadd.f32 %v19700_v52, %v21049_v35  ;;  %v21052_v52 = vld [vmem:[#allocation70_spill] sm:$0xff] }
 0xe06   : > { %v11200_v61 = vadd.f32 %v11137_v23, %v19894_v7  ;;  %v11201_v48 = vadd.f32 %v11138_v29, %v19897_v49  ;;  %v14638_v17 = vadd.f32 %v19704_v22, %v21050_v43  ;;  %v10157_v56 = vadd.f32 %v10075_v58, %v9992_v21  ;;  %v21053_v21 = vld [vmem:[#allocation71_spill] sm:$0xff] }
 0xe07   : > { %v10158_v42 = vadd.f32 %v10077_v50, %v9993_v60  ;;  %v10765_v1 = vrot.slane %v19860_v13, 3  ;;  %v14639_v24 = vadd.f32 %v19779_v8, %v21051_v39  ;;  %v10630_v6 = vsel %vm2477_vm1, %v10627_v28, %v10629_v33  ;;  %v21054_v8 = vld [vmem:[#allocation72_spill] sm:$0xff]  ;;  %v21055_v50 = vld [vmem:[#allocation73_spill] sm:$0xff] }
 0xe08   : > { %v10766_v62 = vrot.slane %v19868_v32, 3  ;;  %11231 = vst.msk [vmem:[%s19686_s15 + $0x40] sm:$0xff] %vm9617_vm3, %v11200_v61  ;;  %v14640_v22 = vadd.f32 %v19790_v53, %v21052_v52  ;;  %v14641_v60 = vadd.f32 %v19839_v54, %v21053_v21  ;;  %v10628_v13 = vsel %vm2477_vm1, %v10626_v5, %v10627_v28 }
 0xe09   : > { %11232 = vst.msk [vmem:[%s19686_s15 + $0x48] sm:$0x7f] %vm11223_vm7, %v11201_v48  ;;  %v10714_v58 = vadd.f32 %v10630_v6, %v10549_v4  ;;  %v14642_v36 = vadd.f32 %v19862_v45, %v21054_v8  ;;  %v19963_v33 = vadd.f32 %v19885_v12, %v21055_v50  ;;  %v10713_v32 = vadd.f32 %v10628_v13, %v10548_v30 }
 0xe0a   : > { %v10960_v40 = vadd.f32 %v10921_v0, %v10628_v13  ;;  %v10961_v27 = vadd.f32 %v10922_v10, %v10630_v6  ;;  %v9672_v47 = vld [vmem:[#allocation4 + $0xd0] sm:$0x3]  ;;  %v9671_v37 = vld [vmem:[#allocation4 + $0xc0] sm:$0xff]  ;;  %v19967_v53 = vadd.f32 %v19904_v59, %v21056_v15  ;;  %v9508_v45 = vadd.f32 %v19926_v34, %v14634_v2  ;;  %v9754_v38 = vld [vmem:[#allocation4 + $0xc8] sm:$0xff] }
 0xe0b   : > { %v15438_v54 = vpop.eup %15437  ;;  %9719 = vst.msk [vmem:[#allocation4 + $0xd1] sm:$0x1] %vm9710_vm4, %v9672_v47  ;;  %v10769_v12 = vsel %vm10233_vm6, %v10766_v62, %v10768_v25  ;;  %v9511_v63 = vadd.f32 %v19926_v34, %v14635_v19  ;;  %v19977_v11 = vadd.f32 %v19894_v7, %v10157_v56  ;;  %v10354_v59 = vadd.f32 %v19897_v49, %v10158_v42 }
 0xe0c   : > { %9700 = vst.msk [vmem:[#allocation4 + $0xbf] sm:$0x2] %vm9691_vm5, %v9671_v37  ;;  %v15440_v5 = vpop.eup %15439  ;;  %v9569_v28 = vadd.f32 1.0, %v15438_v54  ;;  %v10767_v31 = vsel %vm10233_vm6, %v10765_v1, %v10766_v62  ;;  %v10853_v9 = vadd.f32 %v10769_v12, %v10714_v58  ;;  %v11002_v55 = vadd.f32 %v10961_v27, %v10769_v12 }
 0xe0d   : > { %v15442_v18 = vpop.eup %15441  ;;  %v19981_v41 = vadd.f32 %v10767_v31, %v10713_v32  ;;  %v19983_v4 = vadd.f32 %v10960_v40, %v10767_v31  ;;  %v9510_v25 = vadd.f32 %v19926_v34, %v14636_v51  ;;  %v9568_v30 = vadd.f32 1.0, %v15440_v5 }
 0xe0e   : > { %v15444_v57 = vpop.eup %15443  ;;  %v9601_v44 = vmul.f32 0.5, %v9569_v28  ;;  %15447 = vtanh.f32 %v9508_v45  ;;  %v9513_v7 = vadd.f32 %v19926_v34, %v14637_v14  ;;  %v19987_v46 = vmul.f32 0.00390625, %v9754_v38 }
 0xe0f   : > { %v15446_v26 = vpop.eup %15445  ;;  %v9571_v49 = vadd.f32 1.0, %v15442_v18  ;;  %15449 = vtanh.f32 %v9511_v63  ;;  %v9512_v16 = vadd.f32 %v19926_v34, %v14638_v17  ;;  %v19990_v2 = vmul.f32 -0.03515625, %v9754_v38 }
 0xe10   : > { %9635 = vst.msk [vmem:[#allocation4 + $0xe1] sm:$0xff] %vm9617_vm3, %v9601_v44  ;;  %v9600_v0 = vmul.f32 0.5, %v9568_v30  ;;  %v9570_v23 = vadd.f32 1.0, %v15444_v57  ;;  %v9573_v29 = vadd.f32 1.0, %v15446_v26  ;;  %15451 = vtanh.f32 %v9510_v25 }
 0xe11   : > { %v9603_v19 = vmul.f32 0.5, %v9571_v49  ;;  %v19994_v20 = vadd.f32 %v19926_v34, %v14639_v24  ;;  %v19997_v51 = vadd.f32 %v19926_v34, %v14640_v22  ;;  %v11038_v48 = vadd.f32 %v11002_v55, %v19987_v46 }
 0xe12   : > { %v9755_v10 = vld [vmem:[#allocation4 + $0xd0] sm:$0x3]  ;;  %9634 = vst.msk [vmem:[#allocation4 + $0xd9] sm:$0xff] %vm9617_vm3, %v9600_v0  ;;  %15453 = vtanh.f32 %v9513_v7  ;;  %v20004_v35 = vadd.f32 %v19926_v34, %v14641_v60  ;;  %v9602_v17 = vmul.f32 0.5, %v9570_v23  ;;  %v9605_v56 = vmul.f32 0.5, %v9573_v29 }
 0xe13   : > { %v9753_v3 = vld [vmem:[#allocation4 + $0xc0] sm:$0xff]  ;;  %v19999_v61 = vmul.f32 -0.03515625, %v9755_v10  ;;  %v10181_v14 = vmul.f32 0.00390625, %v9755_v10  ;;  %9637 = vst.msk [vmem:[#allocation4 + $0xf9] sm:$0xff] %vm9617_vm3, %v9603_v19  ;;  %v9928_v42 = vrot.slane %v19990_v2, 1  ;;  %v20010_v1 = vmul.f32 0.31640625, %v9754_v38 }
 0xe14   : > { %v20006_v43 = vmul.f32 -0.03515625, %v9753_v3  ;;  %15455 = vtanh.f32 %v9512_v16  ;;  %v20013_v39 = vadd.f32 %v19926_v34, %v14642_v36  ;;  %v20017_v62 = vmul.f32 0.31640625, %v9753_v3  ;;  %9636 = vst.msk [vmem:[#allocation4 + $0xf1] sm:$0xff] %vm9617_vm3, %v9602_v17  ;;  %9639 = vst.msk [vmem:[#allocation4 + $0x111] sm:$0xff] %vm9617_vm3, %v9605_v56 }
 0xe15   : > { %v10081_v24 = vrot.slane %v19999_v61, 2  ;;  %v20023_v52 = vadd.f32 %v19926_v34, %v19963_v33  ;;  %v10079_v22 = vrot.slane %v19990_v2, 2  ;;  %v10275_v21 = vrot.slane %v19987_v46, 3 }
 0xe16   : > { %v9927_v6 = vrot.slane %v20006_v43, 1  ;;  %v10386_v60 = vadd.f32 %v10354_v59, %v19990_v2  ;;  %v11087_v13 = vadd.f32 %v11038_v48, %v9928_v42  ;;  %v10277_v58 = vrot.slane %v10181_v14, 3 }
 0xe17   : > { %v9799_v8 = vmul.f32 0.00390625, %v9753_v3  ;;  %v10885_v50 = vadd.f32 %v10853_v9, %v19990_v2  ;;  %v9674_v32 = vld [vmem:[#allocation4 + $0xe8] sm:$0x3]  ;;  %v10573_v27 = vmul.f32 0.31640625, %v9755_v10  ;;  %v9995_v47 = vadd.f32 %v9928_v42, %v19987_v46 }
 0xe18   : > { %v9929_v36 = vsel %vm2210_vm0, %v9927_v6, %v9928_v42  ;;  %v15448_v40 = vpop.eup %15447  ;;  %v10483_v33 = vrot.slane %v20010_v1, 1  ;;  %v10632_v37 = vrot.slane %v20010_v1, 2  ;;  %9720 = vst.msk [vmem:[#allocation4 + $0xe9] sm:$0x1] %vm9710_vm4, %v9674_v32  ;;  %v10078_v54 = vrot.slane %v20006_v43, 2 }
 0xe19   : > { %v20034_v15 = vpop.eup %15449  ;;  %v10082_v45 = vsel %vm2477_vm1, %v10079_v22, %v10081_v24  ;;  %v10482_v5 = vrot.slane %v20017_v62, 1  ;;  %v9673_v12 = vld [vmem:[#allocation4 + $0xd8] sm:$0xff]  ;;  %v10771_v28 = vrot.slane %v19990_v2, 3  ;;  %v9994_v63 = vadd.f32 %v9929_v36, %v9799_v8  ;;  %v9757_v46 = vld [vmem:[#allocation4 + $0xe0] sm:$0xff] }
 0xe1a   : > { %v10385_v18 = vadd.f32 %v19977_v11, %v20006_v43  ;;  %v11037_v59 = vadd.f32 %v19983_v4, %v9799_v8  ;;  %v11140_v31 = vadd.f32 %v11087_v13, %v10082_v45  ;;  %9701 = vst.msk [vmem:[#allocation4 + $0xd7] sm:$0x2] %vm9691_vm5, %v9673_v12  ;;  %v9676_v9 = vld [vmem:[#allocation4 + $0x100] sm:$0x3]  ;;  %v20044_v38 = vpop.eup %15451  ;;  %v10274_v57 = vrot.slane %v9799_v8, 3 }
 0xe1b   : > { %v10278_v55 = vsel %vm10233_vm6, %v10275_v21, %v10277_v58  ;;  %v10551_v25 = vadd.f32 %v10483_v33, %v10386_v60  ;;  %v10924_v26 = vadd.f32 %v10885_v50, %v10483_v33  ;;  %9721 = vst.msk [vmem:[#allocation4 + $0x101] sm:$0x1] %vm9710_vm4, %v9676_v9  ;;  %v10634_v30 = vrot.slane %v10573_v27, 2  ;;  %v9675_v49 = vld [vmem:[#allocation4 + $0xf0] sm:$0xff]  ;;  %v9678_v16 = vld [vmem:[#allocation4 + $0x118] sm:$0x3] }
 0xe1c   : > { %v20048_v44 = vpop.eup %15453  ;;  %v10884_v11 = vadd.f32 %v19981_v41, %v20006_v43  ;;  %v11086_v4 = vadd.f32 %v11037_v59, %v9929_v36  ;;  %v11203_v7 = vadd.f32 %v11140_v31, %v10278_v55  ;;  %v10080_v0 = vsel %vm2477_vm1, %v10078_v54, %v10079_v22  ;;  %9702 = vst.msk [vmem:[#allocation4 + $0xef] sm:$0x2] %vm9691_vm5, %v9675_v49 }
 0xe1d   : > { %v10160_v23 = vadd.f32 %v10082_v45, %v9995_v47  ;;  %v10484_v29 = vsel %vm2210_vm0, %v10482_v5, %v10483_v33  ;;  %v10631_v10 = vrot.slane %v20017_v62, 2  ;;  %9722 = vst.msk [vmem:[#allocation4 + $0x119] sm:$0x1] %vm9710_vm4, %v9678_v16  ;;  %v10159_v41 = vadd.f32 %v10080_v0, %v9994_v63  ;;  %v20089_v63 = vld [vmem:[#allocation4 + $0xf8] sm:$0xff] }
 0xe1e   : > { %v20057_v3 = vpop.eup %15455  ;;  %v10550_v19 = vadd.f32 %v10484_v29, %v10385_v18  ;;  %v11139_v48 = vadd.f32 %v11086_v4, %v10080_v0  ;;  %11234 = vst.msk [vmem:[%s19686_s15 + $0x58] sm:$0x7f] %vm11223_vm7, %v11203_v7  ;;  %15457 = vtanh.f32 %v19994_v20  ;;  %v10276_v14 = vsel %vm10233_vm6, %v10274_v57, %v10275_v21 }
 0xe1f   : > { %v20063_v17 = vmul.f32 -0.03515625, %v9757_v46  ;;  %v20065_v56 = vadd.f32 1.0, %v15448_v40  ;;  %15459 = vtanh.f32 %v19997_v51  ;;  %v10773_v42 = vrot.slane %v19999_v61, 3  ;;  %v9758_v62 = vld [vmem:[#allocation4 + $0xe8] sm:$0x3] }
 0xe20   : > { %v10635_v1 = vsel %vm2477_vm1, %v10632_v37, %v10634_v30  ;;  %v10923_v24 = vadd.f32 %v10884_v11, %v10484_v29  ;;  %v11202_v6 = vadd.f32 %v11139_v48, %v10276_v14  ;;  %v10356_v22 = vadd.f32 %v10278_v55, %v10160_v23 }
 0xe21   : > { %v10633_v60 = vsel %vm2477_vm1, %v10631_v10, %v10632_v37  ;;  %v10963_v20 = vadd.f32 %v10924_v26, %v10635_v1  ;;  %v9756_v13 = vld [vmem:[#allocation4 + $0xd8] sm:$0xff]  ;;  %v20071_v21 = vmul.f32 0.00390625, %v9757_v46  ;;  %v10355_v58 = vadd.f32 %v10276_v14, %v10159_v41 }
 0xe22   : > { %v10715_v8 = vadd.f32 %v10633_v60, %v10550_v19  ;;  %v10716_v36 = vadd.f32 %v10635_v1, %v10551_v25  ;;  %11233 = vst.msk [vmem:[%s19686_s15 + $0x50] sm:$0xff] %vm9617_vm3, %v11202_v6  ;;  %v20075_v51 = vmul.f32 0.31640625, %v9757_v46  ;;  %v20077_v61 = vmul.f32 -0.03515625, %v9758_v62 }
 0xe23   : > { %v20079_v50 = vmul.f32 -0.03515625, %v9756_v13  ;;  %v9931_v32 = vrot.slane %v20063_v17, 1  ;;  %v10770_v40 = vrot.slane %v20006_v43, 3  ;;  %v10962_v27 = vadd.f32 %v10923_v24, %v10633_v60 }
 0xe24   : > { %v10182_v47 = vmul.f32 0.00390625, %v9758_v62  ;;  %v10084_v33 = vrot.slane %v20063_v17, 2  ;;  %v10774_v37 = vsel %vm10233_vm6, %v10771_v28, %v10773_v42  ;;  %v10280_v45 = vrot.slane %v20071_v21, 3 }
 0xe25   : > { %v9930_v54 = vrot.slane %v20079_v50, 1  ;;  %v10417_v5 = vmul.f32 0.31640625, %v9756_v13  ;;  %v11004_v12 = vadd.f32 %v10963_v20, %v10774_v37  ;;  %v10574_v18 = vmul.f32 0.31640625, %v9758_v62  ;;  %v9759_v62 = vld [vmem:[#allocation4 + $0xf0] sm:$0xff] }
 0xe26   : > { %v10388_v59 = vadd.f32 %v10356_v22, %v20063_v17  ;;  %v10486_v43 = vrot.slane %v20075_v51, 1  ;;  %v10637_v31 = vrot.slane %v20075_v51, 2  ;;  %v10086_v9 = vrot.slane %v20077_v61, 2 }
 0xe27   : > { %v9997_v57 = vadd.f32 %v9931_v32, %v20071_v21  ;;  %v10772_v55 = vsel %vm10233_vm6, %v10770_v40, %v10771_v28  ;;  %v10855_v25 = vadd.f32 %v10774_v37, %v10716_v36  ;;  %v10282_v30 = vrot.slane %v10182_v47, 3 }
 0xe28   : > { %v20099_v26 = vpop.eup %15457  ;;  %v9801_v11 = vmul.f32 0.00390625, %v9756_v13  ;;  %v10854_v4 = vadd.f32 %v10772_v55, %v10715_v8  ;;  %v20102_v7 = vmul.f32 0.00390625, %v20089_v63  ;;  %v9932_v49 = vsel %vm2210_vm0, %v9930_v54, %v9931_v32 }
 0xe29   : > { %v20104_v46 = vpop.eup %15459  ;;  %v10485_v16 = vrot.slane %v10417_v5, 1  ;;  %v11003_v0 = vadd.f32 %v10962_v27, %v10772_v55  ;;  %v11040_v23 = vadd.f32 %v11004_v12, %v20071_v21  ;;  %v10639_v2 = vrot.slane %v10574_v18, 2  ;;  %v9761_v21 = vld [vmem:[#allocation4 + $0x100] sm:$0x3] }
 0xe2a   : > { %v10083_v28 = vrot.slane %v20079_v50, 2  ;;  %v10387_v29 = vadd.f32 %v10355_v58, %v20079_v50  ;;  %v10553_v10 = vadd.f32 %v10486_v43, %v10388_v59  ;;  %v10087_v41 = vsel %vm2477_vm1, %v10084_v33, %v10086_v9 }
 0xe2b   : > { %v10887_v19 = vadd.f32 %v10855_v25, %v20063_v17  ;;  %v11039_v48 = vadd.f32 %v11003_v0, %v9801_v11  ;;  %v11089_v14 = vadd.f32 %v11040_v23, %v9931_v32  ;;  %v10778_v42 = vrot.slane %v20077_v61, 3 }
 0xe2c   : > { %v9996_v1 = vadd.f32 %v9932_v49, %v9801_v11  ;;  %v10279_v24 = vrot.slane %v9801_v11, 3  ;;  %v10886_v6 = vadd.f32 %v10854_v4, %v20079_v50  ;;  %v10283_v22 = vsel %vm10233_vm6, %v10280_v45, %v10282_v30 }
 0xe2d   : > { %v10487_v60 = vsel %vm2210_vm0, %v10485_v16, %v10486_v43  ;;  %v11088_v20 = vadd.f32 %v11039_v48, %v9932_v49  ;;  %v11142_v13 = vadd.f32 %v11089_v14, %v10087_v41  ;;  %v10085_v58 = vsel %vm2477_vm1, %v10083_v28, %v10084_v33 }
 0xe2e   : > { %v10162_v8 = vadd.f32 %v10087_v41, %v9997_v57  ;;  %v10552_v36 = vadd.f32 %v10487_v60, %v10387_v29  ;;  %v10636_v51 = vrot.slane %v10417_v5, 2  ;;  %v10926_v32 = vadd.f32 %v10887_v19, %v10486_v43 }
 0xe2f   : > { %v11141_v40 = vadd.f32 %v11088_v20, %v10085_v58  ;;  %v11205_v27 = vadd.f32 %v11142_v13, %v10283_v22  ;;  %v20117_v47 = vmul.f32 -0.03515625, %v9759_v62  ;;  %v10161_v37 = vadd.f32 %v10085_v58, %v9996_v1 }
 0xe30   : > { %v10281_v54 = vsel %vm10233_vm6, %v10279_v24, %v10280_v45  ;;  %v10925_v12 = vadd.f32 %v10886_v6, %v10487_v60  ;;  %v20120_v18 = vmul.f32 0.00390625, %v9761_v21  ;;  %v10640_v59 = vsel %vm2477_vm1, %v10637_v31, %v10639_v2 }
 0xe31   : > { %v11204_v9 = vadd.f32 %v11141_v40, %v10281_v54  ;;  %11236 = vst.msk [vmem:[%s19686_s15 + $0x68] sm:$0x7f] %vm11223_vm7, %v11205_v27  ;;  %v20125_v33 = vmul.f32 -0.03515625, %v9761_v21  ;;  %v20128_v5 = vmul.f32 -0.03515625, %v20089_v63  ;;  %v10638_v43 = vsel %vm2477_vm1, %v10636_v51, %v10637_v31 }
 0xe32   : > { %v10718_v57 = vadd.f32 %v10640_v59, %v10553_v10  ;;  %v20131_v55 = vmul.f32 0.31640625, %v9761_v21  ;;  %v20133_v45 = vmul.f32 0.00390625, %v9759_v62  ;;  %v20135_v25 = vadd.f32 %v10283_v22, %v10162_v8 }
 0xe33   : > { %v20137_v30 = vadd.f32 %v10638_v43, %v10552_v36  ;;  %v10965_v11 = vadd.f32 %v10926_v32, %v10640_v59  ;;  %11235 = vst.msk [vmem:[%s19686_s15 + $0x60] sm:$0xff] %vm9617_vm3, %v11204_v9  ;;  %v9933_v4 = vrot.slane %v20117_v47, 1  ;;  %v10357_v49 = vadd.f32 %v10281_v54, %v10161_v37 }
 0xe34   : > { %v10964_v16 = vadd.f32 %v10925_v12, %v10638_v43  ;;  %v10287_v0 = vrot.slane %v20120_v18, 3  ;;  %v10775_v31 = vrot.slane %v20079_v50, 3  ;;  %v10091_v23 = vrot.slane %v20125_v33, 2 }
 0xe35   : > { %v10783_v2 = vrot.slane %v20125_v33, 3  ;;  %v20148_v28 = vrot.slane %v20128_v5, 1  ;;  %v10285_v29 = vrot.slane %v20102_v7, 3  ;;  %v10644_v50 = vrot.slane %v20131_v55, 2 }
 0xe36   : > { %v10088_v10 = vrot.slane %v20117_v47, 2  ;;  %v10284_v41 = vrot.slane %v20133_v45, 3  ;;  %v10776_v19 = vrot.slane %v20063_v17, 3  ;;  %v10089_v14 = vrot.slane %v20128_v5, 2 }
 0xe37   : > { %v9935_v48 = vsel %vm2210_vm0, %v9933_v4, %v20148_v28  ;;  %v20167_v1 = vmul.f32 0.31640625, %v9759_v62  ;;  %v20170_v24 = vmul.f32 0.31640625, %v20089_v63 }
 0xe38   : > { %15635 = shalt.err (!%p15632_p13)
}
 0xe39   : > { %s15636_s0 = scalar_lea.hbm %s20154_s20, 16  ;;  %s15640_s23 = scalar_lea.hbm %s21057_s28, 32 }
 0xe3a   : > { %p15637_p9 = scmp.ne.s32.totalorder %s20154_s20, %s15636_s0  ;;  %p15641_p3 = scmp.lt.u32.totalorder %s20154_s20, %s21057_s28 }
 0xe3b   : > { %p15642_p7 = scmp.lt.u32.totalorder %s15640_s23, %s15636_s0  ;;  %p15644_p1 = scmp.lt.u32.totalorder %s15636_s0, %s20154_s20 }
 0xe3c   : > { %p15638_p5 = pnand %p15637_p9, %p21058_p2 }
 0xe3d   : > { %p15643_p12 = por %p15642_p7, %p15641_p3 }
 0xe3e   : > { %p15639_p11 = pneg %p15638_p5 }
 0xe3f   : > { %p15645_p4 = por %p15644_p1, %p15643_p12 }
 0xe41   : > { %p15646_p0 = pnand %p15645_p4, %p15639_p11 }
 0xe43   : > { %15649 = shalt.err (!%p15646_p0)
}
 0xe44   : > { %15228 = dma.vmem_to_hbm [thread:$0]  (%p21058_p2), %s20162_s29, 16, %s20154_s20, %s11254_s2   ;;  %v20195_v17 = vsel %vm10233_vm6, %v10285_v29, %v10287_v0  ;;  %v10389_v63 = vadd.f32 %v10357_v49, %v20117_v47  ;;  %v10777_v6 = vsel %vm10233_vm6, %v10775_v31, %v10776_v19  ;;  %v10779_v62 = vsel %vm10233_vm6, %v10776_v19, %v10778_v42  ;;  %v9764_v54 = vld [vmem:[#allocation4 + $0x118] sm:$0x3] }
 0xe45   : > { %v9999_v22 = vadd.f32 %v20148_v28, %v20102_v7  ;;  %v10092_v60 = vsel %vm2477_vm1, %v10089_v14, %v10091_v23  ;;  %v10857_v20 = vadd.f32 %v10779_v62, %v10718_v57  ;;  %v11005_v13 = vadd.f32 %v10964_v16, %v10777_v6 }
 0xe46   : > { %v9998_v21 = vadd.f32 %v9935_v48, %v20133_v45  ;;  %v10090_v58 = vsel %vm2477_vm1, %v10088_v10, %v10089_v14  ;;  %v20208_v8 = vsel %vm10233_vm6, %v10284_v41, %v10285_v29  ;;  %v11006_v36 = vadd.f32 %v10965_v11, %v10779_v62 }
 0xe47   : > { %v10390_v61 = vadd.f32 %v20135_v25, %v20128_v5  ;;  %v10489_v42 = vrot.slane %v20170_v24, 1  ;;  %v10889_v51 = vadd.f32 %v10857_v20, %v20128_v5  ;;  %v11041_v32 = vadd.f32 %v11005_v13, %v20133_v45 }
 0xe48   : > { %v10164_v40 = vadd.f32 %v10092_v60, %v9999_v22  ;;  %v10488_v27 = vrot.slane %v20167_v1, 1  ;;  %v11042_v37 = vadd.f32 %v11006_v36, %v20102_v7  ;;  %v9604_v12 = vmul.f32 0.5, %v20065_v56 }
 0xe49   : > { %v10642_v18 = vrot.slane %v20170_v24, 2  ;;  %v10856_v59 = vadd.f32 %v10777_v6, %v20137_v30  ;;  %v10928_v9 = vadd.f32 %v10889_v51, %v10489_v42  ;;  %v11090_v43 = vadd.f32 %v11041_v32, %v9935_v48 }
 0xe4a   : > { %v11091_v57 = vadd.f32 %v11042_v37, %v20148_v28  ;;  %9638 = vst.msk [vmem:[#allocation4 + $0x109] sm:$0xff] %vm9617_vm3, %v9604_v12  ;;  %v9575_v45 = vadd.f32 1.0, %v20034_v15  ;;  %v9574_v25 = vadd.f32 1.0, %v20044_v38  ;;  %v9577_v11 = vadd.f32 1.0, %v20048_v44 }
 0xe4b   : > { %v10163_v7 = vadd.f32 %v10090_v58, %v9998_v21  ;;  %v10641_v4 = vrot.slane %v20167_v1, 2  ;;  %v11143_v56 = vadd.f32 %v11090_v43, %v10090_v58  ;;  %v20226_v49 = vmul.f32 -0.03515625, %v9764_v54 }
 0xe4c   : > { %v10490_v30 = vsel %vm2210_vm0, %v10488_v27, %v10489_v42  ;;  %v10645_v16 = vsel %vm2477_vm1, %v10642_v18, %v10644_v50  ;;  %v11144_v0 = vadd.f32 %v11091_v57, %v10092_v60  ;;  %v9607_v15 = vmul.f32 0.5, %v9575_v45 }
 0xe4d   : > { %v10888_v38 = vadd.f32 %v10856_v59, %v20117_v47  ;;  %v10967_v31 = vadd.f32 %v10928_v9, %v10645_v16  ;;  %v11206_v44 = vadd.f32 %v11143_v56, %v20208_v8  ;;  %v10781_v23 = vrot.slane %v20128_v5, 3 }
 0xe4e   : > { %v11207_v28 = vadd.f32 %v11144_v0, %v20195_v17  ;;  %9641 = vst.msk [vmem:[#allocation4 + $0x129] sm:$0xff] %vm9617_vm3, %v9607_v15  ;;  %v9606_v29 = vmul.f32 0.5, %v9574_v25  ;;  %v9609_v10 = vmul.f32 0.5, %v9577_v11  ;;  %v9576_v55 = vadd.f32 1.0, %v20057_v3 }
 0xe4f   : > { %v10554_v41 = vadd.f32 %v10490_v30, %v10389_v63  ;;  %v10555_v50 = vadd.f32 %v10489_v42, %v10390_v61  ;;  %11237 = vst.msk [vmem:[%s19686_s15 + $0x70] sm:$0xff] %vm9617_vm3, %v11206_v44  ;;  %v9579_v19 = vadd.f32 1.0, %v20099_v26  ;;  %v9578_v48 = vadd.f32 1.0, %v20104_v46 }
 0xe50   : > { %11238 = vst.msk [vmem:[%s19686_s15 + $0x78] sm:$0x7f] %vm11223_vm7, %v11207_v28  ;;  %v10184_v14 = vmul.f32 0.00390625, %v9764_v54  ;;  %v20244_v5 = vmul.f32 0.31640625, %v9764_v54  ;;  %v10784_v1 = vsel %vm10233_vm6, %v10781_v23, %v10783_v2  ;;  %v9608_v3 = vmul.f32 0.5, %v9576_v55 }
 0xe51   : > { %9640 = vst.msk [vmem:[#allocation4 + $0x121] sm:$0xff] %vm9617_vm3, %v9606_v29  ;;  %9643 = vst.msk [vmem:[#allocation4 + $0x141] sm:$0xff] %vm9617_vm3, %v9609_v10  ;;  %v10927_v24 = vadd.f32 %v10888_v38, %v10490_v30  ;;  %v9677_v63 = vld [vmem:[#allocation4 + $0x108] sm:$0xff]  ;;  %v9763_v6 = vld [vmem:[#allocation4 + $0x110] sm:$0xff]  ;;  %v11008_v26 = vadd.f32 %v10967_v31, %v10784_v1  ;;  %v9611_v62 = vmul.f32 0.5, %v9579_v19  ;;  %v9610_v46 = vmul.f32 0.5, %v9578_v48 }
 0xe52   : > { %v10643_v22 = vsel %vm2477_vm1, %v10641_v4, %v10642_v18  ;;  %9703 = vst.msk [vmem:[#allocation4 + $0x107] sm:$0x2] %vm9691_vm5, %v9677_v63  ;;  %v20253_v60 = vmul.f32 -0.03515625, %v9763_v6  ;;  %v10780_v33 = vrot.slane %v20117_v47, 3  ;;  %v9518_v2 = vadd.f32 %v19926_v34, %v19967_v53 }
 0xe53   : > { %9642 = vst.msk [vmem:[#allocation4 + $0x139] sm:$0xff] %vm9617_vm3, %v9608_v3  ;;  %v10360_v20 = vadd.f32 %v20195_v17, %v10164_v40  ;;  %v10719_v13 = vadd.f32 %v10643_v22, %v10554_v41  ;;  %v10720_v21 = vadd.f32 %v10645_v16, %v10555_v50  ;;  %v20260_v58 = vmul.f32 0.00390625, %v9763_v6  ;;  %9645 = vst.msk [vmem:[#allocation4 + $0x159] sm:$0xff] %vm9617_vm3, %v9611_v62 }
 0xe54   : > { %9644 = vst.msk [vmem:[#allocation4 + $0x151] sm:$0xff] %vm9617_vm3, %v9610_v46  ;;  %v10359_v36 = vadd.f32 %v20208_v8, %v10163_v7  ;;  %v10096_v61 = vrot.slane %v20226_v49, 2  ;;  %v10292_v47 = vrot.slane %v10184_v14, 3  ;;  %v10649_v42 = vrot.slane %v20244_v5, 2 }
 0xe55   : > { %v10966_v51 = vadd.f32 %v10927_v24, %v10643_v22  ;;  %v9937_v34 = vrot.slane %v20253_v60, 1  ;;  %v20268_v53 = vmul.f32 0.31640625, %v9763_v6  ;;  %v11044_v17 = vadd.f32 %v11008_v26, %v20260_v58  ;;  %v9680_v32 = vld [vmem:[#allocation4 + $0x130] sm:$0x3] }
 0xe56   : > { %v10788_v40 = vrot.slane %v20226_v49, 3  ;;  %v10094_v27 = vrot.slane %v20253_v60, 2  ;;  %v10782_v37 = vsel %vm10233_vm6, %v10780_v33, %v10781_v23  ;;  %9723 = vst.msk [vmem:[#allocation4 + $0x131] sm:$0x1] %vm9710_vm4, %v9680_v32  ;;  %15461 = vtanh.f32 %v20004_v35 }
 0xe57   : > { %v10858_v8 = vadd.f32 %v10782_v37, %v10719_v13  ;;  %v10859_v54 = vadd.f32 %v10784_v1, %v10720_v21  ;;  %v11093_v12 = vadd.f32 %v11044_v17, %v9937_v34  ;;  %15463 = vtanh.f32 %v20013_v39 }
 0xe58   : > { %v9679_v18 = vld [vmem:[#allocation4 + $0x120] sm:$0xff]  ;;  %v9682_v59 = vld [vmem:[#allocation4 + $0x148] sm:$0x3]  ;;  %v10097_v9 = vsel %vm2477_vm1, %v10094_v27, %v10096_v61  ;;  %v10290_v43 = vrot.slane %v20260_v58, 3  ;;  %v10392_v57 = vadd.f32 %v10360_v20, %v20253_v60  ;;  %15465 = vtanh.f32 %v20023_v52 }
 0xe59   : > { %9704 = vst.msk [vmem:[#allocation4 + $0x11f] sm:$0x2] %vm9691_vm5, %v9679_v18  ;;  %v9762_v35 = vld [vmem:[#allocation4 + $0x108] sm:$0xff]  ;;  %v10492_v45 = vrot.slane %v20268_v53, 1  ;;  %v11007_v25 = vadd.f32 %v10966_v51, %v10782_v37  ;;  %v11146_v11 = vadd.f32 %v11093_v12, %v10097_v9  ;;  %15467 = vtanh.f32 %v9518_v2 }
 0xe5a   : > { %9724 = vst.msk [vmem:[#allocation4 + $0x149] sm:$0x1] %vm9710_vm4, %v9682_v59  ;;  %v9681_v7 = vld [vmem:[#allocation4 + $0x138] sm:$0xff]  ;;  %v9805_v39 = vmul.f32 0.00390625, %v9762_v35  ;;  %v20284_v4 = vmul.f32 -0.03515625, %v9762_v35  ;;  %v10293_v56 = vsel %vm10233_vm6, %v10290_v43, %v10292_v47  ;;  %v10421_v30 = vmul.f32 0.31640625, %v9762_v35 }
 0xe5b   : > { %9705 = vst.msk [vmem:[#allocation4 + $0x137] sm:$0x2] %vm9691_vm5, %v9681_v7  ;;  %v9684_v16 = vld [vmem:[#allocation4 + $0x160] sm:$0x3]  ;;  %v9683_v0 = vld [vmem:[#allocation4 + $0x150] sm:$0xff]  ;;  %v10001_v52 = vadd.f32 %v9937_v34, %v20260_v58  ;;  %v10647_v15 = vrot.slane %v20268_v53, 2  ;;  %v10891_v38 = vadd.f32 %v10859_v54, %v20253_v60  ;;  %v11209_v31 = vadd.f32 %v11146_v11, %v10293_v56 }
 0xe5c   : > { %9725 = vst.msk [vmem:[#allocation4 + $0x161] sm:$0x1] %vm9710_vm4, %v9684_v16  ;;  %v9936_v44 = vrot.slane %v20284_v4, 1  ;;  %v10093_v23 = vrot.slane %v20284_v4, 2  ;;  %v10557_v28 = vadd.f32 %v10492_v45, %v10392_v57  ;;  %v10786_v29 = vrot.slane %v20253_v60, 3  ;;  %v9766_v48 = vld [vmem:[#allocation4 + $0x128] sm:$0xff] }
 0xe5d   : > { %9706 = vst.msk [vmem:[#allocation4 + $0x14f] sm:$0x2] %vm9691_vm5, %v9683_v0  ;;  %v10289_v10 = vrot.slane %v9805_v39, 3  ;;  %v10491_v55 = vrot.slane %v10421_v30, 1  ;;  %v10650_v41 = vsel %vm2477_vm1, %v10647_v15, %v10649_v42  ;;  %v11043_v50 = vadd.f32 %v11007_v25, %v9805_v39  ;;  %v9767_v19 = vld [vmem:[#allocation4 + $0x130] sm:$0x3] }
 0xe5e   : > { %11240 = vst.msk [vmem:[%s19686_s15 + $0x88] sm:$0x7f] %vm11223_vm7, %v11209_v31  ;;  %v9938_v14 = vsel %vm2210_vm0, %v9936_v44, %v9937_v34  ;;  %v10391_v5 = vadd.f32 %v10359_v36, %v20284_v4  ;;  %v10890_v1 = vadd.f32 %v10858_v8, %v20284_v4  ;;  %v20302_v3 = vmul.f32 -0.03515625, %v9767_v19 }
 0xe5f   : > { %v10000_v24 = vadd.f32 %v9938_v14, %v9805_v39  ;;  %v10166_v63 = vadd.f32 %v10097_v9, %v10001_v52  ;;  %v10930_v6 = vadd.f32 %v10891_v38, %v10492_v45  ;;  %v11092_v26 = vadd.f32 %v11043_v50, %v9938_v14 }
 0xe60   : > { %v20304_v62 = vpop.eup %15461  ;;  %v10095_v46 = vsel %vm2477_vm1, %v10093_v23, %v10094_v27  ;;  %v9765_v22 = vld [vmem:[#allocation4 + $0x120] sm:$0xff]  ;;  %v9808_v33 = vmul.f32 0.00390625, %v9766_v48  ;;  %v20307_v2 = vmul.f32 -0.03515625, %v9766_v48  ;;  %v20309_v20 = vmul.f32 0.31640625, %v9766_v48 }
 0xe61   : > { %v20311_v13 = vpop.eup %15463  ;;  %v10493_v21 = vsel %vm2210_vm0, %v10491_v55, %v10492_v45  ;;  %v10646_v58 = vrot.slane %v10421_v30, 2  ;;  %v10722_v36 = vadd.f32 %v10650_v41, %v10557_v28  ;;  %v11145_v61 = vadd.f32 %v11092_v26, %v10095_v46  ;;  %v9770_v48 = vld [vmem:[#allocation4 + $0x148] sm:$0x3] }
 0xe62   : > { %v20314_v47 = vpop.eup %15465  ;;  %v10291_v42 = vsel %vm10233_vm6, %v10289_v10, %v10290_v43  ;;  %v10556_v51 = vadd.f32 %v10493_v21, %v10391_v5  ;;  %v10929_v34 = vadd.f32 %v10890_v1, %v10493_v21  ;;  %v10101_v53 = vrot.slane %v20302_v3, 2 }
 0xe63   : > { %v20318_v17 = vpop.eup %15467  ;;  %v10165_v32 = vadd.f32 %v10095_v46, %v10000_v24  ;;  %v11208_v27 = vadd.f32 %v11145_v61, %v10291_v42  ;;  %v10185_v37 = vmul.f32 0.00390625, %v9767_v19  ;;  %v20320_v8 = vmul.f32 -0.03515625, %v9765_v22 }
 0xe64   : > { %v10362_v54 = vadd.f32 %v10293_v56, %v10166_v63  ;;  %v10969_v12 = vadd.f32 %v10930_v6, %v10650_v41  ;;  %v9940_v18 = vrot.slane %v20307_v2, 1  ;;  %v10099_v59 = vrot.slane %v20307_v2, 2 }
 0xe65   : > { %v10648_v9 = vsel %vm2477_vm1, %v10646_v58, %v10647_v15  ;;  %11239 = vst.msk [vmem:[%s19686_s15 + $0x80] sm:$0xff] %vm9617_vm3, %v11208_v27  ;;  %v10577_v43 = vmul.f32 0.31640625, %v9767_v19  ;;  %v9807_v57 = vmul.f32 0.00390625, %v9765_v22  ;;  %v9939_v35 = vrot.slane %v20320_v8, 1  ;;  %v9768_v58 = vld [vmem:[#allocation4 + $0x138] sm:$0xff] }
 0xe66   : > { %v10721_v45 = vadd.f32 %v10648_v9, %v10556_v51  ;;  %v10968_v25 = vadd.f32 %v10929_v34, %v10648_v9  ;;  %v10295_v11 = vrot.slane %v9808_v33, 3  ;;  %v10789_v7 = vsel %vm10233_vm6, %v10786_v29, %v10788_v40 }
 0xe67   : > { %v10361_v39 = vadd.f32 %v10291_v42, %v10165_v32  ;;  %v10297_v56 = vrot.slane %v10185_v37, 3  ;;  %v10102_v30 = vsel %vm2477_vm1, %v10099_v59, %v10101_v53  ;;  %v10785_v16 = vrot.slane %v20284_v4, 3 }
 0xe68   : > { %v9941_v0 = vsel %vm2210_vm0, %v9939_v35, %v9940_v18  ;;  %v10003_v52 = vadd.f32 %v9940_v18, %v9808_v33  ;;  %v10394_v15 = vadd.f32 %v10362_v54, %v20307_v2  ;;  %v10423_v38 = vmul.f32 0.31640625, %v9765_v22 }
 0xe69   : > { %v10654_v31 = vrot.slane %v10577_v43, 2  ;;  %v10793_v44 = vrot.slane %v20302_v3, 3  ;;  %v10098_v49 = vrot.slane %v20320_v8, 2  ;;  %v10294_v23 = vrot.slane %v9807_v57, 3 }
 0xe6a   : > { %v10168_v28 = vadd.f32 %v10102_v30, %v10003_v52  ;;  %v10495_v40 = vrot.slane %v20309_v20, 1  ;;  %v10787_v10 = vsel %vm10233_vm6, %v10785_v16, %v10786_v29  ;;  %v10861_v4 = vadd.f32 %v10789_v7, %v10722_v36  ;;  %v9769_v36 = vld [vmem:[#allocation4 + $0x140] sm:$0xff] }
 0xe6b   : > { %v10002_v55 = vadd.f32 %v9941_v0, %v9807_v57  ;;  %v10298_v41 = vsel %vm10233_vm6, %v10295_v11, %v10297_v56  ;;  %v10393_v50 = vadd.f32 %v10361_v39, %v20320_v8  ;;  %v11009_v19 = vadd.f32 %v10968_v25, %v10787_v10 }
 0xe6c   : > { %v10494_v14 = vrot.slane %v10423_v38, 1  ;;  %v10559_v5 = vadd.f32 %v10495_v40, %v10394_v15  ;;  %v10860_v1 = vadd.f32 %v10787_v10, %v10721_v45  ;;  %v11010_v24 = vadd.f32 %v10969_v12, %v10789_v7 }
 0xe6d   : > { %v10100_v63 = vsel %vm2477_vm1, %v10098_v49, %v10099_v59  ;;  %v10296_v6 = vsel %vm10233_vm6, %v10294_v23, %v10295_v11  ;;  %v10652_v60 = vrot.slane %v20309_v20, 2  ;;  %v11045_v26 = vadd.f32 %v11009_v19, %v9807_v57 }
 0xe6e   : > { %v10364_v29 = vadd.f32 %v10298_v41, %v10168_v28  ;;  %v10893_v46 = vadd.f32 %v10861_v4, %v20307_v2  ;;  %v11046_v22 = vadd.f32 %v11010_v24, %v9808_v33  ;;  %v20349_v21 = vmul.f32 -0.03515625, %v9770_v48 }
 0xe6f   : > { %v10167_v61 = vadd.f32 %v10100_v63, %v10002_v55  ;;  %v10651_v42 = vrot.slane %v10423_v38, 2  ;;  %v10655_v51 = vsel %vm2477_vm1, %v10652_v60, %v10654_v31  ;;  %v11094_v34 = vadd.f32 %v11045_v26, %v9941_v0 }
 0xe70   : > { %v10496_v53 = vsel %vm2210_vm0, %v10494_v14, %v10495_v40  ;;  %v10724_v32 = vadd.f32 %v10655_v51, %v10559_v5  ;;  %v10892_v27 = vadd.f32 %v10860_v1, %v20320_v8  ;;  %v11095_v20 = vadd.f32 %v11046_v22, %v9940_v18 }
 0xe71   : > { %v10558_v37 = vadd.f32 %v10496_v53, %v10393_v50  ;;  %v11147_v54 = vadd.f32 %v11094_v34, %v10100_v63  ;;  %v20354_v12 = vmul.f32 -0.03515625, %v9768_v58  ;;  %v20356_v33 = vmul.f32 -0.03515625, %v9769_v36 }
 0xe72   : > { %v10932_v59 = vadd.f32 %v10893_v46, %v10495_v40  ;;  %v11148_v9 = vadd.f32 %v11095_v20, %v10102_v30  ;;  %v10106_v43 = vrot.slane %v20349_v21, 2  ;;  %v10186_v57 = vmul.f32 0.00390625, %v9770_v48 }
 0xe73   : > { %v11210_v35 = vadd.f32 %v11147_v54, %v10296_v6  ;;  %v9809_v45 = vmul.f32 0.00390625, %v9768_v58  ;;  %v9942_v25 = vrot.slane %v20354_v12, 1  ;;  %v9943_v11 = vrot.slane %v20356_v33, 1  ;;  %v9771_v54 = vld [vmem:[#allocation4 + $0x150] sm:$0xff] }
 0xe74   : > { %v10363_v18 = vadd.f32 %v10296_v6, %v10167_v61  ;;  %v10653_v7 = vsel %vm2477_vm1, %v10651_v42, %v10652_v60  ;;  %v10931_v39 = vadd.f32 %v10892_v27, %v10496_v53  ;;  %v11211_v56 = vadd.f32 %v11148_v9, %v10298_v41  ;;  %v9773_v61 = vld [vmem:[#allocation4 + $0x160] sm:$0x3] }
 0xe75   : > { %11241 = vst.msk [vmem:[%s19686_s15 + $0x90] sm:$0xff] %vm9617_vm3, %v11210_v35  ;;  %v10578_v16 = vmul.f32 0.31640625, %v9770_v48  ;;  %v9810_v0 = vmul.f32 0.00390625, %v9769_v36  ;;  %v9944_v30 = vsel %vm2210_vm0, %v9942_v25, %v9943_v11  ;;  %v10104_v52 = vrot.slane %v20356_v33, 2 }
 0xe76   : > { %v10723_v15 = vadd.f32 %v10653_v7, %v10558_v37  ;;  %v10971_v38 = vadd.f32 %v10932_v59, %v10655_v51  ;;  %11242 = vst.msk [vmem:[%s19686_s15 + $0x98] sm:$0x7f] %vm11223_vm7, %v11211_v56  ;;  %v10302_v31 = vrot.slane %v10186_v57, 3  ;;  %v10425_v49 = vmul.f32 0.31640625, %v9768_v58 }
 0xe77   : > { %v10798_v23 = vrot.slane %v20349_v21, 3  ;;  %v10103_v28 = vrot.slane %v20354_v12, 2  ;;  %v10107_v40 = vsel %vm2477_vm1, %v10104_v52, %v10106_v43  ;;  %v10299_v10 = vrot.slane %v9809_v45, 3 }
 0xe78   : > { %v10970_v4 = vadd.f32 %v10931_v39, %v10653_v7  ;;  %v10004_v55 = vadd.f32 %v9944_v30, %v9809_v45  ;;  %v10005_v41 = vadd.f32 %v9943_v11, %v9810_v0  ;;  %v10790_v50 = vrot.slane %v20320_v8, 3 }
 0xe79   : > { %v10659_v19 = vrot.slane %v10578_v16, 2  ;;  %v10300_v48 = vrot.slane %v9810_v0, 3  ;;  %v10426_v14 = vmul.f32 0.31640625, %v9769_v36  ;;  %v10791_v5 = vrot.slane %v20307_v2, 3 }
 0xe7a   : > { %v10170_v1 = vadd.f32 %v10107_v40, %v10005_v41  ;;  %v10395_v24 = vadd.f32 %v10363_v18, %v20354_v12  ;;  %v10396_v63 = vadd.f32 %v10364_v29, %v20356_v33  ;;  %v10497_v6 = vrot.slane %v10425_v49, 1 }
 0xe7b   : > { %v10105_v60 = vsel %vm2477_vm1, %v10103_v28, %v10104_v52  ;;  %v10301_v26 = vsel %vm10233_vm6, %v10299_v10, %v10300_v48  ;;  %v10792_v46 = vsel %vm10233_vm6, %v10790_v50, %v10791_v5  ;;  %v10794_v8 = vsel %vm10233_vm6, %v10791_v5, %v10793_v44 }
 0xe7c   : > { %v10169_v22 = vadd.f32 %v10105_v60, %v10004_v55  ;;  %v10862_v58 = vadd.f32 %v10792_v46, %v10723_v15  ;;  %v10863_v36 = vadd.f32 %v10794_v8, %v10724_v32  ;;  %v11011_v2 = vadd.f32 %v10970_v4, %v10792_v46  ;;  %v9772_v32 = vld [vmem:[#allocation4 + $0x158] sm:$0xff] }
 0xe7d   : > { %v10303_v42 = vsel %vm10233_vm6, %v10300_v48, %v10302_v31  ;;  %v10498_v51 = vrot.slane %v10426_v14, 1  ;;  %v10656_v29 = vrot.slane %v10425_v49, 2  ;;  %v11012_v34 = vadd.f32 %v10971_v38, %v10794_v8 }
 0xe7e   : > { %v10366_v53 = vadd.f32 %v10303_v42, %v10170_v1  ;;  %v10657_v27 = vrot.slane %v10426_v14, 2  ;;  %v10894_v20 = vadd.f32 %v10862_v58, %v20354_v12  ;;  %v11047_v37 = vadd.f32 %v11011_v2, %v9809_v45 }
 0xe7f   : > { %v10499_v3 = vsel %vm2210_vm0, %v10497_v6, %v10498_v51  ;;  %v10561_v59 = vadd.f32 %v10498_v51, %v10396_v63  ;;  %v11048_v44 = vadd.f32 %v11012_v34, %v9810_v0  ;;  %v20384_v9 = vmul.f32 -0.03515625, %v9773_v61 }
 0xe80   : > { %v10365_v43 = vadd.f32 %v10301_v26, %v10169_v22  ;;  %v10560_v57 = vadd.f32 %v10499_v3, %v10395_v24  ;;  %v10895_v35 = vadd.f32 %v10863_v36, %v20356_v33  ;;  %v11096_v25 = vadd.f32 %v11047_v37, %v9944_v30 }
 0xe81   : > { %v10660_v18 = vsel %vm2477_vm1, %v10657_v27, %v10659_v19  ;;  %v11097_v7 = vadd.f32 %v11048_v44, %v9943_v11  ;;  %v10187_v39 = vmul.f32 0.00390625, %v9773_v61  ;;  %v9811_v56 = vmul.f32 0.00390625, %v9771_v54 }
 0xe82   : > { %v10933_v16 = vadd.f32 %v10894_v20, %v10499_v3  ;;  %v11149_v45 = vadd.f32 %v11096_v25, %v10105_v60  ;;  %v9812_v52 = vmul.f32 0.00390625, %v9772_v32  ;;  %v20388_v15 = vmul.f32 -0.03515625, %v9771_v54 }
 0xe83   : > { %v10658_v0 = vsel %vm2477_vm1, %v10656_v29, %v10657_v27  ;;  %v10726_v38 = vadd.f32 %v10660_v18, %v10561_v59  ;;  %v11150_v31 = vadd.f32 %v11097_v7, %v10107_v40  ;;  %v20391_v49 = vmul.f32 -0.03515625, %v9772_v32 }
 0xe84   : > { %v10934_v28 = vadd.f32 %v10895_v35, %v10498_v51  ;;  %v11212_v30 = vadd.f32 %v11149_v45, %v10301_v26  ;;  %v10111_v10 = vrot.slane %v20384_v9, 2  ;;  %v10579_v11 = vmul.f32 0.31640625, %v9773_v61 }
 0xe85   : > { %v10725_v4 = vadd.f32 %v10658_v0, %v10560_v57  ;;  %v11213_v55 = vadd.f32 %v11150_v31, %v10303_v42  ;;  %v10803_v41 = vrot.slane %v20384_v9, 3  ;;  %v10304_v50 = vrot.slane %v9811_v56, 3 }
 0xe86   : > { %v10972_v19 = vadd.f32 %v10933_v16, %v10658_v0  ;;  %11243 = vst.msk [vmem:[%s19686_s15 + $0xa0] sm:$0xff] %vm9617_vm3, %v11212_v30  ;;  %v10307_v48 = vrot.slane %v10187_v39, 3  ;;  %v9945_v14 = vrot.slane %v20388_v15, 1  ;;  %v10305_v5 = vrot.slane %v9812_v52, 3 }
 0xe87   : > { %11244 = vst.msk [vmem:[%s19686_s15 + $0xa8] sm:$0x7f] %vm11223_vm7, %v11213_v55  ;;  %v9946_v40 = vrot.slane %v20391_v49, 1  ;;  %v10108_v1 = vrot.slane %v20388_v15, 2  ;;  %v10795_v24 = vrot.slane %v20354_v12, 3  ;;  %v10796_v63 = vrot.slane %v20356_v33, 3 }
 0xe88   : > { %v10973_v6 = vadd.f32 %v10934_v28, %v10660_v18  ;;  %v10664_v60 = vrot.slane %v10579_v11, 2  ;;  %v10109_v26 = vrot.slane %v20391_v49, 2  ;;  %v10427_v46 = vmul.f32 0.31640625, %v9771_v54 }
 0xe89   : > { %v20406_v8 = vsel %vm10233_vm6, %v10304_v50, %v10305_v5  ;;  %v10428_v22 = vmul.f32 0.31640625, %v9772_v32  ;;  %v10797_v58 = vsel %vm10233_vm6, %v10795_v24, %v10796_v63  ;;  %v9581_v36 = vadd.f32 1.0, %v20304_v62 }
 0xe8a   : > { %v9947_v2 = vsel %vm2210_vm0, %v9945_v14, %v9946_v40  ;;  %v10308_v61 = vsel %vm10233_vm6, %v10305_v5, %v10307_v48  ;;  %v10397_v12 = vadd.f32 %v10365_v43, %v20388_v15  ;;  %v11013_v33 = vadd.f32 %v10972_v19, %v10797_v58 }
 0xe8b   : > { %v10007_v42 = vadd.f32 %v9946_v40, %v9812_v52  ;;  %v10110_v51 = vsel %vm2477_vm1, %v10108_v1, %v10109_v26  ;;  %v10398_v29 = vadd.f32 %v10366_v53, %v20391_v49  ;;  %v10799_v34 = vsel %vm10233_vm6, %v10796_v63, %v10798_v23 }
 0xe8c   : > { %v10500_v27 = vrot.slane %v10427_v46, 1  ;;  %v10864_v20 = vadd.f32 %v10797_v58, %v10725_v4  ;;  %v10865_v37 = vadd.f32 %v10799_v34, %v10726_v38  ;;  %v11014_v62 = vadd.f32 %v10973_v6, %v10799_v34 }
 0xe8d   : > { %v10501_v54 = vrot.slane %v10428_v22, 1  ;;  %v11049_v3 = vadd.f32 %v11013_v33, %v9811_v56  ;;  %v9613_v59 = vmul.f32 0.5, %v9581_v36  ;;  %v9580_v44 = vadd.f32 1.0, %v20311_v13 }
 0xe8e   : > { %v10006_v32 = vadd.f32 %v9947_v2, %v9811_v56  ;;  %v10112_v43 = vsel %vm2477_vm1, %v10109_v26, %v10111_v10  ;;  %v10897_v57 = vadd.f32 %v10865_v37, %v20391_v49  ;;  %v11050_v35 = vadd.f32 %v11014_v62, %v9812_v52 }
 0xe8f   : > { %v10563_v53 = vadd.f32 %v10501_v54, %v10398_v29  ;;  %v10662_v25 = vrot.slane %v10428_v22, 2  ;;  %v11098_v21 = vadd.f32 %v11049_v3, %v9947_v2  ;;  %9647 = vst.msk [vmem:[#allocation4 + $0x171] sm:$0xff] %vm9617_vm3, %v9613_v59  ;;  %v9612_v23 = vmul.f32 0.5, %v9580_v44 }
 0xe90   : > { %v10896_v18 = vadd.f32 %v10864_v20, %v20388_v15  ;;  %v10936_v7 = vadd.f32 %v10897_v57, %v10501_v54  ;;  %v11099_v39 = vadd.f32 %v11050_v35, %v9946_v40  ;;  %v9583_v16 = vadd.f32 1.0, %v20314_v47 }
 0xe91   : > { %v10172_v45 = vadd.f32 %v10112_v43, %v10007_v42  ;;  %v10502_v13 = vsel %vm2210_vm0, %v10500_v27, %v10501_v54  ;;  %v11151_v56 = vadd.f32 %v11098_v21, %v10110_v51  ;;  %9646 = vst.msk [vmem:[#allocation4 + $0x169] sm:$0xff] %vm9617_vm3, %v9612_v23  ;;  %v9582_v52 = vadd.f32 1.0, %v20318_v17 }
 0xe92   : > { %v10562_v0 = vadd.f32 %v10502_v13, %v10397_v12  ;;  %v10661_v38 = vrot.slane %v10427_v46, 2  ;;  %v10665_v31 = vsel %vm2477_vm1, %v10662_v25, %v10664_v60  ;;  %v11152_v28 = vadd.f32 %v11099_v39, %v10112_v43 }
 0xe93   : > { %v10728_v30 = vadd.f32 %v10665_v31, %v10563_v53  ;;  %v11214_v10 = vadd.f32 %v11151_v56, %v20406_v8  ;;  %v9615_v11 = vmul.f32 0.5, %v9583_v16  ;;  %v9614_v47 = vmul.f32 0.5, %v9582_v52 }
 0xe94   : > { %v10935_v4 = vadd.f32 %v10896_v18, %v10502_v13  ;;  %v11215_v55 = vadd.f32 %v11152_v28, %v10308_v61  ;;  %v10801_v50 = vrot.slane %v20391_v49, 3  ;;  %v10975_v19 = vadd.f32 %v10936_v7, %v10665_v31 }
 0xe95   : > { %11245 = vst.msk [vmem:[%s19686_s15 + $0xb0] sm:$0xff] %vm9617_vm3, %v11214_v10  ;;  %9649 = vst.msk [vmem:[#allocation4 + $0x189] sm:$0xff] %vm9617_vm3, %v9615_v11  ;;  %v10171_v17 = vadd.f32 %v10110_v51, %v10006_v32  ;;  %v10663_v48 = vsel %vm2477_vm1, %v10661_v38, %v10662_v25  ;;  %v10800_v5 = vrot.slane %v20388_v15, 3  ;;  %v10368_v40 = vadd.f32 %v10308_v61, %v10172_v45 }
 0xe96   : > { %9654 = vst.msk [vmem:[#allocation4 + $0x1a1] sm:$0xff] %vm9617_vm3, %v9615_v11  ;;  %9648 = vst.msk [vmem:[#allocation4 + $0x181] sm:$0xff] %vm9617_vm3, %v9614_v47  ;;  %v9686_v14 = vld [vmem:[#allocation4 + $0x178] sm:$0x3]  ;;  %v10804_v49 = vsel %vm10233_vm6, %v10801_v50, %v10803_v41  ;;  %v10727_v1 = vadd.f32 %v10663_v48, %v10562_v0  ;;  %v10974_v60 = vadd.f32 %v10935_v4, %v10663_v48 }
 0xe97   : > { %9653 = vst.msk [vmem:[#allocation4 + $0x199] sm:$0xff] %vm9617_vm3, %v9614_v47  ;;  %v10867_v24 = vadd.f32 %v10804_v49, %v10728_v30  ;;  %v11016_v26 = vadd.f32 %v10975_v19, %v10804_v49  ;;  %v10367_v9 = vadd.f32 %v20406_v8, %v10171_v17  ;;  %v10802_v41 = vsel %vm10233_vm6, %v10800_v5, %v10801_v50 }
 0xe98   : > { %11246 = vst.msk [vmem:[%s19686_s15 + $0xb8] sm:$0x7f] %vm11223_vm7, %v11215_v55  ;;  %v9685_v63 = vld [vmem:[#allocation4 + $0x168] sm:$0xff]  ;;  %v9775_v6 = vld [vmem:[#allocation4 + $0x170] sm:$0xff]  ;;  %v10866_v2 = vadd.f32 %v10802_v41, %v10727_v1  ;;  %v11015_v33 = vadd.f32 %v10974_v60, %v10802_v41 }
 0xe99   : > { %9726 = vst.msk [vmem:[#allocation4 + $0x179] sm:$0x1] %vm9710_vm4, %v9686_v14  ;;  %v20445_v46 = vmul.f32 -0.03515625, %v9775_v6  ;;  %v20447_v22 = vmul.f32 0.31640625, %v9775_v6  ;;  %v20449_v15 = vmul.f32 0.00390625, %v9775_v6 }
 0xe9a   : > { %9707 = vst.msk [vmem:[#allocation4 + $0x167] sm:$0x2] %vm9691_vm5, %v9685_v63 }
 0xe9b   : > { %v10400_v58 = vadd.f32 %v20445_v46, %v10368_v40  ;;  %v10504_v36 = vrot.slane %v20447_v22, 1  ;;  %v10899_v61 = vadd.f32 %v10867_v24, %v20445_v46  ;;  %v10667_v12 = vrot.slane %v20447_v22, 2 }
 0xe9c   : > { %v11052_v42 = vadd.f32 %v20449_v15, %v11016_v26  ;;  %v11062_v51 = vrot.slane %v20445_v46, 1  ;;  %v9688_v29 = vld [vmem:[#allocation4 + $0x190] sm:$0x3]  ;;  %v11109_v20 = vrot.slane %v20445_v46, 2  ;;  %v11172_v37 = vrot.slane %v20449_v15, 3 }
 0xe9d   : > { %v9687_v34 = vld [vmem:[#allocation4 + $0x180] sm:$0xff]  ;;  %v10565_v27 = vadd.f32 %v10504_v36, %v10400_v58  ;;  %v20459_v8 = vadd.f32 %v10899_v61, %v10504_v36  ;;  %v9690_v62 = vld [vmem:[#allocation4 + $0x1a8] sm:$0x3]  ;;  %9727 = vst.msk [vmem:[#allocation4 + $0x191] sm:$0x1] %vm9710_vm4, %v9688_v29  ;;  %v10806_v43 = vrot.slane %v20445_v46, 3 }
 0xe9e   : > { %v9689_v54 = vld [vmem:[#allocation4 + $0x198] sm:$0xff]  ;;  %9708 = vst.msk [vmem:[#allocation4 + $0x17f] sm:$0x2] %vm9691_vm5, %v9687_v34  ;;  %v9778_v3 = vld [vmem:[#allocation4 + $0x188] sm:$0xff]  ;;  %v11101_v44 = vadd.f32 %v11062_v51, %v11052_v42  ;;  %v9781_v32 = vld [vmem:[#allocation4 + $0x1a0] sm:$0xff] }
 0xe9f   : > { %9728 = vst.msk [vmem:[#allocation4 + $0x1a9] sm:$0x1] %vm9710_vm4, %v9690_v62  ;;  %v20468_v57 = vmul.f32 -0.03515625, %v9778_v3  ;;  %v20470_v35 = vmul.f32 0.31640625, %v9778_v3  ;;  %v20472_v23 = vmul.f32 0.00390625, %v9778_v3  ;;  %v20477_v45 = vmul.f32 0.00390625, %v9781_v32 }
 0xea0   : > { %v9776_v59 = vld [vmem:[#allocation4 + $0x178] sm:$0x3]  ;;  %9709 = vst.msk [vmem:[#allocation4 + $0x197] sm:$0x2] %vm9691_vm5, %v9689_v54  ;;  %v20479_v30 = vmul.f32 -0.03515625, %v9781_v32 }
 0xea1   : > { %v10580_v53 = vmul.f32 0.31640625, %v9776_v59  ;;  %v10731_v25 = vmul.f32 -0.03515625, %v9776_v59  ;;  %v11159_v21 = vmul.f32 0.00390625, %v9776_v59  ;;  %v9774_v18 = vld [vmem:[#allocation4 + $0x168] sm:$0xff]  ;;  %v10907_v7 = vrot.slane %v20470_v35, 1 }
 0xea2   : > { %v10944_v39 = vrot.slane %v20470_v35, 2  ;;  %v10985_v16 = vrot.slane %v20468_v57, 3  ;;  %v10369_v38 = vmul.f32 -0.03515625, %v9774_v18  ;;  %v10429_v31 = vmul.f32 0.31640625, %v9774_v18 }
 0xea3   : > { %v10669_v13 = vrot.slane %v10580_v53, 2  ;;  %v10808_v56 = vrot.slane %v10731_v25, 3  ;;  %v11111_v52 = vrot.slane %v10731_v25, 2  ;;  %v11174_v0 = vrot.slane %v11159_v21, 3 }
 0xea4   : > { %v11021_v28 = vmul.f32 0.00390625, %v9774_v18  ;;  %v11065_v4 = vrot.slane %v20468_v57, 1  ;;  %v10399_v55 = vadd.f32 %v10369_v38, %v10367_v9  ;;  %v10503_v50 = vrot.slane %v10429_v31, 1  ;;  %v9779_v40 = vld [vmem:[#allocation4 + $0x190] sm:$0x3] }
 0xea5   : > { %v10670_v10 = vsel %vm2477_vm1, %v10667_v12, %v10669_v13  ;;  %v11112_v11 = vsel %vm2477_vm1, %v11109_v20, %v11111_v52  ;;  %v11175_v47 = vsel %vm10233_vm6, %v11172_v37, %v11174_v0  ;;  %v10666_v19 = vrot.slane %v10429_v31, 2 }
 0xea6   : > { %v10809_v17 = vsel %vm10233_vm6, %v10806_v43, %v10808_v56  ;;  %v10898_v48 = vadd.f32 %v10866_v2, %v10369_v38  ;;  %v11051_v14 = vadd.f32 %v11021_v28, %v11015_v33  ;;  %v11061_v5 = vrot.slane %v10369_v38, 1  ;;  %v9782_v60 = vld [vmem:[#allocation4 + $0x1a8] sm:$0x3] }
 0xea7   : > { %v11108_v49 = vrot.slane %v10369_v38, 2  ;;  %v10505_v1 = vsel %vm2210_vm0, %v10503_v50, %v10504_v36  ;;  %v10668_v24 = vsel %vm2477_vm1, %v10666_v19, %v10667_v12  ;;  %v10730_v63 = vadd.f32 %v10670_v10, %v10565_v27 }
 0xea8   : > { %v11154_v6 = vadd.f32 %v11112_v11, %v11101_v44  ;;  %v10564_v26 = vadd.f32 %v10505_v1, %v10399_v55  ;;  %v10937_v22 = vadd.f32 %v10898_v48, %v10505_v1  ;;  %v11063_v9 = vsel %vm2210_vm0, %v11061_v5, %v11062_v51  ;;  %v9777_v51 = vld [vmem:[#allocation4 + $0x180] sm:$0xff]  ;;  %v9780_v11 = vld [vmem:[#allocation4 + $0x198] sm:$0xff] }
 0xea9   : > { %v11171_v41 = vrot.slane %v11021_v28, 3  ;;  %v11100_v58 = vadd.f32 %v11063_v9, %v11051_v14  ;;  %v11110_v2 = vsel %vm2477_vm1, %v11108_v49, %v11109_v20  ;;  %v10941_v33 = vmul.f32 0.31640625, %v9779_v40 }
 0xeaa   : > { %v11217_v61 = vadd.f32 %v11175_v47, %v11154_v6  ;;  %v10729_v42 = vadd.f32 %v10668_v24, %v10564_v26  ;;  %v20494_v29 = vmul.f32 -0.03515625, %v9779_v40  ;;  %v20496_v36 = vmul.f32 -0.03515625, %v9782_v60 }
 0xeab   : > { %v20498_v12 = vmul.f32 0.00390625, %v9779_v40  ;;  %v11153_v34 = vadd.f32 %v11110_v2, %v11100_v58  ;;  %v10946_v27 = vrot.slane %v10941_v33, 2  ;;  %v20502_v62 = vmul.f32 0.00390625, %v9782_v60 }
 0xeac   : > { %11248 = vst.msk [vmem:[%s19686_s15 + $0xc8] sm:$0x7f] %vm11223_vm7, %v11217_v61  ;;  %v10805_v54 = vrot.slane %v10369_v38, 3  ;;  %v11173_v20 = vsel %vm10233_vm6, %v11171_v41, %v11172_v37  ;;  %v10987_v3 = vrot.slane %v20494_v29, 3  ;;  %v11116_v59 = vrot.slane %v20494_v29, 2 }
 0xead   : > { %v11121_v44 = vrot.slane %v20496_v36, 2  ;;  %v11216_v32 = vadd.f32 %v11173_v20, %v11153_v34  ;;  %v11179_v53 = vrot.slane %v20498_v12, 3  ;;  %v10869_v21 = vadd.f32 %v10809_v17, %v10730_v63 }
 0xeae   : > { %v10807_v25 = vsel %vm10233_vm6, %v10805_v54, %v10806_v43  ;;  %v11184_v18 = vrot.slane %v20502_v62, 3  ;;  %v10870_v15 = vmul.f32 -0.03515625, %v9777_v51  ;;  %v10902_v56 = vmul.f32 0.31640625, %v9777_v51 }
 0xeaf   : > { %v10868_v13 = vadd.f32 %v10807_v25, %v10729_v42  ;;  %11247 = vst.msk [vmem:[%s19686_s15 + $0xc0] sm:$0xff] %vm9617_vm3, %v11216_v32  ;;  %v10901_v37 = vadd.f32 %v20468_v57, %v10869_v21  ;;  %v10947_v52 = vsel %vm2477_vm1, %v10944_v39, %v10946_v27  ;;  %v10976_v0 = vadd.f32 %v10937_v22, %v10668_v24 }
 0xeb0   : > { %v10977_v38 = vadd.f32 %v20459_v8, %v10670_v10  ;;  %v10906_v31 = vrot.slane %v10902_v56, 1  ;;  %v10943_v43 = vrot.slane %v10902_v56, 2  ;;  %v10984_v28 = vrot.slane %v10870_v15, 3 }
 0xeb1   : > { %v10900_v46 = vadd.f32 %v10870_v15, %v10868_v13  ;;  %v10940_v47 = vadd.f32 %v10907_v7, %v10901_v37  ;;  %v11017_v55 = vadd.f32 %v10976_v0, %v10807_v25  ;;  %v11023_v19 = vmul.f32 0.00390625, %v9777_v51 }
 0xeb2   : > { %v11018_v50 = vadd.f32 %v10977_v38, %v10809_v17  ;;  %v10908_v48 = vsel %vm2210_vm0, %v10906_v31, %v10907_v7  ;;  %v10945_v14 = vsel %vm2477_vm1, %v10943_v43, %v10944_v39  ;;  %v10986_v8 = vsel %vm10233_vm6, %v10984_v28, %v10985_v16 }
 0xeb3   : > { %v10988_v10 = vsel %vm10233_vm6, %v10985_v16, %v10987_v3  ;;  %v10939_v5 = vadd.f32 %v10908_v48, %v10900_v46  ;;  %v10979_v49 = vadd.f32 %v10947_v52, %v10940_v47  ;;  %v11053_v17 = vadd.f32 %v11023_v19, %v11017_v55 }
 0xeb4   : > { %v11054_v40 = vadd.f32 %v20472_v23, %v11018_v50  ;;  %v11025_v1 = vmul.f32 0.00390625, %v9780_v11  ;;  %v11057_v24 = vmul.f32 -0.03515625, %v9780_v11  ;;  %v11064_v7 = vrot.slane %v10870_v15, 1 }
 0xeb5   : > { %v11113_v63 = vrot.slane %v10870_v15, 2  ;;  %v10978_v35 = vadd.f32 %v10945_v14, %v10939_v5  ;;  %v11020_v6 = vadd.f32 %v10988_v10, %v10979_v49  ;;  %v11068_v39 = vrot.slane %v20479_v30, 1 }
 0xeb6   : > { %v11103_v60 = vadd.f32 %v11065_v4, %v11054_v40  ;;  %v11066_v16 = vsel %vm2210_vm0, %v11064_v7, %v11065_v4  ;;  %v11067_v26 = vrot.slane %v11057_v24, 1  ;;  %v11114_v22 = vrot.slane %v20468_v57, 2 }
 0xeb7   : > { %v11119_v9 = vrot.slane %v20479_v30, 2  ;;  %v11019_v41 = vadd.f32 %v10986_v8, %v10978_v35  ;;  %v11056_v58 = vadd.f32 %v20477_v45, %v11020_v6  ;;  %v11102_v2 = vadd.f32 %v11066_v16, %v11053_v17 }
 0xeb8   : > { %v11118_v61 = vrot.slane %v11057_v24, 2  ;;  %v11069_v33 = vsel %vm2210_vm0, %v11067_v26, %v11068_v39  ;;  %v11115_v42 = vsel %vm2477_vm1, %v11113_v63, %v11114_v22  ;;  %v11117_v29 = vsel %vm2477_vm1, %v11114_v22, %v11116_v59 }
 0xeb9   : > { %v11122_v36 = vsel %vm2477_vm1, %v11119_v9, %v11121_v44  ;;  %v11055_v12 = vadd.f32 %v11025_v1, %v11019_v41  ;;  %v11105_v4 = vadd.f32 %v11068_v39, %v11056_v58  ;;  %v11155_v34 = vadd.f32 %v11115_v42, %v11102_v2 }
 0xeba   : > { %v11156_v27 = vadd.f32 %v11117_v29, %v11103_v60  ;;  %v11176_v57 = vrot.slane %v11023_v19, 3  ;;  %v11177_v30 = vrot.slane %v20472_v23, 3  ;;  %v11181_v62 = vrot.slane %v11025_v1, 3 }
 0xebb   : > { %v11182_v51 = vrot.slane %v20477_v45, 3  ;;  %v11104_v54 = vadd.f32 %v11069_v33, %v11055_v12  ;;  %v11158_v20 = vadd.f32 %v11122_v36, %v11105_v4  ;;  %v11120_v3 = vsel %vm2477_vm1, %v11118_v61, %v11119_v9 }
 0xebc   : > { %v11178_v59 = vsel %vm10233_vm6, %v11176_v57, %v11177_v30  ;;  %v11180_v44 = vsel %vm10233_vm6, %v11177_v30, %v11179_v53 }
 0xebd   : > { %v11185_v32 = vsel %vm10233_vm6, %v11182_v51, %v11184_v18  ;;  %v11157_v25 = vadd.f32 %v11120_v3, %v11104_v54  ;;  %v11218_v21 = vadd.f32 %v11178_v59, %v11155_v34  ;;  %v11219_v13 = vadd.f32 %v11180_v44, %v11156_v27 }
 0xebe   : > { %v11221_v23 = vadd.f32 %v11185_v32, %v11158_v20  ;;  %v11183_v15 = vsel %vm10233_vm6, %v11181_v62, %v11182_v51 }
 0xebf   : > { %v11220_v56 = vadd.f32 %v11183_v15, %v11157_v25  ;;  %11249 = vst.msk [vmem:[%s19686_s15 + $0xd0] sm:$0xff] %vm9617_vm3, %v11218_v21 }
 0xec0   : > { %11250 = vst.msk [vmem:[%s19686_s15 + $0xd8] sm:$0x7f] %vm11223_vm7, %v11219_v13  ;;  %11252 = vst.msk [vmem:[%s19686_s15 + $0xe8] sm:$0x7f] %vm11223_vm7, %v11221_v23 }
 0xec1   : > { %11251 = vst.msk [vmem:[%s19686_s15 + $0xe0] sm:$0xff] %vm9617_vm3, %v11220_v56 }
 0xec2 PF: > { %s21059_s14 = sld [smem:[#allocation21_spill]]  ;;  %s21060_s17 = sld [smem:[#allocation22_spill]] }
 0xec3   : > { %p21062_p8 = scmp.ge.s32.totalorder %s15700_s26, 2 }
 0xec8   : > { %s11286_s12 = sand.u32 1, %s21059_s14   ;;  %p21061_p2 = scmp.ne.s32.totalorder %s21060_s17, 0 }
 0xec9   : > { %s11287_s20 = scalar_lea.sflag [#allocation8], %s11286_s12 }
 0xeca   : > { %p15248_p6 = pnand %p21062_p8, %p21061_p2 }
 0xecc   : > { %15683 = dma.done.wait (!%p15248_p6), %s11287_s20, 16  }
 0xecd   : > { %15685 = vsyncadd (!%p15248_p6), %s11287_s20, 4294967280  ;;  %p36_p10 = scmp.ge.s32.totalorder %s15982_s16, 4   ;;  %s21063_s23 = smov %s15692_s24 }
 0xece   : > { %s21064_s24 = smov %s15696_s25  ;;  %s21065_s25 = smov %s15992_s13 }
 0xecf   : > { %s21066_s26 = smov %s15982_s16  ;;  %38 = sbr.rel (!%p36_p10) target bundleno = 19 (0x13), region = 169 }
 0xed6   :  { %11299 = vsyncpa [#allocation7], 1 }
 0xed7   :  { %11301 = vsyncpa [#allocation7 + $0x1], 1 }
 0xed8   :  { %11302 = vsyncpa [#allocation10], 1 }
 0xed9   :  { %11304 = vsyncpa [#allocation10 + $0x1], 1 }
 0xeda   :  { %11305 = vsyncpa [#allocation13], 1 }
 0xedb   :  { %11306 = vsyncpa [#allocation8], 1 }
 0xedc   :  { %11308 = vsyncpa [#allocation8 + $0x1], 1 }

</bundles_post_ra>
